<compile_context>
chip_gen: v7x
topology: tpu7x:2x2x1
jax: 0.10.0
libtpu: 0.0.40
codegen_flags: <defaults>
</compile_context>

<pallas_src>
import jax
import jax.numpy as jnp
from jax import lax
from jax.experimental import pallas as pl
from jax.experimental.pallas import tpu as pltpu


def _future_decoder_kernel(x_ref, wih_ref, whh_ref, bih_ref, bhh_ref,
                           out_w_ref, out_b_ref, h0_ref,
                           y_ref, hid_ref,
                           seq_ref, gi_ref):
    T, B, HP = x_ref.shape           # B is the sublane-padded batch
    NL = wih_ref.shape[0]
    NP = y_ref.shape[-1]
    cdt = wih_ref.dtype              # matmul-operand dtype (f32 or bf16)
    TB = T * B

    # ---- stacked GRU: layer-outer / time-inner.
    for l in range(NL):
        # Input-to-hidden for the WHOLE sequence of this layer: one big matmul.
        # Layer 0 consumes x directly (embedding Linear is pre-folded into wih[0]).
        if l == 0:
            layer_in = x_ref[...].reshape(TB, HP)
        else:
            layer_in = seq_ref[...].reshape(TB, HP).astype(cdt)
        gi = jnp.dot(layer_in, wih_ref[l],
                     preferred_element_type=jnp.float32) + bih_ref[l]
        gi_ref[...] = gi.reshape(T, B, 3 * HP)

        def step(t, h):
            g_i = gi_ref[t]                                          # (B, 3*HP) f32
            g_h = jnp.dot(h.astype(cdt), whh_ref[l],
                          preferred_element_type=jnp.float32) + bhh_ref[l]
            # PyTorch GRU gate order [r, z, n]; each gate block is 128-aligned.
            r = jax.nn.sigmoid(g_i[:, 0:HP] + g_h[:, 0:HP])
            z = jax.nn.sigmoid(g_i[:, HP:2 * HP] + g_h[:, HP:2 * HP])
            n = jnp.tanh(g_i[:, 2 * HP:3 * HP] + r * g_h[:, 2 * HP:3 * HP])
            h_new = (1.0 - z) * n + z * h
            seq_ref[t] = h_new                    # layer output -> next layer's input
            return h_new

        h_last = lax.fori_loop(0, T, step, h0_ref[l].astype(jnp.float32),
                               unroll=min(T, 8))
        hid_ref[l] = h_last

    # ---- output Linear, batched over all (t, b): one (T*B, HP) @ (HP, NP) matmul.
    out_in = seq_ref[...].reshape(TB, HP).astype(cdt)
    y = jnp.dot(out_in, out_w_ref[...],
                preferred_element_type=jnp.float32) + out_b_ref[...]
    y_ref[...] = y.reshape(T, B, NP)              # lane- and sublane-dense store


def _round_up(n, m):
    return ((n + m - 1) // m) * m


def future_decoder_forward(x, params, hidden=None, compute_dtype=jnp.float32):
    """x: (B, T, es) float32.  hidden: (nl, B, hs) or None.

    Returns (y, hidden_out) with y: (B, T, nin), hidden_out: (nl, B, hs),
    matching PyTorch Future_Decoder.forward semantics.
    compute_dtype controls the matmul operand dtype (use jnp.bfloat16 on v6e/v7x);
    accumulation and gate math are always f32.
    """
    emb_w, emb_b, wih, whh, bih, bhh, out_w, out_b = params
    B, T, E = x.shape
    NL = wih.shape[0]
    H = whh.shape[1]
    NIN = out_w.shape[1]
    assert E == H, "Future_Decoder requires es == hs for shape consistency"

    LANE, SUB = 128, 8
    HP = _round_up(H, LANE)          # padded hidden / embedding width (E == H)
    NP = _round_up(NIN, LANE)        # padded output width
    BP = _round_up(B, SUB)           # sublane-padded batch
    f32 = jnp.float32

    # --- Fold the embedding Linear into layer 0's input-to-hidden transform (exact):
    #     (x @ We + be) @ W0 + b0  ==  x @ (We @ W0) + (be @ W0 + b0)
    wih0 = emb_w @ wih[0]                      # (E, 3H)
    bih0 = emb_b @ wih[0] + bih[0]             # (1, 3H)
    wih_f = jnp.concatenate([wih0[None], wih[1:]], axis=0)
    bih_f = jnp.concatenate([bih0[None], bih[1:]], axis=0)

    def pad_gates(w, in_pad):
        # (NL, in, 3H) -> (NL, in_pad, 3*HP) with each gate block 128-aligned.
        nl, din, _ = w.shape
        w4 = w.reshape(nl, din, 3, H)
        w4 = jnp.pad(w4, ((0, 0), (0, in_pad - din), (0, 0), (0, HP - H)))
        return w4.reshape(nl, in_pad, 3 * HP)

    # Time-major + zero-pad to (sublane, lane)-aligned widths (fused XLA copies).
    x_p = jnp.pad(jnp.transpose(x, (1, 0, 2)),
                  ((0, 0), (0, BP - B), (0, HP - E))).astype(compute_dtype)
    wih_p = pad_gates(wih_f, HP).astype(compute_dtype)
    whh_p = pad_gates(whh, HP).astype(compute_dtype)
    bih_p = pad_gates(bih_f, 1).astype(f32)
    bhh_p = pad_gates(bhh, 1).astype(f32)
    out_w_p = jnp.pad(out_w, ((0, HP - H), (0, NP - NIN))).astype(compute_dtype)
    out_b_p = jnp.pad(out_b, ((0, 0), (0, NP - NIN))).astype(f32)

    h0_p = jnp.zeros((NL, BP, HP), f32)
    if hidden is not None:
        h0_p = h0_p.at[:, :B, :H].set(hidden.astype(f32))

    vmem = pl.BlockSpec(memory_space=pltpu.MemorySpace.VMEM)

    y_p, hid_p = pl.pallas_call(
        _future_decoder_kernel,
        out_shape=(
            jax.ShapeDtypeStruct((T, BP, NP), f32),    # y (time-major, padded)
            jax.ShapeDtypeStruct((NL, BP, HP), f32),   # final hidden (padded)
        ),
        in_specs=[vmem] * 8,
        out_specs=(vmem, vmem),
        scratch_shapes=[
            pltpu.VMEM((T, BP, HP), f32),        # seq_ref: per-layer activations
            pltpu.VMEM((T, BP, 3 * HP), f32),    # gi_ref: batched input-to-hidden gates
        ],
        input_output_aliases={7: 1},             # h0 HBM buffer -> final-hidden output
    )(x_p, wih_p, whh_p, bih_p, bhh_p, out_w_p, out_b_p, h0_p)

    y = jnp.transpose(y_p[:, :B, :NIN], (1, 0, 2))   # back to batch-first, unpadded
    hid_out = hid_p[:, :B, :H]
    return y, hid_out


def init_params(key, nin, es, hs, nl):
    """Synthetic parameters mirroring the PyTorch module (Linear/GRU weights stored
    transposed so the kernel computes x @ W + b).  GRU gate order is [r, z, n]."""
    assert es == hs, "Future_Decoder requires es == hs for shape consistency"
    ks = jax.random.split(key, 8)
    scale = 0.3
    emb_w = scale * jax.random.normal(ks[0], (es, es), jnp.float32)        # (in, out)
    emb_b = scale * jax.random.normal(ks[1], (1, es), jnp.float32)
    wih = scale * jax.random.normal(ks[2], (nl, es, 3 * hs), jnp.float32)  # (in, 3H)
    whh = scale * jax.random.normal(ks[3], (nl, hs, 3 * hs), jnp.float32)  # (H, 3H)
    bih = scale * jax.random.normal(ks[4], (nl, 1, 3 * hs), jnp.float32)
    bhh = scale * jax.random.normal(ks[5], (nl, 1, 3 * hs), jnp.float32)
    out_w = scale * jax.random.normal(ks[6], (hs, nin), jnp.float32)       # (in, out)
    out_b = scale * jax.random.normal(ks[7], (1, nin), jnp.float32)
    return (emb_w, emb_b, wih, whh, bih, bhh, out_w, out_b)


def reference_forward(x, params, hidden=None):
    """Pure-JAX reference of the PyTorch forward (for correctness check)."""
    emb_w, emb_b, wih, whh, bih, bhh, out_w, out_b = params
    B, T, E = x.shape
    NL, _, H3 = wih.shape
    H = H3 // 3
    if hidden is None:
        hidden = jnp.zeros((NL, B, H), jnp.float32)
    layer_in = x @ emb_w + emb_b
    h_fin = []
    for l in range(NL):
        h = hidden[l]
        outs = []
        for t in range(T):
            xt = layer_in[:, t]
            gi = xt @ wih[l] + bih[l, 0]
            gh = h @ whh[l] + bhh[l, 0]
            r = jax.nn.sigmoid(gi[:, :H] + gh[:, :H])
            z = jax.nn.sigmoid(gi[:, H:2 * H] + gh[:, H:2 * H])
            n = jnp.tanh(gi[:, 2 * H:] + r * gh[:, 2 * H:])
            h = (1.0 - z) * n + z * h
            outs.append(h)
        layer_in = jnp.stack(outs, axis=1)
        h_fin.append(h)
    y = layer_in @ out_w + out_b
    return y, jnp.stack(h_fin)


if __name__ == "__main__":
    # Small shapes consistent with the module: batch=2, seq=8, es=hs=8, nl=3, nin=6.
    B, T, ES, HS, NL, NIN = 2, 8, 8, 8, 3, 6

    key = jax.random.PRNGKey(0)
    k_x, k_p, k_h = jax.random.split(key, 3)
    x = jax.random.normal(k_x, (B, T, ES), jnp.float32)
    params = init_params(k_p, NIN, ES, HS, NL)

    # --- f32 path, hidden=None ---
    y, hid = future_decoder_forward(x, params, hidden=None)
    y = jax.block_until_ready(y)
    hid = jax.block_until_ready(hid)
    y_ref, hid_ref = reference_forward(x, params, hidden=None)
    assert y.shape == (B, T, NIN) and hid.shape == (NL, B, HS)
    assert jnp.allclose(y, y_ref, atol=1e-4, rtol=1e-4)
    assert jnp.allclose(hid, hid_ref, atol=1e-4, rtol=1e-4)

    # --- f32 path with a provided initial hidden state ---
    h0 = 0.5 * jax.random.normal(k_h, (NL, B, HS), jnp.float32)
    y2, hid2 = future_decoder_forward(x, params, hidden=h0)
    y2 = jax.block_until_ready(y2)
    y2_ref, hid2_ref = reference_forward(x, params, hidden=h0)
    assert jnp.allclose(y2, y2_ref, atol=1e-4, rtol=1e-4)
    assert jnp.allclose(hid2, hid2_ref, atol=1e-4, rtol=1e-4)

    # --- bf16 matmul-operand path (v6e/v7x MXU-friendly), f32 accumulation ---
    y16, hid16 = future_decoder_forward(x, params, hidden=None,
                                        compute_dtype=jnp.bfloat16)
    y16 = jax.block_until_ready(y16)
    assert jnp.allclose(y16, y_ref, atol=1e-1, rtol=1e-1)
    assert jnp.allclose(hid16, hid_ref, atol=1e-1, rtol=1e-1)

    print("KERNEL_OK")
</pallas_src>

<mosaic_0001>
module attributes {stable_mosaic.version = 11 : i64} {
  func.func @_future_decoder_kernel(%arg0: memref<8x8x128xf32, #tpu.memory_space<vmem>>, %arg1: memref<3x128x384xf32, #tpu.memory_space<vmem>>, %arg2: memref<3x128x384xf32, #tpu.memory_space<vmem>>, %arg3: memref<3x1x384xf32, #tpu.memory_space<vmem>>, %arg4: memref<3x1x384xf32, #tpu.memory_space<vmem>>, %arg5: memref<128x128xf32, #tpu.memory_space<vmem>>, %arg6: memref<1x128xf32, #tpu.memory_space<vmem>>, %arg7: memref<3x8x128xf32, #tpu.memory_space<vmem>>, %arg8: memref<8x8x128xf32, #tpu.memory_space<vmem>>, %arg9: memref<3x8x128xf32, #tpu.memory_space<vmem>>, %arg10: memref<8x8x128xf32, #tpu.memory_space<vmem>>, %arg11: memref<8x8x384xf32, #tpu.memory_space<vmem>>) attributes {dimension_semantics = [], scalar_prefetch = 0 : i64, scratch_operands = 2 : i64, tpu.core_type = #tpu.core_type<tc>} {
    %c0 = arith.constant 0 : index
    %c0_0 = arith.constant 0 : index
    %c0_1 = arith.constant 0 : index
    %0 = vector.load %arg0[%c0, %c0_0, %c0_1] : memref<8x8x128xf32, #tpu.memory_space<vmem>>, vector<8x8x128xf32>
    %1 = vector.shape_cast %0 : vector<8x8x128xf32> to vector<64x128xf32>
    %c0_2 = arith.constant 0 : index
    %c0_3 = arith.constant 0 : index
    %c0_4 = arith.constant 0 : index
    %2 = vector.load %arg1[%c0_2, %c0_3, %c0_4] : memref<3x128x384xf32, #tpu.memory_space<vmem>>, vector<1x128x384xf32>
    %3 = vector.shape_cast %2 : vector<1x128x384xf32> to vector<128x384xf32>
    %cst = arith.constant dense<0.000000e+00> : vector<64x384xf32>
    %4 = tpu.matmul %1, %3, %cst {dimension_numbers = #tpu.dot_dimension_numbers<[1], [0], [0], [1], [0, 0, 1, 1], [], []>} : vector<64x128xf32>, vector<128x384xf32>, vector<64x384xf32> -> vector<64x384xf32>
    %c0_5 = arith.constant 0 : index
    %c0_6 = arith.constant 0 : index
    %c0_7 = arith.constant 0 : index
    %5 = vector.load %arg3[%c0_5, %c0_6, %c0_7] : memref<3x1x384xf32, #tpu.memory_space<vmem>>, vector<1x1x384xf32>
    %6 = vector.shape_cast %5 : vector<1x1x384xf32> to vector<1x384xf32>
    %7 = vector.broadcast %6 : vector<1x384xf32> to vector<64x384xf32>
    %8 = arith.addf %4, %7 : vector<64x384xf32>
    %9 = vector.shape_cast %8 : vector<64x384xf32> to vector<8x8x384xf32>
    %c0_8 = arith.constant 0 : index
    %c0_9 = arith.constant 0 : index
    %c0_10 = arith.constant 0 : index
    %10 = vector.load %arg11[%c0_8, %c0_9, %c0_10] : memref<8x8x384xf32, #tpu.memory_space<vmem>>, vector<8x8x384xf32>
    tpu.vector_store %arg11[%c0_8, %c0_9, %c0_10], %9 {strides = array<i32>} : memref<8x8x384xf32, #tpu.memory_space<vmem>>, vector<8x8x384xf32>,
    %c0_11 = arith.constant 0 : index
    %c0_12 = arith.constant 0 : index
    %c0_13 = arith.constant 0 : index
    %11 = vector.load %arg7[%c0_11, %c0_12, %c0_13] : memref<3x8x128xf32, #tpu.memory_space<vmem>>, vector<1x8x128xf32>
    %12 = vector.shape_cast %11 : vector<1x8x128xf32> to vector<8x128xf32>
    %c0_i32 = arith.constant 0 : i32
    %13 = arith.index_cast %c0_i32 : i32 to index
    %c0_14 = arith.constant 0 : index
    %c0_15 = arith.constant 0 : index
    %14 = vector.load %arg11[%13, %c0_14, %c0_15] : memref<8x8x384xf32, #tpu.memory_space<vmem>>, vector<1x8x384xf32>
    %15 = vector.shape_cast %14 : vector<1x8x384xf32> to vector<8x384xf32>
    %c0_16 = arith.constant 0 : index
    %c0_17 = arith.constant 0 : index
    %c0_18 = arith.constant 0 : index
    %16 = vector.load %arg2[%c0_16, %c0_17, %c0_18] : memref<3x128x384xf32, #tpu.memory_space<vmem>>, vector<1x128x384xf32>
    %17 = vector.shape_cast %16 : vector<1x128x384xf32> to vector<128x384xf32>
    %cst_19 = arith.constant dense<0.000000e+00> : vector<8x384xf32>
    %18 = tpu.matmul %12, %17, %cst_19 {dimension_numbers = #tpu.dot_dimension_numbers<[1], [0], [0], [1], [0, 0, 1, 1], [], []>} : vector<8x128xf32>, vector<128x384xf32>, vector<8x384xf32> -> vector<8x384xf32>
    %c0_20 = arith.constant 0 : index
    %c0_21 = arith.constant 0 : index
    %c0_22 = arith.constant 0 : index
    %19 = vector.load %arg4[%c0_20, %c0_21, %c0_22] : memref<3x1x384xf32, #tpu.memory_space<vmem>>, vector<1x1x384xf32>
    %20 = vector.shape_cast %19 : vector<1x1x384xf32> to vector<1x384xf32>
    %21 = vector.broadcast %20 : vector<1x384xf32> to vector<8x384xf32>
    %22 = arith.addf %18, %21 : vector<8x384xf32>
    %23 = vector.extract_strided_slice %15 {offsets = [0, 0], sizes = [8, 128], strides = [1, 1]} : vector<8x384xf32> to vector<8x128xf32>
    %24 = vector.extract_strided_slice %22 {offsets = [0, 0], sizes = [8, 128], strides = [1, 1]} : vector<8x384xf32> to vector<8x128xf32>
    %25 = arith.addf %23, %24 : vector<8x128xf32>
    %26 = arith.negf %25 : vector<8x128xf32>
    %27 = math.exp %26 : vector<8x128xf32>
    %cst_23 = arith.constant 1.000000e+00 : f32
    %28 = vector.broadcast %cst_23 : f32 to vector<8x128xf32>
    %29 = arith.addf %28, %27 : vector<8x128xf32>
    %30 = arith.divf %28, %29 : vector<8x128xf32>
    %31 = vector.extract_strided_slice %15 {offsets = [0, 128], sizes = [8, 128], strides = [1, 1]} : vector<8x384xf32> to vector<8x128xf32>
    %32 = vector.extract_strided_slice %22 {offsets = [0, 128], sizes = [8, 128], strides = [1, 1]} : vector<8x384xf32> to vector<8x128xf32>
    %33 = arith.addf %31, %32 : vector<8x128xf32>
    %34 = arith.negf %33 : vector<8x128xf32>
    %35 = math.exp %34 : vector<8x128xf32>
    %cst_24 = arith.constant 1.000000e+00 : f32
    %36 = vector.broadcast %cst_24 : f32 to vector<8x128xf32>
    %37 = arith.addf %36, %35 : vector<8x128xf32>
    %38 = arith.divf %36, %37 : vector<8x128xf32>
    %39 = vector.extract_strided_slice %15 {offsets = [0, 256], sizes = [8, 128], strides = [1, 1]} : vector<8x384xf32> to vector<8x128xf32>
    %40 = vector.extract_strided_slice %22 {offsets = [0, 256], sizes = [8, 128], strides = [1, 1]} : vector<8x384xf32> to vector<8x128xf32>
    %41 = arith.mulf %30, %40 : vector<8x128xf32>
    %42 = arith.addf %39, %41 : vector<8x128xf32>
    %43 = math.tanh %42 : vector<8x128xf32>
    %cst_25 = arith.constant 1.000000e+00 : f32
    %44 = vector.broadcast %cst_25 : f32 to vector<8x128xf32>
    %45 = arith.subf %44, %38 : vector<8x128xf32>
    %46 = arith.mulf %45, %43 : vector<8x128xf32>
    %47 = arith.mulf %38, %12 : vector<8x128xf32>
    %48 = arith.addf %46, %47 : vector<8x128xf32>
    %49 = arith.index_cast %c0_i32 : i32 to index
    %c0_26 = arith.constant 0 : index
    %c0_27 = arith.constant 0 : index
    %50 = vector.load %arg10[%49, %c0_26, %c0_27] : memref<8x8x128xf32, #tpu.memory_space<vmem>>, vector<1x8x128xf32>
    %51 = vector.shape_cast %50 : vector<1x8x128xf32> to vector<8x128xf32>
    %52 = vector.shape_cast %48 : vector<8x128xf32> to vector<1x8x128xf32>
    tpu.vector_store %arg10[%49, %c0_26, %c0_27], %52 {strides = array<i32>} : memref<8x8x128xf32, #tpu.memory_space<vmem>>, vector<1x8x128xf32>,
    %c1_i32 = arith.constant 1 : i32
    %53 = arith.index_cast %c1_i32 : i32 to index
    %c0_28 = arith.constant 0 : index
    %c0_29 = arith.constant 0 : index
    %54 = vector.load %arg11[%53, %c0_28, %c0_29] : memref<8x8x384xf32, #tpu.memory_space<vmem>>, vector<1x8x384xf32>
    %55 = vector.shape_cast %54 : vector<1x8x384xf32> to vector<8x384xf32>
    %c0_30 = arith.constant 0 : index
    %c0_31 = arith.constant 0 : index
    %c0_32 = arith.constant 0 : index
    %56 = vector.load %arg2[%c0_30, %c0_31, %c0_32] : memref<3x128x384xf32, #tpu.memory_space<vmem>>, vector<1x128x384xf32>
    %57 = vector.shape_cast %56 : vector<1x128x384xf32> to vector<128x384xf32>
    %cst_33 = arith.constant dense<0.000000e+00> : vector<8x384xf32>
    %58 = tpu.matmul %48, %57, %cst_33 {dimension_numbers = #tpu.dot_dimension_numbers<[1], [0], [0], [1], [0, 0, 1, 1], [], []>} : vector<8x128xf32>, vector<128x384xf32>, vector<8x384xf32> -> vector<8x384xf32>
    %c0_34 = arith.constant 0 : index
    %c0_35 = arith.constant 0 : index
    %c0_36 = arith.constant 0 : index
    %59 = vector.load %arg4[%c0_34, %c0_35, %c0_36] : memref<3x1x384xf32, #tpu.memory_space<vmem>>, vector<1x1x384xf32>
    %60 = vector.shape_cast %59 : vector<1x1x384xf32> to vector<1x384xf32>
    %61 = vector.broadcast %60 : vector<1x384xf32> to vector<8x384xf32>
    %62 = arith.addf %58, %61 : vector<8x384xf32>
    %63 = vector.extract_strided_slice %55 {offsets = [0, 0], sizes = [8, 128], strides = [1, 1]} : vector<8x384xf32> to vector<8x128xf32>
    %64 = vector.extract_strided_slice %62 {offsets = [0, 0], sizes = [8, 128], strides = [1, 1]} : vector<8x384xf32> to vector<8x128xf32>
    %65 = arith.addf %63, %64 : vector<8x128xf32>
    %66 = arith.negf %65 : vector<8x128xf32>
    %67 = math.exp %66 : vector<8x128xf32>
    %cst_37 = arith.constant 1.000000e+00 : f32
    %68 = vector.broadcast %cst_37 : f32 to vector<8x128xf32>
    %69 = arith.addf %68, %67 : vector<8x128xf32>
    %70 = arith.divf %68, %69 : vector<8x128xf32>
    %71 = vector.extract_strided_slice %55 {offsets = [0, 128], sizes = [8, 128], strides = [1, 1]} : vector<8x384xf32> to vector<8x128xf32>
    %72 = vector.extract_strided_slice %62 {offsets = [0, 128], sizes = [8, 128], strides = [1, 1]} : vector<8x384xf32> to vector<8x128xf32>
    %73 = arith.addf %71, %72 : vector<8x128xf32>
    %74 = arith.negf %73 : vector<8x128xf32>
    %75 = math.exp %74 : vector<8x128xf32>
    %cst_38 = arith.constant 1.000000e+00 : f32
    %76 = vector.broadcast %cst_38 : f32 to vector<8x128xf32>
    %77 = arith.addf %76, %75 : vector<8x128xf32>
    %78 = arith.divf %76, %77 : vector<8x128xf32>
    %79 = vector.extract_strided_slice %55 {offsets = [0, 256], sizes = [8, 128], strides = [1, 1]} : vector<8x384xf32> to vector<8x128xf32>
    %80 = vector.extract_strided_slice %62 {offsets = [0, 256], sizes = [8, 128], strides = [1, 1]} : vector<8x384xf32> to vector<8x128xf32>
    %81 = arith.mulf %70, %80 : vector<8x128xf32>
    %82 = arith.addf %79, %81 : vector<8x128xf32>
    %83 = math.tanh %82 : vector<8x128xf32>
    %cst_39 = arith.constant 1.000000e+00 : f32
    %84 = vector.broadcast %cst_39 : f32 to vector<8x128xf32>
    %85 = arith.subf %84, %78 : vector<8x128xf32>
    %86 = arith.mulf %85, %83 : vector<8x128xf32>
    %87 = arith.mulf %78, %48 : vector<8x128xf32>
    %88 = arith.addf %86, %87 : vector<8x128xf32>
    %89 = arith.index_cast %c1_i32 : i32 to index
    %c0_40 = arith.constant 0 : index
    %c0_41 = arith.constant 0 : index
    %90 = vector.load %arg10[%89, %c0_40, %c0_41] : memref<8x8x128xf32, #tpu.memory_space<vmem>>, vector<1x8x128xf32>
    %91 = vector.shape_cast %90 : vector<1x8x128xf32> to vector<8x128xf32>
    %92 = vector.shape_cast %88 : vector<8x128xf32> to vector<1x8x128xf32>
    tpu.vector_store %arg10[%89, %c0_40, %c0_41], %92 {strides = array<i32>} : memref<8x8x128xf32, #tpu.memory_space<vmem>>, vector<1x8x128xf32>,
    %c2_i32 = arith.constant 2 : i32
    %93 = arith.index_cast %c2_i32 : i32 to index
    %c0_42 = arith.constant 0 : index
    %c0_43 = arith.constant 0 : index
    %94 = vector.load %arg11[%93, %c0_42, %c0_43] : memref<8x8x384xf32, #tpu.memory_space<vmem>>, vector<1x8x384xf32>
    %95 = vector.shape_cast %94 : vector<1x8x384xf32> to vector<8x384xf32>
    %c0_44 = arith.constant 0 : index
    %c0_45 = arith.constant 0 : index
    %c0_46 = arith.constant 0 : index
    %96 = vector.load %arg2[%c0_44, %c0_45, %c0_46] : memref<3x128x384xf32, #tpu.memory_space<vmem>>, vector<1x128x384xf32>
    %97 = vector.shape_cast %96 : vector<1x128x384xf32> to vector<128x384xf32>
    %cst_47 = arith.constant dense<0.000000e+00> : vector<8x384xf32>
    %98 = tpu.matmul %88, %97, %cst_47 {dimension_numbers = #tpu.dot_dimension_numbers<[1], [0], [0], [1], [0, 0, 1, 1], [], []>} : vector<8x128xf32>, vector<128x384xf32>, vector<8x384xf32> -> vector<8x384xf32>
    %c0_48 = arith.constant 0 : index
    %c0_49 = arith.constant 0 : index
    %c0_50 = arith.constant 0 : index
    %99 = vector.load %arg4[%c0_48, %c0_49, %c0_50] : memref<3x1x384xf32, #tpu.memory_space<vmem>>, vector<1x1x384xf32>
    %100 = vector.shape_cast %99 : vector<1x1x384xf32> to vector<1x384xf32>
    %101 = vector.broadcast %100 : vector<1x384xf32> to vector<8x384xf32>
    %102 = arith.addf %98, %101 : vector<8x384xf32>
    %103 = vector.extract_strided_slice %95 {offsets = [0, 0], sizes = [8, 128], strides = [1, 1]} : vector<8x384xf32> to vector<8x128xf32>
    %104 = vector.extract_strided_slice %102 {offsets = [0, 0], sizes = [8, 128], strides = [1, 1]} : vector<8x384xf32> to vector<8x128xf32>
    %105 = arith.addf %103, %104 : vector<8x128xf32>
    %106 = arith.negf %105 : vector<8x128xf32>
    %107 = math.exp %106 : vector<8x128xf32>
    %cst_51 = arith.constant 1.000000e+00 : f32
    %108 = vector.broadcast %cst_51 : f32 to vector<8x128xf32>
    %109 = arith.addf %108, %107 : vector<8x128xf32>
    %110 = arith.divf %108, %109 : vector<8x128xf32>
    %111 = vector.extract_strided_slice %95 {offsets = [0, 128], sizes = [8, 128], strides = [1, 1]} : vector<8x384xf32> to vector<8x128xf32>
    %112 = vector.extract_strided_slice %102 {offsets = [0, 128], sizes = [8, 128], strides = [1, 1]} : vector<8x384xf32> to vector<8x128xf32>
    %113 = arith.addf %111, %112 : vector<8x128xf32>
    %114 = arith.negf %113 : vector<8x128xf32>
    %115 = math.exp %114 : vector<8x128xf32>
    %cst_52 = arith.constant 1.000000e+00 : f32
    %116 = vector.broadcast %cst_52 : f32 to vector<8x128xf32>
    %117 = arith.addf %116, %115 : vector<8x128xf32>
    %118 = arith.divf %116, %117 : vector<8x128xf32>
    %119 = vector.extract_strided_slice %95 {offsets = [0, 256], sizes = [8, 128], strides = [1, 1]} : vector<8x384xf32> to vector<8x128xf32>
    %120 = vector.extract_strided_slice %102 {offsets = [0, 256], sizes = [8, 128], strides = [1, 1]} : vector<8x384xf32> to vector<8x128xf32>
    %121 = arith.mulf %110, %120 : vector<8x128xf32>
    %122 = arith.addf %119, %121 : vector<8x128xf32>
    %123 = math.tanh %122 : vector<8x128xf32>
    %cst_53 = arith.constant 1.000000e+00 : f32
    %124 = vector.broadcast %cst_53 : f32 to vector<8x128xf32>
    %125 = arith.subf %124, %118 : vector<8x128xf32>
    %126 = arith.mulf %125, %123 : vector<8x128xf32>
    %127 = arith.mulf %118, %88 : vector<8x128xf32>
    %128 = arith.addf %126, %127 : vector<8x128xf32>
    %129 = arith.index_cast %c2_i32 : i32 to index
    %c0_54 = arith.constant 0 : index
    %c0_55 = arith.constant 0 : index
    %130 = vector.load %arg10[%129, %c0_54, %c0_55] : memref<8x8x128xf32, #tpu.memory_space<vmem>>, vector<1x8x128xf32>
    %131 = vector.shape_cast %130 : vector<1x8x128xf32> to vector<8x128xf32>
    %132 = vector.shape_cast %128 : vector<8x128xf32> to vector<1x8x128xf32>
    tpu.vector_store %arg10[%129, %c0_54, %c0_55], %132 {strides = array<i32>} : memref<8x8x128xf32, #tpu.memory_space<vmem>>, vector<1x8x128xf32>,
    %c3_i32 = arith.constant 3 : i32
    %133 = arith.index_cast %c3_i32 : i32 to index
    %c0_56 = arith.constant 0 : index
    %c0_57 = arith.constant 0 : index
    %134 = vector.load %arg11[%133, %c0_56, %c0_57] : memref<8x8x384xf32, #tpu.memory_space<vmem>>, vector<1x8x384xf32>
    %135 = vector.shape_cast %134 : vector<1x8x384xf32> to vector<8x384xf32>
    %c0_58 = arith.constant 0 : index
    %c0_59 = arith.constant 0 : index
    %c0_60 = arith.constant 0 : index
    %136 = vector.load %arg2[%c0_58, %c0_59, %c0_60] : memref<3x128x384xf32, #tpu.memory_space<vmem>>, vector<1x128x384xf32>
    %137 = vector.shape_cast %136 : vector<1x128x384xf32> to vector<128x384xf32>
    %cst_61 = arith.constant dense<0.000000e+00> : vector<8x384xf32>
    %138 = tpu.matmul %128, %137, %cst_61 {dimension_numbers = #tpu.dot_dimension_numbers<[1], [0], [0], [1], [0, 0, 1, 1], [], []>} : vector<8x128xf32>, vector<128x384xf32>, vector<8x384xf32> -> vector<8x384xf32>
    %c0_62 = arith.constant 0 : index
    %c0_63 = arith.constant 0 : index
    %c0_64 = arith.constant 0 : index
    %139 = vector.load %arg4[%c0_62, %c0_63, %c0_64] : memref<3x1x384xf32, #tpu.memory_space<vmem>>, vector<1x1x384xf32>
    %140 = vector.shape_cast %139 : vector<1x1x384xf32> to vector<1x384xf32>
    %141 = vector.broadcast %140 : vector<1x384xf32> to vector<8x384xf32>
    %142 = arith.addf %138, %141 : vector<8x384xf32>
    %143 = vector.extract_strided_slice %135 {offsets = [0, 0], sizes = [8, 128], strides = [1, 1]} : vector<8x384xf32> to vector<8x128xf32>
    %144 = vector.extract_strided_slice %142 {offsets = [0, 0], sizes = [8, 128], strides = [1, 1]} : vector<8x384xf32> to vector<8x128xf32>
    %145 = arith.addf %143, %144 : vector<8x128xf32>
    %146 = arith.negf %145 : vector<8x128xf32>
    %147 = math.exp %146 : vector<8x128xf32>
    %cst_65 = arith.constant 1.000000e+00 : f32
    %148 = vector.broadcast %cst_65 : f32 to vector<8x128xf32>
    %149 = arith.addf %148, %147 : vector<8x128xf32>
    %150 = arith.divf %148, %149 : vector<8x128xf32>
    %151 = vector.extract_strided_slice %135 {offsets = [0, 128], sizes = [8, 128], strides = [1, 1]} : vector<8x384xf32> to vector<8x128xf32>
    %152 = vector.extract_strided_slice %142 {offsets = [0, 128], sizes = [8, 128], strides = [1, 1]} : vector<8x384xf32> to vector<8x128xf32>
    %153 = arith.addf %151, %152 : vector<8x128xf32>
    %154 = arith.negf %153 : vector<8x128xf32>
    %155 = math.exp %154 : vector<8x128xf32>
    %cst_66 = arith.constant 1.000000e+00 : f32
    %156 = vector.broadcast %cst_66 : f32 to vector<8x128xf32>
    %157 = arith.addf %156, %155 : vector<8x128xf32>
    %158 = arith.divf %156, %157 : vector<8x128xf32>
    %159 = vector.extract_strided_slice %135 {offsets = [0, 256], sizes = [8, 128], strides = [1, 1]} : vector<8x384xf32> to vector<8x128xf32>
    %160 = vector.extract_strided_slice %142 {offsets = [0, 256], sizes = [8, 128], strides = [1, 1]} : vector<8x384xf32> to vector<8x128xf32>
    %161 = arith.mulf %150, %160 : vector<8x128xf32>
    %162 = arith.addf %159, %161 : vector<8x128xf32>
    %163 = math.tanh %162 : vector<8x128xf32>
    %cst_67 = arith.constant 1.000000e+00 : f32
    %164 = vector.broadcast %cst_67 : f32 to vector<8x128xf32>
    %165 = arith.subf %164, %158 : vector<8x128xf32>
    %166 = arith.mulf %165, %163 : vector<8x128xf32>
    %167 = arith.mulf %158, %128 : vector<8x128xf32>
    %168 = arith.addf %166, %167 : vector<8x128xf32>
    %169 = arith.index_cast %c3_i32 : i32 to index
    %c0_68 = arith.constant 0 : index
    %c0_69 = arith.constant 0 : index
    %170 = vector.load %arg10[%169, %c0_68, %c0_69] : memref<8x8x128xf32, #tpu.memory_space<vmem>>, vector<1x8x128xf32>
    %171 = vector.shape_cast %170 : vector<1x8x128xf32> to vector<8x128xf32>
    %172 = vector.shape_cast %168 : vector<8x128xf32> to vector<1x8x128xf32>
    tpu.vector_store %arg10[%169, %c0_68, %c0_69], %172 {strides = array<i32>} : memref<8x8x128xf32, #tpu.memory_space<vmem>>, vector<1x8x128xf32>,
    %c4_i32 = arith.constant 4 : i32
    %173 = arith.index_cast %c4_i32 : i32 to index
    %c0_70 = arith.constant 0 : index
    %c0_71 = arith.constant 0 : index
    %174 = vector.load %arg11[%173, %c0_70, %c0_71] : memref<8x8x384xf32, #tpu.memory_space<vmem>>, vector<1x8x384xf32>
    %175 = vector.shape_cast %174 : vector<1x8x384xf32> to vector<8x384xf32>
    %c0_72 = arith.constant 0 : index
    %c0_73 = arith.constant 0 : index
    %c0_74 = arith.constant 0 : index
    %176 = vector.load %arg2[%c0_72, %c0_73, %c0_74] : memref<3x128x384xf32, #tpu.memory_space<vmem>>, vector<1x128x384xf32>
    %177 = vector.shape_cast %176 : vector<1x128x384xf32> to vector<128x384xf32>
    %cst_75 = arith.constant dense<0.000000e+00> : vector<8x384xf32>
    %178 = tpu.matmul %168, %177, %cst_75 {dimension_numbers = #tpu.dot_dimension_numbers<[1], [0], [0], [1], [0, 0, 1, 1], [], []>} : vector<8x128xf32>, vector<128x384xf32>, vector<8x384xf32> -> vector<8x384xf32>
    %c0_76 = arith.constant 0 : index
    %c0_77 = arith.constant 0 : index
    %c0_78 = arith.constant 0 : index
    %179 = vector.load %arg4[%c0_76, %c0_77, %c0_78] : memref<3x1x384xf32, #tpu.memory_space<vmem>>, vector<1x1x384xf32>
    %180 = vector.shape_cast %179 : vector<1x1x384xf32> to vector<1x384xf32>
    %181 = vector.broadcast %180 : vector<1x384xf32> to vector<8x384xf32>
    %182 = arith.addf %178, %181 : vector<8x384xf32>
    %183 = vector.extract_strided_slice %175 {offsets = [0, 0], sizes = [8, 128], strides = [1, 1]} : vector<8x384xf32> to vector<8x128xf32>
    %184 = vector.extract_strided_slice %182 {offsets = [0, 0], sizes = [8, 128], strides = [1, 1]} : vector<8x384xf32> to vector<8x128xf32>
    %185 = arith.addf %183, %184 : vector<8x128xf32>
    %186 = arith.negf %185 : vector<8x128xf32>
    %187 = math.exp %186 : vector<8x128xf32>
    %cst_79 = arith.constant 1.000000e+00 : f32
    %188 = vector.broadcast %cst_79 : f32 to vector<8x128xf32>
    %189 = arith.addf %188, %187 : vector<8x128xf32>
    %190 = arith.divf %188, %189 : vector<8x128xf32>
    %191 = vector.extract_strided_slice %175 {offsets = [0, 128], sizes = [8, 128], strides = [1, 1]} : vector<8x384xf32> to vector<8x128xf32>
    %192 = vector.extract_strided_slice %182 {offsets = [0, 128], sizes = [8, 128], strides = [1, 1]} : vector<8x384xf32> to vector<8x128xf32>
    %193 = arith.addf %191, %192 : vector<8x128xf32>
    %194 = arith.negf %193 : vector<8x128xf32>
    %195 = math.exp %194 : vector<8x128xf32>
    %cst_80 = arith.constant 1.000000e+00 : f32
    %196 = vector.broadcast %cst_80 : f32 to vector<8x128xf32>
    %197 = arith.addf %196, %195 : vector<8x128xf32>
    %198 = arith.divf %196, %197 : vector<8x128xf32>
    %199 = vector.extract_strided_slice %175 {offsets = [0, 256], sizes = [8, 128], strides = [1, 1]} : vector<8x384xf32> to vector<8x128xf32>
    %200 = vector.extract_strided_slice %182 {offsets = [0, 256], sizes = [8, 128], strides = [1, 1]} : vector<8x384xf32> to vector<8x128xf32>
    %201 = arith.mulf %190, %200 : vector<8x128xf32>
    %202 = arith.addf %199, %201 : vector<8x128xf32>
    %203 = math.tanh %202 : vector<8x128xf32>
    %cst_81 = arith.constant 1.000000e+00 : f32
    %204 = vector.broadcast %cst_81 : f32 to vector<8x128xf32>
    %205 = arith.subf %204, %198 : vector<8x128xf32>
    %206 = arith.mulf %205, %203 : vector<8x128xf32>
    %207 = arith.mulf %198, %168 : vector<8x128xf32>
    %208 = arith.addf %206, %207 : vector<8x128xf32>
    %209 = arith.index_cast %c4_i32 : i32 to index
    %c0_82 = arith.constant 0 : index
    %c0_83 = arith.constant 0 : index
    %210 = vector.load %arg10[%209, %c0_82, %c0_83] : memref<8x8x128xf32, #tpu.memory_space<vmem>>, vector<1x8x128xf32>
    %211 = vector.shape_cast %210 : vector<1x8x128xf32> to vector<8x128xf32>
    %212 = vector.shape_cast %208 : vector<8x128xf32> to vector<1x8x128xf32>
    tpu.vector_store %arg10[%209, %c0_82, %c0_83], %212 {strides = array<i32>} : memref<8x8x128xf32, #tpu.memory_space<vmem>>, vector<1x8x128xf32>,
    %c5_i32 = arith.constant 5 : i32
    %213 = arith.index_cast %c5_i32 : i32 to index
    %c0_84 = arith.constant 0 : index
    %c0_85 = arith.constant 0 : index
    %214 = vector.load %arg11[%213, %c0_84, %c0_85] : memref<8x8x384xf32, #tpu.memory_space<vmem>>, vector<1x8x384xf32>
    %215 = vector.shape_cast %214 : vector<1x8x384xf32> to vector<8x384xf32>
    %c0_86 = arith.constant 0 : index
    %c0_87 = arith.constant 0 : index
    %c0_88 = arith.constant 0 : index
    %216 = vector.load %arg2[%c0_86, %c0_87, %c0_88] : memref<3x128x384xf32, #tpu.memory_space<vmem>>, vector<1x128x384xf32>
    %217 = vector.shape_cast %216 : vector<1x128x384xf32> to vector<128x384xf32>
    %cst_89 = arith.constant dense<0.000000e+00> : vector<8x384xf32>
    %218 = tpu.matmul %208, %217, %cst_89 {dimension_numbers = #tpu.dot_dimension_numbers<[1], [0], [0], [1], [0, 0, 1, 1], [], []>} : vector<8x128xf32>, vector<128x384xf32>, vector<8x384xf32> -> vector<8x384xf32>
    %c0_90 = arith.constant 0 : index
    %c0_91 = arith.constant 0 : index
    %c0_92 = arith.constant 0 : index
    %219 = vector.load %arg4[%c0_90, %c0_91, %c0_92] : memref<3x1x384xf32, #tpu.memory_space<vmem>>, vector<1x1x384xf32>
    %220 = vector.shape_cast %219 : vector<1x1x384xf32> to vector<1x384xf32>
    %221 = vector.broadcast %220 : vector<1x384xf32> to vector<8x384xf32>
    %222 = arith.addf %218, %221 : vector<8x384xf32>
    %223 = vector.extract_strided_slice %215 {offsets = [0, 0], sizes = [8, 128], strides = [1, 1]} : vector<8x384xf32> to vector<8x128xf32>
    %224 = vector.extract_strided_slice %222 {offsets = [0, 0], sizes = [8, 128], strides = [1, 1]} : vector<8x384xf32> to vector<8x128xf32>
    %225 = arith.addf %223, %224 : vector<8x128xf32>
    %226 = arith.negf %225 : vector<8x128xf32>
    %227 = math.exp %226 : vector<8x128xf32>
    %cst_93 = arith.constant 1.000000e+00 : f32
    %228 = vector.broadcast %cst_93 : f32 to vector<8x128xf32>
    %229 = arith.addf %228, %227 : vector<8x128xf32>
    %230 = arith.divf %228, %229 : vector<8x128xf32>
    %231 = vector.extract_strided_slice %215 {offsets = [0, 128], sizes = [8, 128], strides = [1, 1]} : vector<8x384xf32> to vector<8x128xf32>
    %232 = vector.extract_strided_slice %222 {offsets = [0, 128], sizes = [8, 128], strides = [1, 1]} : vector<8x384xf32> to vector<8x128xf32>
    %233 = arith.addf %231, %232 : vector<8x128xf32>
    %234 = arith.negf %233 : vector<8x128xf32>
    %235 = math.exp %234 : vector<8x128xf32>
    %cst_94 = arith.constant 1.000000e+00 : f32
    %236 = vector.broadcast %cst_94 : f32 to vector<8x128xf32>
    %237 = arith.addf %236, %235 : vector<8x128xf32>
    %238 = arith.divf %236, %237 : vector<8x128xf32>
    %239 = vector.extract_strided_slice %215 {offsets = [0, 256], sizes = [8, 128], strides = [1, 1]} : vector<8x384xf32> to vector<8x128xf32>
    %240 = vector.extract_strided_slice %222 {offsets = [0, 256], sizes = [8, 128], strides = [1, 1]} : vector<8x384xf32> to vector<8x128xf32>
    %241 = arith.mulf %230, %240 : vector<8x128xf32>
    %242 = arith.addf %239, %241 : vector<8x128xf32>
    %243 = math.tanh %242 : vector<8x128xf32>
    %cst_95 = arith.constant 1.000000e+00 : f32
    %244 = vector.broadcast %cst_95 : f32 to vector<8x128xf32>
    %245 = arith.subf %244, %238 : vector<8x128xf32>
    %246 = arith.mulf %245, %243 : vector<8x128xf32>
    %247 = arith.mulf %238, %208 : vector<8x128xf32>
    %248 = arith.addf %246, %247 : vector<8x128xf32>
    %249 = arith.index_cast %c5_i32 : i32 to index
    %c0_96 = arith.constant 0 : index
    %c0_97 = arith.constant 0 : index
    %250 = vector.load %arg10[%249, %c0_96, %c0_97] : memref<8x8x128xf32, #tpu.memory_space<vmem>>, vector<1x8x128xf32>
    %251 = vector.shape_cast %250 : vector<1x8x128xf32> to vector<8x128xf32>
    %252 = vector.shape_cast %248 : vector<8x128xf32> to vector<1x8x128xf32>
    tpu.vector_store %arg10[%249, %c0_96, %c0_97], %252 {strides = array<i32>} : memref<8x8x128xf32, #tpu.memory_space<vmem>>, vector<1x8x128xf32>,
    %c6_i32 = arith.constant 6 : i32
    %253 = arith.index_cast %c6_i32 : i32 to index
    %c0_98 = arith.constant 0 : index
    %c0_99 = arith.constant 0 : index
    %254 = vector.load %arg11[%253, %c0_98, %c0_99] : memref<8x8x384xf32, #tpu.memory_space<vmem>>, vector<1x8x384xf32>
    %255 = vector.shape_cast %254 : vector<1x8x384xf32> to vector<8x384xf32>
    %c0_100 = arith.constant 0 : index
    %c0_101 = arith.constant 0 : index
    %c0_102 = arith.constant 0 : index
    %256 = vector.load %arg2[%c0_100, %c0_101, %c0_102] : memref<3x128x384xf32, #tpu.memory_space<vmem>>, vector<1x128x384xf32>
    %257 = vector.shape_cast %256 : vector<1x128x384xf32> to vector<128x384xf32>
    %cst_103 = arith.constant dense<0.000000e+00> : vector<8x384xf32>
    %258 = tpu.matmul %248, %257, %cst_103 {dimension_numbers = #tpu.dot_dimension_numbers<[1], [0], [0], [1], [0, 0, 1, 1], [], []>} : vector<8x128xf32>, vector<128x384xf32>, vector<8x384xf32> -> vector<8x384xf32>
    %c0_104 = arith.constant 0 : index
    %c0_105 = arith.constant 0 : index
    %c0_106 = arith.constant 0 : index
    %259 = vector.load %arg4[%c0_104, %c0_105, %c0_106] : memref<3x1x384xf32, #tpu.memory_space<vmem>>, vector<1x1x384xf32>
    %260 = vector.shape_cast %259 : vector<1x1x384xf32> to vector<1x384xf32>
    %261 = vector.broadcast %260 : vector<1x384xf32> to vector<8x384xf32>
    %262 = arith.addf %258, %261 : vector<8x384xf32>
    %263 = vector.extract_strided_slice %255 {offsets = [0, 0], sizes = [8, 128], strides = [1, 1]} : vector<8x384xf32> to vector<8x128xf32>
    %264 = vector.extract_strided_slice %262 {offsets = [0, 0], sizes = [8, 128], strides = [1, 1]} : vector<8x384xf32> to vector<8x128xf32>
    %265 = arith.addf %263, %264 : vector<8x128xf32>
    %266 = arith.negf %265 : vector<8x128xf32>
    %267 = math.exp %266 : vector<8x128xf32>
    %cst_107 = arith.constant 1.000000e+00 : f32
    %268 = vector.broadcast %cst_107 : f32 to vector<8x128xf32>
    %269 = arith.addf %268, %267 : vector<8x128xf32>
    %270 = arith.divf %268, %269 : vector<8x128xf32>
    %271 = vector.extract_strided_slice %255 {offsets = [0, 128], sizes = [8, 128], strides = [1, 1]} : vector<8x384xf32> to vector<8x128xf32>
    %272 = vector.extract_strided_slice %262 {offsets = [0, 128], sizes = [8, 128], strides = [1, 1]} : vector<8x384xf32> to vector<8x128xf32>
    %273 = arith.addf %271, %272 : vector<8x128xf32>
    %274 = arith.negf %273 : vector<8x128xf32>
    %275 = math.exp %274 : vector<8x128xf32>
    %cst_108 = arith.constant 1.000000e+00 : f32
    %276 = vector.broadcast %cst_108 : f32 to vector<8x128xf32>
    %277 = arith.addf %276, %275 : vector<8x128xf32>
    %278 = arith.divf %276, %277 : vector<8x128xf32>
    %279 = vector.extract_strided_slice %255 {offsets = [0, 256], sizes = [8, 128], strides = [1, 1]} : vector<8x384xf32> to vector<8x128xf32>
    %280 = vector.extract_strided_slice %262 {offsets = [0, 256], sizes = [8, 128], strides = [1, 1]} : vector<8x384xf32> to vector<8x128xf32>
    %281 = arith.mulf %270, %280 : vector<8x128xf32>
    %282 = arith.addf %279, %281 : vector<8x128xf32>
    %283 = math.tanh %282 : vector<8x128xf32>
    %cst_109 = arith.constant 1.000000e+00 : f32
    %284 = vector.broadcast %cst_109 : f32 to vector<8x128xf32>
    %285 = arith.subf %284, %278 : vector<8x128xf32>
    %286 = arith.mulf %285, %283 : vector<8x128xf32>
    %287 = arith.mulf %278, %248 : vector<8x128xf32>
    %288 = arith.addf %286, %287 : vector<8x128xf32>
    %289 = arith.index_cast %c6_i32 : i32 to index
    %c0_110 = arith.constant 0 : index
    %c0_111 = arith.constant 0 : index
    %290 = vector.load %arg10[%289, %c0_110, %c0_111] : memref<8x8x128xf32, #tpu.memory_space<vmem>>, vector<1x8x128xf32>
    %291 = vector.shape_cast %290 : vector<1x8x128xf32> to vector<8x128xf32>
    %292 = vector.shape_cast %288 : vector<8x128xf32> to vector<1x8x128xf32>
    tpu.vector_store %arg10[%289, %c0_110, %c0_111], %292 {strides = array<i32>} : memref<8x8x128xf32, #tpu.memory_space<vmem>>, vector<1x8x128xf32>,
    %c7_i32 = arith.constant 7 : i32
    %293 = arith.index_cast %c7_i32 : i32 to index
    %c0_112 = arith.constant 0 : index
    %c0_113 = arith.constant 0 : index
    %294 = vector.load %arg11[%293, %c0_112, %c0_113] : memref<8x8x384xf32, #tpu.memory_space<vmem>>, vector<1x8x384xf32>
    %295 = vector.shape_cast %294 : vector<1x8x384xf32> to vector<8x384xf32>
    %c0_114 = arith.constant 0 : index
    %c0_115 = arith.constant 0 : index
    %c0_116 = arith.constant 0 : index
    %296 = vector.load %arg2[%c0_114, %c0_115, %c0_116] : memref<3x128x384xf32, #tpu.memory_space<vmem>>, vector<1x128x384xf32>
    %297 = vector.shape_cast %296 : vector<1x128x384xf32> to vector<128x384xf32>
    %cst_117 = arith.constant dense<0.000000e+00> : vector<8x384xf32>
    %298 = tpu.matmul %288, %297, %cst_117 {dimension_numbers = #tpu.dot_dimension_numbers<[1], [0], [0], [1], [0, 0, 1, 1], [], []>} : vector<8x128xf32>, vector<128x384xf32>, vector<8x384xf32> -> vector<8x384xf32>
    %c0_118 = arith.constant 0 : index
    %c0_119 = arith.constant 0 : index
    %c0_120 = arith.constant 0 : index
    %299 = vector.load %arg4[%c0_118, %c0_119, %c0_120] : memref<3x1x384xf32, #tpu.memory_space<vmem>>, vector<1x1x384xf32>
    %300 = vector.shape_cast %299 : vector<1x1x384xf32> to vector<1x384xf32>
    %301 = vector.broadcast %300 : vector<1x384xf32> to vector<8x384xf32>
    %302 = arith.addf %298, %301 : vector<8x384xf32>
    %303 = vector.extract_strided_slice %295 {offsets = [0, 0], sizes = [8, 128], strides = [1, 1]} : vector<8x384xf32> to vector<8x128xf32>
    %304 = vector.extract_strided_slice %302 {offsets = [0, 0], sizes = [8, 128], strides = [1, 1]} : vector<8x384xf32> to vector<8x128xf32>
    %305 = arith.addf %303, %304 : vector<8x128xf32>
    %306 = arith.negf %305 : vector<8x128xf32>
    %307 = math.exp %306 : vector<8x128xf32>
    %cst_121 = arith.constant 1.000000e+00 : f32
    %308 = vector.broadcast %cst_121 : f32 to vector<8x128xf32>
    %309 = arith.addf %308, %307 : vector<8x128xf32>
    %310 = arith.divf %308, %309 : vector<8x128xf32>
    %311 = vector.extract_strided_slice %295 {offsets = [0, 128], sizes = [8, 128], strides = [1, 1]} : vector<8x384xf32> to vector<8x128xf32>
    %312 = vector.extract_strided_slice %302 {offsets = [0, 128], sizes = [8, 128], strides = [1, 1]} : vector<8x384xf32> to vector<8x128xf32>
    %313 = arith.addf %311, %312 : vector<8x128xf32>
    %314 = arith.negf %313 : vector<8x128xf32>
    %315 = math.exp %314 : vector<8x128xf32>
    %cst_122 = arith.constant 1.000000e+00 : f32
    %316 = vector.broadcast %cst_122 : f32 to vector<8x128xf32>
    %317 = arith.addf %316, %315 : vector<8x128xf32>
    %318 = arith.divf %316, %317 : vector<8x128xf32>
    %319 = vector.extract_strided_slice %295 {offsets = [0, 256], sizes = [8, 128], strides = [1, 1]} : vector<8x384xf32> to vector<8x128xf32>
    %320 = vector.extract_strided_slice %302 {offsets = [0, 256], sizes = [8, 128], strides = [1, 1]} : vector<8x384xf32> to vector<8x128xf32>
    %321 = arith.mulf %310, %320 : vector<8x128xf32>
    %322 = arith.addf %319, %321 : vector<8x128xf32>
    %323 = math.tanh %322 : vector<8x128xf32>
    %cst_123 = arith.constant 1.000000e+00 : f32
    %324 = vector.broadcast %cst_123 : f32 to vector<8x128xf32>
    %325 = arith.subf %324, %318 : vector<8x128xf32>
    %326 = arith.mulf %325, %323 : vector<8x128xf32>
    %327 = arith.mulf %318, %288 : vector<8x128xf32>
    %328 = arith.addf %326, %327 : vector<8x128xf32>
    %329 = arith.index_cast %c7_i32 : i32 to index
    %c0_124 = arith.constant 0 : index
    %c0_125 = arith.constant 0 : index
    %330 = vector.load %arg10[%329, %c0_124, %c0_125] : memref<8x8x128xf32, #tpu.memory_space<vmem>>, vector<1x8x128xf32>
    %331 = vector.shape_cast %330 : vector<1x8x128xf32> to vector<8x128xf32>
    %332 = vector.shape_cast %328 : vector<8x128xf32> to vector<1x8x128xf32>
    tpu.vector_store %arg10[%329, %c0_124, %c0_125], %332 {strides = array<i32>} : memref<8x8x128xf32, #tpu.memory_space<vmem>>, vector<1x8x128xf32>,
    %c8_i32 = arith.constant 8 : i32
    %c0_126 = arith.constant 0 : index
    %c0_127 = arith.constant 0 : index
    %c0_128 = arith.constant 0 : index
    %333 = vector.load %arg9[%c0_126, %c0_127, %c0_128] : memref<3x8x128xf32, #tpu.memory_space<vmem>>, vector<1x8x128xf32>
    %334 = vector.shape_cast %333 : vector<1x8x128xf32> to vector<8x128xf32>
    %335 = vector.shape_cast %328 : vector<8x128xf32> to vector<1x8x128xf32>
    tpu.vector_store %arg9[%c0_126, %c0_127, %c0_128], %335 {strides = array<i32>} : memref<3x8x128xf32, #tpu.memory_space<vmem>>, vector<1x8x128xf32>,
    %c0_129 = arith.constant 0 : index
    %c0_130 = arith.constant 0 : index
    %c0_131 = arith.constant 0 : index
    %336 = vector.load %arg10[%c0_129, %c0_130, %c0_131] : memref<8x8x128xf32, #tpu.memory_space<vmem>>, vector<8x8x128xf32>
    %337 = vector.shape_cast %336 : vector<8x8x128xf32> to vector<64x128xf32>
    %c1 = arith.constant 1 : index
    %c0_132 = arith.constant 0 : index
    %c0_133 = arith.constant 0 : index
    %338 = vector.load %arg1[%c1, %c0_132, %c0_133] : memref<3x128x384xf32, #tpu.memory_space<vmem>>, vector<1x128x384xf32>
    %339 = vector.shape_cast %338 : vector<1x128x384xf32> to vector<128x384xf32>
    %cst_134 = arith.constant dense<0.000000e+00> : vector<64x384xf32>
    %340 = tpu.matmul %337, %339, %cst_134 {dimension_numbers = #tpu.dot_dimension_numbers<[1], [0], [0], [1], [0, 0, 1, 1], [], []>} : vector<64x128xf32>, vector<128x384xf32>, vector<64x384xf32> -> vector<64x384xf32>
    %c1_135 = arith.constant 1 : index
    %c0_136 = arith.constant 0 : index
    %c0_137 = arith.constant 0 : index
    %341 = vector.load %arg3[%c1_135, %c0_136, %c0_137] : memref<3x1x384xf32, #tpu.memory_space<vmem>>, vector<1x1x384xf32>
    %342 = vector.shape_cast %341 : vector<1x1x384xf32> to vector<1x384xf32>
    %343 = vector.broadcast %342 : vector<1x384xf32> to vector<64x384xf32>
    %344 = arith.addf %340, %343 : vector<64x384xf32>
    %345 = vector.shape_cast %344 : vector<64x384xf32> to vector<8x8x384xf32>
    %c0_138 = arith.constant 0 : index
    %c0_139 = arith.constant 0 : index
    %c0_140 = arith.constant 0 : index
    %346 = vector.load %arg11[%c0_138, %c0_139, %c0_140] : memref<8x8x384xf32, #tpu.memory_space<vmem>>, vector<8x8x384xf32>
    tpu.vector_store %arg11[%c0_138, %c0_139, %c0_140], %345 {strides = array<i32>} : memref<8x8x384xf32, #tpu.memory_space<vmem>>, vector<8x8x384xf32>,
    %c1_141 = arith.constant 1 : index
    %c0_142 = arith.constant 0 : index
    %c0_143 = arith.constant 0 : index
    %347 = vector.load %arg7[%c1_141, %c0_142, %c0_143] : memref<3x8x128xf32, #tpu.memory_space<vmem>>, vector<1x8x128xf32>
    %348 = vector.shape_cast %347 : vector<1x8x128xf32> to vector<8x128xf32>
    %c0_i32_144 = arith.constant 0 : i32
    %349 = arith.index_cast %c0_i32_144 : i32 to index
    %c0_145 = arith.constant 0 : index
    %c0_146 = arith.constant 0 : index
    %350 = vector.load %arg11[%349, %c0_145, %c0_146] : memref<8x8x384xf32, #tpu.memory_space<vmem>>, vector<1x8x384xf32>
    %351 = vector.shape_cast %350 : vector<1x8x384xf32> to vector<8x384xf32>
    %c1_147 = arith.constant 1 : index
    %c0_148 = arith.constant 0 : index
    %c0_149 = arith.constant 0 : index
    %352 = vector.load %arg2[%c1_147, %c0_148, %c0_149] : memref<3x128x384xf32, #tpu.memory_space<vmem>>, vector<1x128x384xf32>
    %353 = vector.shape_cast %352 : vector<1x128x384xf32> to vector<128x384xf32>
    %cst_150 = arith.constant dense<0.000000e+00> : vector<8x384xf32>
    %354 = tpu.matmul %348, %353, %cst_150 {dimension_numbers = #tpu.dot_dimension_numbers<[1], [0], [0], [1], [0, 0, 1, 1], [], []>} : vector<8x128xf32>, vector<128x384xf32>, vector<8x384xf32> -> vector<8x384xf32>
    %c1_151 = arith.constant 1 : index
    %c0_152 = arith.constant 0 : index
    %c0_153 = arith.constant 0 : index
    %355 = vector.load %arg4[%c1_151, %c0_152, %c0_153] : memref<3x1x384xf32, #tpu.memory_space<vmem>>, vector<1x1x384xf32>
    %356 = vector.shape_cast %355 : vector<1x1x384xf32> to vector<1x384xf32>
    %357 = vector.broadcast %356 : vector<1x384xf32> to vector<8x384xf32>
    %358 = arith.addf %354, %357 : vector<8x384xf32>
    %359 = vector.extract_strided_slice %351 {offsets = [0, 0], sizes = [8, 128], strides = [1, 1]} : vector<8x384xf32> to vector<8x128xf32>
    %360 = vector.extract_strided_slice %358 {offsets = [0, 0], sizes = [8, 128], strides = [1, 1]} : vector<8x384xf32> to vector<8x128xf32>
    %361 = arith.addf %359, %360 : vector<8x128xf32>
    %362 = arith.negf %361 : vector<8x128xf32>
    %363 = math.exp %362 : vector<8x128xf32>
    %cst_154 = arith.constant 1.000000e+00 : f32
    %364 = vector.broadcast %cst_154 : f32 to vector<8x128xf32>
    %365 = arith.addf %364, %363 : vector<8x128xf32>
    %366 = arith.divf %364, %365 : vector<8x128xf32>
    %367 = vector.extract_strided_slice %351 {offsets = [0, 128], sizes = [8, 128], strides = [1, 1]} : vector<8x384xf32> to vector<8x128xf32>
    %368 = vector.extract_strided_slice %358 {offsets = [0, 128], sizes = [8, 128], strides = [1, 1]} : vector<8x384xf32> to vector<8x128xf32>
    %369 = arith.addf %367, %368 : vector<8x128xf32>
    %370 = arith.negf %369 : vector<8x128xf32>
    %371 = math.exp %370 : vector<8x128xf32>
    %cst_155 = arith.constant 1.000000e+00 : f32
    %372 = vector.broadcast %cst_155 : f32 to vector<8x128xf32>
    %373 = arith.addf %372, %371 : vector<8x128xf32>
    %374 = arith.divf %372, %373 : vector<8x128xf32>
    %375 = vector.extract_strided_slice %351 {offsets = [0, 256], sizes = [8, 128], strides = [1, 1]} : vector<8x384xf32> to vector<8x128xf32>
    %376 = vector.extract_strided_slice %358 {offsets = [0, 256], sizes = [8, 128], strides = [1, 1]} : vector<8x384xf32> to vector<8x128xf32>
    %377 = arith.mulf %366, %376 : vector<8x128xf32>
    %378 = arith.addf %375, %377 : vector<8x128xf32>
    %379 = math.tanh %378 : vector<8x128xf32>
    %cst_156 = arith.constant 1.000000e+00 : f32
    %380 = vector.broadcast %cst_156 : f32 to vector<8x128xf32>
    %381 = arith.subf %380, %374 : vector<8x128xf32>
    %382 = arith.mulf %381, %379 : vector<8x128xf32>
    %383 = arith.mulf %374, %348 : vector<8x128xf32>
    %384 = arith.addf %382, %383 : vector<8x128xf32>
    %385 = arith.index_cast %c0_i32_144 : i32 to index
    %c0_157 = arith.constant 0 : index
    %c0_158 = arith.constant 0 : index
    %386 = vector.load %arg10[%385, %c0_157, %c0_158] : memref<8x8x128xf32, #tpu.memory_space<vmem>>, vector<1x8x128xf32>
    %387 = vector.shape_cast %386 : vector<1x8x128xf32> to vector<8x128xf32>
    %388 = vector.shape_cast %384 : vector<8x128xf32> to vector<1x8x128xf32>
    tpu.vector_store %arg10[%385, %c0_157, %c0_158], %388 {strides = array<i32>} : memref<8x8x128xf32, #tpu.memory_space<vmem>>, vector<1x8x128xf32>,
    %c1_i32_159 = arith.constant 1 : i32
    %389 = arith.index_cast %c1_i32_159 : i32 to index
    %c0_160 = arith.constant 0 : index
    %c0_161 = arith.constant 0 : index
    %390 = vector.load %arg11[%389, %c0_160, %c0_161] : memref<8x8x384xf32, #tpu.memory_space<vmem>>, vector<1x8x384xf32>
    %391 = vector.shape_cast %390 : vector<1x8x384xf32> to vector<8x384xf32>
    %c1_162 = arith.constant 1 : index
    %c0_163 = arith.constant 0 : index
    %c0_164 = arith.constant 0 : index
    %392 = vector.load %arg2[%c1_162, %c0_163, %c0_164] : memref<3x128x384xf32, #tpu.memory_space<vmem>>, vector<1x128x384xf32>
    %393 = vector.shape_cast %392 : vector<1x128x384xf32> to vector<128x384xf32>
    %cst_165 = arith.constant dense<0.000000e+00> : vector<8x384xf32>
    %394 = tpu.matmul %384, %393, %cst_165 {dimension_numbers = #tpu.dot_dimension_numbers<[1], [0], [0], [1], [0, 0, 1, 1], [], []>} : vector<8x128xf32>, vector<128x384xf32>, vector<8x384xf32> -> vector<8x384xf32>
    %c1_166 = arith.constant 1 : index
    %c0_167 = arith.constant 0 : index
    %c0_168 = arith.constant 0 : index
    %395 = vector.load %arg4[%c1_166, %c0_167, %c0_168] : memref<3x1x384xf32, #tpu.memory_space<vmem>>, vector<1x1x384xf32>
    %396 = vector.shape_cast %395 : vector<1x1x384xf32> to vector<1x384xf32>
    %397 = vector.broadcast %396 : vector<1x384xf32> to vector<8x384xf32>
    %398 = arith.addf %394, %397 : vector<8x384xf32>
    %399 = vector.extract_strided_slice %391 {offsets = [0, 0], sizes = [8, 128], strides = [1, 1]} : vector<8x384xf32> to vector<8x128xf32>
    %400 = vector.extract_strided_slice %398 {offsets = [0, 0], sizes = [8, 128], strides = [1, 1]} : vector<8x384xf32> to vector<8x128xf32>
    %401 = arith.addf %399, %400 : vector<8x128xf32>
    %402 = arith.negf %401 : vector<8x128xf32>
    %403 = math.exp %402 : vector<8x128xf32>
    %cst_169 = arith.constant 1.000000e+00 : f32
    %404 = vector.broadcast %cst_169 : f32 to vector<8x128xf32>
    %405 = arith.addf %404, %403 : vector<8x128xf32>
    %406 = arith.divf %404, %405 : vector<8x128xf32>
    %407 = vector.extract_strided_slice %391 {offsets = [0, 128], sizes = [8, 128], strides = [1, 1]} : vector<8x384xf32> to vector<8x128xf32>
    %408 = vector.extract_strided_slice %398 {offsets = [0, 128], sizes = [8, 128], strides = [1, 1]} : vector<8x384xf32> to vector<8x128xf32>
    %409 = arith.addf %407, %408 : vector<8x128xf32>
    %410 = arith.negf %409 : vector<8x128xf32>
    %411 = math.exp %410 : vector<8x128xf32>
    %cst_170 = arith.constant 1.000000e+00 : f32
    %412 = vector.broadcast %cst_170 : f32 to vector<8x128xf32>
    %413 = arith.addf %412, %411 : vector<8x128xf32>
    %414 = arith.divf %412, %413 : vector<8x128xf32>
    %415 = vector.extract_strided_slice %391 {offsets = [0, 256], sizes = [8, 128], strides = [1, 1]} : vector<8x384xf32> to vector<8x128xf32>
    %416 = vector.extract_strided_slice %398 {offsets = [0, 256], sizes = [8, 128], strides = [1, 1]} : vector<8x384xf32> to vector<8x128xf32>
    %417 = arith.mulf %406, %416 : vector<8x128xf32>
    %418 = arith.addf %415, %417 : vector<8x128xf32>
    %419 = math.tanh %418 : vector<8x128xf32>
    %cst_171 = arith.constant 1.000000e+00 : f32
    %420 = vector.broadcast %cst_171 : f32 to vector<8x128xf32>
    %421 = arith.subf %420, %414 : vector<8x128xf32>
    %422 = arith.mulf %421, %419 : vector<8x128xf32>
    %423 = arith.mulf %414, %384 : vector<8x128xf32>
    %424 = arith.addf %422, %423 : vector<8x128xf32>
    %425 = arith.index_cast %c1_i32_159 : i32 to index
    %c0_172 = arith.constant 0 : index
    %c0_173 = arith.constant 0 : index
    %426 = vector.load %arg10[%425, %c0_172, %c0_173] : memref<8x8x128xf32, #tpu.memory_space<vmem>>, vector<1x8x128xf32>
    %427 = vector.shape_cast %426 : vector<1x8x128xf32> to vector<8x128xf32>
    %428 = vector.shape_cast %424 : vector<8x128xf32> to vector<1x8x128xf32>
    tpu.vector_store %arg10[%425, %c0_172, %c0_173], %428 {strides = array<i32>} : memref<8x8x128xf32, #tpu.memory_space<vmem>>, vector<1x8x128xf32>,
    %c2_i32_174 = arith.constant 2 : i32
    %429 = arith.index_cast %c2_i32_174 : i32 to index
    %c0_175 = arith.constant 0 : index
    %c0_176 = arith.constant 0 : index
    %430 = vector.load %arg11[%429, %c0_175, %c0_176] : memref<8x8x384xf32, #tpu.memory_space<vmem>>, vector<1x8x384xf32>
    %431 = vector.shape_cast %430 : vector<1x8x384xf32> to vector<8x384xf32>
    %c1_177 = arith.constant 1 : index
    %c0_178 = arith.constant 0 : index
    %c0_179 = arith.constant 0 : index
    %432 = vector.load %arg2[%c1_177, %c0_178, %c0_179] : memref<3x128x384xf32, #tpu.memory_space<vmem>>, vector<1x128x384xf32>
    %433 = vector.shape_cast %432 : vector<1x128x384xf32> to vector<128x384xf32>
    %cst_180 = arith.constant dense<0.000000e+00> : vector<8x384xf32>
    %434 = tpu.matmul %424, %433, %cst_180 {dimension_numbers = #tpu.dot_dimension_numbers<[1], [0], [0], [1], [0, 0, 1, 1], [], []>} : vector<8x128xf32>, vector<128x384xf32>, vector<8x384xf32> -> vector<8x384xf32>
    %c1_181 = arith.constant 1 : index
    %c0_182 = arith.constant 0 : index
    %c0_183 = arith.constant 0 : index
    %435 = vector.load %arg4[%c1_181, %c0_182, %c0_183] : memref<3x1x384xf32, #tpu.memory_space<vmem>>, vector<1x1x384xf32>
    %436 = vector.shape_cast %435 : vector<1x1x384xf32> to vector<1x384xf32>
    %437 = vector.broadcast %436 : vector<1x384xf32> to vector<8x384xf32>
    %438 = arith.addf %434, %437 : vector<8x384xf32>
    %439 = vector.extract_strided_slice %431 {offsets = [0, 0], sizes = [8, 128], strides = [1, 1]} : vector<8x384xf32> to vector<8x128xf32>
    %440 = vector.extract_strided_slice %438 {offsets = [0, 0], sizes = [8, 128], strides = [1, 1]} : vector<8x384xf32> to vector<8x128xf32>
    %441 = arith.addf %439, %440 : vector<8x128xf32>
    %442 = arith.negf %441 : vector<8x128xf32>
    %443 = math.exp %442 : vector<8x128xf32>
    %cst_184 = arith.constant 1.000000e+00 : f32
    %444 = vector.broadcast %cst_184 : f32 to vector<8x128xf32>
    %445 = arith.addf %444, %443 : vector<8x128xf32>
    %446 = arith.divf %444, %445 : vector<8x128xf32>
    %447 = vector.extract_strided_slice %431 {offsets = [0, 128], sizes = [8, 128], strides = [1, 1]} : vector<8x384xf32> to vector<8x128xf32>
    %448 = vector.extract_strided_slice %438 {offsets = [0, 128], sizes = [8, 128], strides = [1, 1]} : vector<8x384xf32> to vector<8x128xf32>
    %449 = arith.addf %447, %448 : vector<8x128xf32>
    %450 = arith.negf %449 : vector<8x128xf32>
    %451 = math.exp %450 : vector<8x128xf32>
    %cst_185 = arith.constant 1.000000e+00 : f32
    %452 = vector.broadcast %cst_185 : f32 to vector<8x128xf32>
    %453 = arith.addf %452, %451 : vector<8x128xf32>
    %454 = arith.divf %452, %453 : vector<8x128xf32>
    %455 = vector.extract_strided_slice %431 {offsets = [0, 256], sizes = [8, 128], strides = [1, 1]} : vector<8x384xf32> to vector<8x128xf32>
    %456 = vector.extract_strided_slice %438 {offsets = [0, 256], sizes = [8, 128], strides = [1, 1]} : vector<8x384xf32> to vector<8x128xf32>
    %457 = arith.mulf %446, %456 : vector<8x128xf32>
    %458 = arith.addf %455, %457 : vector<8x128xf32>
    %459 = math.tanh %458 : vector<8x128xf32>
    %cst_186 = arith.constant 1.000000e+00 : f32
    %460 = vector.broadcast %cst_186 : f32 to vector<8x128xf32>
    %461 = arith.subf %460, %454 : vector<8x128xf32>
    %462 = arith.mulf %461, %459 : vector<8x128xf32>
    %463 = arith.mulf %454, %424 : vector<8x128xf32>
    %464 = arith.addf %462, %463 : vector<8x128xf32>
    %465 = arith.index_cast %c2_i32_174 : i32 to index
    %c0_187 = arith.constant 0 : index
    %c0_188 = arith.constant 0 : index
    %466 = vector.load %arg10[%465, %c0_187, %c0_188] : memref<8x8x128xf32, #tpu.memory_space<vmem>>, vector<1x8x128xf32>
    %467 = vector.shape_cast %466 : vector<1x8x128xf32> to vector<8x128xf32>
    %468 = vector.shape_cast %464 : vector<8x128xf32> to vector<1x8x128xf32>
    tpu.vector_store %arg10[%465, %c0_187, %c0_188], %468 {strides = array<i32>} : memref<8x8x128xf32, #tpu.memory_space<vmem>>, vector<1x8x128xf32>,
    %c3_i32_189 = arith.constant 3 : i32
    %469 = arith.index_cast %c3_i32_189 : i32 to index
    %c0_190 = arith.constant 0 : index
    %c0_191 = arith.constant 0 : index
    %470 = vector.load %arg11[%469, %c0_190, %c0_191] : memref<8x8x384xf32, #tpu.memory_space<vmem>>, vector<1x8x384xf32>
    %471 = vector.shape_cast %470 : vector<1x8x384xf32> to vector<8x384xf32>
    %c1_192 = arith.constant 1 : index
    %c0_193 = arith.constant 0 : index
    %c0_194 = arith.constant 0 : index
    %472 = vector.load %arg2[%c1_192, %c0_193, %c0_194] : memref<3x128x384xf32, #tpu.memory_space<vmem>>, vector<1x128x384xf32>
    %473 = vector.shape_cast %472 : vector<1x128x384xf32> to vector<128x384xf32>
    %cst_195 = arith.constant dense<0.000000e+00> : vector<8x384xf32>
    %474 = tpu.matmul %464, %473, %cst_195 {dimension_numbers = #tpu.dot_dimension_numbers<[1], [0], [0], [1], [0, 0, 1, 1], [], []>} : vector<8x128xf32>, vector<128x384xf32>, vector<8x384xf32> -> vector<8x384xf32>
    %c1_196 = arith.constant 1 : index
    %c0_197 = arith.constant 0 : index
    %c0_198 = arith.constant 0 : index
    %475 = vector.load %arg4[%c1_196, %c0_197, %c0_198] : memref<3x1x384xf32, #tpu.memory_space<vmem>>, vector<1x1x384xf32>
    %476 = vector.shape_cast %475 : vector<1x1x384xf32> to vector<1x384xf32>
    %477 = vector.broadcast %476 : vector<1x384xf32> to vector<8x384xf32>
    %478 = arith.addf %474, %477 : vector<8x384xf32>
    %479 = vector.extract_strided_slice %471 {offsets = [0, 0], sizes = [8, 128], strides = [1, 1]} : vector<8x384xf32> to vector<8x128xf32>
    %480 = vector.extract_strided_slice %478 {offsets = [0, 0], sizes = [8, 128], strides = [1, 1]} : vector<8x384xf32> to vector<8x128xf32>
    %481 = arith.addf %479, %480 : vector<8x128xf32>
    %482 = arith.negf %481 : vector<8x128xf32>
    %483 = math.exp %482 : vector<8x128xf32>
    %cst_199 = arith.constant 1.000000e+00 : f32
    %484 = vector.broadcast %cst_199 : f32 to vector<8x128xf32>
    %485 = arith.addf %484, %483 : vector<8x128xf32>
    %486 = arith.divf %484, %485 : vector<8x128xf32>
    %487 = vector.extract_strided_slice %471 {offsets = [0, 128], sizes = [8, 128], strides = [1, 1]} : vector<8x384xf32> to vector<8x128xf32>
    %488 = vector.extract_strided_slice %478 {offsets = [0, 128], sizes = [8, 128], strides = [1, 1]} : vector<8x384xf32> to vector<8x128xf32>
    %489 = arith.addf %487, %488 : vector<8x128xf32>
    %490 = arith.negf %489 : vector<8x128xf32>
    %491 = math.exp %490 : vector<8x128xf32>
    %cst_200 = arith.constant 1.000000e+00 : f32
    %492 = vector.broadcast %cst_200 : f32 to vector<8x128xf32>
    %493 = arith.addf %492, %491 : vector<8x128xf32>
    %494 = arith.divf %492, %493 : vector<8x128xf32>
    %495 = vector.extract_strided_slice %471 {offsets = [0, 256], sizes = [8, 128], strides = [1, 1]} : vector<8x384xf32> to vector<8x128xf32>
    %496 = vector.extract_strided_slice %478 {offsets = [0, 256], sizes = [8, 128], strides = [1, 1]} : vector<8x384xf32> to vector<8x128xf32>
    %497 = arith.mulf %486, %496 : vector<8x128xf32>
    %498 = arith.addf %495, %497 : vector<8x128xf32>
    %499 = math.tanh %498 : vector<8x128xf32>
    %cst_201 = arith.constant 1.000000e+00 : f32
    %500 = vector.broadcast %cst_201 : f32 to vector<8x128xf32>
    %501 = arith.subf %500, %494 : vector<8x128xf32>
    %502 = arith.mulf %501, %499 : vector<8x128xf32>
    %503 = arith.mulf %494, %464 : vector<8x128xf32>
    %504 = arith.addf %502, %503 : vector<8x128xf32>
    %505 = arith.index_cast %c3_i32_189 : i32 to index
    %c0_202 = arith.constant 0 : index
    %c0_203 = arith.constant 0 : index
    %506 = vector.load %arg10[%505, %c0_202, %c0_203] : memref<8x8x128xf32, #tpu.memory_space<vmem>>, vector<1x8x128xf32>
    %507 = vector.shape_cast %506 : vector<1x8x128xf32> to vector<8x128xf32>
    %508 = vector.shape_cast %504 : vector<8x128xf32> to vector<1x8x128xf32>
    tpu.vector_store %arg10[%505, %c0_202, %c0_203], %508 {strides = array<i32>} : memref<8x8x128xf32, #tpu.memory_space<vmem>>, vector<1x8x128xf32>,
    %c4_i32_204 = arith.constant 4 : i32
    %509 = arith.index_cast %c4_i32_204 : i32 to index
    %c0_205 = arith.constant 0 : index
    %c0_206 = arith.constant 0 : index
    %510 = vector.load %arg11[%509, %c0_205, %c0_206] : memref<8x8x384xf32, #tpu.memory_space<vmem>>, vector<1x8x384xf32>
    %511 = vector.shape_cast %510 : vector<1x8x384xf32> to vector<8x384xf32>
    %c1_207 = arith.constant 1 : index
    %c0_208 = arith.constant 0 : index
    %c0_209 = arith.constant 0 : index
    %512 = vector.load %arg2[%c1_207, %c0_208, %c0_209] : memref<3x128x384xf32, #tpu.memory_space<vmem>>, vector<1x128x384xf32>
    %513 = vector.shape_cast %512 : vector<1x128x384xf32> to vector<128x384xf32>
    %cst_210 = arith.constant dense<0.000000e+00> : vector<8x384xf32>
    %514 = tpu.matmul %504, %513, %cst_210 {dimension_numbers = #tpu.dot_dimension_numbers<[1], [0], [0], [1], [0, 0, 1, 1], [], []>} : vector<8x128xf32>, vector<128x384xf32>, vector<8x384xf32> -> vector<8x384xf32>
    %c1_211 = arith.constant 1 : index
    %c0_212 = arith.constant 0 : index
    %c0_213 = arith.constant 0 : index
    %515 = vector.load %arg4[%c1_211, %c0_212, %c0_213] : memref<3x1x384xf32, #tpu.memory_space<vmem>>, vector<1x1x384xf32>
    %516 = vector.shape_cast %515 : vector<1x1x384xf32> to vector<1x384xf32>
    %517 = vector.broadcast %516 : vector<1x384xf32> to vector<8x384xf32>
    %518 = arith.addf %514, %517 : vector<8x384xf32>
    %519 = vector.extract_strided_slice %511 {offsets = [0, 0], sizes = [8, 128], strides = [1, 1]} : vector<8x384xf32> to vector<8x128xf32>
    %520 = vector.extract_strided_slice %518 {offsets = [0, 0], sizes = [8, 128], strides = [1, 1]} : vector<8x384xf32> to vector<8x128xf32>
    %521 = arith.addf %519, %520 : vector<8x128xf32>
    %522 = arith.negf %521 : vector<8x128xf32>
    %523 = math.exp %522 : vector<8x128xf32>
    %cst_214 = arith.constant 1.000000e+00 : f32
    %524 = vector.broadcast %cst_214 : f32 to vector<8x128xf32>
    %525 = arith.addf %524, %523 : vector<8x128xf32>
    %526 = arith.divf %524, %525 : vector<8x128xf32>
    %527 = vector.extract_strided_slice %511 {offsets = [0, 128], sizes = [8, 128], strides = [1, 1]} : vector<8x384xf32> to vector<8x128xf32>
    %528 = vector.extract_strided_slice %518 {offsets = [0, 128], sizes = [8, 128], strides = [1, 1]} : vector<8x384xf32> to vector<8x128xf32>
    %529 = arith.addf %527, %528 : vector<8x128xf32>
    %530 = arith.negf %529 : vector<8x128xf32>
    %531 = math.exp %530 : vector<8x128xf32>
    %cst_215 = arith.constant 1.000000e+00 : f32
    %532 = vector.broadcast %cst_215 : f32 to vector<8x128xf32>
    %533 = arith.addf %532, %531 : vector<8x128xf32>
    %534 = arith.divf %532, %533 : vector<8x128xf32>
    %535 = vector.extract_strided_slice %511 {offsets = [0, 256], sizes = [8, 128], strides = [1, 1]} : vector<8x384xf32> to vector<8x128xf32>
    %536 = vector.extract_strided_slice %518 {offsets = [0, 256], sizes = [8, 128], strides = [1, 1]} : vector<8x384xf32> to vector<8x128xf32>
    %537 = arith.mulf %526, %536 : vector<8x128xf32>
    %538 = arith.addf %535, %537 : vector<8x128xf32>
    %539 = math.tanh %538 : vector<8x128xf32>
    %cst_216 = arith.constant 1.000000e+00 : f32
    %540 = vector.broadcast %cst_216 : f32 to vector<8x128xf32>
    %541 = arith.subf %540, %534 : vector<8x128xf32>
    %542 = arith.mulf %541, %539 : vector<8x128xf32>
    %543 = arith.mulf %534, %504 : vector<8x128xf32>
    %544 = arith.addf %542, %543 : vector<8x128xf32>
    %545 = arith.index_cast %c4_i32_204 : i32 to index
    %c0_217 = arith.constant 0 : index
    %c0_218 = arith.constant 0 : index
    %546 = vector.load %arg10[%545, %c0_217, %c0_218] : memref<8x8x128xf32, #tpu.memory_space<vmem>>, vector<1x8x128xf32>
    %547 = vector.shape_cast %546 : vector<1x8x128xf32> to vector<8x128xf32>
    %548 = vector.shape_cast %544 : vector<8x128xf32> to vector<1x8x128xf32>
    tpu.vector_store %arg10[%545, %c0_217, %c0_218], %548 {strides = array<i32>} : memref<8x8x128xf32, #tpu.memory_space<vmem>>, vector<1x8x128xf32>,
    %c5_i32_219 = arith.constant 5 : i32
    %549 = arith.index_cast %c5_i32_219 : i32 to index
    %c0_220 = arith.constant 0 : index
    %c0_221 = arith.constant 0 : index
    %550 = vector.load %arg11[%549, %c0_220, %c0_221] : memref<8x8x384xf32, #tpu.memory_space<vmem>>, vector<1x8x384xf32>
    %551 = vector.shape_cast %550 : vector<1x8x384xf32> to vector<8x384xf32>
    %c1_222 = arith.constant 1 : index
    %c0_223 = arith.constant 0 : index
    %c0_224 = arith.constant 0 : index
    %552 = vector.load %arg2[%c1_222, %c0_223, %c0_224] : memref<3x128x384xf32, #tpu.memory_space<vmem>>, vector<1x128x384xf32>
    %553 = vector.shape_cast %552 : vector<1x128x384xf32> to vector<128x384xf32>
    %cst_225 = arith.constant dense<0.000000e+00> : vector<8x384xf32>
    %554 = tpu.matmul %544, %553, %cst_225 {dimension_numbers = #tpu.dot_dimension_numbers<[1], [0], [0], [1], [0, 0, 1, 1], [], []>} : vector<8x128xf32>, vector<128x384xf32>, vector<8x384xf32> -> vector<8x384xf32>
    %c1_226 = arith.constant 1 : index
    %c0_227 = arith.constant 0 : index
    %c0_228 = arith.constant 0 : index
    %555 = vector.load %arg4[%c1_226, %c0_227, %c0_228] : memref<3x1x384xf32, #tpu.memory_space<vmem>>, vector<1x1x384xf32>
    %556 = vector.shape_cast %555 : vector<1x1x384xf32> to vector<1x384xf32>
    %557 = vector.broadcast %556 : vector<1x384xf32> to vector<8x384xf32>
    %558 = arith.addf %554, %557 : vector<8x384xf32>
    %559 = vector.extract_strided_slice %551 {offsets = [0, 0], sizes = [8, 128], strides = [1, 1]} : vector<8x384xf32> to vector<8x128xf32>
    %560 = vector.extract_strided_slice %558 {offsets = [0, 0], sizes = [8, 128], strides = [1, 1]} : vector<8x384xf32> to vector<8x128xf32>
    %561 = arith.addf %559, %560 : vector<8x128xf32>
    %562 = arith.negf %561 : vector<8x128xf32>
    %563 = math.exp %562 : vector<8x128xf32>
    %cst_229 = arith.constant 1.000000e+00 : f32
    %564 = vector.broadcast %cst_229 : f32 to vector<8x128xf32>
    %565 = arith.addf %564, %563 : vector<8x128xf32>
    %566 = arith.divf %564, %565 : vector<8x128xf32>
    %567 = vector.extract_strided_slice %551 {offsets = [0, 128], sizes = [8, 128], strides = [1, 1]} : vector<8x384xf32> to vector<8x128xf32>
    %568 = vector.extract_strided_slice %558 {offsets = [0, 128], sizes = [8, 128], strides = [1, 1]} : vector<8x384xf32> to vector<8x128xf32>
    %569 = arith.addf %567, %568 : vector<8x128xf32>
    %570 = arith.negf %569 : vector<8x128xf32>
    %571 = math.exp %570 : vector<8x128xf32>
    %cst_230 = arith.constant 1.000000e+00 : f32
    %572 = vector.broadcast %cst_230 : f32 to vector<8x128xf32>
    %573 = arith.addf %572, %571 : vector<8x128xf32>
    %574 = arith.divf %572, %573 : vector<8x128xf32>
    %575 = vector.extract_strided_slice %551 {offsets = [0, 256], sizes = [8, 128], strides = [1, 1]} : vector<8x384xf32> to vector<8x128xf32>
    %576 = vector.extract_strided_slice %558 {offsets = [0, 256], sizes = [8, 128], strides = [1, 1]} : vector<8x384xf32> to vector<8x128xf32>
    %577 = arith.mulf %566, %576 : vector<8x128xf32>
    %578 = arith.addf %575, %577 : vector<8x128xf32>
    %579 = math.tanh %578 : vector<8x128xf32>
    %cst_231 = arith.constant 1.000000e+00 : f32
    %580 = vector.broadcast %cst_231 : f32 to vector<8x128xf32>
    %581 = arith.subf %580, %574 : vector<8x128xf32>
    %582 = arith.mulf %581, %579 : vector<8x128xf32>
    %583 = arith.mulf %574, %544 : vector<8x128xf32>
    %584 = arith.addf %582, %583 : vector<8x128xf32>
    %585 = arith.index_cast %c5_i32_219 : i32 to index
    %c0_232 = arith.constant 0 : index
    %c0_233 = arith.constant 0 : index
    %586 = vector.load %arg10[%585, %c0_232, %c0_233] : memref<8x8x128xf32, #tpu.memory_space<vmem>>, vector<1x8x128xf32>
    %587 = vector.shape_cast %586 : vector<1x8x128xf32> to vector<8x128xf32>
    %588 = vector.shape_cast %584 : vector<8x128xf32> to vector<1x8x128xf32>
    tpu.vector_store %arg10[%585, %c0_232, %c0_233], %588 {strides = array<i32>} : memref<8x8x128xf32, #tpu.memory_space<vmem>>, vector<1x8x128xf32>,
    %c6_i32_234 = arith.constant 6 : i32
    %589 = arith.index_cast %c6_i32_234 : i32 to index
    %c0_235 = arith.constant 0 : index
    %c0_236 = arith.constant 0 : index
    %590 = vector.load %arg11[%589, %c0_235, %c0_236] : memref<8x8x384xf32, #tpu.memory_space<vmem>>, vector<1x8x384xf32>
    %591 = vector.shape_cast %590 : vector<1x8x384xf32> to vector<8x384xf32>
    %c1_237 = arith.constant 1 : index
    %c0_238 = arith.constant 0 : index
    %c0_239 = arith.constant 0 : index
    %592 = vector.load %arg2[%c1_237, %c0_238, %c0_239] : memref<3x128x384xf32, #tpu.memory_space<vmem>>, vector<1x128x384xf32>
    %593 = vector.shape_cast %592 : vector<1x128x384xf32> to vector<128x384xf32>
    %cst_240 = arith.constant dense<0.000000e+00> : vector<8x384xf32>
    %594 = tpu.matmul %584, %593, %cst_240 {dimension_numbers = #tpu.dot_dimension_numbers<[1], [0], [0], [1], [0, 0, 1, 1], [], []>} : vector<8x128xf32>, vector<128x384xf32>, vector<8x384xf32> -> vector<8x384xf32>
    %c1_241 = arith.constant 1 : index
    %c0_242 = arith.constant 0 : index
    %c0_243 = arith.constant 0 : index
    %595 = vector.load %arg4[%c1_241, %c0_242, %c0_243] : memref<3x1x384xf32, #tpu.memory_space<vmem>>, vector<1x1x384xf32>
    %596 = vector.shape_cast %595 : vector<1x1x384xf32> to vector<1x384xf32>
    %597 = vector.broadcast %596 : vector<1x384xf32> to vector<8x384xf32>
    %598 = arith.addf %594, %597 : vector<8x384xf32>
    %599 = vector.extract_strided_slice %591 {offsets = [0, 0], sizes = [8, 128], strides = [1, 1]} : vector<8x384xf32> to vector<8x128xf32>
    %600 = vector.extract_strided_slice %598 {offsets = [0, 0], sizes = [8, 128], strides = [1, 1]} : vector<8x384xf32> to vector<8x128xf32>
    %601 = arith.addf %599, %600 : vector<8x128xf32>
    %602 = arith.negf %601 : vector<8x128xf32>
    %603 = math.exp %602 : vector<8x128xf32>
    %cst_244 = arith.constant 1.000000e+00 : f32
    %604 = vector.broadcast %cst_244 : f32 to vector<8x128xf32>
    %605 = arith.addf %604, %603 : vector<8x128xf32>
    %606 = arith.divf %604, %605 : vector<8x128xf32>
    %607 = vector.extract_strided_slice %591 {offsets = [0, 128], sizes = [8, 128], strides = [1, 1]} : vector<8x384xf32> to vector<8x128xf32>
    %608 = vector.extract_strided_slice %598 {offsets = [0, 128], sizes = [8, 128], strides = [1, 1]} : vector<8x384xf32> to vector<8x128xf32>
    %609 = arith.addf %607, %608 : vector<8x128xf32>
    %610 = arith.negf %609 : vector<8x128xf32>
    %611 = math.exp %610 : vector<8x128xf32>
    %cst_245 = arith.constant 1.000000e+00 : f32
    %612 = vector.broadcast %cst_245 : f32 to vector<8x128xf32>
    %613 = arith.addf %612, %611 : vector<8x128xf32>
    %614 = arith.divf %612, %613 : vector<8x128xf32>
    %615 = vector.extract_strided_slice %591 {offsets = [0, 256], sizes = [8, 128], strides = [1, 1]} : vector<8x384xf32> to vector<8x128xf32>
    %616 = vector.extract_strided_slice %598 {offsets = [0, 256], sizes = [8, 128], strides = [1, 1]} : vector<8x384xf32> to vector<8x128xf32>
    %617 = arith.mulf %606, %616 : vector<8x128xf32>
    %618 = arith.addf %615, %617 : vector<8x128xf32>
    %619 = math.tanh %618 : vector<8x128xf32>
    %cst_246 = arith.constant 1.000000e+00 : f32
    %620 = vector.broadcast %cst_246 : f32 to vector<8x128xf32>
    %621 = arith.subf %620, %614 : vector<8x128xf32>
    %622 = arith.mulf %621, %619 : vector<8x128xf32>
    %623 = arith.mulf %614, %584 : vector<8x128xf32>
    %624 = arith.addf %622, %623 : vector<8x128xf32>
    %625 = arith.index_cast %c6_i32_234 : i32 to index
    %c0_247 = arith.constant 0 : index
    %c0_248 = arith.constant 0 : index
    %626 = vector.load %arg10[%625, %c0_247, %c0_248] : memref<8x8x128xf32, #tpu.memory_space<vmem>>, vector<1x8x128xf32>
    %627 = vector.shape_cast %626 : vector<1x8x128xf32> to vector<8x128xf32>
    %628 = vector.shape_cast %624 : vector<8x128xf32> to vector<1x8x128xf32>
    tpu.vector_store %arg10[%625, %c0_247, %c0_248], %628 {strides = array<i32>} : memref<8x8x128xf32, #tpu.memory_space<vmem>>, vector<1x8x128xf32>,
    %c7_i32_249 = arith.constant 7 : i32
    %629 = arith.index_cast %c7_i32_249 : i32 to index
    %c0_250 = arith.constant 0 : index
    %c0_251 = arith.constant 0 : index
    %630 = vector.load %arg11[%629, %c0_250, %c0_251] : memref<8x8x384xf32, #tpu.memory_space<vmem>>, vector<1x8x384xf32>
    %631 = vector.shape_cast %630 : vector<1x8x384xf32> to vector<8x384xf32>
    %c1_252 = arith.constant 1 : index
    %c0_253 = arith.constant 0 : index
    %c0_254 = arith.constant 0 : index
    %632 = vector.load %arg2[%c1_252, %c0_253, %c0_254] : memref<3x128x384xf32, #tpu.memory_space<vmem>>, vector<1x128x384xf32>
    %633 = vector.shape_cast %632 : vector<1x128x384xf32> to vector<128x384xf32>
    %cst_255 = arith.constant dense<0.000000e+00> : vector<8x384xf32>
    %634 = tpu.matmul %624, %633, %cst_255 {dimension_numbers = #tpu.dot_dimension_numbers<[1], [0], [0], [1], [0, 0, 1, 1], [], []>} : vector<8x128xf32>, vector<128x384xf32>, vector<8x384xf32> -> vector<8x384xf32>
    %c1_256 = arith.constant 1 : index
    %c0_257 = arith.constant 0 : index
    %c0_258 = arith.constant 0 : index
    %635 = vector.load %arg4[%c1_256, %c0_257, %c0_258] : memref<3x1x384xf32, #tpu.memory_space<vmem>>, vector<1x1x384xf32>
    %636 = vector.shape_cast %635 : vector<1x1x384xf32> to vector<1x384xf32>
    %637 = vector.broadcast %636 : vector<1x384xf32> to vector<8x384xf32>
    %638 = arith.addf %634, %637 : vector<8x384xf32>
    %639 = vector.extract_strided_slice %631 {offsets = [0, 0], sizes = [8, 128], strides = [1, 1]} : vector<8x384xf32> to vector<8x128xf32>
    %640 = vector.extract_strided_slice %638 {offsets = [0, 0], sizes = [8, 128], strides = [1, 1]} : vector<8x384xf32> to vector<8x128xf32>
    %641 = arith.addf %639, %640 : vector<8x128xf32>
    %642 = arith.negf %641 : vector<8x128xf32>
    %643 = math.exp %642 : vector<8x128xf32>
    %cst_259 = arith.constant 1.000000e+00 : f32
    %644 = vector.broadcast %cst_259 : f32 to vector<8x128xf32>
    %645 = arith.addf %644, %643 : vector<8x128xf32>
    %646 = arith.divf %644, %645 : vector<8x128xf32>
    %647 = vector.extract_strided_slice %631 {offsets = [0, 128], sizes = [8, 128], strides = [1, 1]} : vector<8x384xf32> to vector<8x128xf32>
    %648 = vector.extract_strided_slice %638 {offsets = [0, 128], sizes = [8, 128], strides = [1, 1]} : vector<8x384xf32> to vector<8x128xf32>
    %649 = arith.addf %647, %648 : vector<8x128xf32>
    %650 = arith.negf %649 : vector<8x128xf32>
    %651 = math.exp %650 : vector<8x128xf32>
    %cst_260 = arith.constant 1.000000e+00 : f32
    %652 = vector.broadcast %cst_260 : f32 to vector<8x128xf32>
    %653 = arith.addf %652, %651 : vector<8x128xf32>
    %654 = arith.divf %652, %653 : vector<8x128xf32>
    %655 = vector.extract_strided_slice %631 {offsets = [0, 256], sizes = [8, 128], strides = [1, 1]} : vector<8x384xf32> to vector<8x128xf32>
    %656 = vector.extract_strided_slice %638 {offsets = [0, 256], sizes = [8, 128], strides = [1, 1]} : vector<8x384xf32> to vector<8x128xf32>
    %657 = arith.mulf %646, %656 : vector<8x128xf32>
    %658 = arith.addf %655, %657 : vector<8x128xf32>
    %659 = math.tanh %658 : vector<8x128xf32>
    %cst_261 = arith.constant 1.000000e+00 : f32
    %660 = vector.broadcast %cst_261 : f32 to vector<8x128xf32>
    %661 = arith.subf %660, %654 : vector<8x128xf32>
    %662 = arith.mulf %661, %659 : vector<8x128xf32>
    %663 = arith.mulf %654, %624 : vector<8x128xf32>
    %664 = arith.addf %662, %663 : vector<8x128xf32>
    %665 = arith.index_cast %c7_i32_249 : i32 to index
    %c0_262 = arith.constant 0 : index
    %c0_263 = arith.constant 0 : index
    %666 = vector.load %arg10[%665, %c0_262, %c0_263] : memref<8x8x128xf32, #tpu.memory_space<vmem>>, vector<1x8x128xf32>
    %667 = vector.shape_cast %666 : vector<1x8x128xf32> to vector<8x128xf32>
    %668 = vector.shape_cast %664 : vector<8x128xf32> to vector<1x8x128xf32>
    tpu.vector_store %arg10[%665, %c0_262, %c0_263], %668 {strides = array<i32>} : memref<8x8x128xf32, #tpu.memory_space<vmem>>, vector<1x8x128xf32>,
    %c8_i32_264 = arith.constant 8 : i32
    %c1_265 = arith.constant 1 : index
    %c0_266 = arith.constant 0 : index
    %c0_267 = arith.constant 0 : index
    %669 = vector.load %arg9[%c1_265, %c0_266, %c0_267] : memref<3x8x128xf32, #tpu.memory_space<vmem>>, vector<1x8x128xf32>
    %670 = vector.shape_cast %669 : vector<1x8x128xf32> to vector<8x128xf32>
    %671 = vector.shape_cast %664 : vector<8x128xf32> to vector<1x8x128xf32>
    tpu.vector_store %arg9[%c1_265, %c0_266, %c0_267], %671 {strides = array<i32>} : memref<3x8x128xf32, #tpu.memory_space<vmem>>, vector<1x8x128xf32>,
    %c0_268 = arith.constant 0 : index
    %c0_269 = arith.constant 0 : index
    %c0_270 = arith.constant 0 : index
    %672 = vector.load %arg10[%c0_268, %c0_269, %c0_270] : memref<8x8x128xf32, #tpu.memory_space<vmem>>, vector<8x8x128xf32>
    %673 = vector.shape_cast %672 : vector<8x8x128xf32> to vector<64x128xf32>
    %c2 = arith.constant 2 : index
    %c0_271 = arith.constant 0 : index
    %c0_272 = arith.constant 0 : index
    %674 = vector.load %arg1[%c2, %c0_271, %c0_272] : memref<3x128x384xf32, #tpu.memory_space<vmem>>, vector<1x128x384xf32>
    %675 = vector.shape_cast %674 : vector<1x128x384xf32> to vector<128x384xf32>
    %cst_273 = arith.constant dense<0.000000e+00> : vector<64x384xf32>
    %676 = tpu.matmul %673, %675, %cst_273 {dimension_numbers = #tpu.dot_dimension_numbers<[1], [0], [0], [1], [0, 0, 1, 1], [], []>} : vector<64x128xf32>, vector<128x384xf32>, vector<64x384xf32> -> vector<64x384xf32>
    %c2_274 = arith.constant 2 : index
    %c0_275 = arith.constant 0 : index
    %c0_276 = arith.constant 0 : index
    %677 = vector.load %arg3[%c2_274, %c0_275, %c0_276] : memref<3x1x384xf32, #tpu.memory_space<vmem>>, vector<1x1x384xf32>
    %678 = vector.shape_cast %677 : vector<1x1x384xf32> to vector<1x384xf32>
    %679 = vector.broadcast %678 : vector<1x384xf32> to vector<64x384xf32>
    %680 = arith.addf %676, %679 : vector<64x384xf32>
    %681 = vector.shape_cast %680 : vector<64x384xf32> to vector<8x8x384xf32>
    %c0_277 = arith.constant 0 : index
    %c0_278 = arith.constant 0 : index
    %c0_279 = arith.constant 0 : index
    %682 = vector.load %arg11[%c0_277, %c0_278, %c0_279] : memref<8x8x384xf32, #tpu.memory_space<vmem>>, vector<8x8x384xf32>
    tpu.vector_store %arg11[%c0_277, %c0_278, %c0_279], %681 {strides = array<i32>} : memref<8x8x384xf32, #tpu.memory_space<vmem>>, vector<8x8x384xf32>,
    %c2_280 = arith.constant 2 : index
    %c0_281 = arith.constant 0 : index
    %c0_282 = arith.constant 0 : index
    %683 = vector.load %arg7[%c2_280, %c0_281, %c0_282] : memref<3x8x128xf32, #tpu.memory_space<vmem>>, vector<1x8x128xf32>
    %684 = vector.shape_cast %683 : vector<1x8x128xf32> to vector<8x128xf32>
    %c0_i32_283 = arith.constant 0 : i32
    %685 = arith.index_cast %c0_i32_283 : i32 to index
    %c0_284 = arith.constant 0 : index
    %c0_285 = arith.constant 0 : index
    %686 = vector.load %arg11[%685, %c0_284, %c0_285] : memref<8x8x384xf32, #tpu.memory_space<vmem>>, vector<1x8x384xf32>
    %687 = vector.shape_cast %686 : vector<1x8x384xf32> to vector<8x384xf32>
    %c2_286 = arith.constant 2 : index
    %c0_287 = arith.constant 0 : index
    %c0_288 = arith.constant 0 : index
    %688 = vector.load %arg2[%c2_286, %c0_287, %c0_288] : memref<3x128x384xf32, #tpu.memory_space<vmem>>, vector<1x128x384xf32>
    %689 = vector.shape_cast %688 : vector<1x128x384xf32> to vector<128x384xf32>
    %cst_289 = arith.constant dense<0.000000e+00> : vector<8x384xf32>
    %690 = tpu.matmul %684, %689, %cst_289 {dimension_numbers = #tpu.dot_dimension_numbers<[1], [0], [0], [1], [0, 0, 1, 1], [], []>} : vector<8x128xf32>, vector<128x384xf32>, vector<8x384xf32> -> vector<8x384xf32>
    %c2_290 = arith.constant 2 : index
    %c0_291 = arith.constant 0 : index
    %c0_292 = arith.constant 0 : index
    %691 = vector.load %arg4[%c2_290, %c0_291, %c0_292] : memref<3x1x384xf32, #tpu.memory_space<vmem>>, vector<1x1x384xf32>
    %692 = vector.shape_cast %691 : vector<1x1x384xf32> to vector<1x384xf32>
    %693 = vector.broadcast %692 : vector<1x384xf32> to vector<8x384xf32>
    %694 = arith.addf %690, %693 : vector<8x384xf32>
    %695 = vector.extract_strided_slice %687 {offsets = [0, 0], sizes = [8, 128], strides = [1, 1]} : vector<8x384xf32> to vector<8x128xf32>
    %696 = vector.extract_strided_slice %694 {offsets = [0, 0], sizes = [8, 128], strides = [1, 1]} : vector<8x384xf32> to vector<8x128xf32>
    %697 = arith.addf %695, %696 : vector<8x128xf32>
    %698 = arith.negf %697 : vector<8x128xf32>
    %699 = math.exp %698 : vector<8x128xf32>
    %cst_293 = arith.constant 1.000000e+00 : f32
    %700 = vector.broadcast %cst_293 : f32 to vector<8x128xf32>
    %701 = arith.addf %700, %699 : vector<8x128xf32>
    %702 = arith.divf %700, %701 : vector<8x128xf32>
    %703 = vector.extract_strided_slice %687 {offsets = [0, 128], sizes = [8, 128], strides = [1, 1]} : vector<8x384xf32> to vector<8x128xf32>
    %704 = vector.extract_strided_slice %694 {offsets = [0, 128], sizes = [8, 128], strides = [1, 1]} : vector<8x384xf32> to vector<8x128xf32>
    %705 = arith.addf %703, %704 : vector<8x128xf32>
    %706 = arith.negf %705 : vector<8x128xf32>
    %707 = math.exp %706 : vector<8x128xf32>
    %cst_294 = arith.constant 1.000000e+00 : f32
    %708 = vector.broadcast %cst_294 : f32 to vector<8x128xf32>
    %709 = arith.addf %708, %707 : vector<8x128xf32>
    %710 = arith.divf %708, %709 : vector<8x128xf32>
    %711 = vector.extract_strided_slice %687 {offsets = [0, 256], sizes = [8, 128], strides = [1, 1]} : vector<8x384xf32> to vector<8x128xf32>
    %712 = vector.extract_strided_slice %694 {offsets = [0, 256], sizes = [8, 128], strides = [1, 1]} : vector<8x384xf32> to vector<8x128xf32>
    %713 = arith.mulf %702, %712 : vector<8x128xf32>
    %714 = arith.addf %711, %713 : vector<8x128xf32>
    %715 = math.tanh %714 : vector<8x128xf32>
    %cst_295 = arith.constant 1.000000e+00 : f32
    %716 = vector.broadcast %cst_295 : f32 to vector<8x128xf32>
    %717 = arith.subf %716, %710 : vector<8x128xf32>
    %718 = arith.mulf %717, %715 : vector<8x128xf32>
    %719 = arith.mulf %710, %684 : vector<8x128xf32>
    %720 = arith.addf %718, %719 : vector<8x128xf32>
    %721 = arith.index_cast %c0_i32_283 : i32 to index
    %c0_296 = arith.constant 0 : index
    %c0_297 = arith.constant 0 : index
    %722 = vector.load %arg10[%721, %c0_296, %c0_297] : memref<8x8x128xf32, #tpu.memory_space<vmem>>, vector<1x8x128xf32>
    %723 = vector.shape_cast %722 : vector<1x8x128xf32> to vector<8x128xf32>
    %724 = vector.shape_cast %720 : vector<8x128xf32> to vector<1x8x128xf32>
    tpu.vector_store %arg10[%721, %c0_296, %c0_297], %724 {strides = array<i32>} : memref<8x8x128xf32, #tpu.memory_space<vmem>>, vector<1x8x128xf32>,
    %c1_i32_298 = arith.constant 1 : i32
    %725 = arith.index_cast %c1_i32_298 : i32 to index
    %c0_299 = arith.constant 0 : index
    %c0_300 = arith.constant 0 : index
    %726 = vector.load %arg11[%725, %c0_299, %c0_300] : memref<8x8x384xf32, #tpu.memory_space<vmem>>, vector<1x8x384xf32>
    %727 = vector.shape_cast %726 : vector<1x8x384xf32> to vector<8x384xf32>
    %c2_301 = arith.constant 2 : index
    %c0_302 = arith.constant 0 : index
    %c0_303 = arith.constant 0 : index
    %728 = vector.load %arg2[%c2_301, %c0_302, %c0_303] : memref<3x128x384xf32, #tpu.memory_space<vmem>>, vector<1x128x384xf32>
    %729 = vector.shape_cast %728 : vector<1x128x384xf32> to vector<128x384xf32>
    %cst_304 = arith.constant dense<0.000000e+00> : vector<8x384xf32>
    %730 = tpu.matmul %720, %729, %cst_304 {dimension_numbers = #tpu.dot_dimension_numbers<[1], [0], [0], [1], [0, 0, 1, 1], [], []>} : vector<8x128xf32>, vector<128x384xf32>, vector<8x384xf32> -> vector<8x384xf32>
    %c2_305 = arith.constant 2 : index
    %c0_306 = arith.constant 0 : index
    %c0_307 = arith.constant 0 : index
    %731 = vector.load %arg4[%c2_305, %c0_306, %c0_307] : memref<3x1x384xf32, #tpu.memory_space<vmem>>, vector<1x1x384xf32>
    %732 = vector.shape_cast %731 : vector<1x1x384xf32> to vector<1x384xf32>
    %733 = vector.broadcast %732 : vector<1x384xf32> to vector<8x384xf32>
    %734 = arith.addf %730, %733 : vector<8x384xf32>
    %735 = vector.extract_strided_slice %727 {offsets = [0, 0], sizes = [8, 128], strides = [1, 1]} : vector<8x384xf32> to vector<8x128xf32>
    %736 = vector.extract_strided_slice %734 {offsets = [0, 0], sizes = [8, 128], strides = [1, 1]} : vector<8x384xf32> to vector<8x128xf32>
    %737 = arith.addf %735, %736 : vector<8x128xf32>
    %738 = arith.negf %737 : vector<8x128xf32>
    %739 = math.exp %738 : vector<8x128xf32>
    %cst_308 = arith.constant 1.000000e+00 : f32
    %740 = vector.broadcast %cst_308 : f32 to vector<8x128xf32>
    %741 = arith.addf %740, %739 : vector<8x128xf32>
    %742 = arith.divf %740, %741 : vector<8x128xf32>
    %743 = vector.extract_strided_slice %727 {offsets = [0, 128], sizes = [8, 128], strides = [1, 1]} : vector<8x384xf32> to vector<8x128xf32>
    %744 = vector.extract_strided_slice %734 {offsets = [0, 128], sizes = [8, 128], strides = [1, 1]} : vector<8x384xf32> to vector<8x128xf32>
    %745 = arith.addf %743, %744 : vector<8x128xf32>
    %746 = arith.negf %745 : vector<8x128xf32>
    %747 = math.exp %746 : vector<8x128xf32>
    %cst_309 = arith.constant 1.000000e+00 : f32
    %748 = vector.broadcast %cst_309 : f32 to vector<8x128xf32>
    %749 = arith.addf %748, %747 : vector<8x128xf32>
    %750 = arith.divf %748, %749 : vector<8x128xf32>
    %751 = vector.extract_strided_slice %727 {offsets = [0, 256], sizes = [8, 128], strides = [1, 1]} : vector<8x384xf32> to vector<8x128xf32>
    %752 = vector.extract_strided_slice %734 {offsets = [0, 256], sizes = [8, 128], strides = [1, 1]} : vector<8x384xf32> to vector<8x128xf32>
    %753 = arith.mulf %742, %752 : vector<8x128xf32>
    %754 = arith.addf %751, %753 : vector<8x128xf32>
    %755 = math.tanh %754 : vector<8x128xf32>
    %cst_310 = arith.constant 1.000000e+00 : f32
    %756 = vector.broadcast %cst_310 : f32 to vector<8x128xf32>
    %757 = arith.subf %756, %750 : vector<8x128xf32>
    %758 = arith.mulf %757, %755 : vector<8x128xf32>
    %759 = arith.mulf %750, %720 : vector<8x128xf32>
    %760 = arith.addf %758, %759 : vector<8x128xf32>
    %761 = arith.index_cast %c1_i32_298 : i32 to index
    %c0_311 = arith.constant 0 : index
    %c0_312 = arith.constant 0 : index
    %762 = vector.load %arg10[%761, %c0_311, %c0_312] : memref<8x8x128xf32, #tpu.memory_space<vmem>>, vector<1x8x128xf32>
    %763 = vector.shape_cast %762 : vector<1x8x128xf32> to vector<8x128xf32>
    %764 = vector.shape_cast %760 : vector<8x128xf32> to vector<1x8x128xf32>
    tpu.vector_store %arg10[%761, %c0_311, %c0_312], %764 {strides = array<i32>} : memref<8x8x128xf32, #tpu.memory_space<vmem>>, vector<1x8x128xf32>,
    %c2_i32_313 = arith.constant 2 : i32
    %765 = arith.index_cast %c2_i32_313 : i32 to index
    %c0_314 = arith.constant 0 : index
    %c0_315 = arith.constant 0 : index
    %766 = vector.load %arg11[%765, %c0_314, %c0_315] : memref<8x8x384xf32, #tpu.memory_space<vmem>>, vector<1x8x384xf32>
    %767 = vector.shape_cast %766 : vector<1x8x384xf32> to vector<8x384xf32>
    %c2_316 = arith.constant 2 : index
    %c0_317 = arith.constant 0 : index
    %c0_318 = arith.constant 0 : index
    %768 = vector.load %arg2[%c2_316, %c0_317, %c0_318] : memref<3x128x384xf32, #tpu.memory_space<vmem>>, vector<1x128x384xf32>
    %769 = vector.shape_cast %768 : vector<1x128x384xf32> to vector<128x384xf32>
    %cst_319 = arith.constant dense<0.000000e+00> : vector<8x384xf32>
    %770 = tpu.matmul %760, %769, %cst_319 {dimension_numbers = #tpu.dot_dimension_numbers<[1], [0], [0], [1], [0, 0, 1, 1], [], []>} : vector<8x128xf32>, vector<128x384xf32>, vector<8x384xf32> -> vector<8x384xf32>
    %c2_320 = arith.constant 2 : index
    %c0_321 = arith.constant 0 : index
    %c0_322 = arith.constant 0 : index
    %771 = vector.load %arg4[%c2_320, %c0_321, %c0_322] : memref<3x1x384xf32, #tpu.memory_space<vmem>>, vector<1x1x384xf32>
    %772 = vector.shape_cast %771 : vector<1x1x384xf32> to vector<1x384xf32>
    %773 = vector.broadcast %772 : vector<1x384xf32> to vector<8x384xf32>
    %774 = arith.addf %770, %773 : vector<8x384xf32>
    %775 = vector.extract_strided_slice %767 {offsets = [0, 0], sizes = [8, 128], strides = [1, 1]} : vector<8x384xf32> to vector<8x128xf32>
    %776 = vector.extract_strided_slice %774 {offsets = [0, 0], sizes = [8, 128], strides = [1, 1]} : vector<8x384xf32> to vector<8x128xf32>
    %777 = arith.addf %775, %776 : vector<8x128xf32>
    %778 = arith.negf %777 : vector<8x128xf32>
    %779 = math.exp %778 : vector<8x128xf32>
    %cst_323 = arith.constant 1.000000e+00 : f32
    %780 = vector.broadcast %cst_323 : f32 to vector<8x128xf32>
    %781 = arith.addf %780, %779 : vector<8x128xf32>
    %782 = arith.divf %780, %781 : vector<8x128xf32>
    %783 = vector.extract_strided_slice %767 {offsets = [0, 128], sizes = [8, 128], strides = [1, 1]} : vector<8x384xf32> to vector<8x128xf32>
    %784 = vector.extract_strided_slice %774 {offsets = [0, 128], sizes = [8, 128], strides = [1, 1]} : vector<8x384xf32> to vector<8x128xf32>
    %785 = arith.addf %783, %784 : vector<8x128xf32>
    %786 = arith.negf %785 : vector<8x128xf32>
    %787 = math.exp %786 : vector<8x128xf32>
    %cst_324 = arith.constant 1.000000e+00 : f32
    %788 = vector.broadcast %cst_324 : f32 to vector<8x128xf32>
    %789 = arith.addf %788, %787 : vector<8x128xf32>
    %790 = arith.divf %788, %789 : vector<8x128xf32>
    %791 = vector.extract_strided_slice %767 {offsets = [0, 256], sizes = [8, 128], strides = [1, 1]} : vector<8x384xf32> to vector<8x128xf32>
    %792 = vector.extract_strided_slice %774 {offsets = [0, 256], sizes = [8, 128], strides = [1, 1]} : vector<8x384xf32> to vector<8x128xf32>
    %793 = arith.mulf %782, %792 : vector<8x128xf32>
    %794 = arith.addf %791, %793 : vector<8x128xf32>
    %795 = math.tanh %794 : vector<8x128xf32>
    %cst_325 = arith.constant 1.000000e+00 : f32
    %796 = vector.broadcast %cst_325 : f32 to vector<8x128xf32>
    %797 = arith.subf %796, %790 : vector<8x128xf32>
    %798 = arith.mulf %797, %795 : vector<8x128xf32>
    %799 = arith.mulf %790, %760 : vector<8x128xf32>
    %800 = arith.addf %798, %799 : vector<8x128xf32>
    %801 = arith.index_cast %c2_i32_313 : i32 to index
    %c0_326 = arith.constant 0 : index
    %c0_327 = arith.constant 0 : index
    %802 = vector.load %arg10[%801, %c0_326, %c0_327] : memref<8x8x128xf32, #tpu.memory_space<vmem>>, vector<1x8x128xf32>
    %803 = vector.shape_cast %802 : vector<1x8x128xf32> to vector<8x128xf32>
    %804 = vector.shape_cast %800 : vector<8x128xf32> to vector<1x8x128xf32>
    tpu.vector_store %arg10[%801, %c0_326, %c0_327], %804 {strides = array<i32>} : memref<8x8x128xf32, #tpu.memory_space<vmem>>, vector<1x8x128xf32>,
    %c3_i32_328 = arith.constant 3 : i32
    %805 = arith.index_cast %c3_i32_328 : i32 to index
    %c0_329 = arith.constant 0 : index
    %c0_330 = arith.constant 0 : index
    %806 = vector.load %arg11[%805, %c0_329, %c0_330] : memref<8x8x384xf32, #tpu.memory_space<vmem>>, vector<1x8x384xf32>
    %807 = vector.shape_cast %806 : vector<1x8x384xf32> to vector<8x384xf32>
    %c2_331 = arith.constant 2 : index
    %c0_332 = arith.constant 0 : index
    %c0_333 = arith.constant 0 : index
    %808 = vector.load %arg2[%c2_331, %c0_332, %c0_333] : memref<3x128x384xf32, #tpu.memory_space<vmem>>, vector<1x128x384xf32>
    %809 = vector.shape_cast %808 : vector<1x128x384xf32> to vector<128x384xf32>
    %cst_334 = arith.constant dense<0.000000e+00> : vector<8x384xf32>
    %810 = tpu.matmul %800, %809, %cst_334 {dimension_numbers = #tpu.dot_dimension_numbers<[1], [0], [0], [1], [0, 0, 1, 1], [], []>} : vector<8x128xf32>, vector<128x384xf32>, vector<8x384xf32> -> vector<8x384xf32>
    %c2_335 = arith.constant 2 : index
    %c0_336 = arith.constant 0 : index
    %c0_337 = arith.constant 0 : index
    %811 = vector.load %arg4[%c2_335, %c0_336, %c0_337] : memref<3x1x384xf32, #tpu.memory_space<vmem>>, vector<1x1x384xf32>
    %812 = vector.shape_cast %811 : vector<1x1x384xf32> to vector<1x384xf32>
    %813 = vector.broadcast %812 : vector<1x384xf32> to vector<8x384xf32>
    %814 = arith.addf %810, %813 : vector<8x384xf32>
    %815 = vector.extract_strided_slice %807 {offsets = [0, 0], sizes = [8, 128], strides = [1, 1]} : vector<8x384xf32> to vector<8x128xf32>
    %816 = vector.extract_strided_slice %814 {offsets = [0, 0], sizes = [8, 128], strides = [1, 1]} : vector<8x384xf32> to vector<8x128xf32>
    %817 = arith.addf %815, %816 : vector<8x128xf32>
    %818 = arith.negf %817 : vector<8x128xf32>
    %819 = math.exp %818 : vector<8x128xf32>
    %cst_338 = arith.constant 1.000000e+00 : f32
    %820 = vector.broadcast %cst_338 : f32 to vector<8x128xf32>
    %821 = arith.addf %820, %819 : vector<8x128xf32>
    %822 = arith.divf %820, %821 : vector<8x128xf32>
    %823 = vector.extract_strided_slice %807 {offsets = [0, 128], sizes = [8, 128], strides = [1, 1]} : vector<8x384xf32> to vector<8x128xf32>
    %824 = vector.extract_strided_slice %814 {offsets = [0, 128], sizes = [8, 128], strides = [1, 1]} : vector<8x384xf32> to vector<8x128xf32>
    %825 = arith.addf %823, %824 : vector<8x128xf32>
    %826 = arith.negf %825 : vector<8x128xf32>
    %827 = math.exp %826 : vector<8x128xf32>
    %cst_339 = arith.constant 1.000000e+00 : f32
    %828 = vector.broadcast %cst_339 : f32 to vector<8x128xf32>
    %829 = arith.addf %828, %827 : vector<8x128xf32>
    %830 = arith.divf %828, %829 : vector<8x128xf32>
    %831 = vector.extract_strided_slice %807 {offsets = [0, 256], sizes = [8, 128], strides = [1, 1]} : vector<8x384xf32> to vector<8x128xf32>
    %832 = vector.extract_strided_slice %814 {offsets = [0, 256], sizes = [8, 128], strides = [1, 1]} : vector<8x384xf32> to vector<8x128xf32>
    %833 = arith.mulf %822, %832 : vector<8x128xf32>
    %834 = arith.addf %831, %833 : vector<8x128xf32>
    %835 = math.tanh %834 : vector<8x128xf32>
    %cst_340 = arith.constant 1.000000e+00 : f32
    %836 = vector.broadcast %cst_340 : f32 to vector<8x128xf32>
    %837 = arith.subf %836, %830 : vector<8x128xf32>
    %838 = arith.mulf %837, %835 : vector<8x128xf32>
    %839 = arith.mulf %830, %800 : vector<8x128xf32>
    %840 = arith.addf %838, %839 : vector<8x128xf32>
    %841 = arith.index_cast %c3_i32_328 : i32 to index
    %c0_341 = arith.constant 0 : index
    %c0_342 = arith.constant 0 : index
    %842 = vector.load %arg10[%841, %c0_341, %c0_342] : memref<8x8x128xf32, #tpu.memory_space<vmem>>, vector<1x8x128xf32>
    %843 = vector.shape_cast %842 : vector<1x8x128xf32> to vector<8x128xf32>
    %844 = vector.shape_cast %840 : vector<8x128xf32> to vector<1x8x128xf32>
    tpu.vector_store %arg10[%841, %c0_341, %c0_342], %844 {strides = array<i32>} : memref<8x8x128xf32, #tpu.memory_space<vmem>>, vector<1x8x128xf32>,
    %c4_i32_343 = arith.constant 4 : i32
    %845 = arith.index_cast %c4_i32_343 : i32 to index
    %c0_344 = arith.constant 0 : index
    %c0_345 = arith.constant 0 : index
    %846 = vector.load %arg11[%845, %c0_344, %c0_345] : memref<8x8x384xf32, #tpu.memory_space<vmem>>, vector<1x8x384xf32>
    %847 = vector.shape_cast %846 : vector<1x8x384xf32> to vector<8x384xf32>
    %c2_346 = arith.constant 2 : index
    %c0_347 = arith.constant 0 : index
    %c0_348 = arith.constant 0 : index
    %848 = vector.load %arg2[%c2_346, %c0_347, %c0_348] : memref<3x128x384xf32, #tpu.memory_space<vmem>>, vector<1x128x384xf32>
    %849 = vector.shape_cast %848 : vector<1x128x384xf32> to vector<128x384xf32>
    %cst_349 = arith.constant dense<0.000000e+00> : vector<8x384xf32>
    %850 = tpu.matmul %840, %849, %cst_349 {dimension_numbers = #tpu.dot_dimension_numbers<[1], [0], [0], [1], [0, 0, 1, 1], [], []>} : vector<8x128xf32>, vector<128x384xf32>, vector<8x384xf32> -> vector<8x384xf32>
    %c2_350 = arith.constant 2 : index
    %c0_351 = arith.constant 0 : index
    %c0_352 = arith.constant 0 : index
    %851 = vector.load %arg4[%c2_350, %c0_351, %c0_352] : memref<3x1x384xf32, #tpu.memory_space<vmem>>, vector<1x1x384xf32>
    %852 = vector.shape_cast %851 : vector<1x1x384xf32> to vector<1x384xf32>
    %853 = vector.broadcast %852 : vector<1x384xf32> to vector<8x384xf32>
    %854 = arith.addf %850, %853 : vector<8x384xf32>
    %855 = vector.extract_strided_slice %847 {offsets = [0, 0], sizes = [8, 128], strides = [1, 1]} : vector<8x384xf32> to vector<8x128xf32>
    %856 = vector.extract_strided_slice %854 {offsets = [0, 0], sizes = [8, 128], strides = [1, 1]} : vector<8x384xf32> to vector<8x128xf32>
    %857 = arith.addf %855, %856 : vector<8x128xf32>
    %858 = arith.negf %857 : vector<8x128xf32>
    %859 = math.exp %858 : vector<8x128xf32>
    %cst_353 = arith.constant 1.000000e+00 : f32
    %860 = vector.broadcast %cst_353 : f32 to vector<8x128xf32>
    %861 = arith.addf %860, %859 : vector<8x128xf32>
    %862 = arith.divf %860, %861 : vector<8x128xf32>
    %863 = vector.extract_strided_slice %847 {offsets = [0, 128], sizes = [8, 128], strides = [1, 1]} : vector<8x384xf32> to vector<8x128xf32>
    %864 = vector.extract_strided_slice %854 {offsets = [0, 128], sizes = [8, 128], strides = [1, 1]} : vector<8x384xf32> to vector<8x128xf32>
    %865 = arith.addf %863, %864 : vector<8x128xf32>
    %866 = arith.negf %865 : vector<8x128xf32>
    %867 = math.exp %866 : vector<8x128xf32>
    %cst_354 = arith.constant 1.000000e+00 : f32
    %868 = vector.broadcast %cst_354 : f32 to vector<8x128xf32>
    %869 = arith.addf %868, %867 : vector<8x128xf32>
    %870 = arith.divf %868, %869 : vector<8x128xf32>
    %871 = vector.extract_strided_slice %847 {offsets = [0, 256], sizes = [8, 128], strides = [1, 1]} : vector<8x384xf32> to vector<8x128xf32>
    %872 = vector.extract_strided_slice %854 {offsets = [0, 256], sizes = [8, 128], strides = [1, 1]} : vector<8x384xf32> to vector<8x128xf32>
    %873 = arith.mulf %862, %872 : vector<8x128xf32>
    %874 = arith.addf %871, %873 : vector<8x128xf32>
    %875 = math.tanh %874 : vector<8x128xf32>
    %cst_355 = arith.constant 1.000000e+00 : f32
    %876 = vector.broadcast %cst_355 : f32 to vector<8x128xf32>
    %877 = arith.subf %876, %870 : vector<8x128xf32>
    %878 = arith.mulf %877, %875 : vector<8x128xf32>
    %879 = arith.mulf %870, %840 : vector<8x128xf32>
    %880 = arith.addf %878, %879 : vector<8x128xf32>
    %881 = arith.index_cast %c4_i32_343 : i32 to index
    %c0_356 = arith.constant 0 : index
    %c0_357 = arith.constant 0 : index
    %882 = vector.load %arg10[%881, %c0_356, %c0_357] : memref<8x8x128xf32, #tpu.memory_space<vmem>>, vector<1x8x128xf32>
    %883 = vector.shape_cast %882 : vector<1x8x128xf32> to vector<8x128xf32>
    %884 = vector.shape_cast %880 : vector<8x128xf32> to vector<1x8x128xf32>
    tpu.vector_store %arg10[%881, %c0_356, %c0_357], %884 {strides = array<i32>} : memref<8x8x128xf32, #tpu.memory_space<vmem>>, vector<1x8x128xf32>,
    %c5_i32_358 = arith.constant 5 : i32
    %885 = arith.index_cast %c5_i32_358 : i32 to index
    %c0_359 = arith.constant 0 : index
    %c0_360 = arith.constant 0 : index
    %886 = vector.load %arg11[%885, %c0_359, %c0_360] : memref<8x8x384xf32, #tpu.memory_space<vmem>>, vector<1x8x384xf32>
    %887 = vector.shape_cast %886 : vector<1x8x384xf32> to vector<8x384xf32>
    %c2_361 = arith.constant 2 : index
    %c0_362 = arith.constant 0 : index
    %c0_363 = arith.constant 0 : index
    %888 = vector.load %arg2[%c2_361, %c0_362, %c0_363] : memref<3x128x384xf32, #tpu.memory_space<vmem>>, vector<1x128x384xf32>
    %889 = vector.shape_cast %888 : vector<1x128x384xf32> to vector<128x384xf32>
    %cst_364 = arith.constant dense<0.000000e+00> : vector<8x384xf32>
    %890 = tpu.matmul %880, %889, %cst_364 {dimension_numbers = #tpu.dot_dimension_numbers<[1], [0], [0], [1], [0, 0, 1, 1], [], []>} : vector<8x128xf32>, vector<128x384xf32>, vector<8x384xf32> -> vector<8x384xf32>
    %c2_365 = arith.constant 2 : index
    %c0_366 = arith.constant 0 : index
    %c0_367 = arith.constant 0 : index
    %891 = vector.load %arg4[%c2_365, %c0_366, %c0_367] : memref<3x1x384xf32, #tpu.memory_space<vmem>>, vector<1x1x384xf32>
    %892 = vector.shape_cast %891 : vector<1x1x384xf32> to vector<1x384xf32>
    %893 = vector.broadcast %892 : vector<1x384xf32> to vector<8x384xf32>
    %894 = arith.addf %890, %893 : vector<8x384xf32>
    %895 = vector.extract_strided_slice %887 {offsets = [0, 0], sizes = [8, 128], strides = [1, 1]} : vector<8x384xf32> to vector<8x128xf32>
    %896 = vector.extract_strided_slice %894 {offsets = [0, 0], sizes = [8, 128], strides = [1, 1]} : vector<8x384xf32> to vector<8x128xf32>
    %897 = arith.addf %895, %896 : vector<8x128xf32>
    %898 = arith.negf %897 : vector<8x128xf32>
    %899 = math.exp %898 : vector<8x128xf32>
    %cst_368 = arith.constant 1.000000e+00 : f32
    %900 = vector.broadcast %cst_368 : f32 to vector<8x128xf32>
    %901 = arith.addf %900, %899 : vector<8x128xf32>
    %902 = arith.divf %900, %901 : vector<8x128xf32>
    %903 = vector.extract_strided_slice %887 {offsets = [0, 128], sizes = [8, 128], strides = [1, 1]} : vector<8x384xf32> to vector<8x128xf32>
    %904 = vector.extract_strided_slice %894 {offsets = [0, 128], sizes = [8, 128], strides = [1, 1]} : vector<8x384xf32> to vector<8x128xf32>
    %905 = arith.addf %903, %904 : vector<8x128xf32>
    %906 = arith.negf %905 : vector<8x128xf32>
    %907 = math.exp %906 : vector<8x128xf32>
    %cst_369 = arith.constant 1.000000e+00 : f32
    %908 = vector.broadcast %cst_369 : f32 to vector<8x128xf32>
    %909 = arith.addf %908, %907 : vector<8x128xf32>
    %910 = arith.divf %908, %909 : vector<8x128xf32>
    %911 = vector.extract_strided_slice %887 {offsets = [0, 256], sizes = [8, 128], strides = [1, 1]} : vector<8x384xf32> to vector<8x128xf32>
    %912 = vector.extract_strided_slice %894 {offsets = [0, 256], sizes = [8, 128], strides = [1, 1]} : vector<8x384xf32> to vector<8x128xf32>
    %913 = arith.mulf %902, %912 : vector<8x128xf32>
    %914 = arith.addf %911, %913 : vector<8x128xf32>
    %915 = math.tanh %914 : vector<8x128xf32>
    %cst_370 = arith.constant 1.000000e+00 : f32
    %916 = vector.broadcast %cst_370 : f32 to vector<8x128xf32>
    %917 = arith.subf %916, %910 : vector<8x128xf32>
    %918 = arith.mulf %917, %915 : vector<8x128xf32>
    %919 = arith.mulf %910, %880 : vector<8x128xf32>
    %920 = arith.addf %918, %919 : vector<8x128xf32>
    %921 = arith.index_cast %c5_i32_358 : i32 to index
    %c0_371 = arith.constant 0 : index
    %c0_372 = arith.constant 0 : index
    %922 = vector.load %arg10[%921, %c0_371, %c0_372] : memref<8x8x128xf32, #tpu.memory_space<vmem>>, vector<1x8x128xf32>
    %923 = vector.shape_cast %922 : vector<1x8x128xf32> to vector<8x128xf32>
    %924 = vector.shape_cast %920 : vector<8x128xf32> to vector<1x8x128xf32>
    tpu.vector_store %arg10[%921, %c0_371, %c0_372], %924 {strides = array<i32>} : memref<8x8x128xf32, #tpu.memory_space<vmem>>, vector<1x8x128xf32>,
    %c6_i32_373 = arith.constant 6 : i32
    %925 = arith.index_cast %c6_i32_373 : i32 to index
    %c0_374 = arith.constant 0 : index
    %c0_375 = arith.constant 0 : index
    %926 = vector.load %arg11[%925, %c0_374, %c0_375] : memref<8x8x384xf32, #tpu.memory_space<vmem>>, vector<1x8x384xf32>
    %927 = vector.shape_cast %926 : vector<1x8x384xf32> to vector<8x384xf32>
    %c2_376 = arith.constant 2 : index
    %c0_377 = arith.constant 0 : index
    %c0_378 = arith.constant 0 : index
    %928 = vector.load %arg2[%c2_376, %c0_377, %c0_378] : memref<3x128x384xf32, #tpu.memory_space<vmem>>, vector<1x128x384xf32>
    %929 = vector.shape_cast %928 : vector<1x128x384xf32> to vector<128x384xf32>
    %cst_379 = arith.constant dense<0.000000e+00> : vector<8x384xf32>
    %930 = tpu.matmul %920, %929, %cst_379 {dimension_numbers = #tpu.dot_dimension_numbers<[1], [0], [0], [1], [0, 0, 1, 1], [], []>} : vector<8x128xf32>, vector<128x384xf32>, vector<8x384xf32> -> vector<8x384xf32>
    %c2_380 = arith.constant 2 : index
    %c0_381 = arith.constant 0 : index
    %c0_382 = arith.constant 0 : index
    %931 = vector.load %arg4[%c2_380, %c0_381, %c0_382] : memref<3x1x384xf32, #tpu.memory_space<vmem>>, vector<1x1x384xf32>
    %932 = vector.shape_cast %931 : vector<1x1x384xf32> to vector<1x384xf32>
    %933 = vector.broadcast %932 : vector<1x384xf32> to vector<8x384xf32>
    %934 = arith.addf %930, %933 : vector<8x384xf32>
    %935 = vector.extract_strided_slice %927 {offsets = [0, 0], sizes = [8, 128], strides = [1, 1]} : vector<8x384xf32> to vector<8x128xf32>
    %936 = vector.extract_strided_slice %934 {offsets = [0, 0], sizes = [8, 128], strides = [1, 1]} : vector<8x384xf32> to vector<8x128xf32>
    %937 = arith.addf %935, %936 : vector<8x128xf32>
    %938 = arith.negf %937 : vector<8x128xf32>
    %939 = math.exp %938 : vector<8x128xf32>
    %cst_383 = arith.constant 1.000000e+00 : f32
    %940 = vector.broadcast %cst_383 : f32 to vector<8x128xf32>
    %941 = arith.addf %940, %939 : vector<8x128xf32>
    %942 = arith.divf %940, %941 : vector<8x128xf32>
    %943 = vector.extract_strided_slice %927 {offsets = [0, 128], sizes = [8, 128], strides = [1, 1]} : vector<8x384xf32> to vector<8x128xf32>
    %944 = vector.extract_strided_slice %934 {offsets = [0, 128], sizes = [8, 128], strides = [1, 1]} : vector<8x384xf32> to vector<8x128xf32>
    %945 = arith.addf %943, %944 : vector<8x128xf32>
    %946 = arith.negf %945 : vector<8x128xf32>
    %947 = math.exp %946 : vector<8x128xf32>
    %cst_384 = arith.constant 1.000000e+00 : f32
    %948 = vector.broadcast %cst_384 : f32 to vector<8x128xf32>
    %949 = arith.addf %948, %947 : vector<8x128xf32>
    %950 = arith.divf %948, %949 : vector<8x128xf32>
    %951 = vector.extract_strided_slice %927 {offsets = [0, 256], sizes = [8, 128], strides = [1, 1]} : vector<8x384xf32> to vector<8x128xf32>
    %952 = vector.extract_strided_slice %934 {offsets = [0, 256], sizes = [8, 128], strides = [1, 1]} : vector<8x384xf32> to vector<8x128xf32>
    %953 = arith.mulf %942, %952 : vector<8x128xf32>
    %954 = arith.addf %951, %953 : vector<8x128xf32>
    %955 = math.tanh %954 : vector<8x128xf32>
    %cst_385 = arith.constant 1.000000e+00 : f32
    %956 = vector.broadcast %cst_385 : f32 to vector<8x128xf32>
    %957 = arith.subf %956, %950 : vector<8x128xf32>
    %958 = arith.mulf %957, %955 : vector<8x128xf32>
    %959 = arith.mulf %950, %920 : vector<8x128xf32>
    %960 = arith.addf %958, %959 : vector<8x128xf32>
    %961 = arith.index_cast %c6_i32_373 : i32 to index
    %c0_386 = arith.constant 0 : index
    %c0_387 = arith.constant 0 : index
    %962 = vector.load %arg10[%961, %c0_386, %c0_387] : memref<8x8x128xf32, #tpu.memory_space<vmem>>, vector<1x8x128xf32>
    %963 = vector.shape_cast %962 : vector<1x8x128xf32> to vector<8x128xf32>
    %964 = vector.shape_cast %960 : vector<8x128xf32> to vector<1x8x128xf32>
    tpu.vector_store %arg10[%961, %c0_386, %c0_387], %964 {strides = array<i32>} : memref<8x8x128xf32, #tpu.memory_space<vmem>>, vector<1x8x128xf32>,
    %c7_i32_388 = arith.constant 7 : i32
    %965 = arith.index_cast %c7_i32_388 : i32 to index
    %c0_389 = arith.constant 0 : index
    %c0_390 = arith.constant 0 : index
    %966 = vector.load %arg11[%965, %c0_389, %c0_390] : memref<8x8x384xf32, #tpu.memory_space<vmem>>, vector<1x8x384xf32>
    %967 = vector.shape_cast %966 : vector<1x8x384xf32> to vector<8x384xf32>
    %c2_391 = arith.constant 2 : index
    %c0_392 = arith.constant 0 : index
    %c0_393 = arith.constant 0 : index
    %968 = vector.load %arg2[%c2_391, %c0_392, %c0_393] : memref<3x128x384xf32, #tpu.memory_space<vmem>>, vector<1x128x384xf32>
    %969 = vector.shape_cast %968 : vector<1x128x384xf32> to vector<128x384xf32>
    %cst_394 = arith.constant dense<0.000000e+00> : vector<8x384xf32>
    %970 = tpu.matmul %960, %969, %cst_394 {dimension_numbers = #tpu.dot_dimension_numbers<[1], [0], [0], [1], [0, 0, 1, 1], [], []>} : vector<8x128xf32>, vector<128x384xf32>, vector<8x384xf32> -> vector<8x384xf32>
    %c2_395 = arith.constant 2 : index
    %c0_396 = arith.constant 0 : index
    %c0_397 = arith.constant 0 : index
    %971 = vector.load %arg4[%c2_395, %c0_396, %c0_397] : memref<3x1x384xf32, #tpu.memory_space<vmem>>, vector<1x1x384xf32>
    %972 = vector.shape_cast %971 : vector<1x1x384xf32> to vector<1x384xf32>
    %973 = vector.broadcast %972 : vector<1x384xf32> to vector<8x384xf32>
    %974 = arith.addf %970, %973 : vector<8x384xf32>
    %975 = vector.extract_strided_slice %967 {offsets = [0, 0], sizes = [8, 128], strides = [1, 1]} : vector<8x384xf32> to vector<8x128xf32>
    %976 = vector.extract_strided_slice %974 {offsets = [0, 0], sizes = [8, 128], strides = [1, 1]} : vector<8x384xf32> to vector<8x128xf32>
    %977 = arith.addf %975, %976 : vector<8x128xf32>
    %978 = arith.negf %977 : vector<8x128xf32>
    %979 = math.exp %978 : vector<8x128xf32>
    %cst_398 = arith.constant 1.000000e+00 : f32
    %980 = vector.broadcast %cst_398 : f32 to vector<8x128xf32>
    %981 = arith.addf %980, %979 : vector<8x128xf32>
    %982 = arith.divf %980, %981 : vector<8x128xf32>
    %983 = vector.extract_strided_slice %967 {offsets = [0, 128], sizes = [8, 128], strides = [1, 1]} : vector<8x384xf32> to vector<8x128xf32>
    %984 = vector.extract_strided_slice %974 {offsets = [0, 128], sizes = [8, 128], strides = [1, 1]} : vector<8x384xf32> to vector<8x128xf32>
    %985 = arith.addf %983, %984 : vector<8x128xf32>
    %986 = arith.negf %985 : vector<8x128xf32>
    %987 = math.exp %986 : vector<8x128xf32>
    %cst_399 = arith.constant 1.000000e+00 : f32
    %988 = vector.broadcast %cst_399 : f32 to vector<8x128xf32>
    %989 = arith.addf %988, %987 : vector<8x128xf32>
    %990 = arith.divf %988, %989 : vector<8x128xf32>
    %991 = vector.extract_strided_slice %967 {offsets = [0, 256], sizes = [8, 128], strides = [1, 1]} : vector<8x384xf32> to vector<8x128xf32>
    %992 = vector.extract_strided_slice %974 {offsets = [0, 256], sizes = [8, 128], strides = [1, 1]} : vector<8x384xf32> to vector<8x128xf32>
    %993 = arith.mulf %982, %992 : vector<8x128xf32>
    %994 = arith.addf %991, %993 : vector<8x128xf32>
    %995 = math.tanh %994 : vector<8x128xf32>
    %cst_400 = arith.constant 1.000000e+00 : f32
    %996 = vector.broadcast %cst_400 : f32 to vector<8x128xf32>
    %997 = arith.subf %996, %990 : vector<8x128xf32>
    %998 = arith.mulf %997, %995 : vector<8x128xf32>
    %999 = arith.mulf %990, %960 : vector<8x128xf32>
    %1000 = arith.addf %998, %999 : vector<8x128xf32>
    %1001 = arith.index_cast %c7_i32_388 : i32 to index
    %c0_401 = arith.constant 0 : index
    %c0_402 = arith.constant 0 : index
    %1002 = vector.load %arg10[%1001, %c0_401, %c0_402] : memref<8x8x128xf32, #tpu.memory_space<vmem>>, vector<1x8x128xf32>
    %1003 = vector.shape_cast %1002 : vector<1x8x128xf32> to vector<8x128xf32>
    %1004 = vector.shape_cast %1000 : vector<8x128xf32> to vector<1x8x128xf32>
    tpu.vector_store %arg10[%1001, %c0_401, %c0_402], %1004 {strides = array<i32>} : memref<8x8x128xf32, #tpu.memory_space<vmem>>, vector<1x8x128xf32>,
    %c8_i32_403 = arith.constant 8 : i32
    %c2_404 = arith.constant 2 : index
    %c0_405 = arith.constant 0 : index
    %c0_406 = arith.constant 0 : index
    %1005 = vector.load %arg9[%c2_404, %c0_405, %c0_406] : memref<3x8x128xf32, #tpu.memory_space<vmem>>, vector<1x8x128xf32>
    %1006 = vector.shape_cast %1005 : vector<1x8x128xf32> to vector<8x128xf32>
    %1007 = vector.shape_cast %1000 : vector<8x128xf32> to vector<1x8x128xf32>
    tpu.vector_store %arg9[%c2_404, %c0_405, %c0_406], %1007 {strides = array<i32>} : memref<3x8x128xf32, #tpu.memory_space<vmem>>, vector<1x8x128xf32>,
    %c0_407 = arith.constant 0 : index
    %c0_408 = arith.constant 0 : index
    %c0_409 = arith.constant 0 : index
    %1008 = vector.load %arg10[%c0_407, %c0_408, %c0_409] : memref<8x8x128xf32, #tpu.memory_space<vmem>>, vector<8x8x128xf32>
    %1009 = vector.shape_cast %1008 : vector<8x8x128xf32> to vector<64x128xf32>
    %c0_410 = arith.constant 0 : index
    %c0_411 = arith.constant 0 : index
    %1010 = vector.load %arg5[%c0_410, %c0_411] : memref<128x128xf32, #tpu.memory_space<vmem>>, vector<128x128xf32>
    %cst_412 = arith.constant dense<0.000000e+00> : vector<64x128xf32>
    %1011 = tpu.matmul %1009, %1010, %cst_412 {dimension_numbers = #tpu.dot_dimension_numbers<[1], [0], [0], [1], [0, 0, 1, 1], [], []>} : vector<64x128xf32>, vector<128x128xf32>, vector<64x128xf32> -> vector<64x128xf32>
    %c0_413 = arith.constant 0 : index
    %c0_414 = arith.constant 0 : index
    %1012 = vector.load %arg6[%c0_413, %c0_414] : memref<1x128xf32, #tpu.memory_space<vmem>>, vector<1x128xf32>
    %1013 = vector.broadcast %1012 : vector<1x128xf32> to vector<64x128xf32>
    %1014 = arith.addf %1011, %1013 : vector<64x128xf32>
    %1015 = vector.shape_cast %1014 : vector<64x128xf32> to vector<8x8x128xf32>
    %c0_415 = arith.constant 0 : index
    %c0_416 = arith.constant 0 : index
    %c0_417 = arith.constant 0 : index
    %1016 = vector.load %arg8[%c0_415, %c0_416, %c0_417] : memref<8x8x128xf32, #tpu.memory_space<vmem>>, vector<8x8x128xf32>
    tpu.vector_store %arg8[%c0_415, %c0_416, %c0_417], %1015 {strides = array<i32>} : memref<8x8x128xf32, #tpu.memory_space<vmem>>, vector<8x8x128xf32>,
    return
  }
}

</mosaic_0001>

<bundles_post_ra>
// kernel: tpu_custom_call.1
= control target key start
LH: loop header
LB: loop body
LE: loop exit
PB: predicated region body
PF: predicated region fallthrough
CT: control target
= control target key end

     0   :  { %15 = vsyncpa [#allocation5], 0  ;;  %s12289_s0 = inlined_call_operand.vmem [shape: f32[8,8,128], index: 0, kind: input, shape index: {}]   ;;  %s12290_s1 = inlined_call_operand.hbm [shape: f32[3,128,384], index: 1, kind: input, shape index: {}]   ;;  %s12291_s2 = inlined_call_operand.hbm [shape: f32[3,128,384], index: 2, kind: input, shape index: {}]   ;;  %s12292_s3 = inlined_call_operand.vmem [shape: f32[3,1,384], index: 3, kind: input, shape index: {}]   ;;  %s12293_s4 = inlined_call_operand.hbm [shape: f32[3,1,384], index: 4, kind: input, shape index: {}]   ;;  %s12294_s5 = inlined_call_operand.hbm [shape: f32[128,128], index: 5, kind: input, shape index: {}]   ;;  %s12295_s6 = inlined_call_operand.vmem [shape: f32[1,128], index: 6, kind: input, shape index: {}]   ;;  %s12296_s7 = inlined_call_operand.hbm [shape: f32[3,8,128], index: 7, kind: input, shape index: {}, may-alias: {7,9}]   ;;  %s12297_s8 = inlined_call_operand.hbm [shape: f32[8,8,128], index: 8, kind: output, shape index: {0}]   ;;  %s12298_s9 = inlined_call_operand.hbm [shape: f32[3,8,128], index: 9, kind: output, shape index: {1}, may-alias: {7,9}]  }
   0x1   :  { %16 = vsyncpa [#allocation8], 0 }
   0x2   :  { %17 = vsyncpa [#allocation11], 0 }
   0x3   :  { %18 = vsyncpa [#allocation6], 0 }
   0x4   :  { %19 = vsyncpa [#allocation15], 0  ;;  %s10504_s30 = smov [#allocation7]   ;;  %s10505_s11 = smov [#allocation10]  }
   0x5   :  { %s39_s10 = sshll.u32 %s10504_s30, 4  ;;  %s65_s12 = sshll.u32 %s10505_s11, 4  ;;  %s40_s10 = int_to_ptr.vmem [resolvable:$true] %s39_s10  ;;  %s10570_s12 = int_to_ptr.vmem [resolvable:$true] %s65_s12 }
   0x6   :  { %s10340_s15 = scalar_lea.hbm %s12291_s2, 18432 }
   0x7   :  { %p10341_p0 = scmp.ne.s32.totalorder %s12291_s2, %s10340_s15  ;;  %p10344_p1 = scmp.lt.u32.totalorder %s10340_s15, %s12291_s2 }
   0x9   :  { %p10346_p2 = pnand %p10344_p1, %p10341_p0 }
   0xb   :  { %10349 = shalt.err (!%p10346_p2)
}
   0xc   :  { %s10350_s20 = scalar_lea.vmem %s40_s10, 18432  ;;  %p10355_p4 = scmp.lt.s32.totalorder %s40_s10, %s40_s10 }
   0xd   :  { %p10351_p3 = scmp.ne.s32.totalorder %s40_s10, %s10350_s20  ;;  %p10356_p5 = scmp.lt.s32.totalorder %s10350_s20, %s10350_s20 }
   0xf   :  { %p10357_p6 = por %p10356_p5, %p10355_p4 }
  0x11   :  { %p10358_p7 = pnand %p10357_p6, %p10351_p3 }
  0x13   :  { %10361 = shalt.err (!%p10358_p7)
}
  0x14   :  { %s10506_s21 = smov 384   ;;  %s10507_s22 = smov 24  }
  0x15   :  { %45 = dma.hbm_to_vmem [thread:$0]  %s12291_s2, 18432, %s40_s10, [#allocation8], %s10506_s21, %s10506_s21, %s10507_s22  }
  0x16   :  { %s10362_s27 = scalar_lea.hbm %s12294_s5, 2048 }
  0x17   :  { %p10363_p8 = scmp.ne.s32.totalorder %s12294_s5, %s10362_s27  ;;  %p10366_p9 = scmp.lt.u32.totalorder %s10362_s27, %s12294_s5 }
  0x19   :  { %p10368_p10 = pnand %p10366_p9, %p10363_p8 }
  0x1b   :  { %10371 = shalt.err (!%p10368_p10)
}
  0x1c   :  { %s10372_s13 = scalar_lea.vmem %s10570_s12, 2048  ;;  %p10377_p12 = scmp.lt.s32.totalorder %s10570_s12, %s10570_s12 }
  0x1d   :  { %p10373_p11 = scmp.ne.s32.totalorder %s10570_s12, %s10372_s13  ;;  %p10378_p13 = scmp.lt.s32.totalorder %s10372_s13, %s10372_s13 }
  0x1f   :  { %p10379_p0 = por %p10378_p13, %p10377_p12 }
  0x21   :  { %p10380_p1 = pnand %p10379_p0, %p10373_p11 }
  0x23   :  { %10383 = shalt.err (!%p10380_p1)
}
  0x24   :  { %s10508_s2 = smov 128   ;;  %s10509_s10 = smov 8  }
  0x25   :  { %71 = dma.hbm_to_vmem [thread:$0]  %s12294_s5, 2048, %s10570_s12, [#allocation11], %s10508_s2, %s10508_s2, %s10509_s10  }
  0x26   :  { %s10510_s16 = smov [#allocation4]   ;;  %s10511_s18 = smov [#allocation9]  }
  0x27   :  { %s27_s17 = sshll.u32 %s10510_s16, 4  ;;  %s53_s19 = sshll.u32 %s10511_s18, 4  ;;  %s28_s17 = int_to_ptr.vmem [resolvable:$true] %s27_s17  ;;  %s10607_s19 = int_to_ptr.vmem [resolvable:$true] %s53_s19 }
  0x28   :  { %s10384_s24 = scalar_lea.hbm %s12290_s1, 18432 }
  0x29   :  { %p10385_p2 = scmp.ne.s32.totalorder %s12290_s1, %s10384_s24  ;;  %p10388_p3 = scmp.lt.u32.totalorder %s10384_s24, %s12290_s1 }
  0x2b   :  { %p10390_p4 = pnand %p10388_p3, %p10385_p2 }
  0x2d   :  { %10393 = shalt.err (!%p10390_p4)
}
  0x2e   :  { %s10394_s5 = scalar_lea.vmem %s28_s17, 18432  ;;  %p10399_p6 = scmp.lt.s32.totalorder %s28_s17, %s28_s17 }
  0x2f   :  { %p10395_p5 = scmp.ne.s32.totalorder %s28_s17, %s10394_s5  ;;  %p10400_p7 = scmp.lt.s32.totalorder %s10394_s5, %s10394_s5 }
  0x31   :  { %p10401_p8 = por %p10400_p7, %p10399_p6 }
  0x33   :  { %p10402_p9 = pnand %p10401_p8, %p10395_p5 }
  0x35   :  { %10405 = shalt.err (!%p10402_p9)
}
  0x36   :  { %33 = dma.hbm_to_vmem [thread:$0]  %s12290_s1, 18432, %s28_s17, [#allocation5], %s10506_s21, %s10506_s21, %s10507_s22  }
  0x37   :  { %s10406_s13 = scalar_lea.hbm %s12293_s4, 144 }
  0x38   :  { %p10407_p10 = scmp.ne.s32.totalorder %s12293_s4, %s10406_s13  ;;  %p10410_p11 = scmp.lt.u32.totalorder %s10406_s13, %s12293_s4 }
  0x3a   :  { %p10412_p12 = pnand %p10410_p11, %p10407_p10 }
  0x3c   :  { %10415 = shalt.err (!%p10412_p12)
}
  0x3d   :  { %s10416_s20 = scalar_lea.vmem %s10607_s19, 144  ;;  %s10420_s1 = scalar_lea.vmem %s10607_s19, 160 }
  0x3e   :  { %p10417_p13 = scmp.ne.s32.totalorder %s10607_s19, %s10416_s20  ;;  %p10421_p0 = scmp.lt.s32.totalorder %s10607_s19, %s10607_s19 }
  0x3f   :  { %p10422_p1 = scmp.lt.s32.totalorder %s10420_s1, %s10416_s20 }
  0x41   :  { %p10423_p2 = por %p10422_p1, %p10421_p0 }
  0x43   :  { %p10424_p3 = pnand %p10423_p2, %p10417_p13 }
  0x45   :  { %10427 = shalt.err (!%p10424_p3)
}
  0x46   :  { %s10512_s21 = smov 48   ;;  %s10513_s22 = smov 3  }
  0x47   :  { %59 = dma.hbm_to_vmem [thread:$0]  %s12293_s4, 144, %s10607_s19, [#allocation8], %s10512_s21, %s10512_s21, %s10513_s22  }
  0x48   :  { %s10514_s24 = smov [#allocation12]   ;;  %s10428_s28 = scalar_lea.hbm %s12296_s7, 384 }
  0x49   :  { %s79_s25 = sshll.u32 %s10514_s24, 4  ;;  %p10429_p4 = scmp.ne.s32.totalorder %s12296_s7, %s10428_s28  ;;  %s80_s25 = int_to_ptr.vmem [resolvable:$true] %s79_s25 }
  0x4a   :  { %p10432_p5 = scmp.lt.u32.totalorder %s10428_s28, %s12296_s7 }
  0x4c   :  { %p10434_p6 = pnand %p10432_p5, %p10429_p4 }
  0x4e   :  { %10437 = shalt.err (!%p10434_p6)
}
  0x4f   :  { %s10438_s11 = scalar_lea.vmem %s80_s25, 384  ;;  %p10443_p8 = scmp.lt.s32.totalorder %s80_s25, %s80_s25 }
  0x50   :  { %p10439_p7 = scmp.ne.s32.totalorder %s80_s25, %s10438_s11  ;;  %p10444_p9 = scmp.lt.s32.totalorder %s10438_s11, %s10438_s11 }
  0x52   :  { %p10445_p10 = por %p10444_p9, %p10443_p8 }
  0x54   :  { %p10446_p11 = pnand %p10445_p10, %p10439_p7 }
  0x56   :  { %10449 = shalt.err (!%p10446_p11)
}
  0x57   :  { %85 = dma.hbm_to_vmem [thread:$0]  %s12296_s7, 384, %s80_s25, [#allocation11], %s10508_s2, %s10508_s2, %s10509_s10  }
  0x58   :  { %10494 = dma.done.wait [#allocation5], 18432  }
  0x59   :  { %10495 = vsyncadd [#allocation5], 4294948864 }
  0x5a   :  { %10496 = dma.done.wait [#allocation8], 18576  }
  0x5b   :  { %10497 = vsyncadd [#allocation8], 4294948720 }
  0x5c   :  { %10498 = dma.done.wait [#allocation11], 2432  }
  0x5d   :  { %10499 = vsyncadd [#allocation11], 4294964864  ;;  %v12299_v0 = vmov 0.0   ;;  %v110_v1 = vld [vmem:[#allocation4 + $0x8] sm:$0xff]  ;;  %v113_v2 = vld [vmem:[#allocation4 + $0x20] sm:$0xff]  ;;  %vm10517_vm0 = vmmov 0  }
  0x5e   :  { %238 = vmatprep.mubr.f32.mxu1 %v12299_v0  ;;  %549 = vmatprep.mubr.f32.mxu0 %v12299_v0  ;;  %v109_v3 = vld [vmem:[#allocation4] sm:$0xff]  ;;  %v8372_v4 = vpack.c.bf16 %v113_v2, %v110_v1  ;;  %v112_v5 = vld [vmem:[#allocation4 + $0x18] sm:$0xff]  ;;  %v119_v7 = vld [vmem:[#allocation4 + $0x50] sm:$0xff] }
  0x5f   :  { %v116_v6 = vld [vmem:[#allocation4 + $0x38] sm:$0xff]  ;;  %v8374_v8 = vpack.c.bf16 %v112_v5, %v109_v3  ;;  %v421_v10 = vld [vmem:[#allocation7 + $0x8] sm:$0xff]  ;;  %v424_v11 = vld [vmem:[#allocation7 + $0x20] sm:$0xff] }
  0x60   :  { %v8376_v9 = vpack.c.bf16 %v119_v7, %v116_v6  ;;  %v115_v12 = vld [vmem:[#allocation4 + $0x30] sm:$0xff]  ;;  %8373 = vmatprep.subr.bf16.mxu1 %v8372_v4  ;;  %v10659_v13 = vpack.c.bf16 %v424_v11, %v421_v10  ;;  %v118_v14 = vld [vmem:[#allocation4 + $0x48] sm:$0xff]  ;;  %v420_v15 = vld [vmem:[#allocation7] sm:$0xff] }
  0x61   :  { %v423_v16 = vld [vmem:[#allocation7 + $0x18] sm:$0xff]  ;;  %8375 = vmatpush1.bf16.msra.mxu1 %v8374_v8  ;;  %v8378_v17 = vpack.c.bf16 %v118_v14, %v115_v12  ;;  %v122_v19 = vld [vmem:[#allocation4 + $0x68] sm:$0xff]  ;;  %v125_v20 = vld [vmem:[#allocation4 + $0x80] sm:$0xff] }
  0x62   :  { %v10661_v18 = vpack.c.bf16 %v423_v16, %v420_v15  ;;  %v427_v21 = vld [vmem:[#allocation7 + $0x38] sm:$0xff]  ;;  %8377 = vmatprep.subr.bf16.mxu1 %v8376_v9  ;;  %8437 = vmatprep.subr.bf16.mxu0 %v10659_v13  ;;  %v8380_v22 = vpack.c.bf16 %v125_v20, %v122_v19  ;;  %v430_v23 = vld [vmem:[#allocation7 + $0x50] sm:$0xff]  ;;  %v121_v24 = vld [vmem:[#allocation4 + $0x60] sm:$0xff] }
  0x63   :  { %v124_v25 = vld [vmem:[#allocation4 + $0x78] sm:$0xff]  ;;  %v10665_v26 = vpack.c.bf16 %v430_v23, %v427_v21  ;;  %v426_v27 = vld [vmem:[#allocation7 + $0x30] sm:$0xff]  ;;  %v429_v28 = vld [vmem:[#allocation7 + $0x48] sm:$0xff] }
  0x64   :  { %8439 = vmatpush1.bf16.msra.mxu0 %v10661_v18  ;;  %v128_v29 = vld [vmem:[#allocation4 + $0x98] sm:$0xff]  ;;  %v10667_v30 = vpack.c.bf16 %v429_v28, %v426_v27  ;;  %v131_v31 = vld [vmem:[#allocation4 + $0xb0] sm:$0xff]  ;;  %v433_v32 = vld [vmem:[#allocation7 + $0x68] sm:$0xff]  ;;  %v8382_v34 = vpack.c.bf16 %v124_v25, %v121_v24 }
  0x65   :  { %v436_v33 = vld [vmem:[#allocation7 + $0x80] sm:$0xff]  ;;  %8379 = vmatpush1.bf16.msra.mxu1 %v8378_v17  ;;  %8441 = vmatprep.subr.bf16.mxu0 %v10665_v26  ;;  %v127_v36 = vld [vmem:[#allocation4 + $0x90] sm:$0xff]  ;;  %v8384_v38 = vpack.c.bf16 %v131_v31, %v128_v29  ;;  %v130_v39 = vld [vmem:[#allocation4 + $0xa8] sm:$0xff] }
  0x66   :  { %v10670_v35 = vpack.c.bf16 %v436_v33, %v433_v32  ;;  %v432_v37 = vld [vmem:[#allocation7 + $0x60] sm:$0xff]  ;;  %8381 = vmatprep.subr.bf16.mxu1 %v8380_v22  ;;  %v435_v40 = vld [vmem:[#allocation7 + $0x78] sm:$0xff]  ;;  %v134_v41 = vld [vmem:[#allocation4 + $0xc8] sm:$0xff]  ;;  %v8386_v49 = vpack.c.bf16 %v130_v39, %v127_v36 }
  0x67   :  { %v10673_v42 = vpack.c.bf16 %v435_v40, %v432_v37  ;;  %v137_v43 = vld [vmem:[#allocation4 + $0xe0] sm:$0xff]  ;;  %v439_v44 = vld [vmem:[#allocation7 + $0x98] sm:$0xff]  ;;  %v442_v45 = vld [vmem:[#allocation7 + $0xb0] sm:$0xff] }
  0x68   :  { %8443 = vmatpush1.bf16.msra.mxu0 %v10667_v30  ;;  %v10676_v46 = vpack.c.bf16 %v442_v45, %v439_v44  ;;  %v438_v47 = vld [vmem:[#allocation7 + $0x90] sm:$0xff]  ;;  %v441_v48 = vld [vmem:[#allocation7 + $0xa8] sm:$0xff]  ;;  %v8388_v51 = vpack.c.bf16 %v137_v43, %v134_v41  ;;  %v133_v52 = vld [vmem:[#allocation4 + $0xc0] sm:$0xff] }
  0x69   :  { %8445 = vmatprep.subr.bf16.mxu0 %v10670_v35  ;;  %8383 = vmatpush1.bf16.msra.mxu1 %v8382_v34  ;;  %v445_v50 = vld [vmem:[#allocation7 + $0xc8] sm:$0xff]  ;;  %v136_v53 = vld [vmem:[#allocation4 + $0xd8] sm:$0xff]  ;;  %v448_v54 = vld [vmem:[#allocation7 + $0xe0] sm:$0xff]  ;;  %v10679_v55 = vpack.c.bf16 %v441_v48, %v438_v47 }
  0x6a   :  { %8385 = vmatprep.subr.bf16.mxu1 %v8384_v38  ;;  %v140_v56 = vld [vmem:[#allocation4 + $0xf8] sm:$0xff]  ;;  %v143_v57 = vld [vmem:[#allocation4 + $0x110] sm:$0xff]  ;;  %v10682_v58 = vpack.c.bf16 %v448_v54, %v445_v50  ;;  %v444_v59 = vld [vmem:[#allocation7 + $0xc0] sm:$0xff]  ;;  %v8390_v61 = vpack.c.bf16 %v136_v53, %v133_v52 }
  0x6b   :  { %v447_v60 = vld [vmem:[#allocation7 + $0xd8] sm:$0xff]  ;;  %v454_v63 = vld [vmem:[#allocation7 + $0x110] sm:$0xff]  ;;  %v8392_v1 = vpack.c.bf16 %v143_v57, %v140_v56  ;;  %v142_v3 = vld [vmem:[#allocation4 + $0x108] sm:$0xff] }
  0x6c   :  { %8447 = vmatpush1.bf16.msra.mxu0 %v10673_v42  ;;  %v451_v62 = vld [vmem:[#allocation7 + $0xf8] sm:$0xff]  ;;  %v139_v2 = vld [vmem:[#allocation4 + $0xf0] sm:$0xff]  ;;  %v10685_v4 = vpack.c.bf16 %v447_v60, %v444_v59  ;;  %v146_v5 = vld [vmem:[#allocation4 + $0x128] sm:$0xff] }
  0x6d   :  { %8449 = vmatprep.subr.bf16.mxu0 %v10676_v46  ;;  %8387 = vmatpush1.bf16.msra.mxu1 %v8386_v49  ;;  %v149_v6 = vld [vmem:[#allocation4 + $0x140] sm:$0xff]  ;;  %v10688_v7 = vpack.c.bf16 %v454_v63, %v451_v62  ;;  %v450_v8 = vld [vmem:[#allocation7 + $0xf0] sm:$0xff]  ;;  %v453_v9 = vld [vmem:[#allocation7 + $0x108] sm:$0xff]  ;;  %v8394_v10 = vpack.c.bf16 %v142_v3, %v139_v2 }
  0x6e   :  { %8389 = vmatprep.subr.bf16.mxu1 %v8388_v51  ;;  %v457_v11 = vld [vmem:[#allocation7 + $0x128] sm:$0xff]  ;;  %v460_v12 = vld [vmem:[#allocation7 + $0x140] sm:$0xff]  ;;  %v8396_v14 = vpack.c.bf16 %v149_v6, %v146_v5  ;;  %v148_v16 = vld [vmem:[#allocation4 + $0x138] sm:$0xff]  ;;  %v10691_v17 = vpack.c.bf16 %v453_v9, %v450_v8 }
  0x6f   :  { %v145_v15 = vld [vmem:[#allocation4 + $0x120] sm:$0xff]  ;;  %v152_v19 = vld [vmem:[#allocation4 + $0x158] sm:$0xff]  ;;  %v155_v20 = vld [vmem:[#allocation4 + $0x170] sm:$0xff]  ;;  %v10694_v21 = vpack.c.bf16 %v460_v12, %v457_v11 }
  0x70   :  { %8451 = vmatpush1.bf16.msra.mxu0 %v10679_v55  ;;  %v456_v22 = vld [vmem:[#allocation7 + $0x120] sm:$0xff]  ;;  %v459_v23 = vld [vmem:[#allocation7 + $0x138] sm:$0xff]  ;;  %v8398_v24 = vpack.c.bf16 %v148_v16, %v145_v15  ;;  %v466_v27 = vld [vmem:[#allocation7 + $0x170] sm:$0xff]  ;;  %v8400_v28 = vpack.c.bf16 %v155_v20, %v152_v19 }
  0x71   :  { %8453 = vmatprep.subr.bf16.mxu0 %v10682_v58  ;;  %8391 = vmatpush1.bf16.msra.mxu1 %v8390_v61  ;;  %v463_v25 = vld [vmem:[#allocation7 + $0x158] sm:$0xff]  ;;  %v151_v29 = vld [vmem:[#allocation4 + $0x150] sm:$0xff]  ;;  %v154_v31 = vld [vmem:[#allocation4 + $0x168] sm:$0xff]  ;;  %v10697_v32 = vpack.c.bf16 %v459_v23, %v456_v22  ;;  %v12301_v22 = vmov 0.0|0.0  }
  0x72   :  { %8393 = vmatprep.subr.bf16.mxu1 %v8392_v1  ;;  %v111_v33 = vld [vmem:[#allocation4 + $0x10] sm:$0xff]  ;;  %v114_v34 = vld [vmem:[#allocation4 + $0x28] sm:$0xff]  ;;  %v10700_v36 = vpack.c.bf16 %v466_v27, %v463_v25  ;;  %v8402_v39 = vpack.c.bf16 %v154_v31, %v151_v29  ;;  %v117_v43 = vld [vmem:[#allocation4 + $0x40] sm:$0xff] }
  0x73   :  { %v462_v37 = vld [vmem:[#allocation7 + $0x150] sm:$0xff]  ;;  %v465_v38 = vld [vmem:[#allocation7 + $0x168] sm:$0xff]  ;;  %v8404_v40 = vpack.c.bf16 %v114_v34, %v111_v33  ;;  %v120_v44 = vld [vmem:[#allocation4 + $0x58] sm:$0xff] }
  0x74   :  { %8455 = vmatpush1.bf16.msra.mxu0 %v10685_v4  ;;  %v10703_v41 = vpack.c.bf16 %v465_v38, %v462_v37  ;;  %v10709_v45 = vld [vmem:[%s12289_s0] sm:$0xff]  ;;  %v8408_v47 = vpack.c.bf16 %v120_v44, %v117_v43  ;;  %v10712_v48 = vld [vmem:[#allocation12] sm:$0xff]  ;;  %v132_v54 = vld [vmem:[#allocation4 + $0xb8] sm:$0xff] }
  0x75   :  { %8457 = vmatprep.subr.bf16.mxu0 %v10688_v7  ;;  %8395 = vmatpush1.bf16.msra.mxu1 %v8394_v10  ;;  %v123_v49 = vld [vmem:[#allocation4 + $0x70] sm:$0xff]  ;;  %v126_v50 = vld [vmem:[#allocation4 + $0x88] sm:$0xff]  ;;  %v129_v53 = vld [vmem:[#allocation4 + $0xa0] sm:$0xff] }
  0x76   :  { %8397 = vmatprep.subr.bf16.mxu1 %v8396_v14  ;;  %v10720_v51 = vld [vmem:[%s12289_s0 + $0x8] sm:$0xff]  ;;  %v8412_v52 = vpack.c.bf16 %v126_v50, %v123_v49  ;;  %v10731_v56 = vld [vmem:[%s12289_s0 + $0x10] sm:$0xff]  ;;  %v8416_v57 = vpack.c.bf16 %v132_v54, %v129_v53  ;;  %v104_v61 = vld [vmem:[%s12289_s0 + $0x18] sm:$0xff] }
  0x77   :  { %v135_v59 = vld [vmem:[#allocation4 + $0xd0] sm:$0xff]  ;;  %v138_v60 = vld [vmem:[#allocation4 + $0xe8] sm:$0xff]  ;;  %v141_v63 = vld [vmem:[#allocation4 + $0x100] sm:$0xff] }
  0x78   :  { %8459 = vmatpush1.bf16.msra.mxu0 %v10691_v17  ;;  %v8420_v62 = vpack.c.bf16 %v138_v60, %v135_v59  ;;  %v144_v1 = vld [vmem:[#allocation4 + $0x118] sm:$0xff]  ;;  %v105_v2 = vld [vmem:[%s12289_s0 + $0x20] sm:$0xff]  ;;  %v147_v5 = vld [vmem:[#allocation4 + $0x130] sm:$0xff] }
  0x79   :  { %8461 = vmatprep.subr.bf16.mxu0 %v10694_v21  ;;  %8399 = vmatpush1.bf16.msra.mxu1 %v8398_v24  ;;  %v8424_v3 = vpack.c.bf16 %v144_v1, %v141_v63  ;;  %v150_v6 = vld [vmem:[#allocation4 + $0x148] sm:$0xff]  ;;  %v153_v10 = vld [vmem:[#allocation4 + $0x160] sm:$0xff]  ;;  %v156_v11 = vld [vmem:[#allocation4 + $0x178] sm:$0xff] }
  0x7a   :  { %8401 = vmatprep.subr.bf16.mxu1 %v8400_v28  ;;  %v106_v8 = vld [vmem:[%s12289_s0 + $0x28] sm:$0xff]  ;;  %v8428_v9 = vpack.c.bf16 %v150_v6, %v147_v5  ;;  %v107_v12 = vld [vmem:[%s12289_s0 + $0x30] sm:$0xff]  ;;  %v8432_v14 = vpack.c.bf16 %v156_v11, %v153_v10  ;;  %v108_v15 = vld [vmem:[%s12289_s0 + $0x38] sm:$0xff] }
  0x7b   :  { %v422_v16 = vld [vmem:[#allocation7 + $0x10] sm:$0xff]  ;;  %v425_v19 = vld [vmem:[#allocation7 + $0x28] sm:$0xff]  ;;  %v428_v23 = vld [vmem:[#allocation7 + $0x40] sm:$0xff] }
  0x7c   :  { %8463 = vmatpush1.bf16.msra.mxu0 %v10697_v32  ;;  %v10767_v20 = vpack.c.bf16 %v425_v19, %v422_v16  ;;  %v431_v24 = vld [vmem:[#allocation7 + $0x58] sm:$0xff]  ;;  %v434_v27 = vld [vmem:[#allocation7 + $0x70] sm:$0xff]  ;;  %v437_v28 = vld [vmem:[#allocation7 + $0x88] sm:$0xff] }
  0x7d   :  { %8465 = vmatprep.subr.bf16.mxu0 %v10700_v36  ;;  %8403 = vmatpush1.bf16.msra.mxu1 %v8402_v39  ;;  %v10774_v25 = vpack.c.bf16 %v431_v24, %v428_v23  ;;  %v10779_v29 = vpack.c.bf16 %v437_v28, %v434_v27  ;;  %v440_v31 = vld [vmem:[#allocation7 + $0xa0] sm:$0xff]  ;;  %v446_v34 = vld [vmem:[#allocation7 + $0xd0] sm:$0xff]  ;;  %v449_v37 = vld [vmem:[#allocation7 + $0xe8] sm:$0xff] }
  0x7e   :  { %8405 = vmatprep.subr.bf16.mxu1 %v8404_v40  ;;  %v10787_v38 = vpack.c.bf16 %v449_v37, %v446_v34  ;;  %v452_v39 = vld [vmem:[#allocation7 + $0x100] sm:$0xff]  ;;  %v458_v44 = vld [vmem:[#allocation7 + $0x130] sm:$0xff]  ;;  %v467_v50 = vld [vmem:[#allocation7 + $0x178] sm:$0xff] }
  0x7f   :  { %v464_v49 = vld [vmem:[#allocation7 + $0x160] sm:$0xff] }
  0x80   :  { %8467 = vmatpush1.bf16.msra.mxu0 %v10703_v41  ;;  %239 = vmatmul.mubr.f32.vlgmr.msra.gmra.mrb[0].mxu1 %v10709_v45  ;;  %v10832_v59 = vld [vmem:[#allocation9] sm:$0x7] }
  0x81   :  { %8493 = vmatprep.subr.bf16.mxu0 %v10659_v13  ;;  %8407 = vmatpush3.bf16.msra.mxu1 %v8404_v40  ;;  %v455_v40 = vld [vmem:[#allocation7 + $0x118] sm:$0xff] }
  0x82   :  { %244 = vmatprep.mubr.f32.mxu1 %v12299_v0  ;;  %8409 = vmatprep.subr.bf16.mxu1 %v8408_v47  ;;  %v10793_v43 = vpack.c.bf16 %v455_v40, %v452_v39 }
  0x83   :  { %550 = vmatmul.mubr.f32.vlgmr.msra.gmra.mrb[0].mxu0 %v10712_v48 }
  0x84   :  { %8495 = vmatpush1.bf16.msra.mxu0 %v10661_v18  ;;  %781 = vmatprep.mubr.f32.mxu0 %v12299_v0 }
  0x85   :  { %245 = vmatmul.mubr.f32.gmra.mrb[2].mxu1 %v10720_v51  ;;  %8497 = vmatprep.subr.bf16.mxu0 %v10665_v26 }
  0x86   :  { %8411 = vmatpush3.bf16.msra.mxu1 %v8408_v47  ;;  %250 = vmatprep.mubr.f32.mxu1 %v12299_v0 }
  0x87   :  { %8413 = vmatprep.subr.bf16.mxu1 %v8412_v52 }
  0x88   :  { %8499 = vmatpush1.bf16.msra.mxu0 %v10667_v30 }
  0x89   :  { %251 = vmatmul.mubr.f32.gmra.mrb[4].mxu1 %v10731_v56  ;;  %8501 = vmatprep.subr.bf16.mxu0 %v10670_v35 }
  0x8a   :  { %8415 = vmatpush3.bf16.msra.mxu1 %v8412_v52  ;;  %256 = vmatprep.mubr.f32.mxu1 %v12299_v0  ;;  %v159_v52 = vlaneseq }
  0x8b   :  { %8417 = vmatprep.subr.bf16.mxu1 %v8416_v57 }
  0x8c   :  { %8503 = vmatpush1.bf16.msra.mxu0 %v10673_v42  ;;  %v160_v53 = vshrl.u32 %v159_v52, 7 }
  0x8d   :  { %257 = vmatmul.mubr.f32.gmra.mrb[6].mxu1 %v104_v61  ;;  %8505 = vmatprep.subr.bf16.mxu0 %v10676_v46 }
  0x8e   :  { %8419 = vmatpush3.bf16.msra.mxu1 %v8416_v57  ;;  %262 = vmatprep.mubr.f32.mxu1 %v12299_v0  ;;  %v10825_v54 = vsub.s32 0, %v160_v53  ;;  %v10830_v57 = vsub.s32 1, %v160_v53 }
  0x8f   :  { %8421 = vmatprep.subr.bf16.mxu1 %v8420_v62 }
  0x90   :  { %8507 = vmatpush1.bf16.msra.mxu0 %v10679_v55  ;;  %v477_v1 = vrot.slane %v10832_v59, %v10830_v57 }
  0x91   :  { %263 = vmatmul.mubr.f32.gmra.mrb[8].mxu1 %v105_v2  ;;  %8509 = vmatprep.subr.bf16.mxu0 %v10682_v58 }
  0x92   :  { %8423 = vmatpush3.bf16.msra.mxu1 %v8420_v62  ;;  %268 = vmatprep.mubr.f32.mxu1 %v12299_v0  ;;  %v473_v62 = vrot.slane %v10832_v59, %v10825_v54 }
  0x93   :  { %8425 = vmatprep.subr.bf16.mxu1 %v8424_v3 }
  0x94   :  { %8511 = vmatpush1.bf16.msra.mxu0 %v10685_v4 }
  0x95   :  { %269 = vmatmul.mubr.f32.gmra.mrb[10].mxu1 %v106_v8  ;;  %8513 = vmatprep.subr.bf16.mxu0 %v10688_v7 }
  0x96   :  { %8427 = vmatpush3.bf16.msra.mxu1 %v8424_v3  ;;  %274 = vmatprep.mubr.f32.mxu1 %v12299_v0 }
  0x97   :  { %8429 = vmatprep.subr.bf16.mxu1 %v8428_v9 }
  0x98   :  { %8515 = vmatpush1.bf16.msra.mxu0 %v10691_v17 }
  0x99   :  { %275 = vmatmul.mubr.f32.gmra.mrb[12].mxu1 %v107_v12  ;;  %8517 = vmatprep.subr.bf16.mxu0 %v10694_v21 }
  0x9a   :  { %8431 = vmatpush3.bf16.msra.mxu1 %v8428_v9  ;;  %280 = vmatprep.mubr.f32.mxu1 %v12299_v0 }
  0x9b   :  { %8433 = vmatprep.subr.bf16.mxu1 %v8432_v14 }
  0x9c   :  { %8519 = vmatpush1.bf16.msra.mxu0 %v10697_v32 }
  0x9d   :  { %281 = vmatmul.mubr.f32.gmra.mrb[14].mxu1 %v108_v15  ;;  %8521 = vmatprep.subr.bf16.mxu0 %v10700_v36 }
  0x9e   :  { %8435 = vmatpush3.bf16.msra.mxu1 %v8432_v14  ;;  %7388 = vmatprep.mubr.f32.mxu1 %v10709_v45  ;;  %v461_v45 = vld [vmem:[#allocation7 + $0x148] sm:$0xff] }
  0x9f   :  { %8468 = vmatprep.subr.bf16.mxu1 %v12301_v22  ;;  %v10797_v47 = vpack.c.bf16 %v461_v45, %v458_v44 }
  0xa0   :  { %8523 = vmatpush1.bf16.msra.mxu0 %v10703_v41 }
  0xa1   :  { %7389 = vmatmul.mubr.f32.vlgmr.msra.gmra.mrb[16].mxu1 %v10720_v51  ;;  %8549 = vmatprep.subr.bf16.mxu0 %v10659_v13  ;;  %v443_v13 = vld [vmem:[#allocation7 + $0xb8] sm:$0xff]  ;;  %v10801_v51 = vpack.c.bf16 %v467_v50, %v464_v49 }
  0xa2   :  { %8470 = vmatpush3.bf16.msra.mxu1 %v10767_v20  ;;  %7391 = vmatprep.mubr.f32.mxu1 %v10731_v56  ;;  %v10783_v33 = vpack.c.bf16 %v443_v13, %v440_v31  ;;  %v157_v56 = vld [vmem:[%s12292_s3] sm:$0x7] }
  0xa3   :  { %8471 = vmatprep.subr.bf16.mxu1 %v12301_v22  ;;  %v162_v60 = vrot.slane %v157_v56, %v10825_v54 }
  0xa5   :  { %7392 = vmatmul.mubr.f32.gmra.mrb[18].mxu1 %v104_v61  ;;  %v166_v61 = vrot.slane %v157_v56, %v10830_v57 }
  0xa6   :  { %8473 = vmatpush3.bf16.msra.mxu1 %v10774_v25  ;;  %7394 = vmatprep.mubr.f32.mxu1 %v105_v2 }
  0xa7   :  { %8474 = vmatprep.subr.bf16.mxu1 %v12301_v22 }
  0xa9   :  { %7395 = vmatmul.mubr.f32.gmra.mrb[20].mxu1 %v106_v8 }
  0xaa   :  { %8476 = vmatpush3.bf16.msra.mxu1 %v10779_v29  ;;  %7397 = vmatprep.mubr.f32.mxu1 %v107_v12 }
  0xab   :  { %8477 = vmatprep.subr.bf16.mxu1 %v12301_v22 }
  0xad   :  { %7398 = vmatmul.mubr.f32.gmra.mrb[22].mxu1 %v108_v15 }
  0xae   :  { %8479 = vmatpush3.bf16.msra.mxu1 %v10783_v33  ;;  %7432 = vmatprep.mubr.msk.f32.mxu1 %vm10517_vm0, %v12299_v0 }
  0xaf   :  { %8480 = vmatprep.subr.bf16.mxu1 %v12301_v22 }
  0xb2   :  { %8482 = vmatpush3.bf16.msra.mxu1 %v10787_v38 }
  0xb3   :  { %8483 = vmatprep.subr.bf16.mxu1 %v12301_v22 }
  0xb6   :  { %8485 = vmatpush3.bf16.msra.mxu1 %v10793_v43 }
  0xb7   :  { %8486 = vmatprep.subr.bf16.mxu1 %v12301_v22 }
  0xba   :  { %8488 = vmatpush3.bf16.msra.mxu1 %v10797_v47 }
  0xbb   :  { %8489 = vmatprep.subr.bf16.mxu1 %v12301_v22 }
  0xbe   :  { %8491 = vmatpush3.bf16.msra.mxu1 %v10801_v51 }
  0xbf   :  { %8524 = vmatprep.subr.bf16.mxu1 %v12301_v22 }
  0xc1   :  { %7433 = vmatmul.mubr.f32.vlgmr.msra.gmra.mrb[24].mxu1 %v10712_v48 }
  0xc2   :  { %8526 = vmatpush3.bf16.msra.mxu1 %v10767_v20  ;;  %7467 = vmatprep.mubr.msk.f32.mxu1 %vm10517_vm0, %v12299_v0 }
  0xc3   :  { %8527 = vmatprep.subr.bf16.mxu1 %v12301_v22 }
  0xc6   :  { %8529 = vmatpush3.bf16.msra.mxu1 %v10774_v25 }
  0xc7   :  { %8530 = vmatprep.subr.bf16.mxu1 %v12301_v22 }
  0xca   :  { %8532 = vmatpush3.bf16.msra.mxu1 %v10779_v29 }
  0xcb   :  { %8533 = vmatprep.subr.bf16.mxu1 %v12301_v22 }
  0xce   :  { %8535 = vmatpush3.bf16.msra.mxu1 %v10783_v33 }
  0xcf   :  { %8536 = vmatprep.subr.bf16.mxu1 %v12301_v22 }
  0xd2   :  { %8538 = vmatpush3.bf16.msra.mxu1 %v10787_v38 }
  0xd3   :  { %8539 = vmatprep.subr.bf16.mxu1 %v12301_v22 }
  0xd6   :  { %8541 = vmatpush3.bf16.msra.mxu1 %v10793_v43 }
  0xd7   :  { %8542 = vmatprep.subr.bf16.mxu1 %v12301_v22 }
  0xda   :  { %8544 = vmatpush3.bf16.msra.mxu1 %v10797_v47 }
  0xdb   :  { %8545 = vmatprep.subr.bf16.mxu1 %v12301_v22 }
  0xde   :  { %8547 = vmatpush3.bf16.msra.mxu1 %v10801_v51 }
  0xdf   :  { %8580 = vmatprep.subr.bf16.mxu1 %v12301_v22 }
 0x153   :  { %v240_v63 = vpop.f32.mrb[0].mxu1 }
 0x154   :  { %v241_v2 = vadd.f32 %v240_v63, %v162_v60  ;;  %v242_v3 = vpop.f32.mrb[1].mxu1 }
 0x155   :  { %v243_v5 = vadd.f32 %v242_v3, %v166_v61  ;;  %v10862_v3 = vsub.s32 2, %v160_v53 }
 0x156   :  { %v551_v6 = vpop.f32.mrb[0].mxu0  ;;  %v9941_v8 = vadd.f32 %v473_v62, %v241_v2 }
 0x157   :  { %v553_v9 = vpop.f32.mrb[1].mxu0  ;;  %v9944_v11 = vadd.f32 %v477_v1, %v243_v5 }
 0x158   :  { %v246_v10 = vpop.f32.mrb[2].mxu1  ;;  %v9942_v14 = vadd.f32 %v9941_v8, %v551_v6 }
 0x159   :  { %v10840_v12 = vadd.f32 %v246_v10, %v162_v60  ;;  %v248_v15 = vpop.f32.mrb[3].mxu1  ;;  %v9945_v19 = vadd.f32 %v9944_v11, %v553_v9  ;;  %v170_v10 = vrot.slane %v157_v56, %v10862_v3 }
 0x15a   :  { %v10842_v16 = vadd.f32 %v248_v15, %v166_v61 }
 0x15c   :  { %v252_v23 = vpop.f32.mrb[4].mxu1 }
 0x15d   :  { %v10844_v24 = vadd.f32 %v252_v23, %v162_v60  ;;  %v254_v27 = vpop.f32.mrb[5].mxu1 }
 0x15e   :  { %v10846_v28 = vadd.f32 %v254_v27, %v166_v61 }
 0x160   :  { %v258_v31 = vpop.f32.mrb[6].mxu1 }
 0x161   :  { %v10848_v13 = vadd.f32 %v258_v31, %v162_v60  ;;  %v260_v34 = vpop.f32.mrb[7].mxu1  ;;  %v6801_v31 = vmul.f32 -1.442695, %v9942_v14 }
 0x162   :  { %v10850_v37 = vadd.f32 %v260_v34, %v166_v61 }
 0x163   :  { %10100 = vpow2.f32 %v6801_v31  ;;  %v481_v31 = vrot.slane %v10832_v59, %v10862_v3 }
 0x164   :  { %v264_v39 = vpop.f32.mrb[8].mxu1 }
 0x165   :  { %v10852_v40 = vadd.f32 %v264_v39, %v162_v60  ;;  %v266_v44 = vpop.f32.mrb[9].mxu1 }
 0x166   :  { %v10854_v45 = vadd.f32 %v266_v44, %v166_v61 }
 0x168   :  { %v270_v49 = vpop.f32.mrb[10].mxu1 }
 0x169   :  { %v10856_v50 = vadd.f32 %v270_v49, %v162_v60  ;;  %v272_v52 = vpop.f32.mrb[11].mxu1 }
 0x16a   :  { %v10858_v62 = vadd.f32 %v272_v52, %v166_v61 }
 0x16c   :  { %v276_v63 = vpop.f32.mrb[12].mxu1 }
 0x16d   :  { %v10860_v1 = vadd.f32 %v276_v63, %v162_v60  ;;  %v278_v2 = vpop.f32.mrb[13].mxu1  ;;  %v10101_v14 = vpop.eup %10100 }
 0x16e   :  { %v10864_v5 = vadd.f32 %v278_v2, %v166_v61 }
 0x170   :  { %v282_v6 = vpop.f32.mrb[14].mxu1 }
 0x171   :  { %v10866_v8 = vadd.f32 %v282_v6, %v162_v60  ;;  %v284_v9 = vpop.f32.mrb[15].mxu1  ;;  %v6802_v6 = vmul.f32 -1.442695, %v9945_v19 }
 0x172   :  { %v10869_v11 = vadd.f32 %v284_v9, %v166_v61 }
 0x173   :  { %12303 = vst [vmem:[#allocation21_spill] sm:$0xff] %v10866_v8  ;;  %10102 = vpow2.f32 %v6802_v6 }
 0x174   :  { %12304 = vst [vmem:[#allocation22_spill] sm:$0xff] %v10869_v11  ;;  %v7390_v15 = vpop.f32.mrb[16].mxu1 }
 0x175   :  { %v10871_v23 = vadd.f32 %v7390_v15, %v170_v10  ;;  %v353_v27 = vpop.f32.mrb[17].mxu1  ;;  %v630_v15 = vadd.f32 1.0, %v10101_v14 }
 0x177   :  { %10104 = vrcp.f32 %v630_v15 }
 0x178   :  { %v7393_v34 = vpop.f32.mrb[18].mxu1 }
 0x179   :  { %v10873_v39 = vadd.f32 %v7393_v34, %v170_v10  ;;  %v363_v53 = vpop.f32.mrb[19].mxu1 }
 0x17a   :  { %v10875_v44 = vadd.f32 %v363_v53, %v170_v10 }
 0x17c   :  { %v7396_v49 = vpop.f32.mrb[20].mxu1 }
 0x17d   :  { %v10877_v60 = vadd.f32 %v7396_v49, %v170_v10  ;;  %v373_v52 = vpop.f32.mrb[21].mxu1  ;;  %v10103_v34 = vpop.eup %10102 }
 0x17e   :  { %v10879_v63 = vadd.f32 %v373_v52, %v170_v10  ;;  %v637_v53 = vadd.f32 1.0, %v10103_v34 }
 0x180   :  { %v7399_v56 = vpop.f32.mrb[22].mxu1  ;;  %10106 = vrcp.f32 %v637_v53 }
 0x181   :  { %v10881_v61 = vadd.f32 %v7399_v56, %v170_v10  ;;  %v383_v2 = vpop.f32.mrb[23].mxu1  ;;  %v10105_v22 = vpop.eup %10104  ;;  %v354_v56 = vadd.f32 %v353_v27, %v170_v10 }
 0x182   :  { %v10883_v9 = vadd.f32 %v383_v2, %v170_v10 }
 0x183   :  { %12305 = vst [vmem:[#allocation23_spill] sm:$0xff] %v10881_v61 }
 0x18a   :  { %v10107_v19 = vpop.eup %10106 }
 0x18b   :  { %v643_v2 = vsub.f32 1.0, %v10107_v19  ;;  %v645_v14 = vmul.f32 %v10107_v19, %v10712_v48 }
 0x194   :  { %v622_v49 = vpop.f32.mrb[24].mxu1 }
 0x195   :  { %v623_v0 = vadd.f32 %v622_v49, %v481_v31  ;;  %v7434_v52 = vpop.f32.mrb[25].mxu1 }
 0x197   :  { %v640_v61 = vmul.f32 %v10105_v22, %v623_v0  ;;  %v12306_v0 = vmov 0.0|0.0   ;;  %v12307_v22 = vmov 0.0  }
 0x199   :  { %v641_v11 = vadd.f32 %v640_v61, %v354_v56  ;;  %v1124_v56 = vld [vmem:[#allocation7 + $0x30] sm:$0xff] }
 0x19b   :  { %10108 = vtanh.f32 %v641_v11 }
 0x1a5   :  { %v10109_v8 = vpop.eup %10108 }
 0x1a6   :  { %v644_v6 = vmul.f32 %v10109_v8, %v643_v2  ;;  %v1131_v2 = vld [vmem:[#allocation7 + $0x68] sm:$0xff] }
 0x1a8   :  { %v10888_v15 = vadd.f32 %v645_v14, %v644_v6  ;;  %v1134_v6 = vld [vmem:[#allocation7 + $0x80] sm:$0xff] }
 0x1a9   :  { %v10968_v14 = vpack.c.bf16 %v1134_v6, %v1131_v2 }
 0x1aa   :  { %782 = vmatmul.mubr.f32.vlgmr.msra.gmra.mrb[2].mxu0 %v10888_v15  ;;  %7468 = vmatmul.mubr.f32.vlgmr.msra.gmra.mrb[26].mxu1 %v10888_v15 }
 0x1ab   :  { %8551 = vmatpush1.bf16.msra.mxu0 %v10661_v18  ;;  %8582 = vmatpush3.bf16.msra.mxu1 %v10767_v20  ;;  %v700_v18 = vld [vmem:[#allocation9] sm:$0x7] }
 0x1ac   :  { %8553 = vmatprep.subr.bf16.mxu0 %v10665_v26  ;;  %8583 = vmatprep.subr.bf16.mxu1 %v12306_v0  ;;  %v705_v26 = vrot.slane %v700_v18, %v10825_v54  ;;  %v713_v59 = vrot.slane %v700_v18, %v10862_v3 }
 0x1ad   :  { %1014 = vmatprep.mubr.f32.mxu0 %v12307_v22  ;;  %7502 = vmatprep.mubr.msk.f32.mxu1 %vm10517_vm0, %v12307_v22 }
 0x1af   :  { %8555 = vmatpush1.bf16.msra.mxu0 %v10667_v30  ;;  %8585 = vmatpush3.bf16.msra.mxu1 %v10774_v25  ;;  %v709_v30 = vrot.slane %v700_v18, %v10830_v57  ;;  %v1130_v18 = vld [vmem:[#allocation7 + $0x60] sm:$0xff] }
 0x1b0   :  { %8557 = vmatprep.subr.bf16.mxu0 %v10670_v35  ;;  %8586 = vmatprep.subr.bf16.mxu1 %v12306_v0  ;;  %v9947_v35 = vadd.f32 %v705_v26, %v10840_v12  ;;  %v1133_v26 = vld [vmem:[#allocation7 + $0x78] sm:$0xff] }
 0x1b3   :  { %8559 = vmatpush1.bf16.msra.mxu0 %v10673_v42  ;;  %8588 = vmatpush3.bf16.msra.mxu1 %v10779_v29 }
 0x1b4   :  { %8561 = vmatprep.subr.bf16.mxu0 %v10676_v46  ;;  %8589 = vmatprep.subr.bf16.mxu1 %v12306_v0 }
 0x1b7   :  { %8563 = vmatpush1.bf16.msra.mxu0 %v10679_v55  ;;  %8591 = vmatpush3.bf16.msra.mxu1 %v10783_v33  ;;  %v9950_v55 = vadd.f32 %v709_v30, %v10842_v16  ;;  %v10970_v30 = vpack.c.bf16 %v1133_v26, %v1130_v18 }
 0x1b8   :  { %8565 = vmatprep.subr.bf16.mxu0 %v10682_v58  ;;  %8592 = vmatprep.subr.bf16.mxu1 %v12306_v0 }
 0x1bb   :  { %8567 = vmatpush1.bf16.msra.mxu0 %v10685_v4  ;;  %8594 = vmatpush3.bf16.msra.mxu1 %v10787_v38 }
 0x1bc   :  { %8569 = vmatprep.subr.bf16.mxu0 %v10688_v7  ;;  %8595 = vmatprep.subr.bf16.mxu1 %v12306_v0 }
 0x1bf   :  { %8571 = vmatpush1.bf16.msra.mxu0 %v10691_v17  ;;  %8597 = vmatpush3.bf16.msra.mxu1 %v10793_v43 }
 0x1c0   :  { %8573 = vmatprep.subr.bf16.mxu0 %v10694_v21  ;;  %8598 = vmatprep.subr.bf16.mxu1 %v12306_v0 }
 0x1c3   :  { %8575 = vmatpush1.bf16.msra.mxu0 %v10697_v32  ;;  %8600 = vmatpush3.bf16.msra.mxu1 %v10797_v47 }
 0x1c4   :  { %8577 = vmatprep.subr.bf16.mxu0 %v10700_v36  ;;  %8601 = vmatprep.subr.bf16.mxu1 %v12306_v0 }
 0x1c7   :  { %8579 = vmatpush1.bf16.msra.mxu0 %v10703_v41  ;;  %8603 = vmatpush3.bf16.msra.mxu1 %v10801_v51 }
 0x1c8   :  { %8636 = vmatprep.subr.bf16.mxu1 %v12306_v0 }
 0x27d   :  { %v783_v42 = vpop.f32.mrb[2].mxu0  ;;  %v854_v46 = vpop.f32.mrb[26].mxu1 }
 0x27e   :  { %v9948_v58 = vadd.f32 %v9947_v35, %v783_v42  ;;  %v785_v4 = vpop.f32.mrb[3].mxu0  ;;  %v7469_v7 = vpop.f32.mrb[27].mxu1  ;;  %v855_v12 = vadd.f32 %v854_v46, %v713_v59  ;;  %v1137_v35 = vld [vmem:[#allocation7 + $0x98] sm:$0xff]  ;;  %v1140_v42 = vld [vmem:[#allocation7 + $0xb0] sm:$0xff] }
 0x27f   :  { %v9951_v17 = vadd.f32 %v9950_v55, %v785_v4  ;;  %v10974_v46 = vpack.c.bf16 %v1140_v42, %v1137_v35  ;;  %v1136_v55 = vld [vmem:[#allocation7 + $0x90] sm:$0xff]  ;;  %v1143_v7 = vld [vmem:[#allocation7 + $0xc8] sm:$0xff] }
 0x280   :  { %v6803_v21 = vmul.f32 -1.442695, %v9948_v58  ;;  %v1139_v58 = vld [vmem:[#allocation7 + $0xa8] sm:$0xff]  ;;  %v1152_v59 = vld [vmem:[#allocation7 + $0x110] sm:$0xff] }
 0x281   :  { %v6804_v32 = vmul.f32 -1.442695, %v9951_v17  ;;  %v10976_v4 = vpack.c.bf16 %v1139_v58, %v1136_v55  ;;  %v1146_v17 = vld [vmem:[#allocation7 + $0xe0] sm:$0xff] }
 0x282   :  { %10110 = vpow2.f32 %v6803_v21  ;;  %v10980_v21 = vpack.c.bf16 %v1146_v17, %v1143_v7 }
 0x283   :  { %10112 = vpow2.f32 %v6804_v32  ;;  %v1142_v32 = vld [vmem:[#allocation7 + $0xc0] sm:$0xff] }
 0x28c   :  { %v10111_v36 = vpop.eup %10110 }
 0x28d   :  { %v862_v41 = vadd.f32 1.0, %v10111_v36  ;;  %v10113_v48 = vpop.eup %10112  ;;  %v1145_v36 = vld [vmem:[#allocation7 + $0xd8] sm:$0xff] }
 0x28e   :  { %v869_v8 = vadd.f32 1.0, %v10113_v48  ;;  %v1149_v48 = vld [vmem:[#allocation7 + $0xf8] sm:$0xff] }
 0x28f   :  { %10114 = vrcp.f32 %v862_v41  ;;  %v10982_v41 = vpack.c.bf16 %v1145_v36, %v1142_v32 }
 0x290   :  { %10116 = vrcp.f32 %v869_v8  ;;  %v1148_v8 = vld [vmem:[#allocation7 + $0xf0] sm:$0xff] }
 0x299   :  { %v10115_v10 = vpop.eup %10114 }
 0x29a   :  { %v872_v11 = vmul.f32 %v10115_v10, %v855_v12  ;;  %v10117_v27 = vpop.eup %10116  ;;  %v10986_v12 = vpack.c.bf16 %v1152_v59, %v1149_v48  ;;  %v1151_v10 = vld [vmem:[#allocation7 + $0x108] sm:$0xff] }
 0x29b   :  { %v875_v61 = vsub.f32 1.0, %v10117_v27  ;;  %v877_v53 = vmul.f32 %v10117_v27, %v10888_v15  ;;  %v10988_v27 = vpack.c.bf16 %v1151_v10, %v1148_v8 }
 0x29c   :  { %v873_v16 = vadd.f32 %v872_v11, %v10871_v23  ;;  %v1155_v11 = vld [vmem:[#allocation7 + $0x128] sm:$0xff] }
 0x29e   :  { %10118 = vtanh.f32 %v873_v16  ;;  %v1158_v16 = vld [vmem:[#allocation7 + $0x140] sm:$0xff] }
 0x2a8   :  { %v10119_v34 = vpop.eup %10118 }
 0x2a9   :  { %v876_v31 = vmul.f32 %v10119_v34, %v875_v61  ;;  %v10990_v61 = vpack.c.bf16 %v1158_v16, %v1155_v11  ;;  %v1154_v34 = vld [vmem:[#allocation7 + $0x120] sm:$0xff] }
 0x2ab   :  { %v10933_v49 = vadd.f32 %v877_v53, %v876_v31  ;;  %v1157_v31 = vld [vmem:[#allocation7 + $0x138] sm:$0xff] }
 0x2ac   :  { %v1161_v53 = vld [vmem:[#allocation7 + $0x158] sm:$0xff] }
 0x2ad   :  { %1015 = vmatmul.mubr.f32.vlgmr.msra.gmra.mrb[4].mxu0 %v10933_v49  ;;  %7503 = vmatmul.mubr.f32.vlgmr.msra.gmra.mrb[28].mxu1 %v10933_v49 }
 0x2ae   :  { %8638 = vmatpush3.bf16.msra.mxu1 %v10767_v20  ;;  %1247 = vmatprep.mubr.f32.mxu0 %v12307_v22  ;;  %v1119_v20 = vld [vmem:[#allocation7 + $0x8] sm:$0xff] }
 0x2af   :  { %8639 = vmatprep.subr.bf16.mxu1 %v12306_v0  ;;  %7537 = vmatprep.mubr.msk.f32.mxu1 %vm10517_vm0, %v12307_v22 }
 0x2b2   :  { %8641 = vmatpush3.bf16.msra.mxu1 %v10774_v25  ;;  %v1122_v25 = vld [vmem:[#allocation7 + $0x20] sm:$0xff] }
 0x2b3   :  { %8642 = vmatprep.subr.bf16.mxu1 %v12306_v0 }
 0x2b6   :  { %8644 = vmatpush3.bf16.msra.mxu1 %v10779_v29  ;;  %v10956_v29 = vpack.c.bf16 %v1122_v25, %v1119_v20  ;;  %v1164_v20 = vld [vmem:[#allocation7 + $0x170] sm:$0xff]  ;;  %v10994_v25 = vpack.c.bf16 %v1157_v31, %v1154_v34 }
 0x2b7   :  { %8645 = vmatprep.subr.bf16.mxu1 %v12306_v0 }
 0x2b8   :  { %8605 = vmatprep.subr.bf16.mxu0 %v10956_v29 }
 0x2ba   :  { %8647 = vmatpush3.bf16.msra.mxu1 %v10783_v33  ;;  %v1118_v33 = vld [vmem:[#allocation7] sm:$0xff] }
 0x2bb   :  { %8648 = vmatprep.subr.bf16.mxu1 %v12306_v0 }
 0x2be   :  { %8650 = vmatpush3.bf16.msra.mxu1 %v10787_v38  ;;  %v1121_v38 = vld [vmem:[#allocation7 + $0x18] sm:$0xff] }
 0x2bf   :  { %8651 = vmatprep.subr.bf16.mxu1 %v12306_v0  ;;  %v10958_v23 = vpack.c.bf16 %v1121_v38, %v1118_v33  ;;  %v10997_v33 = vpack.c.bf16 %v1164_v20, %v1161_v53  ;;  %v1160_v38 = vld [vmem:[#allocation7 + $0x150] sm:$0xff] }
 0x2c1   :  { %8607 = vmatpush1.bf16.msra.mxu0 %v10958_v23 }
 0x2c2   :  { %8653 = vmatpush3.bf16.msra.mxu1 %v10793_v43  ;;  %v1125_v43 = vld [vmem:[#allocation7 + $0x38] sm:$0xff] }
 0x2c3   :  { %8654 = vmatprep.subr.bf16.mxu1 %v12306_v0 }
 0x2c6   :  { %8656 = vmatpush3.bf16.msra.mxu1 %v10797_v47  ;;  %v1128_v47 = vld [vmem:[#allocation7 + $0x50] sm:$0xff] }
 0x2c7   :  { %8657 = vmatprep.subr.bf16.mxu1 %v12306_v0  ;;  %v10962_v52 = vpack.c.bf16 %v1128_v47, %v1125_v43  ;;  %v1163_v43 = vld [vmem:[#allocation7 + $0x168] sm:$0xff] }
 0x2c8   :  { %v11000_v47 = vpack.c.bf16 %v1163_v43, %v1160_v38 }
 0x2c9   :  { %8609 = vmatprep.subr.bf16.mxu0 %v10962_v52 }
 0x2ca   :  { %8659 = vmatpush3.bf16.msra.mxu1 %v10801_v51  ;;  %v1127_v51 = vld [vmem:[#allocation7 + $0x48] sm:$0xff] }
 0x2cb   :  { %8692 = vmatprep.subr.bf16.mxu1 %v12306_v0  ;;  %v10964_v19 = vpack.c.bf16 %v1127_v51, %v1124_v56  ;;  %v933_v56 = vld [vmem:[#allocation9] sm:$0x7] }
 0x2cc   :  { %v938_v51 = vrot.slane %v933_v56, %v10825_v54  ;;  %v942_v2 = vrot.slane %v933_v56, %v10830_v57  ;;  %v946_v8 = vrot.slane %v933_v56, %v10862_v3  ;;  %v1356_v56 = vld [vmem:[#allocation7 + $0x28] sm:$0xff] }
 0x2cd   :  { %8611 = vmatpush1.bf16.msra.mxu0 %v10964_v19 }
 0x2ce   :  { %8613 = vmatprep.subr.bf16.mxu0 %v10968_v14  ;;  %v9953_v6 = vadd.f32 %v938_v51, %v10844_v24  ;;  %v9956_v35 = vadd.f32 %v942_v2, %v10846_v28  ;;  %v1359_v2 = vld [vmem:[#allocation7 + $0x40] sm:$0xff] }
 0x2d1   :  { %8615 = vmatpush1.bf16.msra.mxu0 %v10970_v30 }
 0x2d2   :  { %8617 = vmatprep.subr.bf16.mxu0 %v10974_v46 }
 0x2d5   :  { %8619 = vmatpush1.bf16.msra.mxu0 %v10976_v4 }
 0x2d6   :  { %8621 = vmatprep.subr.bf16.mxu0 %v10980_v21 }
 0x2d9   :  { %8623 = vmatpush1.bf16.msra.mxu0 %v10982_v41 }
 0x2da   :  { %8625 = vmatprep.subr.bf16.mxu0 %v10986_v12 }
 0x2dd   :  { %8627 = vmatpush1.bf16.msra.mxu0 %v10988_v27 }
 0x2de   :  { %8629 = vmatprep.subr.bf16.mxu0 %v10990_v61 }
 0x2e1   :  { %8631 = vmatpush1.bf16.msra.mxu0 %v10994_v25 }
 0x2e2   :  { %8633 = vmatprep.subr.bf16.mxu0 %v10997_v33 }
 0x2e5   :  { %8635 = vmatpush1.bf16.msra.mxu0 %v11000_v47 }
 0x2e6   :  { %8661 = vmatprep.subr.bf16.mxu0 %v10956_v29 }
 0x380   :  { %v1016_v18 = vpop.f32.mrb[4].mxu0  ;;  %v1087_v26 = vpop.f32.mrb[28].mxu1 }
 0x381   :  { %v9954_v42 = vadd.f32 %v9953_v6, %v1016_v18  ;;  %v1018_v55 = vpop.f32.mrb[5].mxu0  ;;  %v7504_v58 = vpop.f32.mrb[29].mxu1  ;;  %v1088_v24 = vadd.f32 %v1087_v26, %v946_v8  ;;  %v1362_v6 = vld [vmem:[#allocation7 + $0x58] sm:$0xff]  ;;  %v1365_v26 = vld [vmem:[#allocation7 + $0x70] sm:$0xff] }
 0x382   :  { %v9957_v7 = vadd.f32 %v9956_v35, %v1018_v55  ;;  %v11039_v18 = vpack.c.bf16 %v1362_v6, %v1359_v2  ;;  %v1368_v35 = vld [vmem:[#allocation7 + $0x88] sm:$0xff]  ;;  %v1371_v55 = vld [vmem:[#allocation7 + $0xa0] sm:$0xff]  ;;  %v1374_v58 = vld [vmem:[#allocation7 + $0xb8] sm:$0xff] }
 0x383   :  { %v6805_v17 = vmul.f32 -1.442695, %v9954_v42  ;;  %v11043_v42 = vpack.c.bf16 %v1368_v35, %v1365_v26 }
 0x384   :  { %v6806_v32 = vmul.f32 -1.442695, %v9957_v7  ;;  %v11047_v7 = vpack.c.bf16 %v1374_v58, %v1371_v55 }
 0x385   :  { %10120 = vpow2.f32 %v6805_v17  ;;  %v1377_v17 = vld [vmem:[#allocation7 + $0xd0] sm:$0xff] }
 0x386   :  { %10122 = vpow2.f32 %v6806_v32  ;;  %v1380_v32 = vld [vmem:[#allocation7 + $0xe8] sm:$0xff] }
 0x38f   :  { %v10121_v36 = vpop.eup %10120 }
 0x390   :  { %v1095_v48 = vadd.f32 1.0, %v10121_v36  ;;  %v10123_v59 = vpop.eup %10122  ;;  %v11051_v36 = vpack.c.bf16 %v1380_v32, %v1377_v17 }
 0x391   :  { %v1102_v10 = vadd.f32 1.0, %v10123_v59  ;;  %v1386_v59 = vld [vmem:[#allocation7 + $0x118] sm:$0xff] }
 0x392   :  { %10124 = vrcp.f32 %v1095_v48  ;;  %v1383_v48 = vld [vmem:[#allocation7 + $0x100] sm:$0xff] }
 0x393   :  { %10126 = vrcp.f32 %v1102_v10  ;;  %v11055_v8 = vpack.c.bf16 %v1386_v59, %v1383_v48  ;;  %v1389_v10 = vld [vmem:[#allocation7 + $0x130] sm:$0xff] }
 0x39c   :  { %v10125_v11 = vpop.eup %10124 }
 0x39d   :  { %v1105_v16 = vmul.f32 %v10125_v11, %v1088_v24  ;;  %v10127_v34 = vpop.eup %10126  ;;  %v1392_v24 = vld [vmem:[#allocation7 + $0x148] sm:$0xff] }
 0x39e   :  { %v1108_v31 = vsub.f32 1.0, %v10127_v34  ;;  %v1110_v38 = vmul.f32 %v10127_v34, %v10933_v49  ;;  %v11058_v11 = vpack.c.bf16 %v1392_v24, %v1389_v10 }
 0x39f   :  { %v1106_v28 = vadd.f32 %v1105_v16, %v10875_v44  ;;  %v1353_v44 = vld [vmem:[#allocation7 + $0x10] sm:$0xff]  ;;  %v1395_v16 = vld [vmem:[#allocation7 + $0x160] sm:$0xff] }
 0x3a0   :  { %v11035_v51 = vpack.c.bf16 %v1356_v56, %v1353_v44 }
 0x3a1   :  { %10128 = vtanh.f32 %v1106_v28  ;;  %v1398_v28 = vld [vmem:[#allocation7 + $0x178] sm:$0xff] }
 0x3a2   :  { %v11062_v34 = vpack.c.bf16 %v1398_v28, %v1395_v16 }
 0x3ab   :  { %v10129_v53 = vpop.eup %10128 }
 0x3ac   :  { %v1109_v20 = vmul.f32 %v10129_v53, %v1108_v31  ;;  %v1166_v31 = vld [vmem:[#allocation9] sm:$0x7] }
 0x3ad   :  { %v1171_v53 = vrot.slane %v1166_v31, %v10825_v54  ;;  %v1179_v10 = vrot.slane %v1166_v31, %v10862_v3 }
 0x3ae   :  { %v11012_v43 = vadd.f32 %v1110_v38, %v1109_v20  ;;  %v1175_v20 = vrot.slane %v1166_v31, %v10830_v57 }
 0x3af   :  { %v9959_v38 = vadd.f32 %v1171_v53, %v10848_v13 }
 0x3b0   :  { %1248 = vmatmul.mubr.f32.vlgmr.msra.gmra.mrb[6].mxu0 %v11012_v43  ;;  %7538 = vmatmul.mubr.f32.vlgmr.msra.gmra.mrb[30].mxu1 %v11012_v43  ;;  %v9962_v2 = vadd.f32 %v1175_v20, %v10850_v37 }
 0x3b1   :  { %8663 = vmatpush1.bf16.msra.mxu0 %v10958_v23  ;;  %1480 = vmatprep.mubr.f32.mxu0 %v12307_v22 }
 0x3b2   :  { %8665 = vmatprep.subr.bf16.mxu0 %v10962_v52  ;;  %7572 = vmatprep.mubr.msk.f32.mxu1 %vm10517_vm0, %v12307_v22 }
 0x3b3   :  { %8694 = vmatpush3.bf16.msra.mxu1 %v11035_v51 }
 0x3b4   :  { %8695 = vmatprep.subr.bf16.mxu1 %v12306_v0 }
 0x3b5   :  { %8667 = vmatpush1.bf16.msra.mxu0 %v10964_v19 }
 0x3b6   :  { %8669 = vmatprep.subr.bf16.mxu0 %v10968_v14 }
 0x3b7   :  { %8697 = vmatpush3.bf16.msra.mxu1 %v11039_v18 }
 0x3b8   :  { %8698 = vmatprep.subr.bf16.mxu1 %v12306_v0 }
 0x3b9   :  { %8671 = vmatpush1.bf16.msra.mxu0 %v10970_v30 }
 0x3ba   :  { %8673 = vmatprep.subr.bf16.mxu0 %v10974_v46 }
 0x3bb   :  { %8700 = vmatpush3.bf16.msra.mxu1 %v11043_v42 }
 0x3bc   :  { %8701 = vmatprep.subr.bf16.mxu1 %v12306_v0 }
 0x3bd   :  { %8675 = vmatpush1.bf16.msra.mxu0 %v10976_v4 }
 0x3be   :  { %8677 = vmatprep.subr.bf16.mxu0 %v10980_v21 }
 0x3bf   :  { %8703 = vmatpush3.bf16.msra.mxu1 %v11047_v7 }
 0x3c0   :  { %8704 = vmatprep.subr.bf16.mxu1 %v12306_v0 }
 0x3c1   :  { %8679 = vmatpush1.bf16.msra.mxu0 %v10982_v41 }
 0x3c2   :  { %8681 = vmatprep.subr.bf16.mxu0 %v10986_v12 }
 0x3c3   :  { %8706 = vmatpush3.bf16.msra.mxu1 %v11051_v36 }
 0x3c4   :  { %8707 = vmatprep.subr.bf16.mxu1 %v12306_v0 }
 0x3c5   :  { %8683 = vmatpush1.bf16.msra.mxu0 %v10988_v27 }
 0x3c6   :  { %8685 = vmatprep.subr.bf16.mxu0 %v10990_v61 }
 0x3c7   :  { %8709 = vmatpush3.bf16.msra.mxu1 %v11055_v8 }
 0x3c8   :  { %8710 = vmatprep.subr.bf16.mxu1 %v12306_v0 }
 0x3c9   :  { %8687 = vmatpush1.bf16.msra.mxu0 %v10994_v25 }
 0x3ca   :  { %8689 = vmatprep.subr.bf16.mxu0 %v10997_v33 }
 0x3cb   :  { %8712 = vmatpush3.bf16.msra.mxu1 %v11058_v11 }
 0x3cc   :  { %8713 = vmatprep.subr.bf16.mxu1 %v12306_v0 }
 0x3cd   :  { %8691 = vmatpush1.bf16.msra.mxu0 %v11000_v47 }
 0x3ce   :  { %8717 = vmatprep.subr.bf16.mxu0 %v10956_v29 }
 0x3cf   :  { %8715 = vmatpush3.bf16.msra.mxu1 %v11062_v34 }
 0x3d0   :  { %8748 = vmatprep.subr.bf16.mxu1 %v12306_v0 }
 0x483   :  { %v1249_v44 = vpop.f32.mrb[6].mxu0  ;;  %v1320_v56 = vpop.f32.mrb[30].mxu1 }
 0x484   :  { %v9960_v6 = vadd.f32 %v9959_v38, %v1249_v44  ;;  %v1251_v26 = vpop.f32.mrb[7].mxu0  ;;  %v7539_v35 = vpop.f32.mrb[31].mxu1  ;;  %v1321_v13 = vadd.f32 %v1320_v56, %v1179_v10 }
 0x485   :  { %v9963_v55 = vadd.f32 %v9962_v2, %v1251_v26 }
 0x486   :  { %v6807_v58 = vmul.f32 -1.442695, %v9960_v6 }
 0x487   :  { %v6808_v17 = vmul.f32 -1.442695, %v9963_v55 }
 0x488   :  { %10130 = vpow2.f32 %v6807_v58 }
 0x489   :  { %10132 = vpow2.f32 %v6808_v17 }
 0x492   :  { %v10131_v32 = vpop.eup %10130 }
 0x493   :  { %v1328_v48 = vadd.f32 1.0, %v10131_v32  ;;  %v10133_v59 = vpop.eup %10132 }
 0x494   :  { %v1335_v24 = vadd.f32 1.0, %v10133_v59 }
 0x495   :  { %10134 = vrcp.f32 %v1328_v48 }
 0x496   :  { %10136 = vrcp.f32 %v1335_v24 }
 0x49f   :  { %v10135_v16 = vpop.eup %10134 }
 0x4a0   :  { %v1338_v28 = vmul.f32 %v10135_v16, %v1321_v13  ;;  %v10137_v53 = vpop.eup %10136 }
 0x4a1   :  { %v1341_v20 = vsub.f32 1.0, %v10137_v53  ;;  %v1343_v2 = vmul.f32 %v10137_v53, %v11012_v43 }
 0x4a2   :  { %v1339_v37 = vadd.f32 %v1338_v28, %v10873_v39  ;;  %v1399_v39 = vld [vmem:[#allocation9] sm:$0x7] }
 0x4a3   :  { %v1404_v31 = vrot.slane %v1399_v39, %v10825_v54  ;;  %v1408_v56 = vrot.slane %v1399_v39, %v10830_v57  ;;  %v1412_v28 = vrot.slane %v1399_v39, %v10862_v3 }
 0x4a4   :  { %10138 = vtanh.f32 %v1339_v37 }
 0x4a5   :  { %v9965_v26 = vadd.f32 %v1404_v31, %v10852_v40  ;;  %v9968_v58 = vadd.f32 %v1408_v56, %v10854_v45 }
 0x4ae   :  { %v10139_v38 = vpop.eup %10138 }
 0x4af   :  { %v1342_v44 = vmul.f32 %v10139_v38, %v1341_v20 }
 0x4b1   :  { %v11074_v6 = vadd.f32 %v1343_v2, %v1342_v44 }
 0x4b3   :  { %1481 = vmatmul.mubr.f32.vlgmr.msra.gmra.mrb[8].mxu0 %v11074_v6  ;;  %7573 = vmatmul.mubr.f32.vlgmr.msra.gmra.mrb[32].mxu1 %v11074_v6 }
 0x4b4   :  { %8719 = vmatpush1.bf16.msra.mxu0 %v10958_v23  ;;  %8750 = vmatpush3.bf16.msra.mxu1 %v11035_v51 }
 0x4b5   :  { %8721 = vmatprep.subr.bf16.mxu0 %v10962_v52  ;;  %8751 = vmatprep.subr.bf16.mxu1 %v12306_v0 }
 0x4b6   :  { %1713 = vmatprep.mubr.f32.mxu0 %v12307_v22  ;;  %7607 = vmatprep.mubr.msk.f32.mxu1 %vm10517_vm0, %v12307_v22 }
 0x4b8   :  { %8723 = vmatpush1.bf16.msra.mxu0 %v10964_v19  ;;  %8753 = vmatpush3.bf16.msra.mxu1 %v11039_v18 }
 0x4b9   :  { %8725 = vmatprep.subr.bf16.mxu0 %v10968_v14  ;;  %8754 = vmatprep.subr.bf16.mxu1 %v12306_v0 }
 0x4bc   :  { %8727 = vmatpush1.bf16.msra.mxu0 %v10970_v30  ;;  %8756 = vmatpush3.bf16.msra.mxu1 %v11043_v42 }
 0x4bd   :  { %8729 = vmatprep.subr.bf16.mxu0 %v10974_v46  ;;  %8757 = vmatprep.subr.bf16.mxu1 %v12306_v0 }
 0x4c0   :  { %8731 = vmatpush1.bf16.msra.mxu0 %v10976_v4  ;;  %8759 = vmatpush3.bf16.msra.mxu1 %v11047_v7 }
 0x4c1   :  { %8733 = vmatprep.subr.bf16.mxu0 %v10980_v21  ;;  %8760 = vmatprep.subr.bf16.mxu1 %v12306_v0 }
 0x4c4   :  { %8735 = vmatpush1.bf16.msra.mxu0 %v10982_v41  ;;  %8762 = vmatpush3.bf16.msra.mxu1 %v11051_v36 }
 0x4c5   :  { %8737 = vmatprep.subr.bf16.mxu0 %v10986_v12  ;;  %8763 = vmatprep.subr.bf16.mxu1 %v12306_v0 }
 0x4c8   :  { %8739 = vmatpush1.bf16.msra.mxu0 %v10988_v27  ;;  %8765 = vmatpush3.bf16.msra.mxu1 %v11055_v8 }
 0x4c9   :  { %8741 = vmatprep.subr.bf16.mxu0 %v10990_v61  ;;  %8766 = vmatprep.subr.bf16.mxu1 %v12306_v0 }
 0x4cc   :  { %8743 = vmatpush1.bf16.msra.mxu0 %v10994_v25  ;;  %8768 = vmatpush3.bf16.msra.mxu1 %v11058_v11 }
 0x4cd   :  { %8745 = vmatprep.subr.bf16.mxu0 %v10997_v33  ;;  %8769 = vmatprep.subr.bf16.mxu1 %v12306_v0 }
 0x4d0   :  { %8747 = vmatpush1.bf16.msra.mxu0 %v11000_v47  ;;  %8771 = vmatpush3.bf16.msra.mxu1 %v11062_v34 }
 0x4d1   :  { %8773 = vmatprep.subr.bf16.mxu0 %v10956_v29  ;;  %8804 = vmatprep.subr.bf16.mxu1 %v12306_v0 }
 0x586   :  { %v1482_v35 = vpop.f32.mrb[8].mxu0  ;;  %v1553_v55 = vpop.f32.mrb[32].mxu1 }
 0x587   :  { %v9966_v17 = vadd.f32 %v9965_v26, %v1482_v35  ;;  %v1484_v32 = vpop.f32.mrb[9].mxu0  ;;  %v7574_v48 = vpop.f32.mrb[33].mxu1  ;;  %v1554_v40 = vadd.f32 %v1553_v55, %v1412_v28  ;;  %v2059_v28 = vld [vmem:[#allocation7 + $0x48] sm:$0xff] }
 0x588   :  { %v9969_v59 = vadd.f32 %v9968_v58, %v1484_v32 }
 0x589   :  { %v6809_v10 = vmul.f32 -1.442695, %v9966_v17 }
 0x58a   :  { %v6810_v29 = vmul.f32 -1.442695, %v9969_v59 }
 0x58b   :  { %10140 = vpow2.f32 %v6809_v10 }
 0x58c   :  { %10142 = vpow2.f32 %v6810_v29 }
 0x595   :  { %v10141_v24 = vpop.eup %10140 }
 0x596   :  { %v1561_v13 = vadd.f32 1.0, %v10141_v24  ;;  %v10143_v16 = vpop.eup %10142 }
 0x597   :  { %v1568_v37 = vadd.f32 1.0, %v10143_v16 }
 0x598   :  { %10144 = vrcp.f32 %v1561_v13  ;;  %v2060_v13 = vld [vmem:[#allocation7 + $0x50] sm:$0xff] }
 0x599   :  { %10146 = vrcp.f32 %v1568_v37 }
 0x5a2   :  { %v10145_v53 = vpop.eup %10144 }
 0x5a3   :  { %v1571_v20 = vmul.f32 %v10145_v53, %v1554_v40  ;;  %v10147_v38 = vpop.eup %10146  ;;  %v2066_v40 = vld [vmem:[#allocation7 + $0x80] sm:$0xff] }
 0x5a4   :  { %v1574_v44 = vsub.f32 1.0, %v10147_v38  ;;  %v1576_v56 = vmul.f32 %v10147_v38, %v11074_v6  ;;  %v2069_v38 = vld [vmem:[#allocation7 + $0x98] sm:$0xff] }
 0x5a5   :  { %v1572_v45 = vadd.f32 %v1571_v20, %v10879_v63  ;;  %v1632_v63 = vld [vmem:[#allocation9] sm:$0x7]  ;;  %v2065_v20 = vld [vmem:[#allocation7 + $0x78] sm:$0xff] }
 0x5a6   :  { %v1645_v39 = vrot.slane %v1632_v63, %v10862_v3 }
 0x5a7   :  { %10148 = vtanh.f32 %v1572_v45 }
 0x5b1   :  { %v10149_v2 = vpop.eup %10148 }
 0x5b2   :  { %v1575_v31 = vmul.f32 %v10149_v2, %v1574_v44  ;;  %v2072_v44 = vld [vmem:[#allocation7 + $0xb0] sm:$0xff] }
 0x5b3   :  { %v8840_v2 = vpack.c.bf16 %v2072_v44, %v2069_v38 }
 0x5b4   :  { %v11120_v26 = vadd.f32 %v1576_v56, %v1575_v31  ;;  %v2068_v31 = vld [vmem:[#allocation7 + $0x90] sm:$0xff]  ;;  %v2071_v56 = vld [vmem:[#allocation7 + $0xa8] sm:$0xff] }
 0x5b6   :  { %1714 = vmatmul.mubr.f32.vlgmr.msra.gmra.mrb[10].mxu0 %v11120_v26  ;;  %7608 = vmatmul.mubr.f32.vlgmr.msra.gmra.mrb[34].mxu1 %v11120_v26 }
 0x5b7   :  { %8775 = vmatpush1.bf16.msra.mxu0 %v10958_v23  ;;  %8806 = vmatpush3.bf16.msra.mxu1 %v11035_v51  ;;  %v1637_v23 = vrot.slane %v1632_v63, %v10825_v54 }
 0x5b8   :  { %8777 = vmatprep.subr.bf16.mxu0 %v10962_v52  ;;  %8807 = vmatprep.subr.bf16.mxu1 %v12306_v0  ;;  %v1641_v52 = vrot.slane %v1632_v63, %v10830_v57  ;;  %v8842_v63 = vpack.c.bf16 %v2071_v56, %v2068_v31 }
 0x5b9   :  { %1946 = vmatprep.mubr.f32.mxu0 %v12307_v22  ;;  %7642 = vmatprep.mubr.msk.f32.mxu1 %vm10517_vm0, %v12307_v22 }
 0x5bb   :  { %8779 = vmatpush1.bf16.msra.mxu0 %v10964_v19  ;;  %8809 = vmatpush3.bf16.msra.mxu1 %v11039_v18  ;;  %v9971_v19 = vadd.f32 %v1637_v23, %v10856_v50  ;;  %v2075_v23 = vld [vmem:[#allocation7 + $0xc8] sm:$0xff] }
 0x5bc   :  { %8781 = vmatprep.subr.bf16.mxu0 %v10968_v14  ;;  %8810 = vmatprep.subr.bf16.mxu1 %v12306_v0 }
 0x5bf   :  { %8783 = vmatpush1.bf16.msra.mxu0 %v10970_v30  ;;  %8812 = vmatpush3.bf16.msra.mxu1 %v11043_v42 }
 0x5c0   :  { %8785 = vmatprep.subr.bf16.mxu0 %v10974_v46  ;;  %8813 = vmatprep.subr.bf16.mxu1 %v12306_v0  ;;  %v9974_v46 = vadd.f32 %v1641_v52, %v10858_v62  ;;  %v2078_v52 = vld [vmem:[#allocation7 + $0xe0] sm:$0xff] }
 0x5c3   :  { %8787 = vmatpush1.bf16.msra.mxu0 %v10976_v4  ;;  %8815 = vmatpush3.bf16.msra.mxu1 %v11047_v7 }
 0x5c4   :  { %8789 = vmatprep.subr.bf16.mxu0 %v10980_v21  ;;  %8816 = vmatprep.subr.bf16.mxu1 %v12306_v0 }
 0x5c7   :  { %8791 = vmatpush1.bf16.msra.mxu0 %v10982_v41  ;;  %8818 = vmatpush3.bf16.msra.mxu1 %v11051_v36 }
 0x5c8   :  { %8793 = vmatprep.subr.bf16.mxu0 %v10986_v12  ;;  %8819 = vmatprep.subr.bf16.mxu1 %v12306_v0 }
 0x5cb   :  { %8795 = vmatpush1.bf16.msra.mxu0 %v10988_v27  ;;  %8821 = vmatpush3.bf16.msra.mxu1 %v11055_v8 }
 0x5cc   :  { %8797 = vmatprep.subr.bf16.mxu0 %v10990_v61  ;;  %8822 = vmatprep.subr.bf16.mxu1 %v12306_v0 }
 0x5cf   :  { %8799 = vmatpush1.bf16.msra.mxu0 %v10994_v25  ;;  %8824 = vmatpush3.bf16.msra.mxu1 %v11058_v11 }
 0x5d0   :  { %8801 = vmatprep.subr.bf16.mxu0 %v10997_v33  ;;  %8825 = vmatprep.subr.bf16.mxu1 %v12306_v0 }
 0x5d3   :  { %8803 = vmatpush1.bf16.msra.mxu0 %v11000_v47  ;;  %8827 = vmatpush3.bf16.msra.mxu1 %v11062_v34 }
 0x5d4   :  { %8860 = vmatprep.subr.bf16.mxu1 %v12306_v0 }
 0x689   :  { %v1715_v14 = vpop.f32.mrb[10].mxu0  ;;  %v1786_v30 = vpop.f32.mrb[34].mxu1 }
 0x68a   :  { %v9972_v4 = vadd.f32 %v9971_v19, %v1715_v14  ;;  %v1717_v21 = vpop.f32.mrb[11].mxu0  ;;  %v7609_v41 = vpop.f32.mrb[35].mxu1  ;;  %v1787_v50 = vadd.f32 %v1786_v30, %v1645_v39  ;;  %v8844_v19 = vpack.c.bf16 %v2078_v52, %v2075_v23  ;;  %v2074_v14 = vld [vmem:[#allocation7 + $0xc0] sm:$0xff]  ;;  %v2077_v30 = vld [vmem:[#allocation7 + $0xd8] sm:$0xff] }
 0x68b   :  { %v9975_v12 = vadd.f32 %v9974_v46, %v1717_v21  ;;  %v8846_v46 = vpack.c.bf16 %v2077_v30, %v2074_v14  ;;  %v2084_v21 = vld [vmem:[#allocation7 + $0x110] sm:$0xff]  ;;  %v2089_v39 = vld [vmem:[#allocation7 + $0x138] sm:$0xff] }
 0x68c   :  { %v6811_v27 = vmul.f32 -1.442695, %v9972_v4  ;;  %v2081_v4 = vld [vmem:[#allocation7 + $0xf8] sm:$0xff] }
 0x68d   :  { %v6812_v61 = vmul.f32 -1.442695, %v9975_v12  ;;  %v8848_v41 = vpack.c.bf16 %v2084_v21, %v2081_v4  ;;  %v2080_v12 = vld [vmem:[#allocation7 + $0xf0] sm:$0xff]  ;;  %v2292_v14 = vld [vmem:[#allocation4 + $0x198] sm:$0xff] }
 0x68e   :  { %10150 = vpow2.f32 %v6811_v27  ;;  %v2083_v27 = vld [vmem:[#allocation7 + $0x108] sm:$0xff]  ;;  %v2299_v4 = vld [vmem:[#allocation4 + $0x1d0] sm:$0xff] }
 0x68f   :  { %10152 = vpow2.f32 %v6812_v61  ;;  %v2087_v61 = vld [vmem:[#allocation7 + $0x128] sm:$0xff] }
 0x698   :  { %v10151_v25 = vpop.eup %10150 }
 0x699   :  { %v1794_v33 = vadd.f32 1.0, %v10151_v25  ;;  %v10153_v47 = vpop.eup %10152  ;;  %v8850_v25 = vpack.c.bf16 %v2083_v27, %v2080_v12  ;;  %v2297_v12 = vld [vmem:[#allocation4 + $0x1c0] sm:$0xff]  ;;  %v2300_v27 = vld [vmem:[#allocation4 + $0x1d8] sm:$0xff] }
 0x69a   :  { %v1801_v35 = vadd.f32 1.0, %v10153_v47  ;;  %v2086_v47 = vld [vmem:[#allocation7 + $0x120] sm:$0xff] }
 0x69b   :  { %10154 = vrcp.f32 %v1794_v33  ;;  %v2090_v33 = vld [vmem:[#allocation7 + $0x140] sm:$0xff] }
 0x69c   :  { %10156 = vrcp.f32 %v1801_v35  ;;  %v8852_v35 = vpack.c.bf16 %v2090_v33, %v2087_v61 }
 0x6a5   :  { %v10155_v55 = vpop.eup %10154 }
 0x6a6   :  { %v1804_v58 = vmul.f32 %v10155_v55, %v1787_v50  ;;  %v10157_v17 = vpop.eup %10156  ;;  %v2093_v50 = vld [vmem:[#allocation7 + $0x158] sm:$0xff]  ;;  %v2096_v55 = vld [vmem:[#allocation7 + $0x170] sm:$0xff] }
 0x6a7   :  { %v1807_v32 = vsub.f32 1.0, %v10157_v17  ;;  %v1809_v10 = vmul.f32 %v10157_v17, %v11120_v26  ;;  %v8856_v17 = vpack.c.bf16 %v2096_v55, %v2093_v50  ;;  %v2305_v50 = vld [vmem:[#allocation4 + $0x200] sm:$0xff]  ;;  %v2303_v55 = vld [vmem:[#allocation4 + $0x1f0] sm:$0xff] }
 0x6a8   :  { %v1805_v62 = vadd.f32 %v1804_v58, %v10877_v60  ;;  %v2051_v60 = vld [vmem:[#allocation7 + $0x8] sm:$0xff]  ;;  %v8854_v58 = vpack.c.bf16 %v2089_v39, %v2086_v47  ;;  %v2295_v47 = vld [vmem:[#allocation4 + $0x1b0] sm:$0xff] }
 0x6a9   :  { %v2298_v39 = vld [vmem:[#allocation4 + $0x1c8] sm:$0xff] }
 0x6aa   :  { %10158 = vtanh.f32 %v1805_v62  ;;  %v2092_v62 = vld [vmem:[#allocation7 + $0x150] sm:$0xff] }
 0x6b4   :  { %v10159_v48 = vpop.eup %10158 }
 0x6b5   :  { %v1808_v59 = vmul.f32 %v10159_v48, %v1807_v32  ;;  %v2095_v32 = vld [vmem:[#allocation7 + $0x168] sm:$0xff]  ;;  %v2291_v48 = vld [vmem:[#allocation4 + $0x190] sm:$0xff] }
 0x6b7   :  { %v11165_v29 = vadd.f32 %v1809_v10, %v1808_v59  ;;  %v2294_v59 = vld [vmem:[#allocation4 + $0x1a8] sm:$0xff] }
 0x6b8   :  { %v2290_v10 = vld [vmem:[#allocation4 + $0x188] sm:$0xff] }
 0x6b9   :  { %1947 = vmatmul.mubr.f32.vlgmr.msra.gmra.mrb[12].mxu0 %v11165_v29  ;;  %7643 = vmatmul.mubr.f32.vlgmr.msra.gmra.mrb[36].mxu1 %v11165_v29 }
 0x6ba   :  { %8862 = vmatpush3.bf16.msra.mxu1 %v11035_v51  ;;  %2179 = vmatprep.mubr.f32.mxu0 %v12307_v22  ;;  %v2054_v51 = vld [vmem:[#allocation7 + $0x20] sm:$0xff] }
 0x6bb   :  { %8863 = vmatprep.subr.bf16.mxu1 %v12306_v0  ;;  %7677 = vmatprep.mubr.msk.f32.mxu1 %vm10517_vm0, %v12307_v22 }
 0x6be   :  { %8865 = vmatpush3.bf16.msra.mxu1 %v11039_v18  ;;  %v8828_v18 = vpack.c.bf16 %v2054_v51, %v2051_v60  ;;  %v2293_v60 = vld [vmem:[#allocation4 + $0x1a0] sm:$0xff]  ;;  %v8916_v51 = vpack.c.bf16 %v2294_v59, %v2291_v48  ;;  %v2304_v59 = vld [vmem:[#allocation4 + $0x1f8] sm:$0xff] }
 0x6bf   :  { %8866 = vmatprep.subr.bf16.mxu1 %v12306_v0  ;;  %v2301_v48 = vld [vmem:[#allocation4 + $0x1e0] sm:$0xff] }
 0x6c0   :  { %8829 = vmatprep.subr.bf16.mxu0 %v8828_v18  ;;  %v8858_v18 = vpack.c.bf16 %v2095_v32, %v2092_v62  ;;  %v8890_v62 = vpack.c.bf16 %v2298_v39, %v2295_v47 }
 0x6c2   :  { %8868 = vmatpush3.bf16.msra.mxu1 %v11043_v42  ;;  %v2050_v42 = vld [vmem:[#allocation7] sm:$0xff] }
 0x6c3   :  { %8869 = vmatprep.subr.bf16.mxu1 %v12306_v0 }
 0x6c6   :  { %8871 = vmatpush3.bf16.msra.mxu1 %v11047_v7  ;;  %v2053_v7 = vld [vmem:[#allocation7 + $0x18] sm:$0xff] }
 0x6c7   :  { %8872 = vmatprep.subr.bf16.mxu1 %v12306_v0  ;;  %v8830_v24 = vpack.c.bf16 %v2053_v7, %v2050_v42  ;;  %v8884_v42 = vpack.c.bf16 %v2293_v60, %v2290_v10  ;;  %v1865_v7 = vld [vmem:[#allocation9] sm:$0x7]  ;;  %v2308_v10 = vld [vmem:[#allocation4 + $0x218] sm:$0xff]  ;;  %v2311_v60 = vld [vmem:[#allocation4 + $0x230] sm:$0xff] }
 0x6c9   :  { %8831 = vmatpush1.bf16.msra.mxu0 %v8830_v24  ;;  %v1870_v24 = vrot.slane %v1865_v7, %v10825_v54 }
 0x6ca   :  { %8874 = vmatpush3.bf16.msra.mxu1 %v11051_v36  ;;  %v2057_v36 = vld [vmem:[#allocation7 + $0x38] sm:$0xff] }
 0x6cb   :  { %8875 = vmatprep.subr.bf16.mxu1 %v12306_v0  ;;  %v8832_v16 = vpack.c.bf16 %v2060_v13, %v2057_v36  ;;  %v1874_v36 = vrot.slane %v1865_v7, %v10830_v57  ;;  %v9977_v13 = vadd.f32 %v1870_v24, %v10860_v1 }
 0x6cd   :  { %8833 = vmatprep.subr.bf16.mxu0 %v8832_v16 }
 0x6ce   :  { %8877 = vmatpush3.bf16.msra.mxu1 %v11055_v8  ;;  %v2056_v8 = vld [vmem:[#allocation7 + $0x30] sm:$0xff] }
 0x6cf   :  { %8878 = vmatprep.subr.bf16.mxu1 %v12306_v0  ;;  %v8834_v37 = vpack.c.bf16 %v2059_v28, %v2056_v8  ;;  %v9980_v28 = vadd.f32 %v1874_v36, %v10864_v5  ;;  %v2307_v36 = vld [vmem:[#allocation4 + $0x210] sm:$0xff] }
 0x6d1   :  { %8835 = vmatpush1.bf16.msra.mxu0 %v8834_v37 }
 0x6d2   :  { %8880 = vmatpush3.bf16.msra.mxu1 %v11058_v11  ;;  %v2063_v11 = vld [vmem:[#allocation7 + $0x68] sm:$0xff] }
 0x6d3   :  { %8881 = vmatprep.subr.bf16.mxu1 %v12306_v0  ;;  %v8836_v53 = vpack.c.bf16 %v2066_v40, %v2063_v11 }
 0x6d5   :  { %8837 = vmatprep.subr.bf16.mxu0 %v8836_v53 }
 0x6d6   :  { %8883 = vmatpush3.bf16.msra.mxu1 %v11062_v34  ;;  %v2062_v34 = vld [vmem:[#allocation7 + $0x60] sm:$0xff] }
 0x6d7   :  { %v8838_v45 = vpack.c.bf16 %v2065_v20, %v2062_v34  ;;  %8917 = vmatprep.subr.bf16.mxu1 %v8916_v51 }
 0x6d9   :  { %8839 = vmatpush1.bf16.msra.mxu0 %v8838_v45 }
 0x6da   :  { %8841 = vmatprep.subr.bf16.mxu0 %v8840_v2  ;;  %v1878_v2 = vrot.slane %v1865_v7, %v10862_v3  ;;  %v8894_v7 = vpack.c.bf16 %v2304_v59, %v2301_v48  ;;  %v2612_v48 = vld [vmem:[#allocation7 + $0x1c8] sm:$0xff] }
 0x6dd   :  { %8843 = vmatpush1.bf16.msra.mxu0 %v8842_v63 }
 0x6de   :  { %8845 = vmatprep.subr.bf16.mxu0 %v8844_v19  ;;  %v2289_v19 = vld [vmem:[#allocation4 + $0x180] sm:$0xff] }
 0x6df   :  { %v8886_v61 = vpack.c.bf16 %v2292_v14, %v2289_v19  ;;  %v2327_v19 = vld [vmem:[#allocation4 + $0x2b0] sm:$0xff]  ;;  %v2330_v14 = vld [vmem:[#allocation4 + $0x2c8] sm:$0xff] }
 0x6e1   :  { %8847 = vmatpush1.bf16.msra.mxu0 %v8846_v46  ;;  %v2296_v46 = vld [vmem:[#allocation4 + $0x1b8] sm:$0xff] }
 0x6e2   :  { %8849 = vmatprep.subr.bf16.mxu0 %v8848_v41  ;;  %v8888_v33 = vpack.c.bf16 %v2299_v4, %v2296_v46  ;;  %v8940_v4 = vpack.c.bf16 %v2330_v14, %v2327_v19  ;;  %v2605_v19 = vld [vmem:[#allocation7 + $0x190] sm:$0xff]  ;;  %v2608_v14 = vld [vmem:[#allocation7 + $0x1a8] sm:$0xff] }
 0x6e5   :  { %8851 = vmatpush1.bf16.msra.mxu0 %v8850_v25 }
 0x6e6   :  { %8853 = vmatprep.subr.bf16.mxu0 %v8852_v35  ;;  %v8920_v35 = vpack.c.bf16 %v2300_v27, %v2297_v12  ;;  %v2332_v12 = vld [vmem:[#allocation4 + $0x2d8] sm:$0xff]  ;;  %v2335_v27 = vld [vmem:[#allocation4 + $0x2f0] sm:$0xff] }
 0x6e7   :  { %v8912_v39 = vpack.c.bf16 %v2335_v27, %v2332_v12  ;;  %v2645_v12 = vld [vmem:[#allocation7 + $0x2d0] sm:$0xff]  ;;  %v2648_v27 = vld [vmem:[#allocation7 + $0x2e8] sm:$0xff] }
 0x6e9   :  { %8855 = vmatpush1.bf16.msra.mxu0 %v8854_v58  ;;  %v2306_v58 = vld [vmem:[#allocation4 + $0x208] sm:$0xff] }
 0x6ea   :  { %8857 = vmatprep.subr.bf16.mxu0 %v8856_v17  ;;  %v8924_v32 = vpack.c.bf16 %v2306_v58, %v2303_v55  ;;  %v2603_v58 = vld [vmem:[#allocation7 + $0x180] sm:$0xff] }
 0x6ed   :  { %8859 = vmatpush1.bf16.msra.mxu0 %v8858_v18  ;;  %v2309_v18 = vld [vmem:[#allocation4 + $0x220] sm:$0xff] }
 0x6ee   :  { %8885 = vmatprep.subr.bf16.mxu0 %v8884_v42  ;;  %v2312_v42 = vld [vmem:[#allocation4 + $0x238] sm:$0xff] }
 0x6ef   :  { %v8928_v24 = vpack.c.bf16 %v2312_v42, %v2309_v18  ;;  %v2615_v42 = vld [vmem:[#allocation7 + $0x1e0] sm:$0xff] }
 0x78c   :  { %v1948_v16 = vpop.f32.mrb[12].mxu0  ;;  %v2019_v8 = vpop.f32.mrb[36].mxu1 }
 0x78d   :  { %v9978_v37 = vadd.f32 %v9977_v13, %v1948_v16  ;;  %v1950_v11 = vpop.f32.mrb[13].mxu0  ;;  %v7644_v40 = vpop.f32.mrb[37].mxu1  ;;  %v2020_v1 = vadd.f32 %v2019_v8, %v1878_v2  ;;  %v2310_v13 = vld [vmem:[#allocation4 + $0x228] sm:$0xff]  ;;  %v2317_v8 = vld [vmem:[#allocation4 + $0x260] sm:$0xff]  ;;  %v2324_v2 = vld [vmem:[#allocation4 + $0x298] sm:$0xff] }
 0x78e   :  { %v9981_v53 = vadd.f32 %v9980_v28, %v1950_v11  ;;  %v2314_v16 = vld [vmem:[#allocation4 + $0x248] sm:$0xff]  ;;  %v2315_v28 = vld [vmem:[#allocation4 + $0x250] sm:$0xff]  ;;  %v8898_v11 = vpack.c.bf16 %v2310_v13, %v2307_v36 }
 0x78f   :  { %v6813_v34 = vmul.f32 -1.442695, %v9978_v37  ;;  %v2318_v37 = vld [vmem:[#allocation4 + $0x268] sm:$0xff]  ;;  %v8900_v40 = vpack.c.bf16 %v2317_v8, %v2314_v16  ;;  %v2625_v36 = vld [vmem:[#allocation7 + $0x230] sm:$0xff] }
 0x790   :  { %v6814_v20 = vmul.f32 -1.442695, %v9981_v53  ;;  %v8932_v53 = vpack.c.bf16 %v2318_v37, %v2315_v28  ;;  %v2621_v16 = vld [vmem:[#allocation7 + $0x210] sm:$0xff]  ;;  %v2624_v8 = vld [vmem:[#allocation7 + $0x228] sm:$0xff] }
 0x791   :  { %10160 = vpow2.f32 %v6813_v34  ;;  %v2313_v34 = vld [vmem:[#allocation4 + $0x240] sm:$0xff]  ;;  %v11241_v28 = vpack.c.bf16 %v2624_v8, %v2621_v16  ;;  %v2628_v37 = vld [vmem:[#allocation7 + $0x248] sm:$0xff] }
 0x792   :  { %10162 = vpow2.f32 %v6814_v20  ;;  %v2316_v20 = vld [vmem:[#allocation4 + $0x258] sm:$0xff]  ;;  %v2098_v16 = vld [vmem:[#allocation9] sm:$0x7] }
 0x793   :  { %v2103_v8 = vrot.slane %v2098_v16, %v10825_v54 }
 0x79b   :  { %v10161_v45 = vpop.eup %10160 }
 0x79c   :  { %v2027_v38 = vadd.f32 1.0, %v10161_v45  ;;  %v10163_v44 = vpop.eup %10162  ;;  %v2320_v45 = vld [vmem:[#allocation4 + $0x278] sm:$0xff] }
 0x79d   :  { %v2034_v31 = vadd.f32 1.0, %v10163_v44  ;;  %v2321_v44 = vld [vmem:[#allocation4 + $0x280] sm:$0xff] }
 0x79e   :  { %10164 = vrcp.f32 %v2027_v38  ;;  %v2323_v38 = vld [vmem:[#allocation4 + $0x290] sm:$0xff] }
 0x79f   :  { %10166 = vrcp.f32 %v2034_v31  ;;  %v8902_v31 = vpack.c.bf16 %v2316_v20, %v2313_v34  ;;  %v2630_v34 = vld [vmem:[#allocation7 + $0x258] sm:$0xff] }
 0x7a8   :  { %v10165_v56 = vpop.eup %10164 }
 0x7a9   :  { %v2037_v63 = vmul.f32 %v10165_v56, %v2020_v1  ;;  %v10167_v23 = vpop.eup %10166  ;;  %v8904_v1 = vpack.c.bf16 %v2323_v38, %v2320_v45  ;;  %v8936_v56 = vpack.c.bf16 %v2324_v2, %v2321_v44  ;;  %v2634_v45 = vld [vmem:[#allocation7 + $0x278] sm:$0xff]  ;;  %v2637_v38 = vld [vmem:[#allocation7 + $0x290] sm:$0xff] }
 0x7aa   :  { %v2040_v52 = vsub.f32 1.0, %v10167_v23  ;;  %v2042_v41 = vmul.f32 %v10167_v23, %v11165_v29  ;;  %v2326_v23 = vld [vmem:[#allocation4 + $0x2a8] sm:$0xff]  ;;  %v11251_v44 = vpack.c.bf16 %v2637_v38, %v2634_v45  ;;  %v2633_v2 = vld [vmem:[#allocation7 + $0x270] sm:$0xff] }
 0x7ab   :  { %v2038_v5 = vadd.f32 %v2037_v63, %v10883_v9  ;;  %v2302_v9 = vld [vmem:[#allocation4 + $0x1e8] sm:$0xff]  ;;  %v2319_v63 = vld [vmem:[#allocation4 + $0x270] sm:$0xff] }
 0x7ac   :  { %v8892_v17 = vpack.c.bf16 %v2305_v50, %v2302_v9  ;;  %v2334_v50 = vld [vmem:[#allocation4 + $0x2e8] sm:$0xff] }
 0x7ad   :  { %10168 = vtanh.f32 %v2038_v5  ;;  %v2322_v5 = vld [vmem:[#allocation4 + $0x288] sm:$0xff] }
 0x7ae   :  { %v12309_v38 = vld [vmem:[#allocation22_spill] sm:$0xff] }
 0x7b7   :  { %v10169_v30 = vpop.eup %10168 }
 0x7b8   :  { %v2041_v21 = vmul.f32 %v10169_v30, %v2040_v52  ;;  %v2329_v52 = vld [vmem:[#allocation4 + $0x2c0] sm:$0xff]  ;;  %v8906_v30 = vpack.c.bf16 %v2322_v5, %v2319_v63 }
 0x7b9   :  { %v8908_v46 = vpack.c.bf16 %v2329_v52, %v2326_v23  ;;  %v2643_v63 = vld [vmem:[#allocation7 + $0x2c0] sm:$0xff]  ;;  %v2642_v52 = vld [vmem:[#allocation7 + $0x2b8] sm:$0xff] }
 0x7ba   :  { %v11194_v25 = vadd.f32 %v2042_v41, %v2041_v21  ;;  %v2325_v21 = vld [vmem:[#allocation4 + $0x2a0] sm:$0xff]  ;;  %v2328_v41 = vld [vmem:[#allocation4 + $0x2b8] sm:$0xff] }
 0x7bb   :  { %v8910_v47 = vpack.c.bf16 %v2328_v41, %v2325_v21  ;;  %v2639_v5 = vld [vmem:[#allocation7 + $0x2a0] sm:$0xff]  ;;  %v2649_v21 = vld [vmem:[#allocation7 + $0x2f0] sm:$0xff] }
 0x7bc   :  { %2180 = vmatmul.mubr.f32.vlgmr.msra.gmra.mrb[14].mxu0 %v11194_v25  ;;  %7678 = vmatmul.mubr.f32.vlgmr.msra.gmra.mrb[38].mxu1 %v11194_v25 }
 0x7bd   :  { %8887 = vmatpush1.bf16.msra.mxu0 %v8886_v61  ;;  %8919 = vmatpush3.bf16.msra.mxu1 %v8916_v51  ;;  %v8896_v51 = vpack.c.bf16 %v2311_v60, %v2308_v10  ;;  %v2333_v61 = vld [vmem:[#allocation4 + $0x2e0] sm:$0xff]  ;;  %v2616_v10 = vld [vmem:[#allocation7 + $0x1e8] sm:$0xff] }
 0x7be   :  { %7712 = vmatprep.mubr.f32.mxu1 %v10888_v15  ;;  %8889 = vmatprep.subr.bf16.mxu0 %v8888_v33  ;;  %v2336_v33 = vld [vmem:[#allocation4 + $0x2f8] sm:$0xff]  ;;  %v2619_v60 = vld [vmem:[#allocation7 + $0x200] sm:$0xff] }
 0x7bf   :  { %8921 = vmatprep.subr.bf16.mxu1 %v8920_v35  ;;  %2419 = vmatprep.mubr.f32.mxu0 %v12307_v22  ;;  %v8944_v9 = vpack.c.bf16 %v2336_v33, %v2333_v61  ;;  %v11233_v18 = vpack.c.bf16 %v2619_v60, %v2616_v10  ;;  %v11270_v61 = vpack.c.bf16 %v2648_v27, %v2645_v12  ;;  %v2611_v33 = vld [vmem:[#allocation7 + $0x1c0] sm:$0xff]  ;;  %v2641_v10 = vld [vmem:[#allocation7 + $0x2b0] sm:$0xff]  ;;  %v2644_v60 = vld [vmem:[#allocation7 + $0x2c8] sm:$0xff] }
 0x7c0   :  { %v2111_v12 = vrot.slane %v2098_v16, %v10862_v3 }
 0x7c1   :  { %8891 = vmatpush1.bf16.msra.mxu0 %v8890_v62  ;;  %8923 = vmatpush3.bf16.msra.mxu1 %v8920_v35  ;;  %v2331_v35 = vld [vmem:[#allocation4 + $0x2d0] sm:$0xff] }
 0x7c2   :  { %8893 = vmatprep.subr.bf16.mxu0 %v8892_v17  ;;  %8925 = vmatprep.subr.bf16.mxu1 %v8924_v32  ;;  %v8914_v55 = vpack.c.bf16 %v2334_v50, %v2331_v35  ;;  %v2620_v35 = vld [vmem:[#allocation7 + $0x208] sm:$0xff]  ;;  %v2623_v50 = vld [vmem:[#allocation7 + $0x220] sm:$0xff] }
 0x7c5   :  { %8895 = vmatpush1.bf16.msra.mxu0 %v8894_v7  ;;  %8927 = vmatpush3.bf16.msra.mxu1 %v8924_v32  ;;  %v2609_v32 = vld [vmem:[#allocation7 + $0x1b0] sm:$0xff]  ;;  %v2618_v7 = vld [vmem:[#allocation7 + $0x1f8] sm:$0xff] }
 0x7c6   :  { %8897 = vmatprep.subr.bf16.mxu0 %v8896_v51  ;;  %8929 = vmatprep.subr.bf16.mxu1 %v8928_v24  ;;  %v11229_v59 = vpack.c.bf16 %v2612_v48, %v2609_v32  ;;  %v11235_v51 = vpack.c.bf16 %v2618_v7, %v2615_v42  ;;  %v2638_v32 = vld [vmem:[#allocation7 + $0x298] sm:$0xff]  ;;  %v11293_v42 = vpack.c.bf16 %v2644_v60, %v2641_v10  ;;  %v2647_v7 = vld [vmem:[#allocation7 + $0x2e0] sm:$0xff] }
 0x7c9   :  { %8899 = vmatpush1.bf16.msra.mxu0 %v8898_v11  ;;  %8931 = vmatpush3.bf16.msra.mxu1 %v8928_v24  ;;  %v2622_v24 = vld [vmem:[#allocation7 + $0x218] sm:$0xff]  ;;  %v2631_v11 = vld [vmem:[#allocation7 + $0x260] sm:$0xff] }
 0x7ca   :  { %8901 = vmatprep.subr.bf16.mxu0 %v8900_v40  ;;  %8933 = vmatprep.subr.bf16.mxu1 %v8932_v53  ;;  %v11239_v13 = vpack.c.bf16 %v2625_v36, %v2622_v24  ;;  %v11245_v40 = vpack.c.bf16 %v2631_v11, %v2628_v37  ;;  %v2650_v24 = vld [vmem:[#allocation7 + $0x2f8] sm:$0xff]  ;;  %v2107_v37 = vrot.slane %v2098_v16, %v10830_v57 }
 0x7cb   :  { %v11297_v36 = vpack.c.bf16 %v2650_v24, %v2647_v7  ;;  %v12308_v11 = vld [vmem:[#allocation21_spill] sm:$0xff] }
 0x7cd   :  { %8903 = vmatpush1.bf16.msra.mxu0 %v8902_v31  ;;  %8935 = vmatpush3.bf16.msra.mxu1 %v8932_v53  ;;  %v2627_v53 = vld [vmem:[#allocation7 + $0x240] sm:$0xff]  ;;  %v2636_v31 = vld [vmem:[#allocation7 + $0x288] sm:$0xff] }
 0x7ce   :  { %8905 = vmatprep.subr.bf16.mxu0 %v8904_v1  ;;  %8937 = vmatprep.subr.bf16.mxu1 %v8936_v56  ;;  %v11247_v20 = vpack.c.bf16 %v2630_v34, %v2627_v53  ;;  %v11253_v1 = vpack.c.bf16 %v2636_v31, %v2633_v2  ;;  %v9983_v53 = vadd.f32 %v2103_v8, %v12308_v11  ;;  %v11322_v11 = vld [vmem:[#allocation12 + $0x8] sm:$0xff] }
 0x7cf   :  { %v9986_v2 = vadd.f32 %v2107_v37, %v12309_v38 }
 0x7d1   :  { %8907 = vmatpush1.bf16.msra.mxu0 %v8906_v30  ;;  %8939 = vmatpush3.bf16.msra.mxu1 %v8936_v56  ;;  %v2640_v56 = vld [vmem:[#allocation7 + $0x2a8] sm:$0xff]  ;;  %v11259_v30 = vpack.c.bf16 %v2642_v52, %v2639_v5 }
 0x7d2   :  { %8909 = vmatprep.subr.bf16.mxu0 %v8908_v46  ;;  %8941 = vmatprep.subr.bf16.mxu1 %v8940_v4  ;;  %v11257_v23 = vpack.c.bf16 %v2643_v63, %v2640_v56  ;;  %v11261_v46 = vpack.c.bf16 %v2608_v14, %v2605_v19 }
 0x7d5   :  { %8911 = vmatpush1.bf16.msra.mxu0 %v8910_v47  ;;  %8943 = vmatpush3.bf16.msra.mxu1 %v8940_v4  ;;  %v2646_v4 = vld [vmem:[#allocation7 + $0x2d8] sm:$0xff] }
 0x7d6   :  { %8913 = vmatprep.subr.bf16.mxu0 %v8912_v39  ;;  %8945 = vmatprep.subr.bf16.mxu1 %v8944_v9  ;;  %v11264_v41 = vpack.c.bf16 %v2649_v21, %v2646_v4  ;;  %v2614_v47 = vld [vmem:[#allocation7 + $0x1d8] sm:$0xff] }
 0x7d7   :  { %v11272_v39 = vpack.c.bf16 %v2614_v47, %v2611_v33 }
 0x7d9   :  { %8915 = vmatpush1.bf16.msra.mxu0 %v8914_v55  ;;  %8947 = vmatpush3.bf16.msra.mxu1 %v8944_v9  ;;  %v2617_v9 = vld [vmem:[#allocation7 + $0x1f0] sm:$0xff] }
 0x7da   :  { %8980 = vmatprep.subr.bf16.mxu1 %v12306_v0  ;;  %v11278_v55 = vpack.c.bf16 %v2620_v35, %v2617_v9  ;;  %v12310_v35 = vld [vmem:[#allocation23_spill] sm:$0xff] }
 0x7dc   :  { %2420 = vmatmul.mubr.f32.vlgmr.msra.gmra.mrb[16].mxu0 %v10888_v15  ;;  %7713 = vmatmul.mubr.f32.vlgmr.msra.gmra.mrb[40].mxu1 %v10933_v49  ;;  %v2604_v15 = vld [vmem:[#allocation7 + $0x188] sm:$0xff] }
 0x7dd   :  { %7715 = vmatprep.mubr.f32.mxu1 %v11012_v43  ;;  %2425 = vmatprep.mubr.f32.mxu0 %v12307_v22 }
 0x7de   :  { %8982 = vmatpush3.bf16.msra.mxu1 %v11261_v46 }
 0x7df   :  { %8983 = vmatprep.subr.bf16.mxu1 %v12306_v0 }
 0x7e0   :  { %2426 = vmatmul.mubr.f32.gmra.mrb[18].mxu0 %v10933_v49  ;;  %7716 = vmatmul.mubr.f32.gmra.mrb[42].mxu1 %v11074_v6  ;;  %v2607_v49 = vld [vmem:[#allocation7 + $0x1a0] sm:$0xff] }
 0x7e1   :  { %7718 = vmatprep.mubr.f32.mxu1 %v11120_v26  ;;  %2431 = vmatprep.mubr.f32.mxu0 %v12307_v22 }
 0x7e2   :  { %8985 = vmatpush3.bf16.msra.mxu1 %v11272_v39 }
 0x7e3   :  { %8986 = vmatprep.subr.bf16.mxu1 %v12306_v0 }
 0x7e4   :  { %2432 = vmatmul.mubr.f32.gmra.mrb[20].mxu0 %v11012_v43  ;;  %7719 = vmatmul.mubr.f32.gmra.mrb[44].mxu1 %v11165_v29  ;;  %v11221_v43 = vpack.c.bf16 %v2607_v49, %v2604_v15  ;;  %v2626_v15 = vld [vmem:[#allocation7 + $0x238] sm:$0xff] }
 0x7e5   :  { %7721 = vmatprep.mubr.f32.mxu1 %v11194_v25  ;;  %2437 = vmatprep.mubr.f32.mxu0 %v12307_v22  ;;  %v11281_v49 = vpack.c.bf16 %v2626_v15, %v2623_v50 }
 0x7e6   :  { %8949 = vmatprep.subr.bf16.mxu0 %v11221_v43  ;;  %8988 = vmatpush3.bf16.msra.mxu1 %v11278_v55 }
 0x7e7   :  { %8989 = vmatprep.subr.bf16.mxu1 %v12306_v0 }
 0x7e8   :  { %2438 = vmatmul.mubr.f32.gmra.mrb[22].mxu0 %v11074_v6  ;;  %v2606_v6 = vld [vmem:[#allocation7 + $0x198] sm:$0xff] }
 0x7e9   :  { %2443 = vmatprep.mubr.f32.mxu0 %v12307_v22  ;;  %v11223_v62 = vpack.c.bf16 %v2606_v6, %v2603_v58  ;;  %v2629_v58 = vld [vmem:[#allocation7 + $0x250] sm:$0xff]  ;;  %v2632_v6 = vld [vmem:[#allocation7 + $0x268] sm:$0xff] }
 0x7ea   :  { %8991 = vmatpush3.bf16.msra.mxu1 %v11281_v49 }
 0x7eb   :  { %8951 = vmatpush1.bf16.msra.mxu0 %v11223_v62  ;;  %8992 = vmatprep.subr.bf16.mxu1 %v12306_v0 }
 0x7ec   :  { %2444 = vmatmul.mubr.f32.gmra.mrb[24].mxu0 %v11120_v26  ;;  %v2610_v26 = vld [vmem:[#allocation7 + $0x1b8] sm:$0xff] }
 0x7ed   :  { %2449 = vmatprep.mubr.f32.mxu0 %v12307_v22 }
 0x7f0   :  { %2450 = vmatmul.mubr.f32.gmra.mrb[26].mxu0 %v11165_v29  ;;  %v2613_v29 = vld [vmem:[#allocation7 + $0x1d0] sm:$0xff] }
 0x7f1   :  { %2455 = vmatprep.mubr.f32.mxu0 %v12307_v22  ;;  %v11227_v17 = vpack.c.bf16 %v2613_v29, %v2610_v26  ;;  %v11285_v26 = vpack.c.bf16 %v2632_v6, %v2629_v58  ;;  %v2635_v29 = vld [vmem:[#allocation7 + $0x280] sm:$0xff] }
 0x7f2   :  { %v11289_v48 = vpack.c.bf16 %v2638_v32, %v2635_v29 }
 0x7f3   :  { %8953 = vmatprep.subr.bf16.mxu0 %v11227_v17  ;;  %8994 = vmatpush3.bf16.msra.mxu1 %v11285_v26 }
 0x7f4   :  { %2456 = vmatmul.mubr.f32.gmra.mrb[28].mxu0 %v11194_v25  ;;  %8995 = vmatprep.subr.bf16.mxu1 %v12306_v0 }
 0x7f5   :  { %2461 = vmatprep.mubr.f32.mxu0 %v12307_v22  ;;  %8955 = vmatpush1.bf16.msra.mxu0 %v11229_v59 }
 0x7f6   :  { %8957 = vmatprep.subr.bf16.mxu0 %v11233_v18 }
 0x7f7   :  { %8997 = vmatpush3.bf16.msra.mxu1 %v11289_v48 }
 0x7f8   :  { %8998 = vmatprep.subr.bf16.mxu1 %v12306_v0 }
 0x7f9   :  { %8959 = vmatpush1.bf16.msra.mxu0 %v11235_v51 }
 0x7fa   :  { %8961 = vmatprep.subr.bf16.mxu0 %v11239_v13 }
 0x7fb   :  { %9000 = vmatpush3.bf16.msra.mxu1 %v11293_v42 }
 0x7fc   :  { %9001 = vmatprep.subr.bf16.mxu1 %v12306_v0 }
 0x7fd   :  { %8963 = vmatpush1.bf16.msra.mxu0 %v11241_v28 }
 0x7fe   :  { %8965 = vmatprep.subr.bf16.mxu0 %v11245_v40 }
 0x7ff   :  { %9003 = vmatpush3.bf16.msra.mxu1 %v11297_v36 }
 0x800   :  { %9036 = vmatprep.subr.bf16.mxu1 %v12306_v0 }
 0x801   :  { %8967 = vmatpush1.bf16.msra.mxu0 %v11247_v20 }
 0x802   :  { %8969 = vmatprep.subr.bf16.mxu0 %v11251_v44 }
 0x805   :  { %8971 = vmatpush1.bf16.msra.mxu0 %v11253_v1 }
 0x806   :  { %8973 = vmatprep.subr.bf16.mxu0 %v11257_v23 }
 0x809   :  { %8975 = vmatpush1.bf16.msra.mxu0 %v11259_v30 }
 0x80a   :  { %8977 = vmatprep.subr.bf16.mxu0 %v11264_v41 }
 0x80d   :  { %8979 = vmatpush1.bf16.msra.mxu0 %v11270_v61 }
 0x80e   :  { %9005 = vmatprep.subr.bf16.mxu0 %v11221_v43 }
 0x88f   :  { %v2181_v34 = vpop.f32.mrb[14].mxu0  ;;  %v2252_v45 = vpop.f32.mrb[38].mxu1 }
 0x890   :  { %v9984_v31 = vadd.f32 %v9983_v53, %v2181_v34  ;;  %v2183_v56 = vpop.f32.mrb[15].mxu0  ;;  %v7679_v63 = vpop.f32.mrb[39].mxu1  ;;  %v2253_v33 = vadd.f32 %v2252_v45, %v2111_v12  ;;  %v6817_v53 = vld [vmem:[%s12292_s3 + $0x3] sm:$0x7] }
 0x891   :  { %v9987_v5 = vadd.f32 %v9986_v2, %v2183_v56  ;;  %v11367_v34 = vrot.slane %v6817_v53, %v10825_v54  ;;  %v11373_v2 = vrot.slane %v6817_v53, %v10830_v57 }
 0x892   :  { %v6815_v52 = vmul.f32 -1.442695, %v9984_v31 }
 0x893   :  { %v6816_v19 = vmul.f32 -1.442695, %v9987_v5 }
 0x894   :  { %10170 = vpow2.f32 %v6815_v52 }
 0x895   :  { %10172 = vpow2.f32 %v6816_v19 }
 0x89e   :  { %v10171_v14 = vpop.eup %10170 }
 0x89f   :  { %v2260_v4 = vadd.f32 1.0, %v10171_v14  ;;  %v10173_v21 = vpop.eup %10172 }
 0x8a0   :  { %v2267_v27 = vadd.f32 1.0, %v10173_v21 }
 0x8a1   :  { %10174 = vrcp.f32 %v2260_v4 }
 0x8a2   :  { %10176 = vrcp.f32 %v2267_v27 }
 0x8ab   :  { %v10175_v47 = vpop.eup %10174 }
 0x8ac   :  { %v2270_v9 = vmul.f32 %v10175_v47, %v2253_v33  ;;  %v10177_v32 = vpop.eup %10176 }
 0x8ad   :  { %v2273_v7 = vsub.f32 1.0, %v10177_v32  ;;  %v2275_v8 = vmul.f32 %v10177_v32, %v11194_v25  ;;  %v2652_v25 = vld [vmem:[#allocation9 + $0x3] sm:$0x7]  ;;  %v11382_v32 = vrot.slane %v6817_v53, %v10862_v3 }
 0x8ae   :  { %v2271_v50 = vadd.f32 %v2270_v9, %v12310_v35  ;;  %v2657_v45 = vrot.slane %v2652_v25, %v10825_v54  ;;  %v2661_v31 = vrot.slane %v2652_v25, %v10830_v57  ;;  %v2665_v35 = vrot.slane %v2652_v25, %v10862_v3 }
 0x8af   :  { %v11308_v15 = vpop.f32.mrb[40].mxu1 }
 0x8b0   :  { %10178 = vtanh.f32 %v2271_v50  ;;  %v11310_v58 = vpop.f32.mrb[41].mxu1  ;;  %v9988_v63 = vadd.f32 %v2657_v45, %v11367_v34  ;;  %v9990_v52 = vadd.f32 %v2661_v31, %v11373_v2 }
 0x8b3   :  { %v11312_v6 = vpop.f32.mrb[42].mxu1 }
 0x8b4   :  { %v11314_v29 = vpop.f32.mrb[43].mxu1 }
 0x8b7   :  { %v11316_v10 = vpop.f32.mrb[44].mxu1 }
 0x8b8   :  { %v11318_v60 = vpop.f32.mrb[45].mxu1 }
 0x8ba   :  { %v10179_v24 = vpop.eup %10178 }
 0x8bb   :  { %v2274_v16 = vmul.f32 %v10179_v24, %v2273_v7 }
 0x8bd   :  { %v2276_v37 = vadd.f32 %v2275_v8, %v2274_v16  ;;  %v2535_v8 = vadd.f32 %v11310_v58, %v11382_v32  ;;  %v2883_v58 = vld [vmem:[#allocation9 + $0x3] sm:$0x7] }
 0x8be   :  { %v2892_v53 = vrot.slane %v2883_v58, %v10830_v57 }
 0x8bf   :  { %2462 = vmatmul.mubr.f32.gmra.mrb[30].mxu0 %v2276_v37  ;;  %2279 = vst [vmem:[#allocation14] sm:$0xff] %v2276_v37  ;;  %7722 = vmatmul.mubr.f32.gmra.mrb[46].mxu1 %v2276_v37 }
 0x8c0   :  { %2733 = vmatprep.mubr.f32.mxu0 %v12307_v22  ;;  %7756 = vmatprep.mubr.msk.f32.mxu1 %vm10517_vm0, %v12307_v22 }
 0x8c3   :  { %2734 = vmatmul.mubr.f32.vlgmr.msra.gmra.mrb[16].mxu0 %v11322_v11  ;;  %7757 = vmatmul.mubr.f32.vlgmr.msra.gmra.mrb[48].mxu1 %v11322_v11 }
 0x8c4   :  { %9007 = vmatpush1.bf16.msra.mxu0 %v11223_v62  ;;  %9038 = vmatpush3.bf16.msra.mxu1 %v11261_v46 }
 0x8c5   :  { %9009 = vmatprep.subr.bf16.mxu0 %v11227_v17  ;;  %9039 = vmatprep.subr.bf16.mxu1 %v12306_v0 }
 0x8c6   :  { %2964 = vmatprep.mubr.f32.mxu0 %v12307_v22  ;;  %7791 = vmatprep.mubr.msk.f32.mxu1 %vm10517_vm0, %v12307_v22 }
 0x8c8   :  { %9011 = vmatpush1.bf16.msra.mxu0 %v11229_v59  ;;  %9041 = vmatpush3.bf16.msra.mxu1 %v11272_v39 }
 0x8c9   :  { %9013 = vmatprep.subr.bf16.mxu0 %v11233_v18  ;;  %9042 = vmatprep.subr.bf16.mxu1 %v12306_v0 }
 0x8cc   :  { %9015 = vmatpush1.bf16.msra.mxu0 %v11235_v51  ;;  %9044 = vmatpush3.bf16.msra.mxu1 %v11278_v55 }
 0x8cd   :  { %9017 = vmatprep.subr.bf16.mxu0 %v11239_v13  ;;  %9045 = vmatprep.subr.bf16.mxu1 %v12306_v0 }
 0x8d0   :  { %9019 = vmatpush1.bf16.msra.mxu0 %v11241_v28  ;;  %9047 = vmatpush3.bf16.msra.mxu1 %v11281_v49 }
 0x8d1   :  { %9021 = vmatprep.subr.bf16.mxu0 %v11245_v40  ;;  %9048 = vmatprep.subr.bf16.mxu1 %v12306_v0 }
 0x8d4   :  { %9023 = vmatpush1.bf16.msra.mxu0 %v11247_v20  ;;  %9050 = vmatpush3.bf16.msra.mxu1 %v11285_v26 }
 0x8d5   :  { %9025 = vmatprep.subr.bf16.mxu0 %v11251_v44  ;;  %9051 = vmatprep.subr.bf16.mxu1 %v12306_v0 }
 0x8d8   :  { %9027 = vmatpush1.bf16.msra.mxu0 %v11253_v1  ;;  %9053 = vmatpush3.bf16.msra.mxu1 %v11289_v48 }
 0x8d9   :  { %9029 = vmatprep.subr.bf16.mxu0 %v11257_v23  ;;  %9054 = vmatprep.subr.bf16.mxu1 %v12306_v0 }
 0x8dc   :  { %9031 = vmatpush1.bf16.msra.mxu0 %v11259_v30  ;;  %9056 = vmatpush3.bf16.msra.mxu1 %v11293_v42 }
 0x8dd   :  { %9033 = vmatprep.subr.bf16.mxu0 %v11264_v41  ;;  %9057 = vmatprep.subr.bf16.mxu1 %v12306_v0 }
 0x8e0   :  { %9035 = vmatpush1.bf16.msra.mxu0 %v11270_v61  ;;  %9059 = vmatpush3.bf16.msra.mxu1 %v11297_v36 }
 0x8e1   :  { %9061 = vmatprep.subr.bf16.mxu0 %v11221_v43  ;;  %9092 = vmatprep.subr.bf16.mxu1 %v12306_v0 }
 0x992   :  { %v11370_v38 = vpop.f32.mrb[46].mxu1 }
 0x993   :  { %v11376_v56 = vpop.f32.mrb[47].mxu1 }
 0x996   :  { %v2735_v5 = vpop.f32.mrb[16].mxu0  ;;  %v2806_v19 = vpop.f32.mrb[48].mxu1 }
 0x997   :  { %v9989_v14 = vadd.f32 %v9988_v63, %v2735_v5  ;;  %v2737_v4 = vpop.f32.mrb[17].mxu0  ;;  %v7758_v21 = vpop.f32.mrb[49].mxu1  ;;  %v2807_v24 = vadd.f32 %v2806_v19, %v2665_v35 }
 0x998   :  { %v9991_v27 = vadd.f32 %v9990_v52, %v2737_v4 }
 0x999   :  { %v6818_v12 = vmul.f32 -1.442695, %v9989_v14 }
 0x99a   :  { %v6819_v33 = vmul.f32 -1.442695, %v9991_v27 }
 0x99b   :  { %10180 = vpow2.f32 %v6818_v12  ;;  %v9994_v12 = vadd.f32 %v2892_v53, %v11373_v2 }
 0x99c   :  { %10182 = vpow2.f32 %v6819_v33 }
 0x9a5   :  { %v10181_v47 = vpop.eup %10180 }
 0x9a6   :  { %v2814_v9 = vadd.f32 1.0, %v10181_v47  ;;  %v10183_v50 = vpop.eup %10182 }
 0x9a7   :  { %v2821_v7 = vadd.f32 1.0, %v10183_v50 }
 0x9a8   :  { %10184 = vrcp.f32 %v2814_v9 }
 0x9a9   :  { %10186 = vrcp.f32 %v2821_v7 }
 0x9b2   :  { %v10185_v16 = vpop.eup %10184 }
 0x9b3   :  { %v2824_v37 = vmul.f32 %v10185_v16, %v2807_v24  ;;  %v10187_v31 = vpop.eup %10186  ;;  %v2896_v16 = vrot.slane %v2883_v58, %v10862_v3 }
 0x9b4   :  { %v2827_v63 = vsub.f32 1.0, %v10187_v31  ;;  %v2829_v25 = vmul.f32 %v10187_v31, %v11322_v11  ;;  %v2888_v11 = vrot.slane %v2883_v58, %v10825_v54  ;;  %v2540_v31 = vadd.f32 %v11308_v15, %v11382_v32 }
 0x9b5   :  { %v2825_v45 = vadd.f32 %v2824_v37, %v2535_v8  ;;  %v2545_v15 = vadd.f32 %v11314_v29, %v11382_v32  ;;  %v3529_v29 = vld [vmem:[#allocation7 + $0x188] sm:$0xff] }
 0x9b6   :  { %v9992_v19 = vadd.f32 %v2888_v11, %v11367_v34 }
 0x9b7   :  { %10188 = vtanh.f32 %v2825_v45 }
 0x9c1   :  { %v10189_v5 = vpop.eup %10188 }
 0x9c2   :  { %v2828_v52 = vmul.f32 %v10189_v5, %v2827_v63 }
 0x9c4   :  { %v11387_v14 = vadd.f32 %v2829_v25, %v2828_v52 }
 0x9c6   :  { %2965 = vmatmul.mubr.f32.vlgmr.msra.gmra.mrb[18].mxu0 %v11387_v14  ;;  %7792 = vmatmul.mubr.f32.vlgmr.msra.gmra.mrb[50].mxu1 %v11387_v14 }
 0x9c7   :  { %9063 = vmatpush1.bf16.msra.mxu0 %v11223_v62  ;;  %9094 = vmatpush3.bf16.msra.mxu1 %v11261_v46 }
 0x9c8   :  { %9065 = vmatprep.subr.bf16.mxu0 %v11227_v17  ;;  %9095 = vmatprep.subr.bf16.mxu1 %v12306_v0 }
 0x9c9   :  { %3195 = vmatprep.mubr.f32.mxu0 %v12307_v22  ;;  %7826 = vmatprep.mubr.msk.f32.mxu1 %vm10517_vm0, %v12307_v22 }
 0x9cb   :  { %9067 = vmatpush1.bf16.msra.mxu0 %v11229_v59  ;;  %9097 = vmatpush3.bf16.msra.mxu1 %v11272_v39 }
 0x9cc   :  { %9069 = vmatprep.subr.bf16.mxu0 %v11233_v18  ;;  %9098 = vmatprep.subr.bf16.mxu1 %v12306_v0 }
 0x9cf   :  { %9071 = vmatpush1.bf16.msra.mxu0 %v11235_v51  ;;  %9100 = vmatpush3.bf16.msra.mxu1 %v11278_v55 }
 0x9d0   :  { %9073 = vmatprep.subr.bf16.mxu0 %v11239_v13  ;;  %9101 = vmatprep.subr.bf16.mxu1 %v12306_v0 }
 0x9d3   :  { %9075 = vmatpush1.bf16.msra.mxu0 %v11241_v28  ;;  %9103 = vmatpush3.bf16.msra.mxu1 %v11281_v49 }
 0x9d4   :  { %9077 = vmatprep.subr.bf16.mxu0 %v11245_v40  ;;  %9104 = vmatprep.subr.bf16.mxu1 %v12306_v0 }
 0x9d7   :  { %9079 = vmatpush1.bf16.msra.mxu0 %v11247_v20  ;;  %9106 = vmatpush3.bf16.msra.mxu1 %v11285_v26 }
 0x9d8   :  { %9081 = vmatprep.subr.bf16.mxu0 %v11251_v44  ;;  %9107 = vmatprep.subr.bf16.mxu1 %v12306_v0 }
 0x9db   :  { %9083 = vmatpush1.bf16.msra.mxu0 %v11253_v1  ;;  %9109 = vmatpush3.bf16.msra.mxu1 %v11289_v48 }
 0x9dc   :  { %9085 = vmatprep.subr.bf16.mxu0 %v11257_v23  ;;  %9110 = vmatprep.subr.bf16.mxu1 %v12306_v0 }
 0x9df   :  { %9087 = vmatpush1.bf16.msra.mxu0 %v11259_v30  ;;  %9112 = vmatpush3.bf16.msra.mxu1 %v11293_v42 }
 0x9e0   :  { %9089 = vmatprep.subr.bf16.mxu0 %v11264_v41  ;;  %9113 = vmatprep.subr.bf16.mxu1 %v12306_v0 }
 0x9e3   :  { %9091 = vmatpush1.bf16.msra.mxu0 %v11270_v61  ;;  %9115 = vmatpush3.bf16.msra.mxu1 %v11297_v36 }
 0x9e4   :  { %9117 = vmatprep.subr.bf16.mxu0 %v11221_v43  ;;  %9148 = vmatprep.subr.bf16.mxu1 %v12306_v0 }
 0xa99   :  { %v2966_v4 = vpop.f32.mrb[18].mxu0  ;;  %v3037_v21 = vpop.f32.mrb[50].mxu1 }
 0xa9a   :  { %v9993_v27 = vadd.f32 %v9992_v19, %v2966_v4  ;;  %v2968_v33 = vpop.f32.mrb[19].mxu0  ;;  %v7793_v47 = vpop.f32.mrb[51].mxu1  ;;  %v3038_v37 = vadd.f32 %v3037_v21, %v2896_v16  ;;  %v3535_v16 = vld [vmem:[#allocation7 + $0x1b8] sm:$0xff] }
 0xa9b   :  { %v9995_v35 = vadd.f32 %v9994_v12, %v2968_v33 }
 0xa9c   :  { %v6820_v9 = vmul.f32 -1.442695, %v9993_v27 }
 0xa9d   :  { %v6821_v43 = vmul.f32 -1.442695, %v9995_v35 }
 0xa9e   :  { %10190 = vpow2.f32 %v6820_v9 }
 0xa9f   :  { %10192 = vpow2.f32 %v6821_v43  ;;  %v3532_v43 = vld [vmem:[#allocation7 + $0x1a0] sm:$0xff] }
 0xaa8   :  { %v10191_v50 = vpop.eup %10190 }
 0xaa9   :  { %v3045_v7 = vadd.f32 1.0, %v10191_v50  ;;  %v10193_v24 = vpop.eup %10192  ;;  %v11493_v50 = vpack.c.bf16 %v3532_v43, %v3529_v29  ;;  %v3567_v43 = vld [vmem:[#allocation7 + $0x2b8] sm:$0xff] }
 0xaaa   :  { %v3052_v8 = vadd.f32 1.0, %v10193_v24 }
 0xaab   :  { %10194 = vrcp.f32 %v3045_v7  ;;  %v3531_v7 = vld [vmem:[#allocation7 + $0x198] sm:$0xff] }
 0xaac   :  { %10196 = vrcp.f32 %v3052_v8 }
 0xab5   :  { %v10195_v45 = vpop.eup %10194 }
 0xab6   :  { %v3055_v63 = vmul.f32 %v10195_v45, %v3038_v37  ;;  %v10197_v52 = vpop.eup %10196  ;;  %v3534_v37 = vld [vmem:[#allocation7 + $0x1b0] sm:$0xff] }
 0xab7   :  { %v3058_v25 = vsub.f32 1.0, %v10197_v52  ;;  %v3060_v19 = vmul.f32 %v10197_v52, %v11387_v14  ;;  %v3540_v52 = vld [vmem:[#allocation7 + $0x1e0] sm:$0xff] }
 0xab8   :  { %v3056_v5 = vadd.f32 %v3055_v63, %v2540_v31  ;;  %v3541_v31 = vld [vmem:[#allocation7 + $0x1e8] sm:$0xff]  ;;  %v3544_v63 = vld [vmem:[#allocation7 + $0x200] sm:$0xff] }
 0xaba   :  { %10198 = vtanh.f32 %v3056_v5  ;;  %v11505_v5 = vpack.c.bf16 %v3544_v63, %v3541_v31  ;;  %v3570_v63 = vld [vmem:[#allocation7 + $0x2d0] sm:$0xff] }
 0xac4   :  { %v10199_v11 = vpop.eup %10198 }
 0xac5   :  { %v3059_v53 = vmul.f32 %v10199_v11, %v3058_v25  ;;  %v3543_v25 = vld [vmem:[#allocation7 + $0x1f8] sm:$0xff] }
 0xac6   :  { %v11507_v11 = vpack.c.bf16 %v3543_v25, %v3540_v52  ;;  %v3573_v52 = vld [vmem:[#allocation7 + $0x2e8] sm:$0xff]  ;;  %v3572_v25 = vld [vmem:[#allocation7 + $0x2e0] sm:$0xff] }
 0xac7   :  { %v11434_v4 = vadd.f32 %v3060_v19, %v3059_v53  ;;  %v3547_v53 = vld [vmem:[#allocation7 + $0x218] sm:$0xff]  ;;  %v3550_v19 = vld [vmem:[#allocation7 + $0x230] sm:$0xff] }
 0xac9   :  { %3196 = vmatmul.mubr.f32.vlgmr.msra.gmra.mrb[20].mxu0 %v11434_v4  ;;  %7827 = vmatmul.mubr.f32.vlgmr.msra.gmra.mrb[52].mxu1 %v11434_v4 }
 0xaca   :  { %9119 = vmatpush1.bf16.msra.mxu0 %v11223_v62  ;;  %9150 = vmatpush3.bf16.msra.mxu1 %v11261_v46  ;;  %v3114_v62 = vld [vmem:[#allocation9 + $0x3] sm:$0x7] }
 0xacb   :  { %9121 = vmatprep.subr.bf16.mxu0 %v11227_v17  ;;  %9151 = vmatprep.subr.bf16.mxu1 %v12306_v0  ;;  %v3119_v17 = vrot.slane %v3114_v62, %v10825_v54 }
 0xacc   :  { %3426 = vmatprep.mubr.f32.mxu0 %v12307_v22  ;;  %7861 = vmatprep.mubr.msk.f32.mxu1 %vm10517_vm0, %v12307_v22 }
 0xace   :  { %9123 = vmatpush1.bf16.msra.mxu0 %v11229_v59  ;;  %9153 = vmatpush3.bf16.msra.mxu1 %v11272_v39  ;;  %v3123_v59 = vrot.slane %v3114_v62, %v10830_v57 }
 0xacf   :  { %9125 = vmatprep.subr.bf16.mxu0 %v11233_v18  ;;  %9154 = vmatprep.subr.bf16.mxu1 %v12306_v0  ;;  %v9996_v18 = vadd.f32 %v3119_v17, %v11367_v34  ;;  %v3546_v17 = vld [vmem:[#allocation7 + $0x210] sm:$0xff] }
 0xad2   :  { %9127 = vmatpush1.bf16.msra.mxu0 %v11235_v51  ;;  %9156 = vmatpush3.bf16.msra.mxu1 %v11278_v55 }
 0xad3   :  { %9129 = vmatprep.subr.bf16.mxu0 %v11239_v13  ;;  %9157 = vmatprep.subr.bf16.mxu1 %v12306_v0 }
 0xad6   :  { %9131 = vmatpush1.bf16.msra.mxu0 %v11241_v28  ;;  %9159 = vmatpush3.bf16.msra.mxu1 %v11281_v49  ;;  %v9998_v28 = vadd.f32 %v3123_v59, %v11373_v2  ;;  %v3549_v59 = vld [vmem:[#allocation7 + $0x228] sm:$0xff] }
 0xad7   :  { %9133 = vmatprep.subr.bf16.mxu0 %v11245_v40  ;;  %9160 = vmatprep.subr.bf16.mxu1 %v12306_v0 }
 0xada   :  { %9135 = vmatpush1.bf16.msra.mxu0 %v11247_v20  ;;  %9162 = vmatpush3.bf16.msra.mxu1 %v11285_v26  ;;  %v3127_v26 = vrot.slane %v3114_v62, %v10862_v3  ;;  %v11511_v62 = vpack.c.bf16 %v3550_v19, %v3547_v53  ;;  %v3575_v53 = vld [vmem:[#allocation7 + $0x2f8] sm:$0xff]  ;;  %v11551_v19 = vpack.c.bf16 %v3573_v52, %v3570_v63 }
 0xadb   :  { %9137 = vmatprep.subr.bf16.mxu0 %v11251_v44  ;;  %9163 = vmatprep.subr.bf16.mxu1 %v12306_v0 }
 0xade   :  { %9139 = vmatpush1.bf16.msra.mxu0 %v11253_v1  ;;  %9165 = vmatpush3.bf16.msra.mxu1 %v11289_v48 }
 0xadf   :  { %9141 = vmatprep.subr.bf16.mxu0 %v11257_v23  ;;  %9166 = vmatprep.subr.bf16.mxu1 %v12306_v0 }
 0xae2   :  { %9143 = vmatpush1.bf16.msra.mxu0 %v11259_v30  ;;  %9168 = vmatpush3.bf16.msra.mxu1 %v11293_v42 }
 0xae3   :  { %9145 = vmatprep.subr.bf16.mxu0 %v11264_v41  ;;  %9169 = vmatprep.subr.bf16.mxu1 %v12306_v0 }
 0xae6   :  { %9147 = vmatpush1.bf16.msra.mxu0 %v11270_v61  ;;  %9171 = vmatpush3.bf16.msra.mxu1 %v11297_v36 }
 0xae7   :  { %9204 = vmatprep.subr.bf16.mxu1 %v12306_v0  ;;  %9173 = vmatprep.subr.bf16.mxu0 %v11493_v50 }
 0xb9c   :  { %v3197_v51 = vpop.f32.mrb[20].mxu0  ;;  %v3268_v13 = vpop.f32.mrb[52].mxu1 }
 0xb9d   :  { %v9997_v40 = vadd.f32 %v9996_v18, %v3197_v51  ;;  %v3199_v20 = vpop.f32.mrb[21].mxu0  ;;  %v7828_v44 = vpop.f32.mrb[53].mxu1  ;;  %v3269_v42 = vadd.f32 %v3268_v13, %v3127_v26  ;;  %v3548_v18 = vld [vmem:[#allocation7 + $0x220] sm:$0xff]  ;;  %v11513_v51 = vpack.c.bf16 %v3549_v59, %v3546_v17  ;;  %v3551_v13 = vld [vmem:[#allocation7 + $0x238] sm:$0xff]  ;;  %v11555_v17 = vpack.c.bf16 %v3575_v53, %v3572_v25 }
 0xb9e   :  { %v9999_v23 = vadd.f32 %v9998_v28, %v3199_v20  ;;  %v11516_v28 = vpack.c.bf16 %v3551_v13, %v3548_v18  ;;  %v3556_v20 = vld [vmem:[#allocation7 + $0x260] sm:$0xff]  ;;  %v3559_v26 = vld [vmem:[#allocation7 + $0x278] sm:$0xff] }
 0xb9f   :  { %v6822_v1 = vmul.f32 -1.442695, %v9997_v40  ;;  %v3553_v40 = vld [vmem:[#allocation7 + $0x248] sm:$0xff]  ;;  %v3345_v59 = vld [vmem:[#allocation9 + $0x3] sm:$0x7] }
 0xba0   :  { %v6823_v30 = vmul.f32 -1.442695, %v9999_v23  ;;  %v11520_v44 = vpack.c.bf16 %v3556_v20, %v3553_v40  ;;  %v3555_v23 = vld [vmem:[#allocation7 + $0x258] sm:$0xff]  ;;  %v3350_v18 = vrot.slane %v3345_v59, %v10825_v54  ;;  %v3354_v13 = vrot.slane %v3345_v59, %v10830_v57 }
 0xba1   :  { %10200 = vpow2.f32 %v6822_v1  ;;  %v3552_v1 = vld [vmem:[#allocation7 + $0x240] sm:$0xff] }
 0xba2   :  { %10202 = vpow2.f32 %v6823_v30  ;;  %v3554_v30 = vld [vmem:[#allocation7 + $0x250] sm:$0xff]  ;;  %v10000_v40 = vadd.f32 %v3350_v18, %v11367_v34 }
 0xbab   :  { %v10201_v41 = vpop.eup %10200 }
 0xbac   :  { %v3276_v61 = vadd.f32 1.0, %v10201_v41  ;;  %v10203_v49 = vpop.eup %10202  ;;  %v11523_v41 = vpack.c.bf16 %v3555_v23, %v3552_v1  ;;  %v10002_v23 = vadd.f32 %v3354_v13, %v11373_v2 }
 0xbad   :  { %v3283_v48 = vadd.f32 1.0, %v10203_v49 }
 0xbae   :  { %10204 = vrcp.f32 %v3276_v61  ;;  %v3557_v61 = vld [vmem:[#allocation7 + $0x268] sm:$0xff] }
 0xbaf   :  { %10206 = vrcp.f32 %v3283_v48  ;;  %v11526_v49 = vpack.c.bf16 %v3557_v61, %v3554_v30  ;;  %v3562_v48 = vld [vmem:[#allocation7 + $0x290] sm:$0xff] }
 0xbb8   :  { %v10205_v36 = vpop.eup %10204 }
 0xbb9   :  { %v3286_v58 = vmul.f32 %v10205_v36, %v3269_v42  ;;  %v10207_v12 = vpop.eup %10206  ;;  %v3558_v42 = vld [vmem:[#allocation7 + $0x270] sm:$0xff]  ;;  %v11529_v36 = vpack.c.bf16 %v3562_v48, %v3559_v26 }
 0xbba   :  { %v3289_v27 = vsub.f32 1.0, %v10207_v12  ;;  %v3291_v9 = vmul.f32 %v10207_v12, %v11434_v4 }
 0xbbb   :  { %v3287_v21 = vadd.f32 %v3286_v58, %v2545_v15  ;;  %v3561_v15 = vld [vmem:[#allocation7 + $0x288] sm:$0xff]  ;;  %v3560_v58 = vld [vmem:[#allocation7 + $0x280] sm:$0xff] }
 0xbbc   :  { %v11532_v12 = vpack.c.bf16 %v3561_v15, %v3558_v42 }
 0xbbd   :  { %10208 = vtanh.f32 %v3287_v21  ;;  %v3563_v21 = vld [vmem:[#allocation7 + $0x298] sm:$0xff] }
 0xbc7   :  { %v10209_v33 = vpop.eup %10208 }
 0xbc8   :  { %v3290_v47 = vmul.f32 %v10209_v33, %v3289_v27  ;;  %v11534_v27 = vpack.c.bf16 %v3563_v21, %v3560_v58  ;;  %v3565_v33 = vld [vmem:[#allocation7 + $0x2a8] sm:$0xff] }
 0xbca   :  { %v11480_v35 = vadd.f32 %v3291_v9, %v3290_v47  ;;  %v3568_v47 = vld [vmem:[#allocation7 + $0x2c0] sm:$0xff] }
 0xbcb   :  { %v3564_v9 = vld [vmem:[#allocation7 + $0x2a0] sm:$0xff]  ;;  %v11538_v29 = vpack.c.bf16 %v3568_v47, %v3565_v33  ;;  %v3358_v47 = vrot.slane %v3345_v59, %v10862_v3  ;;  %v3764_v59 = vld [vmem:[#allocation7 + $0x1a8] sm:$0xff] }
 0xbcc   :  { %3427 = vmatmul.mubr.f32.vlgmr.msra.gmra.mrb[22].mxu0 %v11480_v35  ;;  %7862 = vmatmul.mubr.f32.vlgmr.msra.gmra.mrb[54].mxu1 %v11480_v35 }
 0xbcd   :  { %9206 = vmatpush3.bf16.msra.mxu1 %v11261_v46  ;;  %3657 = vmatprep.mubr.f32.mxu0 %v12307_v22  ;;  %v3528_v46 = vld [vmem:[#allocation7 + $0x180] sm:$0xff] }
 0xbce   :  { %9207 = vmatprep.subr.bf16.mxu1 %v12306_v0  ;;  %7896 = vmatprep.mubr.msk.f32.mxu1 %vm10517_vm0, %v12307_v22  ;;  %v11495_v24 = vpack.c.bf16 %v3531_v7, %v3528_v46  ;;  %v3566_v46 = vld [vmem:[#allocation7 + $0x2b0] sm:$0xff]  ;;  %v3569_v7 = vld [vmem:[#allocation7 + $0x2c8] sm:$0xff] }
 0xbd0   :  { %9175 = vmatpush1.bf16.msra.mxu0 %v11495_v24 }
 0xbd1   :  { %9209 = vmatpush3.bf16.msra.mxu1 %v11272_v39  ;;  %v3538_v39 = vld [vmem:[#allocation7 + $0x1d0] sm:$0xff] }
 0xbd2   :  { %9210 = vmatprep.subr.bf16.mxu1 %v12306_v0  ;;  %v11499_v8 = vpack.c.bf16 %v3538_v39, %v3535_v16  ;;  %v3571_v16 = vld [vmem:[#allocation7 + $0x2d8] sm:$0xff]  ;;  %v3574_v39 = vld [vmem:[#allocation7 + $0x2f0] sm:$0xff] }
 0xbd3   :  { %v11547_v31 = vpack.c.bf16 %v3574_v39, %v3571_v16 }
 0xbd4   :  { %9177 = vmatprep.subr.bf16.mxu0 %v11499_v8 }
 0xbd5   :  { %9212 = vmatpush3.bf16.msra.mxu1 %v11278_v55  ;;  %v3537_v55 = vld [vmem:[#allocation7 + $0x1c8] sm:$0xff] }
 0xbd6   :  { %9213 = vmatprep.subr.bf16.mxu1 %v12306_v0  ;;  %v11501_v45 = vpack.c.bf16 %v3537_v55, %v3534_v37  ;;  %v11541_v37 = vpack.c.bf16 %v3567_v43, %v3564_v9  ;;  %v11545_v55 = vpack.c.bf16 %v3569_v7, %v3566_v46  ;;  %v2550_v7 = vadd.f32 %v11312_v6, %v11382_v32  ;;  %v3761_v6 = vld [vmem:[#allocation7 + $0x190] sm:$0xff] }
 0xbd8   :  { %9179 = vmatpush1.bf16.msra.mxu0 %v11501_v45 }
 0xbd9   :  { %9181 = vmatprep.subr.bf16.mxu0 %v11505_v5  ;;  %9215 = vmatpush3.bf16.msra.mxu1 %v11516_v28 }
 0xbda   :  { %9216 = vmatprep.subr.bf16.mxu1 %v12306_v0 }
 0xbdc   :  { %9183 = vmatpush1.bf16.msra.mxu0 %v11507_v11 }
 0xbdd   :  { %9185 = vmatprep.subr.bf16.mxu0 %v11511_v62  ;;  %9218 = vmatpush3.bf16.msra.mxu1 %v11526_v49 }
 0xbde   :  { %9219 = vmatprep.subr.bf16.mxu1 %v12306_v0 }
 0xbe0   :  { %9187 = vmatpush1.bf16.msra.mxu0 %v11513_v51 }
 0xbe1   :  { %9189 = vmatprep.subr.bf16.mxu0 %v11520_v44  ;;  %9221 = vmatpush3.bf16.msra.mxu1 %v11534_v27 }
 0xbe2   :  { %9222 = vmatprep.subr.bf16.mxu1 %v12306_v0 }
 0xbe4   :  { %9191 = vmatpush1.bf16.msra.mxu0 %v11523_v41 }
 0xbe5   :  { %9193 = vmatprep.subr.bf16.mxu0 %v11529_v36  ;;  %9224 = vmatpush3.bf16.msra.mxu1 %v11545_v55 }
 0xbe6   :  { %9225 = vmatprep.subr.bf16.mxu1 %v12306_v0 }
 0xbe8   :  { %9195 = vmatpush1.bf16.msra.mxu0 %v11532_v12 }
 0xbe9   :  { %9197 = vmatprep.subr.bf16.mxu0 %v11538_v29  ;;  %9227 = vmatpush3.bf16.msra.mxu1 %v11555_v17 }
 0xbea   :  { %9260 = vmatprep.subr.bf16.mxu1 %v12306_v0 }
 0xbec   :  { %9199 = vmatpush1.bf16.msra.mxu0 %v11541_v37 }
 0xbed   :  { %9201 = vmatprep.subr.bf16.mxu0 %v11547_v31 }
 0xbf0   :  { %9203 = vmatpush1.bf16.msra.mxu0 %v11551_v19 }
 0xbf1   :  { %9229 = vmatprep.subr.bf16.mxu0 %v11493_v50 }
 0xc9f   :  { %v3428_v20 = vpop.f32.mrb[22].mxu0  ;;  %v3499_v1 = vpop.f32.mrb[54].mxu1 }
 0xca0   :  { %v10001_v30 = vadd.f32 %v10000_v40, %v3428_v20  ;;  %v3430_v61 = vpop.f32.mrb[23].mxu0  ;;  %v7863_v26 = vpop.f32.mrb[55].mxu1  ;;  %v3500_v43 = vadd.f32 %v3499_v1, %v3358_v47  ;;  %v11593_v40 = vpack.c.bf16 %v3764_v59, %v3761_v6  ;;  %v3767_v20 = vld [vmem:[#allocation7 + $0x1c0] sm:$0xff]  ;;  %v3770_v1 = vld [vmem:[#allocation7 + $0x1d8] sm:$0xff] }
 0xca1   :  { %v10003_v42 = vadd.f32 %v10002_v23, %v3430_v61  ;;  %v11597_v23 = vpack.c.bf16 %v3770_v1, %v3767_v20  ;;  %v3776_v61 = vld [vmem:[#allocation7 + $0x208] sm:$0xff]  ;;  %v2555_v20 = vadd.f32 %v11318_v60, %v11382_v32  ;;  %v3807_v60 = vld [vmem:[#allocation9 + $0x3] sm:$0x7] }
 0xca2   :  { %v6824_v48 = vmul.f32 -1.442695, %v10001_v30  ;;  %v3773_v30 = vld [vmem:[#allocation7 + $0x1f0] sm:$0xff] }
 0xca3   :  { %v6825_v15 = vmul.f32 -1.442695, %v10003_v42  ;;  %v11601_v26 = vpack.c.bf16 %v3776_v61, %v3773_v30 }
 0xca4   :  { %10210 = vpow2.f32 %v6824_v48  ;;  %v3576_v48 = vld [vmem:[#allocation9 + $0x3] sm:$0x7] }
 0xca5   :  { %10212 = vpow2.f32 %v6825_v15  ;;  %v3581_v42 = vrot.slane %v3576_v48, %v10825_v54  ;;  %v3585_v15 = vrot.slane %v3576_v48, %v10830_v57 }
 0xca7   :  { %v10006_v47 = vadd.f32 %v3585_v15, %v11373_v2 }
 0xcae   :  { %v10211_v58 = vpop.eup %10210 }
 0xcaf   :  { %v3507_v21 = vadd.f32 1.0, %v10211_v58  ;;  %v10213_v33 = vpop.eup %10212  ;;  %v10004_v58 = vadd.f32 %v3581_v42, %v11367_v34 }
 0xcb0   :  { %v3514_v9 = vadd.f32 1.0, %v10213_v33 }
 0xcb1   :  { %10214 = vrcp.f32 %v3507_v21 }
 0xcb2   :  { %10216 = vrcp.f32 %v3514_v9 }
 0xcbb   :  { %v10215_v46 = vpop.eup %10214 }
 0xcbc   :  { %v3517_v16 = vmul.f32 %v10215_v46, %v3500_v43  ;;  %v10217_v63 = vpop.eup %10216 }
 0xcbd   :  { %v3520_v52 = vsub.f32 1.0, %v10217_v63  ;;  %v3522_v18 = vmul.f32 %v10217_v63, %v11480_v35 }
 0xcbe   :  { %v3518_v39 = vadd.f32 %v3517_v16, %v2550_v7 }
 0xcc0   :  { %10218 = vtanh.f32 %v3518_v39 }
 0xcca   :  { %v10219_v25 = vpop.eup %10218 }
 0xccb   :  { %v3521_v53 = vmul.f32 %v10219_v25, %v3520_v52 }
 0xccd   :  { %v11570_v13 = vadd.f32 %v3522_v18, %v3521_v53  ;;  %v3589_v53 = vrot.slane %v3576_v48, %v10862_v3  ;;  %v3812_v48 = vrot.slane %v3807_v60, %v10825_v54 }
 0xccf   :  { %3658 = vmatmul.mubr.f32.vlgmr.msra.gmra.mrb[24].mxu0 %v11570_v13  ;;  %7897 = vmatmul.mubr.f32.vlgmr.msra.gmra.mrb[56].mxu1 %v11570_v13 }
 0xcd0   :  { %9231 = vmatpush1.bf16.msra.mxu0 %v11495_v24  ;;  %3888 = vmatprep.mubr.f32.mxu0 %v12307_v22 }
 0xcd1   :  { %9233 = vmatprep.subr.bf16.mxu0 %v11499_v8  ;;  %7931 = vmatprep.mubr.msk.f32.mxu1 %vm10517_vm0, %v12307_v22 }
 0xcd2   :  { %9262 = vmatpush3.bf16.msra.mxu1 %v11593_v40 }
 0xcd3   :  { %9263 = vmatprep.subr.bf16.mxu1 %v12306_v0 }
 0xcd4   :  { %9235 = vmatpush1.bf16.msra.mxu0 %v11501_v45 }
 0xcd5   :  { %9237 = vmatprep.subr.bf16.mxu0 %v11505_v5 }
 0xcd6   :  { %9265 = vmatpush3.bf16.msra.mxu1 %v11597_v23 }
 0xcd7   :  { %9266 = vmatprep.subr.bf16.mxu1 %v12306_v0 }
 0xcd8   :  { %9239 = vmatpush1.bf16.msra.mxu0 %v11507_v11 }
 0xcd9   :  { %9241 = vmatprep.subr.bf16.mxu0 %v11511_v62 }
 0xcda   :  { %9268 = vmatpush3.bf16.msra.mxu1 %v11601_v26 }
 0xcdb   :  { %9269 = vmatprep.subr.bf16.mxu1 %v12306_v0 }
 0xcdc   :  { %9243 = vmatpush1.bf16.msra.mxu0 %v11513_v51 }
 0xcdd   :  { %9245 = vmatprep.subr.bf16.mxu0 %v11520_v44 }
 0xcde   :  { %9271 = vmatpush3.bf16.msra.mxu1 %v11516_v28 }
 0xcdf   :  { %9272 = vmatprep.subr.bf16.mxu1 %v12306_v0 }
 0xce0   :  { %9247 = vmatpush1.bf16.msra.mxu0 %v11523_v41 }
 0xce1   :  { %9249 = vmatprep.subr.bf16.mxu0 %v11529_v36 }
 0xce2   :  { %9274 = vmatpush3.bf16.msra.mxu1 %v11526_v49 }
 0xce3   :  { %9275 = vmatprep.subr.bf16.mxu1 %v12306_v0 }
 0xce4   :  { %9251 = vmatpush1.bf16.msra.mxu0 %v11532_v12 }
 0xce5   :  { %9253 = vmatprep.subr.bf16.mxu0 %v11538_v29 }
 0xce6   :  { %9277 = vmatpush3.bf16.msra.mxu1 %v11534_v27 }
 0xce7   :  { %9278 = vmatprep.subr.bf16.mxu1 %v12306_v0 }
 0xce8   :  { %9255 = vmatpush1.bf16.msra.mxu0 %v11541_v37 }
 0xce9   :  { %9257 = vmatprep.subr.bf16.mxu0 %v11547_v31 }
 0xcea   :  { %9280 = vmatpush3.bf16.msra.mxu1 %v11545_v55 }
 0xceb   :  { %9281 = vmatprep.subr.bf16.mxu1 %v12306_v0 }
 0xcec   :  { %9259 = vmatpush1.bf16.msra.mxu0 %v11551_v19 }
 0xced   :  { %9285 = vmatprep.subr.bf16.mxu0 %v11493_v50 }
 0xcee   :  { %9283 = vmatpush3.bf16.msra.mxu1 %v11555_v17 }
 0xcef   :  { %9316 = vmatprep.subr.bf16.mxu1 %v12306_v0 }
 0xda2   :  { %v3659_v21 = vpop.f32.mrb[24].mxu0  ;;  %v3730_v33 = vpop.f32.mrb[56].mxu1 }
 0xda3   :  { %v10005_v9 = vadd.f32 %v10004_v58, %v3659_v21  ;;  %v3661_v43 = vpop.f32.mrb[25].mxu0  ;;  %v7898_v46 = vpop.f32.mrb[57].mxu1  ;;  %v3731_v6 = vadd.f32 %v3730_v33, %v3589_v53  ;;  %v3816_v33 = vrot.slane %v3807_v60, %v10830_v57 }
 0xda4   :  { %v10007_v16 = vadd.f32 %v10006_v47, %v3661_v43 }
 0xda5   :  { %v6826_v7 = vmul.f32 -1.442695, %v10005_v9  ;;  %v10008_v9 = vadd.f32 %v3812_v48, %v11367_v34 }
 0xda6   :  { %v6827_v39 = vmul.f32 -1.442695, %v10007_v16 }
 0xda7   :  { %10220 = vpow2.f32 %v6826_v7  ;;  %v10010_v7 = vadd.f32 %v3816_v33, %v11373_v2 }
 0xda8   :  { %10222 = vpow2.f32 %v6827_v39 }
 0xdb1   :  { %v10221_v63 = vpop.eup %10220 }
 0xdb2   :  { %v3738_v52 = vadd.f32 1.0, %v10221_v63  ;;  %v10223_v25 = vpop.eup %10222 }
 0xdb3   :  { %v3745_v18 = vadd.f32 1.0, %v10223_v25 }
 0xdb4   :  { %10224 = vrcp.f32 %v3738_v52 }
 0xdb5   :  { %10226 = vrcp.f32 %v3745_v18 }
 0xdbe   :  { %v10225_v59 = vpop.eup %10224 }
 0xdbf   :  { %v3748_v1 = vmul.f32 %v10225_v59, %v3731_v6  ;;  %v10227_v61 = vpop.eup %10226  ;;  %v3820_v59 = vrot.slane %v3807_v60, %v10862_v3 }
 0xdc0   :  { %v3751_v42 = vsub.f32 1.0, %v10227_v61  ;;  %v3753_v21 = vmul.f32 %v10227_v61, %v11570_v13  ;;  %v2560_v61 = vadd.f32 %v11316_v10, %v11382_v32  ;;  %v4461_v10 = vld [vmem:[#allocation4 + $0x308] sm:$0xff] }
 0xdc1   :  { %v3749_v30 = vadd.f32 %v3748_v1, %v2555_v20 }
 0xdc3   :  { %10228 = vtanh.f32 %v3749_v30 }
 0xdcd   :  { %v10229_v15 = vpop.eup %10228 }
 0xdce   :  { %v3752_v58 = vmul.f32 %v10229_v15, %v3751_v42 }
 0xdd0   :  { %v11623_v47 = vadd.f32 %v3753_v21, %v3752_v58 }
 0xdd2   :  { %3889 = vmatmul.mubr.f32.vlgmr.msra.gmra.mrb[26].mxu0 %v11623_v47  ;;  %7932 = vmatmul.mubr.f32.vlgmr.msra.gmra.mrb[58].mxu1 %v11623_v47 }
 0xdd3   :  { %9287 = vmatpush1.bf16.msra.mxu0 %v11495_v24  ;;  %9318 = vmatpush3.bf16.msra.mxu1 %v11593_v40 }
 0xdd4   :  { %9289 = vmatprep.subr.bf16.mxu0 %v11499_v8  ;;  %9319 = vmatprep.subr.bf16.mxu1 %v12306_v0 }
 0xdd5   :  { %4119 = vmatprep.mubr.f32.mxu0 %v12307_v22  ;;  %7966 = vmatprep.mubr.msk.f32.mxu1 %vm10517_vm0, %v12307_v22 }
 0xdd7   :  { %9291 = vmatpush1.bf16.msra.mxu0 %v11501_v45  ;;  %9321 = vmatpush3.bf16.msra.mxu1 %v11597_v23 }
 0xdd8   :  { %9293 = vmatprep.subr.bf16.mxu0 %v11505_v5  ;;  %9322 = vmatprep.subr.bf16.mxu1 %v12306_v0 }
 0xddb   :  { %9295 = vmatpush1.bf16.msra.mxu0 %v11507_v11  ;;  %9324 = vmatpush3.bf16.msra.mxu1 %v11601_v26 }
 0xddc   :  { %9297 = vmatprep.subr.bf16.mxu0 %v11511_v62  ;;  %9325 = vmatprep.subr.bf16.mxu1 %v12306_v0 }
 0xddf   :  { %9299 = vmatpush1.bf16.msra.mxu0 %v11513_v51  ;;  %9327 = vmatpush3.bf16.msra.mxu1 %v11516_v28 }
 0xde0   :  { %9301 = vmatprep.subr.bf16.mxu0 %v11520_v44  ;;  %9328 = vmatprep.subr.bf16.mxu1 %v12306_v0 }
 0xde3   :  { %9303 = vmatpush1.bf16.msra.mxu0 %v11523_v41  ;;  %9330 = vmatpush3.bf16.msra.mxu1 %v11526_v49 }
 0xde4   :  { %9305 = vmatprep.subr.bf16.mxu0 %v11529_v36  ;;  %9331 = vmatprep.subr.bf16.mxu1 %v12306_v0 }
 0xde7   :  { %9307 = vmatpush1.bf16.msra.mxu0 %v11532_v12  ;;  %9333 = vmatpush3.bf16.msra.mxu1 %v11534_v27 }
 0xde8   :  { %9309 = vmatprep.subr.bf16.mxu0 %v11538_v29  ;;  %9334 = vmatprep.subr.bf16.mxu1 %v12306_v0 }
 0xdeb   :  { %9311 = vmatpush1.bf16.msra.mxu0 %v11541_v37  ;;  %9336 = vmatpush3.bf16.msra.mxu1 %v11545_v55 }
 0xdec   :  { %9313 = vmatprep.subr.bf16.mxu0 %v11547_v31  ;;  %9337 = vmatprep.subr.bf16.mxu1 %v12306_v0 }
 0xdef   :  { %9315 = vmatpush1.bf16.msra.mxu0 %v11551_v19  ;;  %9339 = vmatpush3.bf16.msra.mxu1 %v11555_v17 }
 0xdf0   :  { %9341 = vmatprep.subr.bf16.mxu0 %v11493_v50  ;;  %9372 = vmatprep.subr.bf16.mxu1 %v12306_v0 }
 0xea5   :  { %v3890_v43 = vpop.f32.mrb[26].mxu0  ;;  %v3961_v46 = vpop.f32.mrb[58].mxu1 }
 0xea6   :  { %v10009_v16 = vadd.f32 %v10008_v9, %v3890_v43  ;;  %v3892_v39 = vpop.f32.mrb[27].mxu0  ;;  %v7933_v63 = vpop.f32.mrb[59].mxu1  ;;  %v3962_v1 = vadd.f32 %v3961_v46, %v3820_v59 }
 0xea7   :  { %v10011_v25 = vadd.f32 %v10010_v7, %v3892_v39  ;;  %v2565_v7 = vadd.f32 %v11376_v56, %v11382_v32 }
 0xea8   :  { %v6828_v52 = vmul.f32 -1.442695, %v10009_v16 }
 0xea9   :  { %v6829_v50 = vmul.f32 -1.442695, %v10011_v25  ;;  %v4460_v25 = vld [vmem:[#allocation4 + $0x300] sm:$0xff] }
 0xeaa   :  { %10230 = vpow2.f32 %v6828_v52 }
 0xeab   :  { %10232 = vpow2.f32 %v6829_v50  ;;  %v4463_v50 = vld [vmem:[#allocation4 + $0x318] sm:$0xff] }
 0xeb4   :  { %v10231_v53 = vpop.eup %10230 }
 0xeb5   :  { %v3969_v18 = vadd.f32 1.0, %v10231_v53  ;;  %v10233_v6 = vpop.eup %10232 }
 0xeb6   :  { %v3976_v20 = vadd.f32 1.0, %v10233_v6  ;;  %v4470_v6 = vld [vmem:[#allocation4 + $0x350] sm:$0xff] }
 0xeb7   :  { %10234 = vrcp.f32 %v3969_v18  ;;  %v4467_v18 = vld [vmem:[#allocation4 + $0x338] sm:$0xff] }
 0xeb8   :  { %10236 = vrcp.f32 %v3976_v20  ;;  %v9400_v56 = vpack.c.bf16 %v4470_v6, %v4467_v18  ;;  %v4500_v18 = vld [vmem:[#allocation4 + $0x440] sm:$0xff]  ;;  %v4498_v6 = vld [vmem:[#allocation4 + $0x430] sm:$0xff] }
 0xec1   :  { %v10235_v30 = vpop.eup %10234 }
 0xec2   :  { %v3979_v42 = vmul.f32 %v10235_v30, %v3962_v1  ;;  %v10237_v58 = vpop.eup %10236  ;;  %v4468_v1 = vld [vmem:[#allocation4 + $0x340] sm:$0xff]  ;;  %v4471_v30 = vld [vmem:[#allocation4 + $0x358] sm:$0xff] }
 0xec3   :  { %v3982_v21 = vsub.f32 1.0, %v10237_v58  ;;  %v3984_v9 = vmul.f32 %v10237_v58, %v11623_v47  ;;  %v4469_v58 = vld [vmem:[#allocation4 + $0x348] sm:$0xff] }
 0xec4   :  { %v3980_v15 = vadd.f32 %v3979_v42, %v2560_v61  ;;  %v9398_v61 = vpack.c.bf16 %v4463_v50, %v4460_v25  ;;  %v4490_v25 = vld [vmem:[#allocation4 + $0x3f0] sm:$0xff]  ;;  %v4493_v50 = vld [vmem:[#allocation4 + $0x408] sm:$0xff] }
 0xec6   :  { %10238 = vtanh.f32 %v3980_v15  ;;  %v4466_v15 = vld [vmem:[#allocation4 + $0x330] sm:$0xff] }
 0xed0   :  { %v10239_v48 = vpop.eup %10238 }
 0xed1   :  { %v3983_v33 = vmul.f32 %v10239_v48, %v3982_v21  ;;  %v4473_v21 = vld [vmem:[#allocation4 + $0x368] sm:$0xff]  ;;  %v9432_v48 = vpack.c.bf16 %v4471_v30, %v4468_v1 }
 0xed3   :  { %v11670_v43 = vadd.f32 %v3984_v9, %v3983_v33  ;;  %v4476_v33 = vld [vmem:[#allocation4 + $0x380] sm:$0xff]  ;;  %v4474_v9 = vld [vmem:[#allocation4 + $0x370] sm:$0xff] }
 0xed5   :  { %4120 = vmatmul.mubr.f32.vlgmr.msra.gmra.mrb[28].mxu0 %v11670_v43  ;;  %7967 = vmatmul.mubr.f32.vlgmr.msra.gmra.mrb[60].mxu1 %v11670_v43 }
 0xed6   :  { %9343 = vmatpush1.bf16.msra.mxu0 %v11495_v24  ;;  %9374 = vmatpush3.bf16.msra.mxu1 %v11593_v40  ;;  %v4464_v24 = vld [vmem:[#allocation4 + $0x320] sm:$0xff] }
 0xed7   :  { %9345 = vmatprep.subr.bf16.mxu0 %v11499_v8  ;;  %9375 = vmatprep.subr.bf16.mxu1 %v12306_v0  ;;  %v4462_v8 = vld [vmem:[#allocation4 + $0x310] sm:$0xff] }
 0xed8   :  { %4350 = vmatprep.mubr.f32.mxu0 %v12307_v22  ;;  %8001 = vmatprep.mubr.msk.f32.mxu1 %vm10517_vm0, %v12307_v22 }
 0xeda   :  { %9347 = vmatpush1.bf16.msra.mxu0 %v11501_v45  ;;  %9377 = vmatpush3.bf16.msra.mxu1 %v11597_v23  ;;  %v9396_v45 = vpack.c.bf16 %v4464_v24, %v4461_v10  ;;  %v4477_v10 = vld [vmem:[#allocation4 + $0x388] sm:$0xff]  ;;  %v9402_v24 = vpack.c.bf16 %v4469_v58, %v4466_v15  ;;  %v4503_v15 = vld [vmem:[#allocation4 + $0x458] sm:$0xff]  ;;  %v4506_v58 = vld [vmem:[#allocation4 + $0x470] sm:$0xff] }
 0xedb   :  { %9349 = vmatprep.subr.bf16.mxu0 %v11505_v5  ;;  %9378 = vmatprep.subr.bf16.mxu1 %v12306_v0  ;;  %v4465_v5 = vld [vmem:[#allocation4 + $0x328] sm:$0xff] }
 0xede   :  { %9351 = vmatpush1.bf16.msra.mxu0 %v11507_v11  ;;  %9380 = vmatpush3.bf16.msra.mxu1 %v11601_v26  ;;  %v9428_v11 = vpack.c.bf16 %v4465_v5, %v4462_v8  ;;  %v9404_v8 = vpack.c.bf16 %v4476_v33, %v4473_v21  ;;  %v4472_v5 = vld [vmem:[#allocation4 + $0x360] sm:$0xff] }
 0xedf   :  { %9353 = vmatprep.subr.bf16.mxu0 %v11511_v62  ;;  %9381 = vmatprep.subr.bf16.mxu1 %v12306_v0  ;;  %v4038_v62 = vld [vmem:[#allocation9 + $0x3] sm:$0x7] }
 0xee0   :  { %v4051_v23 = vrot.slane %v4038_v62, %v10862_v3  ;;  %v4504_v21 = vld [vmem:[#allocation4 + $0x460] sm:$0xff] }
 0xee2   :  { %9355 = vmatpush1.bf16.msra.mxu0 %v11513_v51  ;;  %9383 = vmatpush3.bf16.msra.mxu1 %v11516_v28  ;;  %v4043_v51 = vrot.slane %v4038_v62, %v10825_v54  ;;  %v4047_v28 = vrot.slane %v4038_v62, %v10830_v57  ;;  %v4475_v62 = vld [vmem:[#allocation4 + $0x378] sm:$0xff] }
 0xee3   :  { %9357 = vmatprep.subr.bf16.mxu0 %v11520_v44  ;;  %9384 = vmatprep.subr.bf16.mxu1 %v12306_v0 }
 0xee4   :  { %v10012_v44 = vadd.f32 %v4043_v51, %v11367_v34  ;;  %v4479_v51 = vld [vmem:[#allocation4 + $0x398] sm:$0xff] }
 0xee6   :  { %9359 = vmatpush1.bf16.msra.mxu0 %v11523_v41  ;;  %9386 = vmatpush3.bf16.msra.mxu1 %v11526_v49 }
 0xee7   :  { %9361 = vmatprep.subr.bf16.mxu0 %v11529_v36  ;;  %9387 = vmatprep.subr.bf16.mxu1 %v12306_v0  ;;  %v10014_v36 = vadd.f32 %v4047_v28, %v11373_v2  ;;  %v4482_v28 = vld [vmem:[#allocation4 + $0x3b0] sm:$0xff] }
 0xeea   :  { %9363 = vmatpush1.bf16.msra.mxu0 %v11532_v12  ;;  %9389 = vmatpush3.bf16.msra.mxu1 %v11534_v27 }
 0xeeb   :  { %9365 = vmatprep.subr.bf16.mxu0 %v11538_v29  ;;  %9390 = vmatprep.subr.bf16.mxu1 %v12306_v0 }
 0xeee   :  { %9367 = vmatpush1.bf16.msra.mxu0 %v11541_v37  ;;  %9392 = vmatpush3.bf16.msra.mxu1 %v11545_v55 }
 0xeef   :  { %9369 = vmatprep.subr.bf16.mxu0 %v11547_v31  ;;  %9393 = vmatprep.subr.bf16.mxu1 %v12306_v0 }
 0xef2   :  { %9371 = vmatpush1.bf16.msra.mxu0 %v11551_v19  ;;  %9395 = vmatpush3.bf16.msra.mxu1 %v11555_v17 }
 0xef3   :  { %9397 = vmatprep.subr.bf16.mxu0 %v9396_v45  ;;  %9429 = vmatprep.subr.bf16.mxu1 %v9428_v11  ;;  %v9436_v45 = vpack.c.bf16 %v4477_v10, %v4474_v9  ;;  %v9424_v9 = vpack.c.bf16 %v4506_v58, %v4503_v15  ;;  %v4817_v58 = vld [vmem:[#allocation7 + $0x458] sm:$0xff] }
 0xfa8   :  { %v4121_v41 = vpop.f32.mrb[28].mxu0  ;;  %v4192_v49 = vpop.f32.mrb[60].mxu1 }
 0xfa9   :  { %v10013_v12 = vadd.f32 %v10012_v44, %v4121_v41  ;;  %v4123_v27 = vpop.f32.mrb[29].mxu0  ;;  %v7968_v29 = vpop.f32.mrb[61].mxu1  ;;  %v4193_v60 = vadd.f32 %v4192_v49, %v4051_v23  ;;  %v4480_v44 = vld [vmem:[#allocation4 + $0x3a0] sm:$0xff]  ;;  %v4483_v41 = vld [vmem:[#allocation4 + $0x3b8] sm:$0xff]  ;;  %v9406_v49 = vpack.c.bf16 %v4475_v62, %v4472_v5 }
 0xfaa   :  { %v10015_v55 = vadd.f32 %v10014_v36, %v4123_v27  ;;  %v9440_v36 = vpack.c.bf16 %v4483_v41, %v4480_v44  ;;  %v4481_v27 = vld [vmem:[#allocation4 + $0x3a8] sm:$0xff]  ;;  %v4484_v23 = vld [vmem:[#allocation4 + $0x3c0] sm:$0xff] }
 0xfab   :  { %v6830_v37 = vmul.f32 -1.442695, %v10013_v12  ;;  %v4478_v12 = vld [vmem:[#allocation4 + $0x390] sm:$0xff]  ;;  %v4485_v29 = vld [vmem:[#allocation4 + $0x3c8] sm:$0xff]  ;;  %v4774_v5 = vld [vmem:[#allocation7 + $0x300] sm:$0xff] }
 0xfac   :  { %v6831_v31 = vmul.f32 -1.442695, %v10015_v55  ;;  %v4486_v55 = vld [vmem:[#allocation4 + $0x3d0] sm:$0xff]  ;;  %v4783_v44 = vld [vmem:[#allocation7 + $0x348] sm:$0xff] }
 0xfad   :  { %10240 = vpow2.f32 %v6830_v37  ;;  %v4488_v37 = vld [vmem:[#allocation4 + $0x3e0] sm:$0xff] }
 0xfae   :  { %10242 = vpow2.f32 %v6831_v31  ;;  %v4489_v31 = vld [vmem:[#allocation4 + $0x3e8] sm:$0xff] }
 0xfb7   :  { %v10241_v19 = vpop.eup %10240 }
 0xfb8   :  { %v4200_v17 = vadd.f32 1.0, %v10241_v19  ;;  %v10243_v40 = vpop.eup %10242  ;;  %v9410_v19 = vpack.c.bf16 %v4481_v27, %v4478_v12  ;;  %v4786_v12 = vld [vmem:[#allocation7 + $0x360] sm:$0xff]  ;;  %v4789_v27 = vld [vmem:[#allocation7 + $0x378] sm:$0xff] }
 0xfb9   :  { %v4207_v26 = vadd.f32 1.0, %v10243_v40  ;;  %v9444_v40 = vpack.c.bf16 %v4489_v31, %v4486_v55  ;;  %v4796_v55 = vld [vmem:[#allocation7 + $0x3b0] sm:$0xff] }
 0xfba   :  { %10244 = vrcp.f32 %v4200_v17  ;;  %v9412_v17 = vpack.c.bf16 %v4488_v37, %v4485_v29  ;;  %v11756_v29 = vpack.c.bf16 %v4789_v27, %v4786_v12  ;;  %v4793_v37 = vld [vmem:[#allocation7 + $0x398] sm:$0xff] }
 0xfbb   :  { %10246 = vrcp.f32 %v4207_v26  ;;  %v4487_v26 = vld [vmem:[#allocation4 + $0x3d8] sm:$0xff]  ;;  %v11760_v31 = vpack.c.bf16 %v4796_v55, %v4793_v37  ;;  %v4812_v37 = vld [vmem:[#allocation7 + $0x430] sm:$0xff]  ;;  %v4815_v55 = vld [vmem:[#allocation7 + $0x448] sm:$0xff] }
 0xfbc   :  { %v4809_v12 = vld [vmem:[#allocation7 + $0x418] sm:$0xff] }
 0xfc4   :  { %v10245_v46 = vpop.eup %10244 }
 0xfc5   :  { %v4210_v16 = vmul.f32 %v10245_v46, %v4193_v60  ;;  %v10247_v63 = vpop.eup %10246  ;;  %v4491_v60 = vld [vmem:[#allocation4 + $0x3f8] sm:$0xff]  ;;  %v4494_v46 = vld [vmem:[#allocation4 + $0x410] sm:$0xff] }
 0xfc6   :  { %v4213_v52 = vsub.f32 1.0, %v10247_v63  ;;  %v4215_v20 = vmul.f32 %v10247_v63, %v11670_v43  ;;  %v9416_v63 = vpack.c.bf16 %v4494_v46, %v4491_v60  ;;  %v4798_v46 = vld [vmem:[#allocation7 + $0x3c0] sm:$0xff] }
 0xfc7   :  { %v4211_v39 = vadd.f32 %v4210_v16, %v2565_v7  ;;  %v4492_v7 = vld [vmem:[#allocation4 + $0x400] sm:$0xff]  ;;  %v4495_v16 = vld [vmem:[#allocation4 + $0x418] sm:$0xff] }
 0xfc9   :  { %10248 = vtanh.f32 %v4211_v39  ;;  %v9414_v39 = vpack.c.bf16 %v4487_v26, %v4484_v23  ;;  %v4799_v23 = vld [vmem:[#allocation7 + $0x3c8] sm:$0xff]  ;;  %v4802_v26 = vld [vmem:[#allocation7 + $0x3e0] sm:$0xff] }
 0xfca   :  { %v11766_v60 = vpack.c.bf16 %v4802_v26, %v4799_v23  ;;  %v4821_v23 = vld [vmem:[#allocation7 + $0x478] sm:$0xff] }
 0xfd3   :  { %v10249_v53 = vpop.eup %10248 }
 0xfd4   :  { %v4214_v59 = vmul.f32 %v10249_v53, %v4213_v52  ;;  %v9448_v52 = vpack.c.bf16 %v4495_v16, %v4492_v7  ;;  %v4497_v53 = vld [vmem:[#allocation4 + $0x428] sm:$0xff]  ;;  %v4801_v7 = vld [vmem:[#allocation7 + $0x3d8] sm:$0xff] }
 0xfd5   :  { %v9420_v1 = vpack.c.bf16 %v4500_v18, %v4497_v53  ;;  %v11768_v16 = vpack.c.bf16 %v4801_v7, %v4798_v46  ;;  %v4811_v18 = vld [vmem:[#allocation7 + $0x428] sm:$0xff]  ;;  %v4269_v46 = vld [vmem:[#allocation9 + $0x3] sm:$0x7] }
 0xfd6   :  { %v11715_v42 = vadd.f32 %v4215_v20, %v4214_v59  ;;  %v4501_v59 = vld [vmem:[#allocation4 + $0x448] sm:$0xff]  ;;  %v9418_v20 = vpack.c.bf16 %v4493_v50, %v4490_v25  ;;  %v4804_v25 = vld [vmem:[#allocation7 + $0x3f0] sm:$0xff]  ;;  %v4274_v7 = vrot.slane %v4269_v46, %v10825_v54 }
 0xfd7   :  { %v9452_v30 = vpack.c.bf16 %v4501_v59, %v4498_v6  ;;  %v4807_v50 = vld [vmem:[#allocation7 + $0x408] sm:$0xff]  ;;  %v4814_v6 = vld [vmem:[#allocation7 + $0x440] sm:$0xff] }
 0xfd8   :  { %4351 = vmatmul.mubr.f32.vlgmr.msra.gmra.mrb[30].mxu0 %v11715_v42  ;;  %8002 = vmatmul.mubr.f32.vlgmr.msra.gmra.mrb[62].mxu1 %v11715_v42  ;;  %v11774_v53 = vpack.c.bf16 %v4807_v50, %v4804_v25  ;;  %v4810_v59 = vld [vmem:[#allocation7 + $0x420] sm:$0xff] }
 0xfd9   :  { %9399 = vmatpush1.bf16.msra.mxu0 %v9398_v61  ;;  %9431 = vmatpush3.bf16.msra.mxu1 %v9428_v11  ;;  %v9408_v11 = vpack.c.bf16 %v4482_v28, %v4479_v51  ;;  %v4496_v61 = vld [vmem:[#allocation4 + $0x420] sm:$0xff]  ;;  %v4780_v28 = vld [vmem:[#allocation7 + $0x330] sm:$0xff] }
 0xfda   :  { %8036 = vmatprep.mubr.f32.mxu1 %v11387_v14  ;;  %9401 = vmatprep.subr.bf16.mxu0 %v9400_v56  ;;  %v4499_v56 = vld [vmem:[#allocation4 + $0x438] sm:$0xff]  ;;  %v11750_v41 = vpack.c.bf16 %v4783_v44, %v4780_v28  ;;  %v4800_v28 = vld [vmem:[#allocation7 + $0x3d0] sm:$0xff]  ;;  %v4803_v44 = vld [vmem:[#allocation7 + $0x3e8] sm:$0xff] }
 0xfdb   :  { %9433 = vmatprep.subr.bf16.mxu1 %v9432_v48  ;;  %4590 = vmatprep.mubr.f32.mxu0 %v12307_v22  ;;  %v9422_v33 = vpack.c.bf16 %v4499_v56, %v4496_v61  ;;  %v4779_v61 = vld [vmem:[#allocation7 + $0x328] sm:$0xff] }
 0xfdd   :  { %9403 = vmatpush1.bf16.msra.mxu0 %v9402_v24  ;;  %9435 = vmatpush3.bf16.msra.mxu1 %v9432_v48  ;;  %v4507_v48 = vld [vmem:[#allocation4 + $0x478] sm:$0xff]  ;;  %v4502_v24 = vld [vmem:[#allocation4 + $0x450] sm:$0xff] }
 0xfde   :  { %9405 = vmatprep.subr.bf16.mxu0 %v9404_v8  ;;  %9437 = vmatprep.subr.bf16.mxu1 %v9436_v45  ;;  %v9456_v10 = vpack.c.bf16 %v4507_v48, %v4504_v21  ;;  %v4505_v8 = vld [vmem:[#allocation4 + $0x468] sm:$0xff]  ;;  %v4820_v21 = vld [vmem:[#allocation7 + $0x470] sm:$0xff] }
 0xfdf   :  { %v11785_v48 = vpack.c.bf16 %v4820_v21, %v4817_v58 }
 0xfe1   :  { %9407 = vmatpush1.bf16.msra.mxu0 %v9406_v49  ;;  %9439 = vmatpush3.bf16.msra.mxu1 %v9436_v45  ;;  %v9426_v45 = vpack.c.bf16 %v4505_v8, %v4502_v24  ;;  %v4787_v49 = vld [vmem:[#allocation7 + $0x368] sm:$0xff]  ;;  %v4782_v24 = vld [vmem:[#allocation7 + $0x340] sm:$0xff]  ;;  %v4785_v8 = vld [vmem:[#allocation7 + $0x358] sm:$0xff] }
 0xfe2   :  { %9409 = vmatprep.subr.bf16.mxu0 %v9408_v11  ;;  %9441 = vmatprep.subr.bf16.mxu1 %v9440_v36  ;;  %v4790_v11 = vld [vmem:[#allocation7 + $0x380] sm:$0xff] }
 0xfe5   :  { %9411 = vmatpush1.bf16.msra.mxu0 %v9410_v19  ;;  %9443 = vmatpush3.bf16.msra.mxu1 %v9440_v36  ;;  %v11754_v36 = vpack.c.bf16 %v4790_v11, %v4787_v49  ;;  %v4792_v19 = vld [vmem:[#allocation7 + $0x390] sm:$0xff]  ;;  %v11806_v49 = vpack.c.bf16 %v4803_v44, %v4800_v28  ;;  %v4806_v11 = vld [vmem:[#allocation7 + $0x400] sm:$0xff] }
 0xfe6   :  { %9413 = vmatprep.subr.bf16.mxu0 %v9412_v17  ;;  %9445 = vmatprep.subr.bf16.mxu1 %v9444_v40  ;;  %v4795_v17 = vld [vmem:[#allocation7 + $0x3a8] sm:$0xff]  ;;  %v11810_v27 = vpack.c.bf16 %v4809_v12, %v4806_v11 }
 0xfe9   :  { %9415 = vmatpush1.bf16.msra.mxu0 %v9414_v39  ;;  %9447 = vmatpush3.bf16.msra.mxu1 %v9444_v40  ;;  %v11762_v40 = vpack.c.bf16 %v4795_v17, %v4792_v19  ;;  %v4805_v39 = vld [vmem:[#allocation7 + $0x3f8] sm:$0xff]  ;;  %v11814_v19 = vpack.c.bf16 %v4815_v55, %v4812_v37  ;;  %v4818_v17 = vld [vmem:[#allocation7 + $0x460] sm:$0xff] }
 0xfea   :  { %9417 = vmatprep.subr.bf16.mxu0 %v9416_v63  ;;  %9449 = vmatprep.subr.bf16.mxu1 %v9448_v52  ;;  %v4808_v63 = vld [vmem:[#allocation7 + $0x410] sm:$0xff]  ;;  %v11818_v26 = vpack.c.bf16 %v4821_v23, %v4818_v17 }
 0xfed   :  { %9419 = vmatpush1.bf16.msra.mxu0 %v9418_v20  ;;  %9451 = vmatpush3.bf16.msra.mxu1 %v9448_v52  ;;  %v11772_v52 = vpack.c.bf16 %v4808_v63, %v4805_v39  ;;  %v11778_v20 = vpack.c.bf16 %v4814_v6, %v4811_v18  ;;  %v4278_v39 = vrot.slane %v4269_v46, %v10830_v57 }
 0xfee   :  { %9421 = vmatprep.subr.bf16.mxu0 %v9420_v1  ;;  %9453 = vmatprep.subr.bf16.mxu1 %v9452_v30  ;;  %v4813_v1 = vld [vmem:[#allocation7 + $0x438] sm:$0xff]  ;;  %v10016_v63 = vadd.f32 %v4274_v7, %v11367_v34 }
 0xfef   :  { %v11780_v56 = vpack.c.bf16 %v4813_v1, %v4810_v59  ;;  %v10018_v18 = vadd.f32 %v4278_v39, %v11373_v2  ;;  %v2570_v2 = vadd.f32 %v11370_v38, %v11382_v32  ;;  %v11844_v7 = vld [vmem:[#allocation12 + $0x10] sm:$0xff]  ;;  %v6834_v39 = vld [vmem:[%s12292_s3 + $0x6] sm:$0x7] }
 0xff1   :  { %9423 = vmatpush1.bf16.msra.mxu0 %v9422_v33  ;;  %9455 = vmatpush3.bf16.msra.mxu1 %v9452_v30  ;;  %v4776_v30 = vld [vmem:[#allocation7 + $0x310] sm:$0xff] }
 0xff2   :  { %9425 = vmatprep.subr.bf16.mxu0 %v9424_v9  ;;  %9457 = vmatprep.subr.bf16.mxu1 %v9456_v10  ;;  %v11782_v15 = vpack.c.bf16 %v4779_v61, %v4776_v30  ;;  %v4816_v33 = vld [vmem:[#allocation7 + $0x450] sm:$0xff]  ;;  %v4819_v9 = vld [vmem:[#allocation7 + $0x468] sm:$0xff] }
 0xff5   :  { %9427 = vmatpush1.bf16.msra.mxu0 %v9426_v45  ;;  %9459 = vmatpush3.bf16.msra.mxu1 %v9456_v10  ;;  %v11791_v10 = vpack.c.bf16 %v4819_v9, %v4816_v33  ;;  %v11793_v45 = vpack.c.bf16 %v4785_v8, %v4782_v24  ;;  %v4282_v24 = vrot.slane %v4269_v46, %v10862_v3 }
 0xff6   :  { %9492 = vmatprep.subr.bf16.mxu1 %v12306_v0 }
 0xff8   :  { %4591 = vmatmul.mubr.f32.vlgmr.msra.gmra.mrb[32].mxu0 %v11387_v14  ;;  %8037 = vmatmul.mubr.f32.vlgmr.msra.gmra.mrb[64].mxu1 %v11434_v4  ;;  %v4775_v14 = vld [vmem:[#allocation7 + $0x308] sm:$0xff] }
 0xff9   :  { %8039 = vmatprep.mubr.f32.mxu1 %v11480_v35  ;;  %4596 = vmatprep.mubr.f32.mxu0 %v12307_v22 }
 0xffa   :  { %9494 = vmatpush3.bf16.msra.mxu1 %v11782_v15 }
 0xffb   :  { %9495 = vmatprep.subr.bf16.mxu1 %v12306_v0 }
 0xffc   :  { %4597 = vmatmul.mubr.f32.gmra.mrb[34].mxu0 %v11434_v4  ;;  %8040 = vmatmul.mubr.f32.gmra.mrb[66].mxu1 %v11570_v13  ;;  %v4778_v4 = vld [vmem:[#allocation7 + $0x320] sm:$0xff] }
 0xffd   :  { %8042 = vmatprep.mubr.f32.mxu1 %v11623_v47  ;;  %4602 = vmatprep.mubr.f32.mxu0 %v12307_v22 }
 0xffe   :  { %9497 = vmatpush3.bf16.msra.mxu1 %v11793_v45 }
 0xfff   :  { %9498 = vmatprep.subr.bf16.mxu1 %v12306_v0 }
0x1000   :  { %4603 = vmatmul.mubr.f32.gmra.mrb[36].mxu0 %v11480_v35  ;;  %8043 = vmatmul.mubr.f32.gmra.mrb[68].mxu1 %v11670_v43  ;;  %v11742_v35 = vpack.c.bf16 %v4778_v4, %v4775_v14  ;;  %v4788_v14 = vld [vmem:[#allocation7 + $0x370] sm:$0xff]  ;;  %v4791_v4 = vld [vmem:[#allocation7 + $0x388] sm:$0xff] }
0x1001   :  { %8045 = vmatprep.mubr.f32.mxu1 %v11715_v42  ;;  %4608 = vmatprep.mubr.f32.mxu0 %v12307_v22 }
0x1002   :  { %9461 = vmatprep.subr.bf16.mxu0 %v11742_v35 }
0x1004   :  { %4609 = vmatmul.mubr.f32.gmra.mrb[38].mxu0 %v11570_v13  ;;  %v4777_v13 = vld [vmem:[#allocation7 + $0x318] sm:$0xff] }
0x1005   :  { %4614 = vmatprep.mubr.f32.mxu0 %v12307_v22  ;;  %v11744_v62 = vpack.c.bf16 %v4777_v13, %v4774_v5  ;;  %v4794_v5 = vld [vmem:[#allocation7 + $0x3a0] sm:$0xff]  ;;  %v11799_v13 = vpack.c.bf16 %v4791_v4, %v4788_v14 }
0x1007   :  { %9463 = vmatpush1.bf16.msra.mxu0 %v11744_v62  ;;  %9500 = vmatpush3.bf16.msra.mxu1 %v11799_v13 }
0x1008   :  { %4615 = vmatmul.mubr.f32.gmra.mrb[40].mxu0 %v11623_v47  ;;  %v4781_v47 = vld [vmem:[#allocation7 + $0x338] sm:$0xff]  ;;  %9501 = vmatprep.subr.bf16.mxu1 %v12306_v0 }
0x1009   :  { %4620 = vmatprep.mubr.f32.mxu0 %v12307_v22 }
0x100c   :  { %4621 = vmatmul.mubr.f32.gmra.mrb[42].mxu0 %v11670_v43  ;;  %v4784_v43 = vld [vmem:[#allocation7 + $0x350] sm:$0xff] }
0x100d   :  { %4626 = vmatprep.mubr.f32.mxu0 %v12307_v22  ;;  %v11748_v51 = vpack.c.bf16 %v4784_v43, %v4781_v47  ;;  %v4797_v47 = vld [vmem:[#allocation7 + $0x3b8] sm:$0xff] }
0x100e   :  { %v11802_v43 = vpack.c.bf16 %v4797_v47, %v4794_v5 }
0x100f   :  { %9465 = vmatprep.subr.bf16.mxu0 %v11748_v51 }
0x1010   :  { %4627 = vmatmul.mubr.f32.gmra.mrb[44].mxu0 %v11715_v42  ;;  %9503 = vmatpush3.bf16.msra.mxu1 %v11802_v43 }
0x1011   :  { %4632 = vmatprep.mubr.f32.mxu0 %v12307_v22  ;;  %9467 = vmatpush1.bf16.msra.mxu0 %v11750_v41 }
0x1012   :  { %9469 = vmatprep.subr.bf16.mxu0 %v11754_v36  ;;  %9504 = vmatprep.subr.bf16.mxu1 %v12306_v0 }
0x1014   :  { %9506 = vmatpush3.bf16.msra.mxu1 %v11806_v49 }
0x1015   :  { %9471 = vmatpush1.bf16.msra.mxu0 %v11756_v29  ;;  %9507 = vmatprep.subr.bf16.mxu1 %v12306_v0 }
0x1016   :  { %9473 = vmatprep.subr.bf16.mxu0 %v11760_v31 }
0x1018   :  { %9509 = vmatpush3.bf16.msra.mxu1 %v11810_v27 }
0x1019   :  { %9475 = vmatpush1.bf16.msra.mxu0 %v11762_v40  ;;  %9510 = vmatprep.subr.bf16.mxu1 %v12306_v0 }
0x101a   :  { %9477 = vmatprep.subr.bf16.mxu0 %v11766_v60 }
0x101c   :  { %9512 = vmatpush3.bf16.msra.mxu1 %v11814_v19 }
0x101d   :  { %9479 = vmatpush1.bf16.msra.mxu0 %v11768_v16  ;;  %9513 = vmatprep.subr.bf16.mxu1 %v12306_v0 }
0x101e   :  { %9481 = vmatprep.subr.bf16.mxu0 %v11772_v52 }
0x1020   :  { %9515 = vmatpush3.bf16.msra.mxu1 %v11818_v26 }
0x1021   :  { %9483 = vmatpush1.bf16.msra.mxu0 %v11774_v53  ;;  %9548 = vmatprep.subr.bf16.mxu1 %v12306_v0 }
0x1022   :  { %9485 = vmatprep.subr.bf16.mxu0 %v11778_v20 }
0x1025   :  { %9487 = vmatpush1.bf16.msra.mxu0 %v11780_v56 }
0x1026   :  { %9489 = vmatprep.subr.bf16.mxu0 %v11785_v48 }
0x1029   :  { %9491 = vmatpush1.bf16.msra.mxu0 %v11791_v10 }
0x102a   :  { %9517 = vmatprep.subr.bf16.mxu0 %v11742_v35 }
0x10ab   :  { %v4352_v25 = vpop.f32.mrb[30].mxu0  ;;  %v4423_v50 = vpop.f32.mrb[62].mxu1 }
0x10ac   :  { %v10017_v6 = vadd.f32 %v10016_v63, %v4352_v25  ;;  %v4354_v59 = vpop.f32.mrb[31].mxu0  ;;  %v8003_v1 = vpop.f32.mrb[63].mxu1  ;;  %v4424_v34 = vadd.f32 %v4423_v50, %v4282_v24  ;;  %v11889_v63 = vrot.slane %v6834_v39, %v10825_v54 }
0x10ad   :  { %v10019_v61 = vadd.f32 %v10018_v18, %v4354_v59  ;;  %v11895_v18 = vrot.slane %v6834_v39, %v10830_v57 }
0x10ae   :  { %v6832_v30 = vmul.f32 -1.442695, %v10017_v6 }
0x10af   :  { %v6833_v58 = vmul.f32 -1.442695, %v10019_v61 }
0x10b0   :  { %10250 = vpow2.f32 %v6832_v30 }
0x10b1   :  { %10252 = vpow2.f32 %v6833_v58 }
0x10ba   :  { %v10251_v21 = vpop.eup %10250 }
0x10bb   :  { %v4431_v33 = vadd.f32 1.0, %v10251_v21  ;;  %v10253_v9 = vpop.eup %10252 }
0x10bc   :  { %v4438_v8 = vadd.f32 1.0, %v10253_v9 }
0x10bd   :  { %10254 = vrcp.f32 %v4431_v33 }
0x10be   :  { %10256 = vrcp.f32 %v4438_v8 }
0x10c7   :  { %v10255_v14 = vpop.eup %10254 }
0x10c8   :  { %v4441_v4 = vmul.f32 %v10255_v14, %v4424_v34  ;;  %v10257_v12 = vpop.eup %10256 }
0x10c9   :  { %v4444_v17 = vsub.f32 1.0, %v10257_v12  ;;  %v4446_v32 = vmul.f32 %v10257_v12, %v11715_v42  ;;  %v4823_v42 = vld [vmem:[#allocation9 + $0x6] sm:$0x7]  ;;  %v11904_v12 = vrot.slane %v6834_v39, %v10862_v3 }
0x10ca   :  { %v4442_v5 = vadd.f32 %v4441_v4, %v2570_v2  ;;  %v4828_v25 = vrot.slane %v4823_v42, %v10825_v54  ;;  %v4832_v6 = vrot.slane %v4823_v42, %v10830_v57  ;;  %v4836_v4 = vrot.slane %v4823_v42, %v10862_v3 }
0x10cb   :  { %v11830_v47 = vpop.f32.mrb[64].mxu1 }
0x10cc   :  { %10258 = vtanh.f32 %v4442_v5  ;;  %v11832_v28 = vpop.f32.mrb[65].mxu1  ;;  %v10020_v1 = vadd.f32 %v4828_v25, %v11889_v63  ;;  %v10022_v61 = vadd.f32 %v4832_v6, %v11895_v18 }
0x10cf   :  { %v11834_v44 = vpop.f32.mrb[66].mxu1 }
0x10d0   :  { %v11836_v11 = vpop.f32.mrb[67].mxu1 }
0x10d3   :  { %v11838_v37 = vpop.f32.mrb[68].mxu1 }
0x10d4   :  { %v11840_v55 = vpop.f32.mrb[69].mxu1 }
0x10d6   :  { %v10259_v23 = vpop.eup %10258 }
0x10d7   :  { %v4445_v38 = vmul.f32 %v10259_v23, %v4444_v17 }
0x10d9   :  { %v4447_v46 = vadd.f32 %v4446_v32, %v4445_v38  ;;  %v4706_v32 = vadd.f32 %v11832_v28, %v11904_v12  ;;  %v5054_v28 = vld [vmem:[#allocation9 + $0x6] sm:$0x7] }
0x10da   :  { %v5063_v39 = vrot.slane %v5054_v28, %v10830_v57 }
0x10db   :  { %4633 = vmatmul.mubr.f32.gmra.mrb[46].mxu0 %v4447_v46  ;;  %4450 = vst [vmem:[#allocation14 + $0x8] sm:$0xff] %v4447_v46  ;;  %8046 = vmatmul.mubr.f32.gmra.mrb[70].mxu1 %v4447_v46 }
0x10dc   :  { %4904 = vmatprep.mubr.f32.mxu0 %v12307_v22  ;;  %8080 = vmatprep.mubr.msk.f32.mxu1 %vm10517_vm0, %v12307_v22 }
0x10df   :  { %4905 = vmatmul.mubr.f32.vlgmr.msra.gmra.mrb[32].mxu0 %v11844_v7  ;;  %8081 = vmatmul.mubr.f32.vlgmr.msra.gmra.mrb[72].mxu1 %v11844_v7 }
0x10e0   :  { %9519 = vmatpush1.bf16.msra.mxu0 %v11744_v62  ;;  %9550 = vmatpush3.bf16.msra.mxu1 %v11782_v15 }
0x10e1   :  { %9521 = vmatprep.subr.bf16.mxu0 %v11748_v51  ;;  %9551 = vmatprep.subr.bf16.mxu1 %v12306_v0 }
0x10e2   :  { %5135 = vmatprep.mubr.f32.mxu0 %v12307_v22  ;;  %8115 = vmatprep.mubr.msk.f32.mxu1 %vm10517_vm0, %v12307_v22 }
0x10e4   :  { %9523 = vmatpush1.bf16.msra.mxu0 %v11750_v41  ;;  %9553 = vmatpush3.bf16.msra.mxu1 %v11793_v45 }
0x10e5   :  { %9525 = vmatprep.subr.bf16.mxu0 %v11754_v36  ;;  %9554 = vmatprep.subr.bf16.mxu1 %v12306_v0 }
0x10e8   :  { %9527 = vmatpush1.bf16.msra.mxu0 %v11756_v29  ;;  %9556 = vmatpush3.bf16.msra.mxu1 %v11799_v13 }
0x10e9   :  { %9529 = vmatprep.subr.bf16.mxu0 %v11760_v31  ;;  %9557 = vmatprep.subr.bf16.mxu1 %v12306_v0 }
0x10ec   :  { %9531 = vmatpush1.bf16.msra.mxu0 %v11762_v40  ;;  %9559 = vmatpush3.bf16.msra.mxu1 %v11802_v43 }
0x10ed   :  { %9533 = vmatprep.subr.bf16.mxu0 %v11766_v60  ;;  %9560 = vmatprep.subr.bf16.mxu1 %v12306_v0 }
0x10f0   :  { %9535 = vmatpush1.bf16.msra.mxu0 %v11768_v16  ;;  %9562 = vmatpush3.bf16.msra.mxu1 %v11806_v49 }
0x10f1   :  { %9537 = vmatprep.subr.bf16.mxu0 %v11772_v52  ;;  %9563 = vmatprep.subr.bf16.mxu1 %v12306_v0 }
0x10f4   :  { %9539 = vmatpush1.bf16.msra.mxu0 %v11774_v53  ;;  %9565 = vmatpush3.bf16.msra.mxu1 %v11810_v27 }
0x10f5   :  { %9541 = vmatprep.subr.bf16.mxu0 %v11778_v20  ;;  %9566 = vmatprep.subr.bf16.mxu1 %v12306_v0 }
0x10f8   :  { %9543 = vmatpush1.bf16.msra.mxu0 %v11780_v56  ;;  %9568 = vmatpush3.bf16.msra.mxu1 %v11814_v19 }
0x10f9   :  { %9545 = vmatprep.subr.bf16.mxu0 %v11785_v48  ;;  %9569 = vmatprep.subr.bf16.mxu1 %v12306_v0 }
0x10fc   :  { %9547 = vmatpush1.bf16.msra.mxu0 %v11791_v10  ;;  %9571 = vmatpush3.bf16.msra.mxu1 %v11818_v26 }
0x10fd   :  { %9573 = vmatprep.subr.bf16.mxu0 %v11742_v35  ;;  %9604 = vmatprep.subr.bf16.mxu1 %v12306_v0 }
0x11ae   :  { %v11892_v50 = vpop.f32.mrb[70].mxu1 }
0x11af   :  { %v11898_v59 = vpop.f32.mrb[71].mxu1 }
0x11b2   :  { %v4906_v30 = vpop.f32.mrb[32].mxu0  ;;  %v4977_v58 = vpop.f32.mrb[72].mxu1 }
0x11b3   :  { %v10021_v21 = vadd.f32 %v10020_v1, %v4906_v30  ;;  %v4908_v33 = vpop.f32.mrb[33].mxu0  ;;  %v8082_v9 = vpop.f32.mrb[73].mxu1  ;;  %v4978_v23 = vadd.f32 %v4977_v58, %v4836_v4 }
0x11b4   :  { %v10023_v8 = vadd.f32 %v10022_v61, %v4908_v33 }
0x11b5   :  { %v6835_v24 = vmul.f32 -1.442695, %v10021_v21 }
0x11b6   :  { %v6836_v34 = vmul.f32 -1.442695, %v10023_v8 }
0x11b7   :  { %10260 = vpow2.f32 %v6835_v24  ;;  %v10026_v24 = vadd.f32 %v5063_v39, %v11895_v18 }
0x11b8   :  { %10262 = vpow2.f32 %v6836_v34 }
0x11c1   :  { %v10261_v14 = vpop.eup %10260 }
0x11c2   :  { %v4985_v2 = vadd.f32 1.0, %v10261_v14  ;;  %v10263_v5 = vpop.eup %10262 }
0x11c3   :  { %v4992_v17 = vadd.f32 1.0, %v10263_v5 }
0x11c4   :  { %10264 = vrcp.f32 %v4985_v2 }
0x11c5   :  { %10266 = vrcp.f32 %v4992_v17 }
0x11ce   :  { %v10265_v38 = vpop.eup %10264 }
0x11cf   :  { %v4995_v46 = vmul.f32 %v10265_v38, %v4978_v23  ;;  %v10267_v6 = vpop.eup %10266  ;;  %v5067_v38 = vrot.slane %v5054_v28, %v10862_v3 }
0x11d0   :  { %v4998_v1 = vsub.f32 1.0, %v10267_v6  ;;  %v5000_v42 = vmul.f32 %v10267_v6, %v11844_v7  ;;  %v5059_v7 = vrot.slane %v5054_v28, %v10825_v54  ;;  %v4711_v6 = vadd.f32 %v11830_v47, %v11904_v12 }
0x11d1   :  { %v4996_v25 = vadd.f32 %v4995_v46, %v4706_v32  ;;  %v4716_v28 = vadd.f32 %v11836_v11, %v11904_v12  ;;  %v5703_v11 = vld [vmem:[#allocation7 + $0x320] sm:$0xff] }
0x11d2   :  { %v10024_v58 = vadd.f32 %v5059_v7, %v11889_v63 }
0x11d3   :  { %10268 = vtanh.f32 %v4996_v25 }
0x11dd   :  { %v10269_v30 = vpop.eup %10268 }
0x11de   :  { %v4999_v61 = vmul.f32 %v10269_v30, %v4998_v1 }
0x11e0   :  { %v11909_v21 = vadd.f32 %v5000_v42, %v4999_v61 }
0x11e2   :  { %5136 = vmatmul.mubr.f32.vlgmr.msra.gmra.mrb[34].mxu0 %v11909_v21  ;;  %8116 = vmatmul.mubr.f32.vlgmr.msra.gmra.mrb[74].mxu1 %v11909_v21 }
0x11e3   :  { %9575 = vmatpush1.bf16.msra.mxu0 %v11744_v62  ;;  %9606 = vmatpush3.bf16.msra.mxu1 %v11782_v15 }
0x11e4   :  { %9577 = vmatprep.subr.bf16.mxu0 %v11748_v51  ;;  %9607 = vmatprep.subr.bf16.mxu1 %v12306_v0 }
0x11e5   :  { %5366 = vmatprep.mubr.f32.mxu0 %v12307_v22  ;;  %8150 = vmatprep.mubr.msk.f32.mxu1 %vm10517_vm0, %v12307_v22 }
0x11e7   :  { %9579 = vmatpush1.bf16.msra.mxu0 %v11750_v41  ;;  %9609 = vmatpush3.bf16.msra.mxu1 %v11793_v45 }
0x11e8   :  { %9581 = vmatprep.subr.bf16.mxu0 %v11754_v36  ;;  %9610 = vmatprep.subr.bf16.mxu1 %v12306_v0 }
0x11eb   :  { %9583 = vmatpush1.bf16.msra.mxu0 %v11756_v29  ;;  %9612 = vmatpush3.bf16.msra.mxu1 %v11799_v13 }
0x11ec   :  { %9585 = vmatprep.subr.bf16.mxu0 %v11760_v31  ;;  %9613 = vmatprep.subr.bf16.mxu1 %v12306_v0 }
0x11ef   :  { %9587 = vmatpush1.bf16.msra.mxu0 %v11762_v40  ;;  %9615 = vmatpush3.bf16.msra.mxu1 %v11802_v43 }
0x11f0   :  { %9589 = vmatprep.subr.bf16.mxu0 %v11766_v60  ;;  %9616 = vmatprep.subr.bf16.mxu1 %v12306_v0 }
0x11f3   :  { %9591 = vmatpush1.bf16.msra.mxu0 %v11768_v16  ;;  %9618 = vmatpush3.bf16.msra.mxu1 %v11806_v49 }
0x11f4   :  { %9593 = vmatprep.subr.bf16.mxu0 %v11772_v52  ;;  %9619 = vmatprep.subr.bf16.mxu1 %v12306_v0 }
0x11f7   :  { %9595 = vmatpush1.bf16.msra.mxu0 %v11774_v53  ;;  %9621 = vmatpush3.bf16.msra.mxu1 %v11810_v27 }
0x11f8   :  { %9597 = vmatprep.subr.bf16.mxu0 %v11778_v20  ;;  %9622 = vmatprep.subr.bf16.mxu1 %v12306_v0 }
0x11fb   :  { %9599 = vmatpush1.bf16.msra.mxu0 %v11780_v56  ;;  %9624 = vmatpush3.bf16.msra.mxu1 %v11814_v19 }
0x11fc   :  { %9601 = vmatprep.subr.bf16.mxu0 %v11785_v48  ;;  %9625 = vmatprep.subr.bf16.mxu1 %v12306_v0 }
0x11ff   :  { %9603 = vmatpush1.bf16.msra.mxu0 %v11791_v10  ;;  %9627 = vmatpush3.bf16.msra.mxu1 %v11818_v26 }
0x1200   :  { %9629 = vmatprep.subr.bf16.mxu0 %v11742_v35  ;;  %9660 = vmatprep.subr.bf16.mxu1 %v12306_v0 }
0x12b5   :  { %v5137_v33 = vpop.f32.mrb[34].mxu0  ;;  %v5208_v9 = vpop.f32.mrb[74].mxu1 }
0x12b6   :  { %v10025_v8 = vadd.f32 %v10024_v58, %v5137_v33  ;;  %v5139_v34 = vpop.f32.mrb[35].mxu0  ;;  %v8117_v14 = vpop.f32.mrb[75].mxu1  ;;  %v5209_v46 = vadd.f32 %v5208_v9, %v5067_v38 }
0x12b7   :  { %v10027_v4 = vadd.f32 %v10026_v24, %v5139_v34 }
0x12b8   :  { %v6837_v2 = vmul.f32 -1.442695, %v10025_v8 }
0x12b9   :  { %v6838_v35 = vmul.f32 -1.442695, %v10027_v4 }
0x12ba   :  { %10270 = vpow2.f32 %v6837_v2 }
0x12bb   :  { %10272 = vpow2.f32 %v6838_v35 }
0x12c4   :  { %v10271_v5 = vpop.eup %10270 }
0x12c5   :  { %v5216_v17 = vadd.f32 1.0, %v10271_v5  ;;  %v10273_v23 = vpop.eup %10272 }
0x12c6   :  { %v5223_v32 = vadd.f32 1.0, %v10273_v23  ;;  %v5702_v23 = vld [vmem:[#allocation7 + $0x318] sm:$0xff] }
0x12c7   :  { %10274 = vrcp.f32 %v5216_v17  ;;  %v5699_v17 = vld [vmem:[#allocation7 + $0x300] sm:$0xff] }
0x12c8   :  { %10276 = vrcp.f32 %v5223_v32  ;;  %v12019_v38 = vpack.c.bf16 %v5702_v23, %v5699_v17  ;;  %v5745_v17 = vld [vmem:[#allocation7 + $0x470] sm:$0xff] }
0x12d1   :  { %v10275_v25 = vpop.eup %10274 }
0x12d2   :  { %v5226_v1 = vmul.f32 %v10275_v25, %v5209_v46  ;;  %v10277_v61 = vpop.eup %10276  ;;  %v5705_v46 = vld [vmem:[#allocation7 + $0x330] sm:$0xff] }
0x12d3   :  { %v5229_v42 = vsub.f32 1.0, %v10277_v61  ;;  %v5231_v58 = vmul.f32 %v10277_v61, %v11909_v21  ;;  %v5711_v61 = vld [vmem:[#allocation7 + $0x360] sm:$0xff] }
0x12d4   :  { %v5227_v30 = vadd.f32 %v5226_v1, %v4711_v6  ;;  %v5712_v6 = vld [vmem:[#allocation7 + $0x368] sm:$0xff]  ;;  %v5715_v1 = vld [vmem:[#allocation7 + $0x380] sm:$0xff] }
0x12d6   :  { %10278 = vtanh.f32 %v5227_v30  ;;  %v12029_v30 = vpack.c.bf16 %v5715_v1, %v5712_v6  ;;  %v5743_v6 = vld [vmem:[#allocation7 + $0x460] sm:$0xff]  ;;  %v5746_v1 = vld [vmem:[#allocation7 + $0x478] sm:$0xff] }
0x12e0   :  { %v10279_v7 = vpop.eup %10278 }
0x12e1   :  { %v5230_v39 = vmul.f32 %v10279_v7, %v5229_v42  ;;  %v5714_v42 = vld [vmem:[#allocation7 + $0x378] sm:$0xff] }
0x12e2   :  { %v12031_v7 = vpack.c.bf16 %v5714_v42, %v5711_v61  ;;  %v12075_v42 = vpack.c.bf16 %v5746_v1, %v5743_v6 }
0x12e3   :  { %v11956_v33 = vadd.f32 %v5231_v58, %v5230_v39  ;;  %v5718_v39 = vld [vmem:[#allocation7 + $0x398] sm:$0xff]  ;;  %v5721_v58 = vld [vmem:[#allocation7 + $0x3b0] sm:$0xff] }
0x12e5   :  { %5367 = vmatmul.mubr.f32.vlgmr.msra.gmra.mrb[36].mxu0 %v11956_v33  ;;  %8151 = vmatmul.mubr.f32.vlgmr.msra.gmra.mrb[76].mxu1 %v11956_v33 }
0x12e6   :  { %9631 = vmatpush1.bf16.msra.mxu0 %v11744_v62  ;;  %9662 = vmatpush3.bf16.msra.mxu1 %v11782_v15  ;;  %v5285_v62 = vld [vmem:[#allocation9 + $0x6] sm:$0x7] }
0x12e7   :  { %9633 = vmatprep.subr.bf16.mxu0 %v11748_v51  ;;  %9663 = vmatprep.subr.bf16.mxu1 %v12306_v0  ;;  %v5290_v51 = vrot.slane %v5285_v62, %v10825_v54 }
0x12e8   :  { %5597 = vmatprep.mubr.f32.mxu0 %v12307_v22  ;;  %8185 = vmatprep.mubr.msk.f32.mxu1 %vm10517_vm0, %v12307_v22 }
0x12ea   :  { %9635 = vmatpush1.bf16.msra.mxu0 %v11750_v41  ;;  %9665 = vmatpush3.bf16.msra.mxu1 %v11793_v45  ;;  %v5294_v41 = vrot.slane %v5285_v62, %v10830_v57 }
0x12eb   :  { %9637 = vmatprep.subr.bf16.mxu0 %v11754_v36  ;;  %9666 = vmatprep.subr.bf16.mxu1 %v12306_v0  ;;  %v10028_v36 = vadd.f32 %v5290_v51, %v11889_v63  ;;  %v5717_v51 = vld [vmem:[#allocation7 + $0x390] sm:$0xff] }
0x12ee   :  { %9639 = vmatpush1.bf16.msra.mxu0 %v11756_v29  ;;  %9668 = vmatpush3.bf16.msra.mxu1 %v11799_v13 }
0x12ef   :  { %9641 = vmatprep.subr.bf16.mxu0 %v11760_v31  ;;  %9669 = vmatprep.subr.bf16.mxu1 %v12306_v0 }
0x12f2   :  { %9643 = vmatpush1.bf16.msra.mxu0 %v11762_v40  ;;  %9671 = vmatpush3.bf16.msra.mxu1 %v11802_v43  ;;  %v10030_v40 = vadd.f32 %v5294_v41, %v11895_v18  ;;  %v5720_v41 = vld [vmem:[#allocation7 + $0x3a8] sm:$0xff] }
0x12f3   :  { %9645 = vmatprep.subr.bf16.mxu0 %v11766_v60  ;;  %9672 = vmatprep.subr.bf16.mxu1 %v12306_v0 }
0x12f6   :  { %9647 = vmatpush1.bf16.msra.mxu0 %v11768_v16  ;;  %9674 = vmatpush3.bf16.msra.mxu1 %v11806_v49 }
0x12f7   :  { %9649 = vmatprep.subr.bf16.mxu0 %v11772_v52  ;;  %9675 = vmatprep.subr.bf16.mxu1 %v12306_v0 }
0x12fa   :  { %9651 = vmatpush1.bf16.msra.mxu0 %v11774_v53  ;;  %9677 = vmatpush3.bf16.msra.mxu1 %v11810_v27  ;;  %v5298_v27 = vrot.slane %v5285_v62, %v10862_v3  ;;  %v12035_v62 = vpack.c.bf16 %v5721_v58, %v5718_v39  ;;  %v5516_v39 = vld [vmem:[#allocation9 + $0x6] sm:$0x7] }
0x12fb   :  { %9653 = vmatprep.subr.bf16.mxu0 %v11778_v20  ;;  %9678 = vmatprep.subr.bf16.mxu1 %v12306_v0  ;;  %v5521_v58 = vrot.slane %v5516_v39, %v10825_v54 }
0x12fe   :  { %9655 = vmatpush1.bf16.msra.mxu0 %v11780_v56  ;;  %9680 = vmatpush3.bf16.msra.mxu1 %v11814_v19 }
0x12ff   :  { %9657 = vmatprep.subr.bf16.mxu0 %v11785_v48  ;;  %9681 = vmatprep.subr.bf16.mxu1 %v12306_v0 }
0x1302   :  { %9659 = vmatpush1.bf16.msra.mxu0 %v11791_v10  ;;  %9683 = vmatpush3.bf16.msra.mxu1 %v11818_v26 }
0x1303   :  { %9716 = vmatprep.subr.bf16.mxu1 %v12306_v0 }
0x13b8   :  { %v5368_v29 = vpop.f32.mrb[36].mxu0  ;;  %v5439_v31 = vpop.f32.mrb[76].mxu1 }
0x13b9   :  { %v10029_v60 = vadd.f32 %v10028_v36, %v5368_v29  ;;  %v5370_v16 = vpop.f32.mrb[37].mxu0  ;;  %v8152_v52 = vpop.f32.mrb[77].mxu1  ;;  %v5440_v26 = vadd.f32 %v5439_v31, %v5298_v27  ;;  %v12037_v36 = vpack.c.bf16 %v5720_v41, %v5717_v51  ;;  %v5724_v29 = vld [vmem:[#allocation7 + $0x3c8] sm:$0xff]  ;;  %v5727_v31 = vld [vmem:[#allocation7 + $0x3e0] sm:$0xff]  ;;  %v5525_v51 = vrot.slane %v5516_v39, %v10830_v57 }
0x13ba   :  { %v10031_v20 = vadd.f32 %v10030_v40, %v5370_v16  ;;  %v12041_v40 = vpack.c.bf16 %v5727_v31, %v5724_v29  ;;  %v5726_v16 = vld [vmem:[#allocation7 + $0x3d8] sm:$0xff]  ;;  %v5725_v52 = vld [vmem:[#allocation7 + $0x3d0] sm:$0xff]  ;;  %v10032_v41 = vadd.f32 %v5521_v58, %v11889_v63 }
0x13bb   :  { %v6839_v53 = vmul.f32 -1.442695, %v10029_v60  ;;  %v5723_v60 = vld [vmem:[#allocation7 + $0x3c0] sm:$0xff] }
0x13bc   :  { %v6840_v56 = vmul.f32 -1.442695, %v10031_v20  ;;  %v5728_v20 = vld [vmem:[#allocation7 + $0x3e8] sm:$0xff] }
0x13bd   :  { %10280 = vpow2.f32 %v6839_v53  ;;  %v12043_v53 = vpack.c.bf16 %v5726_v16, %v5723_v60  ;;  %v10034_v60 = vadd.f32 %v5525_v51, %v11895_v18 }
0x13be   :  { %10282 = vpow2.f32 %v6840_v56  ;;  %v12046_v56 = vpack.c.bf16 %v5728_v20, %v5725_v52 }
0x13c7   :  { %v10281_v48 = vpop.eup %10280 }
0x13c8   :  { %v5447_v10 = vadd.f32 1.0, %v10281_v48  ;;  %v10283_v49 = vpop.eup %10282  ;;  %v5730_v48 = vld [vmem:[#allocation7 + $0x3f8] sm:$0xff] }
0x13c9   :  { %v5454_v19 = vadd.f32 1.0, %v10283_v49  ;;  %v5729_v49 = vld [vmem:[#allocation7 + $0x3f0] sm:$0xff] }
0x13ca   :  { %10284 = vrcp.f32 %v5447_v10  ;;  %v5733_v10 = vld [vmem:[#allocation7 + $0x410] sm:$0xff] }
0x13cb   :  { %10286 = vrcp.f32 %v5454_v19  ;;  %v12049_v27 = vpack.c.bf16 %v5733_v10, %v5730_v48  ;;  %v5732_v19 = vld [vmem:[#allocation7 + $0x408] sm:$0xff] }
0x13d4   :  { %v10285_v47 = vpop.eup %10284 }
0x13d5   :  { %v5457_v9 = vmul.f32 %v10285_v47, %v5440_v26  ;;  %v10287_v8 = vpop.eup %10286  ;;  %v5731_v26 = vld [vmem:[#allocation7 + $0x400] sm:$0xff]  ;;  %v5734_v47 = vld [vmem:[#allocation7 + $0x418] sm:$0xff] }
0x13d6   :  { %v5460_v34 = vsub.f32 1.0, %v10287_v8  ;;  %v5462_v4 = vmul.f32 %v10287_v8, %v11956_v33  ;;  %v5739_v8 = vld [vmem:[#allocation7 + $0x440] sm:$0xff] }
0x13d7   :  { %v5458_v24 = vadd.f32 %v5457_v9, %v4716_v28  ;;  %v12052_v28 = vpack.c.bf16 %v5732_v19, %v5729_v49  ;;  %v12054_v9 = vpack.c.bf16 %v5734_v47, %v5731_v26 }
0x13d9   :  { %10288 = vtanh.f32 %v5458_v24  ;;  %v5736_v24 = vld [vmem:[#allocation7 + $0x428] sm:$0xff] }
0x13e3   :  { %v10289_v14 = vpop.eup %10288 }
0x13e4   :  { %v5461_v2 = vmul.f32 %v10289_v14, %v5460_v34  ;;  %v5735_v34 = vld [vmem:[#allocation7 + $0x420] sm:$0xff]  ;;  %v12058_v14 = vpack.c.bf16 %v5739_v8, %v5736_v24  ;;  %v5529_v24 = vrot.slane %v5516_v39, %v10862_v3  ;;  %v5935_v39 = vld [vmem:[#allocation7 + $0x328] sm:$0xff] }
0x13e6   :  { %v12002_v35 = vadd.f32 %v5462_v4, %v5461_v2  ;;  %v5738_v2 = vld [vmem:[#allocation7 + $0x438] sm:$0xff]  ;;  %v5737_v4 = vld [vmem:[#allocation7 + $0x430] sm:$0xff] }
0x13e7   :  { %v12061_v23 = vpack.c.bf16 %v5738_v2, %v5735_v34 }
0x13e8   :  { %5598 = vmatmul.mubr.f32.vlgmr.msra.gmra.mrb[38].mxu0 %v12002_v35  ;;  %8186 = vmatmul.mubr.f32.vlgmr.msra.gmra.mrb[78].mxu1 %v12002_v35 }
0x13e9   :  { %9718 = vmatpush3.bf16.msra.mxu1 %v11782_v15  ;;  %5828 = vmatprep.mubr.f32.mxu0 %v12307_v22  ;;  %v5700_v15 = vld [vmem:[#allocation7 + $0x308] sm:$0xff] }
0x13ea   :  { %9719 = vmatprep.subr.bf16.mxu1 %v12306_v0  ;;  %8220 = vmatprep.mubr.msk.f32.mxu1 %vm10517_vm0, %v12307_v22  ;;  %v12017_v5 = vpack.c.bf16 %v5703_v11, %v5700_v15  ;;  %v5740_v15 = vld [vmem:[#allocation7 + $0x448] sm:$0xff]  ;;  %v5742_v11 = vld [vmem:[#allocation7 + $0x458] sm:$0xff] }
0x13ec   :  { %9685 = vmatprep.subr.bf16.mxu0 %v12017_v5 }
0x13ed   :  { %9721 = vmatpush3.bf16.msra.mxu1 %v11793_v45  ;;  %9687 = vmatpush1.bf16.msra.mxu0 %v12019_v38  ;;  %v5706_v45 = vld [vmem:[#allocation7 + $0x338] sm:$0xff] }
0x13ee   :  { %9722 = vmatprep.subr.bf16.mxu1 %v12306_v0 }
0x13f1   :  { %9724 = vmatpush3.bf16.msra.mxu1 %v11799_v13  ;;  %v5709_v13 = vld [vmem:[#allocation7 + $0x350] sm:$0xff] }
0x13f2   :  { %9725 = vmatprep.subr.bf16.mxu1 %v12306_v0  ;;  %v12023_v32 = vpack.c.bf16 %v5709_v13, %v5706_v45  ;;  %v12065_v45 = vpack.c.bf16 %v5740_v15, %v5737_v4  ;;  %v12067_v13 = vpack.c.bf16 %v5745_v17, %v5742_v11  ;;  %v4721_v4 = vadd.f32 %v11834_v44, %v11904_v12  ;;  %v5932_v44 = vld [vmem:[#allocation7 + $0x310] sm:$0xff] }
0x13f3   :  { %v12113_v51 = vpack.c.bf16 %v5935_v39, %v5932_v44 }
0x13f4   :  { %9689 = vmatprep.subr.bf16.mxu0 %v12023_v32 }
0x13f5   :  { %9727 = vmatpush3.bf16.msra.mxu1 %v11802_v43  ;;  %v5708_v43 = vld [vmem:[#allocation7 + $0x348] sm:$0xff] }
0x13f6   :  { %9728 = vmatprep.subr.bf16.mxu1 %v12306_v0  ;;  %v12025_v25 = vpack.c.bf16 %v5708_v43, %v5705_v46  ;;  %v5741_v46 = vld [vmem:[#allocation7 + $0x450] sm:$0xff]  ;;  %v5744_v43 = vld [vmem:[#allocation7 + $0x468] sm:$0xff] }
0x13f7   :  { %v12071_v61 = vpack.c.bf16 %v5744_v43, %v5741_v46 }
0x13f8   :  { %9691 = vmatpush1.bf16.msra.mxu0 %v12025_v25 }
0x13f9   :  { %9693 = vmatprep.subr.bf16.mxu0 %v12029_v30  ;;  %9730 = vmatpush3.bf16.msra.mxu1 %v12046_v56 }
0x13fa   :  { %9731 = vmatprep.subr.bf16.mxu1 %v12306_v0 }
0x13fc   :  { %9695 = vmatpush1.bf16.msra.mxu0 %v12031_v7 }
0x13fd   :  { %9697 = vmatprep.subr.bf16.mxu0 %v12035_v62  ;;  %9733 = vmatpush3.bf16.msra.mxu1 %v12054_v9 }
0x13fe   :  { %9734 = vmatprep.subr.bf16.mxu1 %v12306_v0 }
0x1400   :  { %9699 = vmatpush1.bf16.msra.mxu0 %v12037_v36 }
0x1401   :  { %9701 = vmatprep.subr.bf16.mxu0 %v12041_v40  ;;  %9736 = vmatpush3.bf16.msra.mxu1 %v12065_v45 }
0x1402   :  { %9737 = vmatprep.subr.bf16.mxu1 %v12306_v0 }
0x1404   :  { %9703 = vmatpush1.bf16.msra.mxu0 %v12043_v53 }
0x1405   :  { %9705 = vmatprep.subr.bf16.mxu0 %v12049_v27  ;;  %9739 = vmatpush3.bf16.msra.mxu1 %v12075_v42 }
0x1406   :  { %9772 = vmatprep.subr.bf16.mxu1 %v12306_v0 }
0x1408   :  { %9707 = vmatpush1.bf16.msra.mxu0 %v12052_v28 }
0x1409   :  { %9709 = vmatprep.subr.bf16.mxu0 %v12058_v14 }
0x140c   :  { %9711 = vmatpush1.bf16.msra.mxu0 %v12061_v23 }
0x140d   :  { %9713 = vmatprep.subr.bf16.mxu0 %v12067_v13 }
0x1410   :  { %9715 = vmatpush1.bf16.msra.mxu0 %v12071_v61 }
0x1411   :  { %9741 = vmatprep.subr.bf16.mxu0 %v12017_v5 }
0x14bb   :  { %v5599_v29 = vpop.f32.mrb[38].mxu0  ;;  %v5670_v31 = vpop.f32.mrb[78].mxu1 }
0x14bc   :  { %v10033_v16 = vadd.f32 %v10032_v41, %v5599_v29  ;;  %v5601_v52 = vpop.f32.mrb[39].mxu0  ;;  %v8187_v20 = vpop.f32.mrb[79].mxu1  ;;  %v5671_v34 = vadd.f32 %v5670_v31, %v5529_v24  ;;  %v5938_v41 = vld [vmem:[#allocation7 + $0x340] sm:$0xff]  ;;  %v5941_v29 = vld [vmem:[#allocation7 + $0x358] sm:$0xff] }
0x14bd   :  { %v10035_v10 = vadd.f32 %v10034_v60, %v5601_v52  ;;  %v12117_v31 = vpack.c.bf16 %v5941_v29, %v5938_v41  ;;  %v5944_v60 = vld [vmem:[#allocation7 + $0x370] sm:$0xff]  ;;  %v5950_v20 = vld [vmem:[#allocation7 + $0x3a0] sm:$0xff] }
0x14be   :  { %v6841_v48 = vmul.f32 -1.442695, %v10033_v16  ;;  %v5947_v16 = vld [vmem:[#allocation7 + $0x388] sm:$0xff] }
0x14bf   :  { %v6842_v49 = vmul.f32 -1.442695, %v10035_v10  ;;  %v12121_v52 = vpack.c.bf16 %v5947_v16, %v5944_v60  ;;  %v4726_v60 = vadd.f32 %v11840_v55, %v11904_v12  ;;  %v5978_v55 = vld [vmem:[#allocation9 + $0x6] sm:$0x7] }
0x14c0   :  { %10290 = vpow2.f32 %v6841_v48  ;;  %v5953_v48 = vld [vmem:[#allocation7 + $0x3b8] sm:$0xff] }
0x14c1   :  { %10292 = vpow2.f32 %v6842_v49  ;;  %v12125_v10 = vpack.c.bf16 %v5953_v48, %v5950_v20  ;;  %v5747_v49 = vld [vmem:[#allocation9 + $0x6] sm:$0x7] }
0x14c2   :  { %v5760_v44 = vrot.slane %v5747_v49, %v10862_v3 }
0x14ca   :  { %v10291_v19 = vpop.eup %10290 }
0x14cb   :  { %v5678_v26 = vadd.f32 1.0, %v10291_v19  ;;  %v10293_v47 = vpop.eup %10292  ;;  %v5752_v19 = vrot.slane %v5747_v49, %v10825_v54 }
0x14cc   :  { %v5685_v8 = vadd.f32 1.0, %v10293_v47 }
0x14cd   :  { %10294 = vrcp.f32 %v5678_v26  ;;  %v5756_v26 = vrot.slane %v5747_v49, %v10830_v57  ;;  %v10036_v47 = vadd.f32 %v5752_v19, %v11889_v63  ;;  %v5983_v49 = vrot.slane %v5978_v55, %v10825_v54 }
0x14ce   :  { %10296 = vrcp.f32 %v5685_v8 }
0x14d7   :  { %v10295_v2 = vpop.eup %10294 }
0x14d8   :  { %v5688_v15 = vmul.f32 %v10295_v2, %v5671_v34  ;;  %v10297_v17 = vpop.eup %10296  ;;  %v10038_v34 = vadd.f32 %v5756_v26, %v11895_v18 }
0x14d9   :  { %v5691_v46 = vsub.f32 1.0, %v10297_v17  ;;  %v5693_v1 = vmul.f32 %v10297_v17, %v12002_v35 }
0x14da   :  { %v5689_v11 = vadd.f32 %v5688_v15, %v4721_v4 }
0x14dc   :  { %10298 = vtanh.f32 %v5689_v11 }
0x14e6   :  { %v10299_v43 = vpop.eup %10298 }
0x14e7   :  { %v5692_v6 = vmul.f32 %v10299_v43, %v5691_v46 }
0x14e9   :  { %v12090_v58 = vadd.f32 %v5693_v1, %v5692_v6 }
0x14eb   :  { %5829 = vmatmul.mubr.f32.vlgmr.msra.gmra.mrb[40].mxu0 %v12090_v58  ;;  %8221 = vmatmul.mubr.f32.vlgmr.msra.gmra.mrb[80].mxu1 %v12090_v58 }
0x14ec   :  { %9743 = vmatpush1.bf16.msra.mxu0 %v12019_v38  ;;  %6059 = vmatprep.mubr.f32.mxu0 %v12307_v22 }
0x14ed   :  { %9745 = vmatprep.subr.bf16.mxu0 %v12023_v32  ;;  %8255 = vmatprep.mubr.msk.f32.mxu1 %vm10517_vm0, %v12307_v22 }
0x14ee   :  { %9774 = vmatpush3.bf16.msra.mxu1 %v12113_v51 }
0x14ef   :  { %9775 = vmatprep.subr.bf16.mxu1 %v12306_v0 }
0x14f0   :  { %9747 = vmatpush1.bf16.msra.mxu0 %v12025_v25 }
0x14f1   :  { %9749 = vmatprep.subr.bf16.mxu0 %v12029_v30 }
0x14f2   :  { %9777 = vmatpush3.bf16.msra.mxu1 %v12117_v31 }
0x14f3   :  { %9778 = vmatprep.subr.bf16.mxu1 %v12306_v0 }
0x14f4   :  { %9751 = vmatpush1.bf16.msra.mxu0 %v12031_v7 }
0x14f5   :  { %9753 = vmatprep.subr.bf16.mxu0 %v12035_v62 }
0x14f6   :  { %9780 = vmatpush3.bf16.msra.mxu1 %v12121_v52 }
0x14f7   :  { %9781 = vmatprep.subr.bf16.mxu1 %v12306_v0 }
0x14f8   :  { %9755 = vmatpush1.bf16.msra.mxu0 %v12037_v36 }
0x14f9   :  { %9757 = vmatprep.subr.bf16.mxu0 %v12041_v40 }
0x14fa   :  { %9783 = vmatpush3.bf16.msra.mxu1 %v12125_v10 }
0x14fb   :  { %9784 = vmatprep.subr.bf16.mxu1 %v12306_v0 }
0x14fc   :  { %9759 = vmatpush1.bf16.msra.mxu0 %v12043_v53 }
0x14fd   :  { %9761 = vmatprep.subr.bf16.mxu0 %v12049_v27 }
0x14fe   :  { %9786 = vmatpush3.bf16.msra.mxu1 %v12046_v56 }
0x14ff   :  { %9787 = vmatprep.subr.bf16.mxu1 %v12306_v0 }
0x1500   :  { %9763 = vmatpush1.bf16.msra.mxu0 %v12052_v28 }
0x1501   :  { %9765 = vmatprep.subr.bf16.mxu0 %v12058_v14 }
0x1502   :  { %9789 = vmatpush3.bf16.msra.mxu1 %v12054_v9 }
0x1503   :  { %9790 = vmatprep.subr.bf16.mxu1 %v12306_v0 }
0x1504   :  { %9767 = vmatpush1.bf16.msra.mxu0 %v12061_v23 }
0x1505   :  { %9769 = vmatprep.subr.bf16.mxu0 %v12067_v13 }
0x1506   :  { %9792 = vmatpush3.bf16.msra.mxu1 %v12065_v45 }
0x1507   :  { %9793 = vmatprep.subr.bf16.mxu1 %v12306_v0 }
0x1508   :  { %9771 = vmatpush1.bf16.msra.mxu0 %v12071_v61 }
0x1509   :  { %9797 = vmatprep.subr.bf16.mxu0 %v12017_v5 }
0x150a   :  { %9795 = vmatpush3.bf16.msra.mxu1 %v12075_v42 }
0x150b   :  { %9828 = vmatprep.subr.bf16.mxu1 %v12306_v0 }
0x15be   :  { %v5830_v24 = vpop.f32.mrb[40].mxu0  ;;  %v5901_v8 = vpop.f32.mrb[80].mxu1 }
0x15bf   :  { %v10037_v2 = vadd.f32 %v10036_v47, %v5830_v24  ;;  %v5832_v4 = vpop.f32.mrb[41].mxu0  ;;  %v8222_v15 = vpop.f32.mrb[81].mxu1  ;;  %v5902_v41 = vadd.f32 %v5901_v8, %v5760_v44  ;;  %v5987_v8 = vrot.slane %v5978_v55, %v10830_v57 }
0x15c0   :  { %v10039_v17 = vadd.f32 %v10038_v34, %v5832_v4 }
0x15c1   :  { %v6843_v11 = vmul.f32 -1.442695, %v10037_v2  ;;  %v10040_v2 = vadd.f32 %v5983_v49, %v11889_v63 }
0x15c2   :  { %v6844_v46 = vmul.f32 -1.442695, %v10039_v17 }
0x15c3   :  { %10300 = vpow2.f32 %v6843_v11  ;;  %v10042_v11 = vadd.f32 %v5987_v8, %v11895_v18 }
0x15c4   :  { %10302 = vpow2.f32 %v6844_v46 }
0x15cd   :  { %v10301_v43 = vpop.eup %10300 }
0x15ce   :  { %v5909_v6 = vadd.f32 1.0, %v10301_v43  ;;  %v10303_v1 = vpop.eup %10302 }
0x15cf   :  { %v5916_v39 = vadd.f32 1.0, %v10303_v1 }
0x15d0   :  { %10304 = vrcp.f32 %v5909_v6 }
0x15d1   :  { %10306 = vrcp.f32 %v5916_v39 }
0x15da   :  { %v10305_v29 = vpop.eup %10304 }
0x15db   :  { %v5919_v16 = vmul.f32 %v10305_v29, %v5902_v41  ;;  %v10307_v48 = vpop.eup %10306  ;;  %v5991_v29 = vrot.slane %v5978_v55, %v10862_v3 }
0x15dc   :  { %v5922_v19 = vsub.f32 1.0, %v10307_v48  ;;  %v5924_v24 = vmul.f32 %v10307_v48, %v12090_v58  ;;  %v4731_v48 = vadd.f32 %v11838_v37, %v11904_v12  ;;  %v6631_v37 = vld [vmem:[#allocation10 + $0x8] sm:$0xff] }
0x15dd   :  { %v5920_v20 = vadd.f32 %v5919_v16, %v4726_v60 }
0x15df   :  { %10308 = vtanh.f32 %v5920_v20 }
0x15e9   :  { %v10309_v26 = vpop.eup %10308 }
0x15ea   :  { %v5923_v47 = vmul.f32 %v10309_v26, %v5922_v19 }
0x15ec   :  { %v12145_v34 = vadd.f32 %v5924_v24, %v5923_v47 }
0x15ee   :  { %6060 = vmatmul.mubr.f32.vlgmr.msra.gmra.mrb[42].mxu0 %v12145_v34  ;;  %8256 = vmatmul.mubr.f32.vlgmr.msra.gmra.mrb[82].mxu1 %v12145_v34 }
0x15ef   :  { %9799 = vmatpush1.bf16.msra.mxu0 %v12019_v38  ;;  %9830 = vmatpush3.bf16.msra.mxu1 %v12113_v51 }
0x15f0   :  { %9801 = vmatprep.subr.bf16.mxu0 %v12023_v32  ;;  %9831 = vmatprep.subr.bf16.mxu1 %v12306_v0 }
0x15f1   :  { %6290 = vmatprep.mubr.f32.mxu0 %v12307_v22  ;;  %8290 = vmatprep.mubr.msk.f32.mxu1 %vm10517_vm0, %v12307_v22 }
0x15f3   :  { %9803 = vmatpush1.bf16.msra.mxu0 %v12025_v25  ;;  %9833 = vmatpush3.bf16.msra.mxu1 %v12117_v31 }
0x15f4   :  { %9805 = vmatprep.subr.bf16.mxu0 %v12029_v30  ;;  %9834 = vmatprep.subr.bf16.mxu1 %v12306_v0 }
0x15f7   :  { %9807 = vmatpush1.bf16.msra.mxu0 %v12031_v7  ;;  %9836 = vmatpush3.bf16.msra.mxu1 %v12121_v52 }
0x15f8   :  { %9809 = vmatprep.subr.bf16.mxu0 %v12035_v62  ;;  %9837 = vmatprep.subr.bf16.mxu1 %v12306_v0 }
0x15fb   :  { %9811 = vmatpush1.bf16.msra.mxu0 %v12037_v36  ;;  %9839 = vmatpush3.bf16.msra.mxu1 %v12125_v10 }
0x15fc   :  { %9813 = vmatprep.subr.bf16.mxu0 %v12041_v40  ;;  %9840 = vmatprep.subr.bf16.mxu1 %v12306_v0 }
0x15ff   :  { %9815 = vmatpush1.bf16.msra.mxu0 %v12043_v53  ;;  %9842 = vmatpush3.bf16.msra.mxu1 %v12046_v56 }
0x1600   :  { %9817 = vmatprep.subr.bf16.mxu0 %v12049_v27  ;;  %9843 = vmatprep.subr.bf16.mxu1 %v12306_v0 }
0x1603   :  { %9819 = vmatpush1.bf16.msra.mxu0 %v12052_v28  ;;  %9845 = vmatpush3.bf16.msra.mxu1 %v12054_v9 }
0x1604   :  { %9821 = vmatprep.subr.bf16.mxu0 %v12058_v14  ;;  %9846 = vmatprep.subr.bf16.mxu1 %v12306_v0 }
0x1607   :  { %9823 = vmatpush1.bf16.msra.mxu0 %v12061_v23  ;;  %9848 = vmatpush3.bf16.msra.mxu1 %v12065_v45 }
0x1608   :  { %9825 = vmatprep.subr.bf16.mxu0 %v12067_v13  ;;  %9849 = vmatprep.subr.bf16.mxu1 %v12306_v0 }
0x160b   :  { %9827 = vmatpush1.bf16.msra.mxu0 %v12071_v61  ;;  %9851 = vmatpush3.bf16.msra.mxu1 %v12075_v42 }
0x160c   :  { %9853 = vmatprep.subr.bf16.mxu0 %v12017_v5  ;;  %9884 = vmatprep.subr.bf16.mxu1 %v12306_v0 }
0x16c1   :  { %v6061_v4 = vpop.f32.mrb[42].mxu0  ;;  %v6132_v15 = vpop.f32.mrb[82].mxu1 }
0x16c2   :  { %v10041_v17 = vadd.f32 %v10040_v2, %v6061_v4  ;;  %v6063_v46 = vpop.f32.mrb[43].mxu0  ;;  %v8257_v43 = vpop.f32.mrb[83].mxu1  ;;  %v6133_v16 = vadd.f32 %v6132_v15, %v5991_v29  ;;  %v6637_v29 = vld [vmem:[#allocation10 + $0x38] sm:$0xff] }
0x16c3   :  { %v10043_v1 = vadd.f32 %v10042_v11, %v6063_v46  ;;  %v6633_v46 = vld [vmem:[#allocation10 + $0x18] sm:$0xff] }
0x16c4   :  { %v6845_v6 = vmul.f32 -1.442695, %v10041_v17  ;;  %v6632_v17 = vld [vmem:[#allocation10 + $0x10] sm:$0xff] }
0x16c5   :  { %v6846_v5 = vmul.f32 -1.442695, %v10043_v1 }
0x16c6   :  { %10310 = vpow2.f32 %v6845_v6 }
0x16c7   :  { %10312 = vpow2.f32 %v6846_v5  ;;  %v9912_v5 = vpack.c.bf16 %v6633_v46, %v6632_v17 }
0x16d0   :  { %v10311_v44 = vpop.eup %10310 }
0x16d1   :  { %v6140_v39 = vadd.f32 1.0, %v10311_v44  ;;  %v10313_v41 = vpop.eup %10312  ;;  %v6634_v44 = vld [vmem:[#allocation10 + $0x20] sm:$0xff] }
0x16d2   :  { %v6147_v60 = vadd.f32 1.0, %v10313_v41  ;;  %v6636_v41 = vld [vmem:[#allocation10 + $0x30] sm:$0xff] }
0x16d3   :  { %10314 = vrcp.f32 %v6140_v39  ;;  %v6635_v39 = vld [vmem:[#allocation10 + $0x28] sm:$0xff] }
0x16d4   :  { %10316 = vrcp.f32 %v6147_v60  ;;  %v9920_v60 = vpack.c.bf16 %v6637_v29, %v6636_v41 }
0x16dd   :  { %v10315_v20 = vpop.eup %10314 }
0x16de   :  { %v6150_v19 = vmul.f32 %v10315_v20, %v6133_v16  ;;  %v10317_v47 = vpop.eup %10316  ;;  %v6638_v16 = vld [vmem:[#allocation10 + $0x40] sm:$0xff]  ;;  %v6639_v20 = vld [vmem:[#allocation10 + $0x48] sm:$0xff] }
0x16df   :  { %v6153_v24 = vsub.f32 1.0, %v10317_v47  ;;  %v6155_v2 = vmul.f32 %v10317_v47, %v12145_v34 }
0x16e0   :  { %v6151_v26 = vadd.f32 %v6150_v19, %v4731_v48  ;;  %v9924_v48 = vpack.c.bf16 %v6639_v20, %v6638_v16  ;;  %v6640_v19 = vld [vmem:[#allocation10 + $0x50] sm:$0xff] }
0x16e2   :  { %10318 = vtanh.f32 %v6151_v26  ;;  %v6641_v26 = vld [vmem:[#allocation10 + $0x58] sm:$0xff] }
0x16e3   :  { %v9928_v47 = vpack.c.bf16 %v6641_v26, %v6640_v19 }
0x16ec   :  { %v10319_v49 = vpop.eup %10318 }
0x16ed   :  { %v6154_v8 = vmul.f32 %v10319_v49, %v6153_v24  ;;  %v6642_v24 = vld [vmem:[#allocation10 + $0x60] sm:$0xff]  ;;  %v6643_v49 = vld [vmem:[#allocation10 + $0x68] sm:$0xff] }
0x16ef   :  { %v12192_v4 = vadd.f32 %v6155_v2, %v6154_v8  ;;  %v6644_v8 = vld [vmem:[#allocation10 + $0x70] sm:$0xff]  ;;  %v6645_v2 = vld [vmem:[#allocation10 + $0x78] sm:$0xff] }
0x16f1   :  { %6291 = vmatmul.mubr.f32.vlgmr.msra.gmra.mrb[44].mxu0 %v12192_v4  ;;  %8291 = vmatmul.mubr.f32.vlgmr.msra.gmra.mrb[84].mxu1 %v12192_v4 }
0x16f2   :  { %9855 = vmatpush1.bf16.msra.mxu0 %v12019_v38  ;;  %9886 = vmatpush3.bf16.msra.mxu1 %v12113_v51 }
0x16f3   :  { %9857 = vmatprep.subr.bf16.mxu0 %v12023_v32  ;;  %9887 = vmatprep.subr.bf16.mxu1 %v12306_v0  ;;  %v6209_v32 = vld [vmem:[#allocation9 + $0x6] sm:$0x7] }
0x16f4   :  { %6521 = vmatprep.mubr.f32.mxu0 %v12307_v22  ;;  %8325 = vmatprep.mubr.msk.f32.mxu1 %vm10517_vm0, %v12307_v22  ;;  %v6630_v22 = vld [vmem:[#allocation10] sm:$0xff] }
0x16f5   :  { %v9908_v38 = vpack.c.bf16 %v6631_v37, %v6630_v22  ;;  %v9936_v22 = vpack.c.bf16 %v6645_v2, %v6644_v8  ;;  %v6440_v37 = vld [vmem:[#allocation9 + $0x6] sm:$0x7] }
0x16f6   :  { %9859 = vmatpush1.bf16.msra.mxu0 %v12025_v25  ;;  %9889 = vmatpush3.bf16.msra.mxu1 %v12117_v31  ;;  %v6214_v25 = vrot.slane %v6209_v32, %v10825_v54  ;;  %v4736_v31 = vadd.f32 %v11898_v59, %v11904_v12  ;;  %v9916_v59 = vpack.c.bf16 %v6635_v39, %v6634_v44 }
0x16f7   :  { %9861 = vmatprep.subr.bf16.mxu0 %v12029_v30  ;;  %9890 = vmatprep.subr.bf16.mxu1 %v12306_v0  ;;  %v6218_v30 = vrot.slane %v6209_v32, %v10830_v57 }
0x16fa   :  { %9863 = vmatpush1.bf16.msra.mxu0 %v12031_v7  ;;  %9892 = vmatpush3.bf16.msra.mxu1 %v12121_v52  ;;  %v10044_v7 = vadd.f32 %v6214_v25, %v11889_v63 }
0x16fb   :  { %9865 = vmatprep.subr.bf16.mxu0 %v12035_v62  ;;  %9893 = vmatprep.subr.bf16.mxu1 %v12306_v0 }
0x16fe   :  { %9867 = vmatpush1.bf16.msra.mxu0 %v12037_v36  ;;  %9895 = vmatpush3.bf16.msra.mxu1 %v12125_v10 }
0x16ff   :  { %9869 = vmatprep.subr.bf16.mxu0 %v12041_v40  ;;  %9896 = vmatprep.subr.bf16.mxu1 %v12306_v0  ;;  %v10046_v40 = vadd.f32 %v6218_v30, %v11895_v18 }
0x1702   :  { %9871 = vmatpush1.bf16.msra.mxu0 %v12043_v53  ;;  %9898 = vmatpush3.bf16.msra.mxu1 %v12046_v56 }
0x1703   :  { %9873 = vmatprep.subr.bf16.mxu0 %v12049_v27  ;;  %9899 = vmatprep.subr.bf16.mxu1 %v12306_v0 }
0x1706   :  { %9875 = vmatpush1.bf16.msra.mxu0 %v12052_v28  ;;  %9901 = vmatpush3.bf16.msra.mxu1 %v12054_v9 }
0x1707   :  { %9877 = vmatprep.subr.bf16.mxu0 %v12058_v14  ;;  %9902 = vmatprep.subr.bf16.mxu1 %v12306_v0 }
0x170a   :  { %9879 = vmatpush1.bf16.msra.mxu0 %v12061_v23  ;;  %9904 = vmatpush3.bf16.msra.mxu1 %v12065_v45 }
0x170b   :  { %9881 = vmatprep.subr.bf16.mxu0 %v12067_v13  ;;  %9905 = vmatprep.subr.bf16.mxu1 %v12306_v0  ;;  %v6222_v13 = vrot.slane %v6209_v32, %v10862_v3  ;;  %v6449_v32 = vrot.slane %v6440_v37, %v10830_v57  ;;  %v6453_v57 = vrot.slane %v6440_v37, %v10862_v3 }
0x170e   :  { %9883 = vmatpush1.bf16.msra.mxu0 %v12071_v61  ;;  %9907 = vmatpush3.bf16.msra.mxu1 %v12075_v42 }
0x170f   :  { %9909 = vmatprep.subr.bf16.mxu0 %v9908_v38 }
0x17c4   :  { %v6292_v62 = vpop.f32.mrb[44].mxu0  ;;  %v6363_v36 = vpop.f32.mrb[84].mxu1 }
0x17c5   :  { %v10045_v0 = vadd.f32 %v10044_v7, %v6292_v62  ;;  %v6294_v53 = vpop.f32.mrb[45].mxu0  ;;  %v8292_v56 = vpop.f32.mrb[85].mxu1  ;;  %v6364_v42 = vadd.f32 %v6363_v36, %v6222_v13 }
0x17c6   :  { %v10047_v28 = vadd.f32 %v10046_v40, %v6294_v53 }
0x17c7   :  { %v6847_v27 = vmul.f32 -1.442695, %v10045_v0 }
0x17c8   :  { %v6848_v9 = vmul.f32 -1.442695, %v10047_v28  ;;  %v6851_v28 = vld [vmem:[%s12295_s6] ss:$0 sm:$0xff]  ;;  %s10518_s6 = smov [#allocation14]  }
0x17c9   :  { %10320 = vpow2.f32 %v6847_v27  ;;  %s6783_s4 = sshll.u32 %s10518_s6, 4  ;;  %s6784_s4 = int_to_ptr.vmem [resolvable:$true] %s6783_s4 }
0x17ca   :  { %10322 = vpow2.f32 %v6848_v9  ;;  %s10450_s19 = scalar_lea.vmem %s6784_s4, 384  ;;  %p10455_p13 = scmp.lt.s32.totalorder %s6784_s4, %s6784_s4 }
0x17cb   :  { %p10451_p12 = scmp.ne.s32.totalorder %s6784_s4, %s10450_s19  ;;  %p10456_p0 = scmp.lt.s32.totalorder %s10450_s19, %s10450_s19 }
0x17cd   :  { %p10457_p1 = por %p10456_p0, %p10455_p13 }
0x17cf   :  { %p10458_p2 = pnand %p10457_p1, %p10451_p12 }
0x17d3   :  { %v10321_v14 = vpop.eup %10320 }
0x17d4   :  { %v6371_v23 = vadd.f32 1.0, %v10321_v14  ;;  %v10323_v45 = vpop.eup %10322 }
0x17d5   :  { %v6378_v61 = vadd.f32 1.0, %v10323_v45 }
0x17d6   :  { %10324 = vrcp.f32 %v6371_v23 }
0x17d7   :  { %10326 = vrcp.f32 %v6378_v61 }
0x17e0   :  { %v10325_v51 = vpop.eup %10324 }
0x17e1   :  { %v6381_v52 = vmul.f32 %v10325_v51, %v6364_v42  ;;  %v10327_v55 = vpop.eup %10326 }
0x17e2   :  { %v6384_v15 = vsub.f32 1.0, %v10327_v55  ;;  %v6386_v6 = vmul.f32 %v10327_v55, %v12192_v4 }
0x17e3   :  { %v6382_v10 = vadd.f32 %v6381_v52, %v4736_v31 }
0x17e5   :  { %10328 = vtanh.f32 %v6382_v10 }
0x17ef   :  { %v10329_v11 = vpop.eup %10328 }
0x17f0   :  { %v6385_v43 = vmul.f32 %v10329_v11, %v6384_v15 }
0x17f2   :  { %v12237_v1 = vadd.f32 %v6386_v6, %v6385_v43 }
0x17f4   :  { %6522 = vmatmul.mubr.f32.vlgmr.msra.gmra.mrb[46].mxu0 %v12237_v1  ;;  %8326 = vmatmul.mubr.f32.vlgmr.msra.gmra.mrb[86].mxu1 %v12237_v1 }
0x17f5   :  { %9911 = vmatpush3.bf16.msra.mxu0 %v9908_v38  ;;  %8360 = vmatprep.mubr.f32.mxu0 %v11909_v21  ;;  %v9932_v21 = vpack.c.bf16 %v6643_v49, %v6642_v24  ;;  %v6445_v38 = vrot.slane %v6440_v37, %v10825_v54 }
0x17f6   :  { %9913 = vmatprep.subr.bf16.mxu0 %v9912_v5 }
0x17f7   :  { %v10048_v25 = vadd.f32 %v6445_v38, %v11889_v63 }
0x17f9   :  { %9915 = vmatpush3.bf16.msra.mxu0 %v9912_v5 }
0x17fa   :  { %9917 = vmatprep.subr.bf16.mxu0 %v9916_v59 }
0x17fd   :  { %9919 = vmatpush3.bf16.msra.mxu0 %v9916_v59 }
0x17fe   :  { %9921 = vmatprep.subr.bf16.mxu0 %v9920_v60 }
0x1801   :  { %9923 = vmatpush3.bf16.msra.mxu0 %v9920_v60 }
0x1802   :  { %9925 = vmatprep.subr.bf16.mxu0 %v9924_v48 }
0x1805   :  { %9927 = vmatpush3.bf16.msra.mxu0 %v9924_v48 }
0x1806   :  { %9929 = vmatprep.subr.bf16.mxu0 %v9928_v47 }
0x1809   :  { %9931 = vmatpush3.bf16.msra.mxu0 %v9928_v47 }
0x180a   :  { %9933 = vmatprep.subr.bf16.mxu0 %v9932_v21 }
0x180d   :  { %9935 = vmatpush3.bf16.msra.mxu0 %v9932_v21 }
0x180e   :  { %9937 = vmatprep.subr.bf16.mxu0 %v9936_v22 }
0x1811   :  { %9939 = vmatpush3.bf16.msra.mxu0 %v9936_v22 }
0x1814   :  { %8361 = vmatmul.mubr.f32.vlgmr.msra.gmra.mrb[48].mxu0 %v11956_v33  ;;  %v10050_v33 = vadd.f32 %v6449_v32, %v11895_v18  ;;  %v4741_v18 = vadd.f32 %v11892_v50, %v11904_v12 }
0x1815   :  { %8363 = vmatprep.mubr.f32.mxu0 %v12002_v35 }
0x1818   :  { %8364 = vmatmul.mubr.f32.gmra.mrb[50].mxu0 %v12090_v58 }
0x1819   :  { %8366 = vmatprep.mubr.f32.mxu0 %v12145_v34 }
0x181c   :  { %8367 = vmatmul.mubr.f32.gmra.mrb[52].mxu0 %v12192_v4 }
0x181d   :  { %8369 = vmatprep.mubr.f32.mxu0 %v12237_v1 }
0x18c7   :  { %v6523_v30 = vpop.f32.mrb[46].mxu0  ;;  %v6594_v7 = vpop.f32.mrb[86].mxu1 }
0x18c8   :  { %v10049_v35 = vadd.f32 %v10048_v25, %v6523_v30  ;;  %v6525_v62 = vpop.f32.mrb[47].mxu0  ;;  %v8327_v58 = vpop.f32.mrb[87].mxu1  ;;  %v6595_v63 = vadd.f32 %v6594_v7, %v6453_v57 }
0x18c9   :  { %v10051_v34 = vadd.f32 %v10050_v33, %v6525_v62 }
0x18ca   :  { %v6849_v36 = vmul.f32 -1.442695, %v10049_v35 }
0x18cb   :  { %v6850_v4 = vmul.f32 -1.442695, %v10051_v34 }
0x18cc   :  { %10330 = vpow2.f32 %v6849_v36 }
0x18cd   :  { %10332 = vpow2.f32 %v6850_v4 }
0x18d6   :  { %v10331_v40 = vpop.eup %10330 }
0x18d7   :  { %v6602_v0 = vadd.f32 1.0, %v10331_v40  ;;  %v10333_v54 = vpop.eup %10332 }
0x18d8   :  { %v6609_v53 = vadd.f32 1.0, %v10333_v54 }
0x18d9   :  { %10334 = vrcp.f32 %v6602_v0 }
0x18da   :  { %10336 = vrcp.f32 %v6609_v53 }
0x18e3   :  { %v10335_v56 = vpop.eup %10334 }
0x18e4   :  { %v6612_v27 = vmul.f32 %v10335_v56, %v6595_v63  ;;  %v10337_v31 = vpop.eup %10336 }
0x18e5   :  { %v6615_v55 = vsub.f32 1.0, %v10337_v31  ;;  %v6617_v17 = vmul.f32 %v10337_v31, %v12237_v1 }
0x18e6   :  { %v6613_v9 = vadd.f32 %v6612_v27, %v4741_v18 }
0x18e7   :  { %v8362_v14 = vpop.f32.mrb[48].mxu0 }
0x18e8   :  { %10338 = vtanh.f32 %v6613_v9  ;;  %v6725_v23 = vadd.f32 %v8362_v14, %v6851_v28  ;;  %v6719_v45 = vpop.f32.mrb[49].mxu0 }
0x18e9   :  { %v6720_v13 = vadd.f32 %v6851_v28, %v6719_v45 }
0x18ea   :  { %6759 = vst [vmem:[#allocation13 + $0x8] sm:$0xff] %v6725_v23 }
0x18eb   :  { %6758 = vst [vmem:[#allocation13] sm:$0xff] %v6720_v13  ;;  %v8365_v3 = vpop.f32.mrb[50].mxu0 }
0x18ec   :  { %v6735_v61 = vadd.f32 %v8365_v3, %v6851_v28  ;;  %v6729_v42 = vpop.f32.mrb[51].mxu0 }
0x18ed   :  { %v6730_v51 = vadd.f32 %v6851_v28, %v6729_v42 }
0x18ee   :  { %6761 = vst [vmem:[#allocation13 + $0x18] sm:$0xff] %v6735_v61 }
0x18ef   :  { %6760 = vst [vmem:[#allocation13 + $0x10] sm:$0xff] %v6730_v51  ;;  %v8368_v50 = vpop.f32.mrb[52].mxu0 }
0x18f0   :  { %v6745_v12 = vadd.f32 %v8368_v50, %v6851_v28  ;;  %v6739_v52 = vpop.f32.mrb[53].mxu0 }
0x18f1   :  { %v6740_v10 = vadd.f32 %v6851_v28, %v6739_v52 }
0x18f2   :  { %v10339_v15 = vpop.eup %10338  ;;  %6763 = vst [vmem:[#allocation13 + $0x28] sm:$0xff] %v6745_v12 }
0x18f3   :  { %6762 = vst [vmem:[#allocation13 + $0x20] sm:$0xff] %v6740_v10  ;;  %v6616_v11 = vmul.f32 %v10339_v15, %v6615_v55 }
0x18f5   :  { %v6618_v46 = vadd.f32 %v6617_v17, %v6616_v11 }
0x18f7   :  { %8370 = vmatmul.mubr.f32.gmra.mrb[54].mxu0 %v6618_v46  ;;  %6621 = vst [vmem:[#allocation14 + $0x10] sm:$0xff] %v6618_v46 }
0x18f8   :  { %10461 = shalt.err (!%p10458_p2)
}
0x18f9   :  { %s10462_s14 = scalar_lea.hbm %s12298_s9, 384 }
0x18fa   :  { %p10463_p3 = scmp.ne.s32.totalorder %s12298_s9, %s10462_s14  ;;  %p10466_p4 = scmp.lt.u32.totalorder %s10462_s14, %s12298_s9 }
0x18fc   :  { %p10468_p5 = pnand %p10466_p4, %p10463_p3 }
0x18fe   :  { %10471 = shalt.err (!%p10468_p5)
}
0x18ff   :  { %6789 = dma.vmem_to_hbm [thread:$0]  %s6784_s4, 384, %s12298_s9, [#allocation15], %s10508_s2, %s10508_s2, %s10509_s10  }
0x1900   :  { %s10519_s22 = smov [#allocation13]  }
0x1901   :  { %s6771_s17 = sshll.u32 %s10519_s22, 4  ;;  %s6772_s17 = int_to_ptr.vmem [resolvable:$true] %s6771_s17 }
0x1902   :  { %s10472_s23 = scalar_lea.vmem %s6772_s17, 1024  ;;  %p10477_p7 = scmp.lt.s32.totalorder %s6772_s17, %s6772_s17 }
0x1903   :  { %p10473_p6 = scmp.ne.s32.totalorder %s6772_s17, %s10472_s23  ;;  %p10478_p8 = scmp.lt.s32.totalorder %s10472_s23, %s10472_s23 }
0x1905   :  { %p10479_p9 = por %p10478_p8, %p10477_p7 }
0x1907   :  { %p10480_p10 = pnand %p10479_p9, %p10473_p6 }
0x19ca   :  { %v8371_v43 = vpop.f32.mrb[54].mxu0 }
0x19cb   :  { %v6755_v6 = vadd.f32 %v8371_v43, %v6851_v28  ;;  %v6749_v1 = vpop.f32.mrb[55].mxu0 }
0x19cc   :  { %v6750_v5 = vadd.f32 %v6851_v28, %v6749_v1 }
0x19cd   :  { %6765 = vst [vmem:[#allocation13 + $0x38] sm:$0xff] %v6755_v6 }
0x19ce   :  { %6764 = vst [vmem:[#allocation13 + $0x30] sm:$0xff] %v6750_v5 }
0x19cf   :  { %10483 = shalt.err (!%p10480_p10)
}
0x19d0   :  { %s10484_s9 = scalar_lea.hbm %s12297_s8, 1024 }
0x19d1   :  { %p10485_p11 = scmp.ne.s32.totalorder %s12297_s8, %s10484_s9  ;;  %p10488_p12 = scmp.lt.u32.totalorder %s10484_s9, %s12297_s8 }
0x19d3   :  { %p10490_p13 = pnand %p10488_p12, %p10485_p11 }
0x19d5   :  { %10493 = shalt.err (!%p10490_p13)
}
0x19d6   :  { %6777 = dma.vmem_to_hbm [thread:$0]  %s6772_s17, 1024, %s12297_s8, [#allocation6], %s10508_s2, %s10508_s2, %s10509_s10  }
0x19d7   :  { %10500 = dma.done.wait [#allocation6], 1024  }
0x19d8   :  { %10501 = vsyncadd [#allocation6], 4294966272 }
0x19d9   :  { %10502 = dma.done.wait [#allocation15], 384  }
0x19da   :  { %10503 = vsyncadd [#allocation15], 4294966912 }
0x19db   :  { %6796 = vsyncpa [#allocation5], 1 }
0x19dc   :  { %6797 = vsyncpa [#allocation8], 1 }
0x19dd   :  { %6798 = vsyncpa [#allocation11], 1 }
0x19de   :  { %6799 = vsyncpa [#allocation6], 1 }
0x19df   :  { %6800 = vsyncpa [#allocation15], 1 }

</bundles_post_ra>
